<compile_context>
chip_gen: v7x
topology: tpu7x:2x2x1
jax: 0.10.0
libtpu: 0.0.40
codegen_flags: <defaults>
</compile_context>

<pallas_src>
import jax
import jax.numpy as jnp
from jax.experimental import pallas as pl
from jax.experimental.pallas import tpu as pltpu

L_IN = 160          # input length (20 * (160/4/4) == 200 == fc1 in-features)
K = 5               # conv kernel size (padding=2)
C1, C2 = 10, 20     # conv1 / conv2 output channels
L1 = L_IN           # conv1 output length (160)
P1 = L1 // 4        # pool1 output length (40)
L2 = P1             # conv2 output length (40)
P2 = L2 // 4        # pool2 output length (10)

XP = L_IN + 4                 # zero-padded input width fed to conv1 matmul (164)
C1W = C1 * L1                 # 1600  flat conv1 output width (channel-major)
M1W = C1W - 3                 # 1597  width of the shifted-max array for pool1
P1W = C1 * (P1 + 4)           # 440   flat pool1 width incl. conv2 zero padding (44/ch)
C2W = C2 * L2                 # 800   flat conv2 output width
M2W = C2W - 3                 # 797
P2W = C2 * P2                 # 200   == fc1 in-features


def convnet_kernel(x_ref, w1_ref, b1_ref, s1_ref, w2_ref, b2_ref, s2_ref,
                   fw1_ref, fb1_ref, fw2_ref, fb2_ref, fw3_ref, fb3_ref,
                   out_ref):
    f32 = jnp.float32
    x = x_ref[...]                                             # (B, 164)

    # conv1 (Toeplitz matmul) + bias + ReLU -> (B, 1600), channel-major 160-wide blocks
    c1 = jnp.dot(x, w1_ref[...], preferred_element_type=f32)
    c1 = jnp.maximum(c1 + b1_ref[...], 0.0)

    # maxpool(4): max over 4 shifted slices, then 0/1 selection matmul that compacts
    # stride-4, keeps channel-major order and inserts conv2's zero padding -> (B, 440)
    m1 = jnp.maximum(jnp.maximum(c1[:, 0:M1W], c1[:, 1:M1W + 1]),
                     jnp.maximum(c1[:, 2:M1W + 2], c1[:, 3:M1W + 3]))
    p1 = jnp.dot(m1, s1_ref[...], preferred_element_type=f32)

    # conv2 (Toeplitz matmul) + bias + ReLU -> (B, 800), channel-major 40-wide blocks
    c2 = jnp.dot(p1, w2_ref[...], preferred_element_type=f32)
    c2 = jnp.maximum(c2 + b2_ref[...], 0.0)

    # maxpool(4) + flatten to (B, 200) in c*10+l order (== torch .view(-1, 200))
    m2 = jnp.maximum(jnp.maximum(c2[:, 0:M2W], c2[:, 1:M2W + 1]),
                     jnp.maximum(c2[:, 2:M2W + 2], c2[:, 3:M2W + 3]))
    p2 = jnp.dot(m2, s2_ref[...], preferred_element_type=f32)

    # fc1 -> ReLU -> fc2 -> ReLU -> fc3
    h1 = jnp.maximum(jnp.dot(p2, fw1_ref[...], preferred_element_type=f32)
                     + fb1_ref[...], 0.0)
    h2 = jnp.maximum(jnp.dot(h1, fw2_ref[...], preferred_element_type=f32)
                     + fb2_ref[...], 0.0)
    out_ref[...] = (jnp.dot(h2, fw3_ref[...], preferred_element_type=f32)
                    + fb3_ref[...])


# ---------------- wrapper-side (plain JAX, one-time) weight repacking -----------------

def _conv1_toeplitz(w1):
    """(10,1,5) -> (164, 1600) with W[i, c*160+l] = w1[c,0,i-l] for 0<=i-l<5."""
    i = jnp.arange(XP)[:, None]                  # padded-input index
    l = jnp.arange(L1)[None, :]                  # output position
    k = i - l
    valid = (k >= 0) & (k < K)
    taps = w1[:, 0, :]                           # (10, 5)
    g = taps[:, jnp.clip(k, 0, K - 1)]           # (10, 164, 160)
    g = jnp.where(valid[None], g, 0.0)
    return jnp.transpose(g, (1, 0, 2)).reshape(XP, C1W).astype(jnp.float32)


def _conv2_toeplitz(w2):
    """(20,10,5) -> (440, 800) with W[ci*44+m, o*40+l] = w2[o,ci,m-l] for 0<=m-l<5."""
    m = jnp.arange(P1 + 4)[:, None]              # padded pool1 position (0..43)
    l = jnp.arange(L2)[None, :]                  # output position (0..39)
    k = m - l
    valid = (k >= 0) & (k < K)
    g = w2[:, :, jnp.clip(k, 0, K - 1)]          # (20, 10, 44, 40)
    g = jnp.where(valid[None, None], g, 0.0)
    return jnp.transpose(g, (1, 2, 0, 3)).reshape(C1 * (P1 + 4), C2W).astype(jnp.float32)


def _pool_select(n_ch, l_in, pad):
    """0/1 matrix (n_ch*l_in - 3, n_ch*(l_in//4 + 2*pad)) that picks every 4th column of
    the shifted-max array per channel, keeps channel-major order and inserts `pad`
    zero columns on both sides of every channel block."""
    l_out = l_in // 4
    blk = l_out + 2 * pad
    rows = jnp.arange(n_ch * l_in - 3)[:, None]
    cols = jnp.arange(n_ch * blk)[None, :]
    c = cols // blk
    j = cols % blk - pad                          # pooled index inside the channel
    src = c * l_in + 4 * j
    valid = (j >= 0) & (j < l_out)
    return jnp.where(valid & (rows == src), 1.0, 0.0).astype(jnp.float32)


def convnet_forward(x, params, block_b=256):
    """x: (N, 1, 160) float32 -> (N, 2) float32 (matches ConvNet.forward)."""
    w1, b1, w2, b2, fw1, fb1, fw2, fb2, fw3, fb3 = params
    N = x.shape[0]
    assert x.shape[1:] == (1, L_IN)

    # batch block: multiple of 8 sublanes, capped at block_b; tail handled by zero-pad
    B = min(block_b, max(8, ((N + 7) // 8) * 8))
    n_blocks = pl.cdiv(N, B)
    n_pad = n_blocks * B

    xp = jnp.pad(x.reshape(N, L_IN).astype(jnp.float32),
                 ((0, n_pad - N), (2, 2)))                     # (n_pad, 164)
    w1_t = _conv1_toeplitz(w1)                                 # (164, 1600)
    b1_f = jnp.repeat(b1, L1)[None, :].astype(jnp.float32)      # (1, 1600)
    s1 = _pool_select(C1, L1, pad=2)                           # (1597, 440)
    w2_t = _conv2_toeplitz(w2)                                 # (440, 800)
    b2_f = jnp.repeat(b2, L2)[None, :].astype(jnp.float32)      # (1, 800)
    s2 = _pool_select(C2, L2, pad=0)                           # (797, 200)
    fw1_t = fw1.T.astype(jnp.float32)                           # (200, 64)
    fw2_t = fw2.T.astype(jnp.float32)                           # (64, 8)
    fw3_t = fw3.T.astype(jnp.float32)                           # (8, 2)
    fb1_r = fb1[None, :].astype(jnp.float32)                    # (1, 64)
    fb2_r = fb2[None, :].astype(jnp.float32)                    # (1, 8)
    fb3_r = fb3[None, :].astype(jnp.float32)                    # (1, 2)

    weights = (w1_t, b1_f, s1, w2_t, b2_f, s2,
               fw1_t, fb1_r, fw2_t, fb2_r, fw3_t, fb3_r)

    def whole(a):
        return pl.BlockSpec(a.shape, lambda n: (0, 0))

    flops_per_row = 2 * (XP * C1W + M1W * P1W + P1W * C2W + M2W * P2W
                         + P2W * 64 + 64 * 8 + 8 * 2)
    weight_bytes = sum(int(w.size) * 4 for w in weights)
    cost = pl.CostEstimate(flops=int(n_pad) * int(flops_per_row),
                           transcendentals=0,
                           bytes_accessed=int(n_pad) * (XP + 2) * 4 + weight_bytes)

    out = pl.pallas_call(
        convnet_kernel,
        out_shape=jax.ShapeDtypeStruct((n_pad, 2), jnp.float32),
        grid=(n_blocks,),
        in_specs=[pl.BlockSpec((B, XP), lambda n: (n, 0))]
                 + [whole(w) for w in weights],
        out_specs=pl.BlockSpec((B, 2), lambda n: (n, 0)),
        compiler_params=pltpu.CompilerParams(
            dimension_semantics=("parallel",),
            vmem_limit_bytes=40 * 1024 * 1024),
        cost_estimate=cost,
    )(xp, *weights)
    return out[:N]


def reference_forward(x, params):
    """Pure-JAX/XLA reference with PyTorch semantics, for validation."""
    w1, b1, w2, b2, fw1, fb1, fw2, fb2, fw3, fb3 = params
    dn = ('NCH', 'OIH', 'NCH')
    y = jax.lax.conv_general_dilated(x, w1, (1,), [(2, 2)], dimension_numbers=dn)
    y = jnp.maximum(y + b1[None, :, None], 0.0)
    y = jax.lax.reduce_window(y, -jnp.inf, jax.lax.max, (1, 1, 4), (1, 1, 4), 'VALID')
    y = jax.lax.conv_general_dilated(y, w2, (1,), [(2, 2)], dimension_numbers=dn)
    y = jnp.maximum(y + b2[None, :, None], 0.0)
    y = jax.lax.reduce_window(y, -jnp.inf, jax.lax.max, (1, 1, 4), (1, 1, 4), 'VALID')
    y = y.reshape(y.shape[0], -1)                               # (N, 200) == x.view(-1, 200)
    y = jnp.maximum(y @ fw1.T + fb1, 0.0)
    y = jnp.maximum(y @ fw2.T + fb2, 0.0)
    return y @ fw3.T + fb3


if __name__ == "__main__":
    key = jax.random.PRNGKey(0)
    keys = jax.random.split(key, 11)
    N = 4
    x = jax.random.normal(keys[0], (N, 1, L_IN), jnp.float32)

    # Deterministic synthetic parameters (PyTorch-style uniform(-1/sqrt(fan_in), ...)).
    def u(k, shape, fan_in):
        bound = 1.0 / (fan_in ** 0.5)
        return jax.random.uniform(k, shape, jnp.float32, -bound, bound)

    params = (
        u(keys[1], (10, 1, 5), 1 * 5),   u(keys[2], (10,), 1 * 5),    # conv1
        u(keys[3], (20, 10, 5), 10 * 5), u(keys[4], (20,), 10 * 5),   # conv2
        u(keys[5], (64, 200), 200),      u(keys[6], (64,), 200),      # fc1
        u(keys[7], (8, 64), 64),         u(keys[8], (8,), 64),        # fc2
        u(keys[9], (2, 8), 8),           u(keys[10], (2,), 8),        # fc3
    )

    out = jax.block_until_ready(convnet_forward(x, params))
    ref = jax.block_until_ready(reference_forward(x, params))
    assert out.shape == (N, 2)
    assert jnp.allclose(out, ref, atol=1e-4, rtol=1e-4), (out, ref)
    print("KERNEL_OK")
</pallas_src>

<mosaic_0001>
module attributes {stable_mosaic.version = 11 : i64} {
  func.func @convnet_kernel(%arg0: i32, %arg1: memref<8x164xf32, #tpu.memory_space<vmem>>, %arg2: memref<164x1600xf32, #tpu.memory_space<vmem>>, %arg3: memref<1x1600xf32, #tpu.memory_space<vmem>>, %arg4: memref<1597x440xf32, #tpu.memory_space<vmem>>, %arg5: memref<440x800xf32, #tpu.memory_space<vmem>>, %arg6: memref<1x800xf32, #tpu.memory_space<vmem>>, %arg7: memref<797x200xf32, #tpu.memory_space<vmem>>, %arg8: memref<200x64xf32, #tpu.memory_space<vmem>>, %arg9: memref<1x64xf32, #tpu.memory_space<vmem>>, %arg10: memref<64x8xf32, #tpu.memory_space<vmem>>, %arg11: memref<1x8xf32, #tpu.memory_space<vmem>>, %arg12: memref<8x2xf32, #tpu.memory_space<vmem>>, %arg13: memref<1x2xf32, #tpu.memory_space<vmem>>, %arg14: memref<8x2xf32, #tpu.memory_space<vmem>>) attributes {dimension_semantics = [#tpu.dimension_semantics<parallel>], iteration_bounds = array<i64: 1>, scalar_prefetch = 0 : i64, scratch_operands = 0 : i64, tpu.core_type = #tpu.core_type<tc>, window_params = [{transform_indices = @transform_0, window_bounds = array<i64: 8, 164>}, {pipeline_mode = #tpu.pipeline_mode<synchronous>, transform_indices = @transform_1, window_bounds = array<i64: 164, 1600>}, {pipeline_mode = #tpu.pipeline_mode<synchronous>, transform_indices = @transform_2, window_bounds = array<i64: 1, 1600>}, {pipeline_mode = #tpu.pipeline_mode<synchronous>, transform_indices = @transform_3, window_bounds = array<i64: 1597, 440>}, {pipeline_mode = #tpu.pipeline_mode<synchronous>, transform_indices = @transform_4, window_bounds = array<i64: 440, 800>}, {pipeline_mode = #tpu.pipeline_mode<synchronous>, transform_indices = @transform_5, window_bounds = array<i64: 1, 800>}, {pipeline_mode = #tpu.pipeline_mode<synchronous>, transform_indices = @transform_6, window_bounds = array<i64: 797, 200>}, {pipeline_mode = #tpu.pipeline_mode<synchronous>, transform_indices = @transform_7, window_bounds = array<i64: 200, 64>}, {pipeline_mode = #tpu.pipeline_mode<synchronous>, transform_indices = @transform_8, window_bounds = array<i64: 1, 64>}, {pipeline_mode = #tpu.pipeline_mode<synchronous>, transform_indices = @transform_9, window_bounds = array<i64: 64, 8>}, {pipeline_mode = #tpu.pipeline_mode<synchronous>, transform_indices = @transform_10, window_bounds = array<i64: 1, 8>}, {pipeline_mode = #tpu.pipeline_mode<synchronous>, transform_indices = @transform_11, window_bounds = array<i64: 8, 2>}, {pipeline_mode = #tpu.pipeline_mode<synchronous>, transform_indices = @transform_12, window_bounds = array<i64: 1, 2>}, {transform_indices = @transform_13, window_bounds = array<i64: 8, 2>}]} {
    %c0 = arith.constant 0 : index
    %c0_0 = arith.constant 0 : index
    %0 = vector.load %arg1[%c0, %c0_0] : memref<8x164xf32, #tpu.memory_space<vmem>>, vector<8x164xf32>
    %c0_1 = arith.constant 0 : index
    %c0_2 = arith.constant 0 : index
    %1 = vector.load %arg2[%c0_1, %c0_2] : memref<164x1600xf32, #tpu.memory_space<vmem>>, vector<164x1600xf32>
    %cst = arith.constant dense<0.000000e+00> : vector<8x1600xf32>
    %2 = tpu.matmul %0, %1, %cst {dimension_numbers = #tpu.dot_dimension_numbers<[1], [0], [0], [1], [0, 0, 1, 1], [], []>} : vector<8x164xf32>, vector<164x1600xf32>, vector<8x1600xf32> -> vector<8x1600xf32>
    %c0_3 = arith.constant 0 : index
    %c0_4 = arith.constant 0 : index
    %3 = vector.load %arg3[%c0_3, %c0_4] : memref<1x1600xf32, #tpu.memory_space<vmem>>, vector<1x1600xf32>
    %4 = vector.broadcast %3 : vector<1x1600xf32> to vector<8x1600xf32>
    %5 = arith.addf %2, %4 : vector<8x1600xf32>
    %cst_5 = arith.constant 0.000000e+00 : f32
    %6 = vector.broadcast %cst_5 : f32 to vector<8x1600xf32>
    %7 = arith.maximumf %5, %6 : vector<8x1600xf32>
    %8 = vector.extract_strided_slice %7 {offsets = [0, 0], sizes = [8, 1597], strides = [1, 1]} : vector<8x1600xf32> to vector<8x1597xf32>
    %9 = vector.extract_strided_slice %7 {offsets = [0, 1], sizes = [8, 1597], strides = [1, 1]} : vector<8x1600xf32> to vector<8x1597xf32>
    %10 = arith.maximumf %8, %9 : vector<8x1597xf32>
    %11 = vector.extract_strided_slice %7 {offsets = [0, 2], sizes = [8, 1597], strides = [1, 1]} : vector<8x1600xf32> to vector<8x1597xf32>
    %12 = vector.extract_strided_slice %7 {offsets = [0, 3], sizes = [8, 1597], strides = [1, 1]} : vector<8x1600xf32> to vector<8x1597xf32>
    %13 = arith.maximumf %11, %12 : vector<8x1597xf32>
    %14 = arith.maximumf %10, %13 : vector<8x1597xf32>
    %c0_6 = arith.constant 0 : index
    %c0_7 = arith.constant 0 : index
    %15 = vector.load %arg4[%c0_6, %c0_7] : memref<1597x440xf32, #tpu.memory_space<vmem>>, vector<1597x440xf32>
    %cst_8 = arith.constant dense<0.000000e+00> : vector<8x440xf32>
    %16 = tpu.matmul %14, %15, %cst_8 {dimension_numbers = #tpu.dot_dimension_numbers<[1], [0], [0], [1], [0, 0, 1, 1], [], []>} : vector<8x1597xf32>, vector<1597x440xf32>, vector<8x440xf32> -> vector<8x440xf32>
    %c0_9 = arith.constant 0 : index
    %c0_10 = arith.constant 0 : index
    %17 = vector.load %arg5[%c0_9, %c0_10] : memref<440x800xf32, #tpu.memory_space<vmem>>, vector<440x800xf32>
    %cst_11 = arith.constant dense<0.000000e+00> : vector<8x800xf32>
    %18 = tpu.matmul %16, %17, %cst_11 {dimension_numbers = #tpu.dot_dimension_numbers<[1], [0], [0], [1], [0, 0, 1, 1], [], []>} : vector<8x440xf32>, vector<440x800xf32>, vector<8x800xf32> -> vector<8x800xf32>
    %c0_12 = arith.constant 0 : index
    %c0_13 = arith.constant 0 : index
    %19 = vector.load %arg6[%c0_12, %c0_13] : memref<1x800xf32, #tpu.memory_space<vmem>>, vector<1x800xf32>
    %20 = vector.broadcast %19 : vector<1x800xf32> to vector<8x800xf32>
    %21 = arith.addf %18, %20 : vector<8x800xf32>
    %cst_14 = arith.constant 0.000000e+00 : f32
    %22 = vector.broadcast %cst_14 : f32 to vector<8x800xf32>
    %23 = arith.maximumf %21, %22 : vector<8x800xf32>
    %24 = vector.extract_strided_slice %23 {offsets = [0, 0], sizes = [8, 797], strides = [1, 1]} : vector<8x800xf32> to vector<8x797xf32>
    %25 = vector.extract_strided_slice %23 {offsets = [0, 1], sizes = [8, 797], strides = [1, 1]} : vector<8x800xf32> to vector<8x797xf32>
    %26 = arith.maximumf %24, %25 : vector<8x797xf32>
    %27 = vector.extract_strided_slice %23 {offsets = [0, 2], sizes = [8, 797], strides = [1, 1]} : vector<8x800xf32> to vector<8x797xf32>
    %28 = vector.extract_strided_slice %23 {offsets = [0, 3], sizes = [8, 797], strides = [1, 1]} : vector<8x800xf32> to vector<8x797xf32>
    %29 = arith.maximumf %27, %28 : vector<8x797xf32>
    %30 = arith.maximumf %26, %29 : vector<8x797xf32>
    %c0_15 = arith.constant 0 : index
    %c0_16 = arith.constant 0 : index
    %31 = vector.load %arg7[%c0_15, %c0_16] : memref<797x200xf32, #tpu.memory_space<vmem>>, vector<797x200xf32>
    %cst_17 = arith.constant dense<0.000000e+00> : vector<8x200xf32>
    %32 = tpu.matmul %30, %31, %cst_17 {dimension_numbers = #tpu.dot_dimension_numbers<[1], [0], [0], [1], [0, 0, 1, 1], [], []>} : vector<8x797xf32>, vector<797x200xf32>, vector<8x200xf32> -> vector<8x200xf32>
    %c0_18 = arith.constant 0 : index
    %c0_19 = arith.constant 0 : index
    %33 = vector.load %arg8[%c0_18, %c0_19] : memref<200x64xf32, #tpu.memory_space<vmem>>, vector<200x64xf32>
    %cst_20 = arith.constant dense<0.000000e+00> : vector<8x64xf32>
    %34 = tpu.matmul %32, %33, %cst_20 {dimension_numbers = #tpu.dot_dimension_numbers<[1], [0], [0], [1], [0, 0, 1, 1], [], []>} : vector<8x200xf32>, vector<200x64xf32>, vector<8x64xf32> -> vector<8x64xf32>
    %c0_21 = arith.constant 0 : index
    %c0_22 = arith.constant 0 : index
    %35 = vector.load %arg9[%c0_21, %c0_22] : memref<1x64xf32, #tpu.memory_space<vmem>>, vector<1x64xf32>
    %36 = vector.broadcast %35 : vector<1x64xf32> to vector<8x64xf32>
    %37 = arith.addf %34, %36 : vector<8x64xf32>
    %cst_23 = arith.constant 0.000000e+00 : f32
    %38 = vector.broadcast %cst_23 : f32 to vector<8x64xf32>
    %39 = arith.maximumf %37, %38 : vector<8x64xf32>
    %c0_24 = arith.constant 0 : index
    %c0_25 = arith.constant 0 : index
    %40 = vector.load %arg10[%c0_24, %c0_25] : memref<64x8xf32, #tpu.memory_space<vmem>>, vector<64x8xf32>
    %cst_26 = arith.constant dense<0.000000e+00> : vector<8x8xf32>
    %41 = tpu.matmul %39, %40, %cst_26 {dimension_numbers = #tpu.dot_dimension_numbers<[1], [0], [0], [1], [0, 0, 1, 1], [], []>} : vector<8x64xf32>, vector<64x8xf32>, vector<8x8xf32> -> vector<8x8xf32>
    %c0_27 = arith.constant 0 : index
    %c0_28 = arith.constant 0 : index
    %42 = vector.load %arg11[%c0_27, %c0_28] : memref<1x8xf32, #tpu.memory_space<vmem>>, vector<1x8xf32>
    %43 = vector.broadcast %42 : vector<1x8xf32> to vector<8x8xf32>
    %44 = arith.addf %41, %43 : vector<8x8xf32>
    %cst_29 = arith.constant 0.000000e+00 : f32
    %45 = vector.broadcast %cst_29 : f32 to vector<8x8xf32>
    %46 = arith.maximumf %44, %45 : vector<8x8xf32>
    %c0_30 = arith.constant 0 : index
    %c0_31 = arith.constant 0 : index
    %47 = vector.load %arg12[%c0_30, %c0_31] : memref<8x2xf32, #tpu.memory_space<vmem>>, vector<8x2xf32>
    %cst_32 = arith.constant dense<0.000000e+00> : vector<8x2xf32>
    %48 = tpu.matmul %46, %47, %cst_32 {dimension_numbers = #tpu.dot_dimension_numbers<[1], [0], [0], [1], [0, 0, 1, 1], [], []>} : vector<8x8xf32>, vector<8x2xf32>, vector<8x2xf32> -> vector<8x2xf32>
    %c0_33 = arith.constant 0 : index
    %c0_34 = arith.constant 0 : index
    %49 = vector.load %arg13[%c0_33, %c0_34] : memref<1x2xf32, #tpu.memory_space<vmem>>, vector<1x2xf32>
    %50 = vector.broadcast %49 : vector<1x2xf32> to vector<8x2xf32>
    %51 = arith.addf %48, %50 : vector<8x2xf32>
    %c0_35 = arith.constant 0 : index
    %c0_36 = arith.constant 0 : index
    %52 = vector.load %arg14[%c0_35, %c0_36] : memref<8x2xf32, #tpu.memory_space<vmem>>, vector<8x2xf32>
    tpu.vector_store %arg14[%c0_35, %c0_36], %51 {strides = array<i32>} : memref<8x2xf32, #tpu.memory_space<vmem>>, vector<8x2xf32>,
    return
  }
  func.func @transform_0(%arg0: i32) -> (i32, i32) {
    %c0_i32 = arith.constant 0 : i32
    %c0_i32_0 = arith.constant 0 : i32
    return %arg0, %c0_i32 : i32, i32
  }
  func.func @transform_1(%arg0: i32) -> (i32, i32) {
    %c0_i32 = arith.constant 0 : i32
    %c0_i32_0 = arith.constant 0 : i32
    %c0_i32_1 = arith.constant 0 : i32
    return %c0_i32, %c0_i32_0 : i32, i32
  }
  func.func @transform_2(%arg0: i32) -> (i32, i32) {
    %c0_i32 = arith.constant 0 : i32
    %c0_i32_0 = arith.constant 0 : i32
    %c0_i32_1 = arith.constant 0 : i32
    return %c0_i32, %c0_i32_0 : i32, i32
  }
  func.func @transform_3(%arg0: i32) -> (i32, i32) {
    %c0_i32 = arith.constant 0 : i32
    %c0_i32_0 = arith.constant 0 : i32
    %c0_i32_1 = arith.constant 0 : i32
    return %c0_i32, %c0_i32_0 : i32, i32
  }
  func.func @transform_4(%arg0: i32) -> (i32, i32) {
    %c0_i32 = arith.constant 0 : i32
    %c0_i32_0 = arith.constant 0 : i32
    %c0_i32_1 = arith.constant 0 : i32
    return %c0_i32, %c0_i32_0 : i32, i32
  }
  func.func @transform_5(%arg0: i32) -> (i32, i32) {
    %c0_i32 = arith.constant 0 : i32
    %c0_i32_0 = arith.constant 0 : i32
    %c0_i32_1 = arith.constant 0 : i32
    return %c0_i32, %c0_i32_0 : i32, i32
  }
  func.func @transform_6(%arg0: i32) -> (i32, i32) {
    %c0_i32 = arith.constant 0 : i32
    %c0_i32_0 = arith.constant 0 : i32
    %c0_i32_1 = arith.constant 0 : i32
    return %c0_i32, %c0_i32_0 : i32, i32
  }
  func.func @transform_7(%arg0: i32) -> (i32, i32) {
    %c0_i32 = arith.constant 0 : i32
    %c0_i32_0 = arith.constant 0 : i32
    %c0_i32_1 = arith.constant 0 : i32
    return %c0_i32, %c0_i32_0 : i32, i32
  }
  func.func @transform_8(%arg0: i32) -> (i32, i32) {
    %c0_i32 = arith.constant 0 : i32
    %c0_i32_0 = arith.constant 0 : i32
    %c0_i32_1 = arith.constant 0 : i32
    return %c0_i32, %c0_i32_0 : i32, i32
  }
  func.func @transform_9(%arg0: i32) -> (i32, i32) {
    %c0_i32 = arith.constant 0 : i32
    %c0_i32_0 = arith.constant 0 : i32
    %c0_i32_1 = arith.constant 0 : i32
    return %c0_i32, %c0_i32_0 : i32, i32
  }
  func.func @transform_10(%arg0: i32) -> (i32, i32) {
    %c0_i32 = arith.constant 0 : i32
    %c0_i32_0 = arith.constant 0 : i32
    %c0_i32_1 = arith.constant 0 : i32
    return %c0_i32, %c0_i32_0 : i32, i32
  }
  func.func @transform_11(%arg0: i32) -> (i32, i32) {
    %c0_i32 = arith.constant 0 : i32
    %c0_i32_0 = arith.constant 0 : i32
    %c0_i32_1 = arith.constant 0 : i32
    return %c0_i32, %c0_i32_0 : i32, i32
  }
  func.func @transform_12(%arg0: i32) -> (i32, i32) {
    %c0_i32 = arith.constant 0 : i32
    %c0_i32_0 = arith.constant 0 : i32
    %c0_i32_1 = arith.constant 0 : i32
    return %c0_i32, %c0_i32_0 : i32, i32
  }
  func.func @transform_13(%arg0: i32) -> (i32, i32) {
    %c0_i32 = arith.constant 0 : i32
    %c0_i32_0 = arith.constant 0 : i32
    return %arg0, %c0_i32 : i32, i32
  }
}

</mosaic_0001>

<bundles_post_ra>
// kernel: tpu_custom_call.1
= control target key start
LH: loop header
LB: loop body
LE: loop exit
PB: predicated region body
PF: predicated region fallthrough
CT: control target
= control target key end

     0   :  { %vm388_vm0 = vcmask 293888   ;;  %vm392_vm1 = vcmask 1043456   ;;  %vm980_vm2 = vcmask 1039360   ;;  %s6721_s29 = smov 126   ;;  %vm1058_vm3 = vcmask 1031168   ;;  %s12495_s1 = inlined_call_operand.vmem [shape: f32[164,1600], index: 1, kind: input, shape index: {}]   ;;  %s12496_s0 = inlined_call_operand.vmem [shape: f32[8,164], index: 0, kind: input, shape index: {}]   ;;  %s12497_s2 = inlined_call_operand.vmem [shape: f32[1,1600], index: 2, kind: input, shape index: {}]   ;;  %s12498_s3 = inlined_call_operand.vmem [shape: f32[1597,440], index: 3, kind: input, shape index: {}]   ;;  %s12499_s4 = inlined_call_operand.vmem [shape: f32[440,800], index: 4, kind: input, shape index: {}]   ;;  %s12500_s5 = inlined_call_operand.vmem [shape: f32[1,800], index: 5, kind: input, shape index: {}]   ;;  %s12501_s6 = inlined_call_operand.vmem [shape: f32[797,200], index: 6, kind: input, shape index: {}]   ;;  %s12502_s7 = inlined_call_operand.vmem [shape: f32[200,64], index: 7, kind: input, shape index: {}]   ;;  %s12503_s9 = inlined_call_operand.vmem [shape: f32[64,8], index: 9, kind: input, shape index: {}]   ;;  %s12504_s8 = inlined_call_operand.vmem [shape: f32[1,64], index: 8, kind: input, shape index: {}]   ;;  %s12505_s11 = inlined_call_operand.vmem [shape: f32[8,2], index: 11, kind: input, shape index: {}]   ;;  %s12506_s10 = inlined_call_operand.vmem [shape: f32[1,8], index: 10, kind: input, shape index: {}]   ;;  %s12507_s12 = inlined_call_operand.vmem [shape: f32[1,2], index: 12, kind: input, shape index: {}]   ;;  %s12508_s13 = inlined_call_operand.vmem [shape: f32[8,2], index: 13, kind: output, shape index: {}]  }
   0x1   :  { %v47_v0 = vld [vmem:[%s12495_s1 + $0x8] sm:$0xff]  ;;  %v60_v1 = vld [vmem:[%s12495_s1 + $0x70] sm:$0xff]  ;;  %v49_v2 = vld [vmem:[%s12495_s1 + $0x18] sm:$0xff]  ;;  %vm1901_vm4 = vcmask 1044480   ;;  %vm6722_vm5 = vmmov 1   ;;  %vm1897_vm7 = vcmask 498688  }
   0x2   :  { %v4877_v3 = vpack.c.bf16 %v60_v1, %v47_v0  ;;  %v62_v4 = vld [vmem:[%s12495_s1 + $0x80] sm:$0xff]  ;;  %v59_v6 = vld [vmem:[%s12495_s1 + $0x68] sm:$0xff]  ;;  %v48_v9 = vld [vmem:[%s12495_s1 + $0x10] sm:$0xff]  ;;  %vm3330_vm8 = vcmask 457728   ;;  %vm4189_vm9 = vcmask 236544   ;;  %vm4515_vm10 = vcmask 588800  }
   0x3   :  { %v46_v5 = vld [vmem:[%s12495_s1] sm:$0xff]  ;;  %v4917_v7 = vpack.c.bf16 %v62_v4, %v49_v2  ;;  %v61_v10 = vld [vmem:[%s12495_s1 + $0x78] sm:$0xff]  ;;  %v75_v14 = vld [vmem:[%s12495_s1 + $0xe8] sm:$0xff]  ;;  %vm6723_vm11 = vmmov 0   ;;  %vm4605_vm12 = vcmask 523264   ;;  %vm4688_vm13 = vcmask 64512  }
   0x4   :  { %v4879_v8 = vpack.c.bf16 %v59_v6, %v46_v5  ;;  %v73_v11 = vld [vmem:[%s12495_s1 + $0xd8] sm:$0xff]  ;;  %4878 = vmatprep.subr.bf16.mxu0 %v4877_v3  ;;  %v4919_v12 = vpack.c.bf16 %v61_v10, %v48_v9  ;;  %v86_v13 = vld [vmem:[%s12495_s1 + $0x140] sm:$0xff]  ;;  %v88_v15 = vld [vmem:[%s12495_s1 + $0x150] sm:$0xff]  ;;  %vm4762_vm14 = vcmask 15360  }
   0x5   :  { %4918 = vmatprep.subr.bf16.mxu1 %v4917_v7  ;;  %v4881_v16 = vpack.c.bf16 %v86_v13, %v73_v11  ;;  %v4921_v17 = vpack.c.bf16 %v88_v15, %v75_v14  ;;  %v72_v18 = vld [vmem:[%s12495_s1 + $0xd0] sm:$0xff]  ;;  %v85_v19 = vld [vmem:[%s12495_s1 + $0x138] sm:$0xff]  ;;  %v74_v20 = vld [vmem:[%s12495_s1 + $0xe0] sm:$0xff] }
   0x6   :  { %4880 = vmatpush1.bf16.msra.mxu0 %v4879_v8  ;;  %4920 = vmatpush1.bf16.msra.mxu1 %v4919_v12  ;;  %v4883_v21 = vpack.c.bf16 %v85_v19, %v72_v18  ;;  %v87_v22 = vld [vmem:[%s12495_s1 + $0x148] sm:$0xff]  ;;  %v112_v24 = vld [vmem:[%s12495_s1 + $0x210] sm:$0xff]  ;;  %v101_v27 = vld [vmem:[%s12495_s1 + $0x1b8] sm:$0xff] }
   0x7   :  { %v99_v23 = vld [vmem:[%s12495_s1 + $0x1a8] sm:$0xff]  ;;  %4882 = vmatprep.subr.bf16.mxu0 %v4881_v16  ;;  %4922 = vmatprep.subr.bf16.mxu1 %v4921_v17  ;;  %v4923_v25 = vpack.c.bf16 %v87_v22, %v74_v20  ;;  %v114_v28 = vld [vmem:[%s12495_s1 + $0x220] sm:$0xff]  ;;  %v100_v32 = vld [vmem:[%s12495_s1 + $0x1b0] sm:$0xff] }
   0x8   :  { %v4885_v26 = vpack.c.bf16 %v112_v24, %v99_v23  ;;  %v98_v29 = vld [vmem:[%s12495_s1 + $0x1a0] sm:$0xff]  ;;  %v4925_v30 = vpack.c.bf16 %v114_v28, %v101_v27  ;;  %v111_v31 = vld [vmem:[%s12495_s1 + $0x208] sm:$0xff]  ;;  %v113_v33 = vld [vmem:[%s12495_s1 + $0x218] sm:$0xff] }
   0x9   :  { %v4887_v34 = vpack.c.bf16 %v111_v31, %v98_v29  ;;  %v125_v35 = vld [vmem:[%s12495_s1 + $0x278] sm:$0xff]  ;;  %v138_v36 = vld [vmem:[%s12495_s1 + $0x2e0] sm:$0xff]  ;;  %v127_v37 = vld [vmem:[%s12495_s1 + $0x288] sm:$0xff]  ;;  %v4927_v38 = vpack.c.bf16 %v113_v33, %v100_v32 }
   0xa   :  { %4884 = vmatpush1.bf16.msra.mxu0 %v4883_v21  ;;  %4924 = vmatpush1.bf16.msra.mxu1 %v4923_v25  ;;  %v4889_v39 = vpack.c.bf16 %v138_v36, %v125_v35  ;;  %v140_v40 = vld [vmem:[%s12495_s1 + $0x2f0] sm:$0xff]  ;;  %v137_v42 = vld [vmem:[%s12495_s1 + $0x2d8] sm:$0xff]  ;;  %v126_v44 = vld [vmem:[%s12495_s1 + $0x280] sm:$0xff] }
   0xb   :  { %4886 = vmatprep.subr.bf16.mxu0 %v4885_v26  ;;  %v124_v41 = vld [vmem:[%s12495_s1 + $0x270] sm:$0xff]  ;;  %4926 = vmatprep.subr.bf16.mxu1 %v4925_v30  ;;  %v4929_v43 = vpack.c.bf16 %v140_v40, %v127_v37  ;;  %v139_v45 = vld [vmem:[%s12495_s1 + $0x2e8] sm:$0xff]  ;;  %v153_v48 = vld [vmem:[%s12495_s1 + $0x358] sm:$0xff] }
   0xc   :  { %v151_v46 = vld [vmem:[%s12495_s1 + $0x348] sm:$0xff]  ;;  %v164_v47 = vld [vmem:[%s12495_s1 + $0x3b0] sm:$0xff]  ;;  %v166_v49 = vld [vmem:[%s12495_s1 + $0x3c0] sm:$0xff]  ;;  %v4891_v50 = vpack.c.bf16 %v137_v42, %v124_v41  ;;  %v4931_v51 = vpack.c.bf16 %v139_v45, %v126_v44 }
   0xd   :  { %v4893_v52 = vpack.c.bf16 %v164_v47, %v151_v46  ;;  %v150_v53 = vld [vmem:[%s12495_s1 + $0x340] sm:$0xff]  ;;  %v163_v54 = vld [vmem:[%s12495_s1 + $0x3a8] sm:$0xff]  ;;  %v152_v55 = vld [vmem:[%s12495_s1 + $0x350] sm:$0xff]  ;;  %v4933_v56 = vpack.c.bf16 %v166_v49, %v153_v48 }
   0xe   :  { %4888 = vmatpush1.bf16.msra.mxu0 %v4887_v34  ;;  %4928 = vmatpush1.bf16.msra.mxu1 %v4927_v38  ;;  %v165_v57 = vld [vmem:[%s12495_s1 + $0x3b8] sm:$0xff]  ;;  %v190_v59 = vld [vmem:[%s12495_s1 + $0x480] sm:$0xff]  ;;  %v179_v60 = vld [vmem:[%s12495_s1 + $0x428] sm:$0xff]  ;;  %v4895_v62 = vpack.c.bf16 %v163_v54, %v150_v53 }
   0xf   :  { %4890 = vmatprep.subr.bf16.mxu0 %v4889_v39  ;;  %4930 = vmatprep.subr.bf16.mxu1 %v4929_v43  ;;  %v177_v58 = vld [vmem:[%s12495_s1 + $0x418] sm:$0xff]  ;;  %v192_v61 = vld [vmem:[%s12495_s1 + $0x490] sm:$0xff]  ;;  %v4935_v63 = vpack.c.bf16 %v165_v57, %v152_v55  ;;  %v178_v3 = vld [vmem:[%s12495_s1 + $0x420] sm:$0xff] }
  0x10   :  { %v4897_v0 = vpack.c.bf16 %v190_v59, %v177_v58  ;;  %v176_v1 = vld [vmem:[%s12495_s1 + $0x410] sm:$0xff]  ;;  %v189_v2 = vld [vmem:[%s12495_s1 + $0x478] sm:$0xff]  ;;  %v4937_v4 = vpack.c.bf16 %v192_v61, %v179_v60  ;;  %v191_v5 = vld [vmem:[%s12495_s1 + $0x488] sm:$0xff] }
  0x11   :  { %v203_v6 = vld [vmem:[%s12495_s1 + $0x4e8] sm:$0xff]  ;;  %v216_v7 = vld [vmem:[%s12495_s1 + $0x550] sm:$0xff]  ;;  %v205_v8 = vld [vmem:[%s12495_s1 + $0x4f8] sm:$0xff]  ;;  %v4899_v10 = vpack.c.bf16 %v189_v2, %v176_v1  ;;  %v4939_v11 = vpack.c.bf16 %v191_v5, %v178_v3 }
  0x12   :  { %4892 = vmatpush1.bf16.msra.mxu0 %v4891_v50  ;;  %4932 = vmatpush1.bf16.msra.mxu1 %v4931_v51  ;;  %v218_v9 = vld [vmem:[%s12495_s1 + $0x560] sm:$0xff]  ;;  %v4901_v12 = vpack.c.bf16 %v216_v7, %v203_v6  ;;  %v215_v14 = vld [vmem:[%s12495_s1 + $0x548] sm:$0xff]  ;;  %v204_v15 = vld [vmem:[%s12495_s1 + $0x4f0] sm:$0xff] }
  0x13   :  { %4894 = vmatprep.subr.bf16.mxu0 %v4893_v52  ;;  %4934 = vmatprep.subr.bf16.mxu1 %v4933_v56  ;;  %v202_v13 = vld [vmem:[%s12495_s1 + $0x4e0] sm:$0xff]  ;;  %v4941_v16 = vpack.c.bf16 %v218_v9, %v205_v8  ;;  %v217_v17 = vld [vmem:[%s12495_s1 + $0x558] sm:$0xff]  ;;  %v231_v20 = vld [vmem:[%s12495_s1 + $0x5c8] sm:$0xff] }
  0x14   :  { %v229_v18 = vld [vmem:[%s12495_s1 + $0x5b8] sm:$0xff]  ;;  %v242_v19 = vld [vmem:[%s12495_s1 + $0x620] sm:$0xff]  ;;  %v244_v21 = vld [vmem:[%s12495_s1 + $0x630] sm:$0xff]  ;;  %v4903_v22 = vpack.c.bf16 %v215_v14, %v202_v13  ;;  %v4943_v23 = vpack.c.bf16 %v217_v17, %v204_v15 }
  0x15   :  { %v4905_v24 = vpack.c.bf16 %v242_v19, %v229_v18  ;;  %v228_v25 = vld [vmem:[%s12495_s1 + $0x5b0] sm:$0xff]  ;;  %v241_v26 = vld [vmem:[%s12495_s1 + $0x618] sm:$0xff]  ;;  %v230_v27 = vld [vmem:[%s12495_s1 + $0x5c0] sm:$0xff]  ;;  %v4945_v28 = vpack.c.bf16 %v244_v21, %v231_v20 }
  0x16   :  { %4896 = vmatpush1.bf16.msra.mxu0 %v4895_v62  ;;  %4936 = vmatpush1.bf16.msra.mxu1 %v4935_v63  ;;  %v243_v29 = vld [vmem:[%s12495_s1 + $0x628] sm:$0xff]  ;;  %v268_v31 = vld [vmem:[%s12495_s1 + $0x6f0] sm:$0xff]  ;;  %v257_v32 = vld [vmem:[%s12495_s1 + $0x698] sm:$0xff]  ;;  %v4907_v35 = vpack.c.bf16 %v241_v26, %v228_v25 }
  0x17   :  { %4898 = vmatprep.subr.bf16.mxu0 %v4897_v0  ;;  %4938 = vmatprep.subr.bf16.mxu1 %v4937_v4  ;;  %v255_v30 = vld [vmem:[%s12495_s1 + $0x688] sm:$0xff]  ;;  %v270_v33 = vld [vmem:[%s12495_s1 + $0x700] sm:$0xff]  ;;  %v4947_v36 = vpack.c.bf16 %v243_v29, %v230_v27  ;;  %v256_v40 = vld [vmem:[%s12495_s1 + $0x690] sm:$0xff] }
  0x18   :  { %v7001_v34 = vld [vmem:[%s12496_s0 + $0x8] sm:$0xff]  ;;  %v4909_v37 = vpack.c.bf16 %v268_v31, %v255_v30  ;;  %v254_v38 = vld [vmem:[%s12495_s1 + $0x680] sm:$0xff]  ;;  %v4949_v41 = vpack.c.bf16 %v270_v33, %v257_v32  ;;  %v269_v42 = vld [vmem:[%s12495_s1 + $0x6f8] sm:$0xff] }
  0x19   :  { %4770 = vmatprep.mubr.msk.f32.mxu0 %vm388_vm0, %v7001_v34  ;;  %v267_v39 = vld [vmem:[%s12495_s1 + $0x6e8] sm:$0xff]  ;;  %v281_v43 = vld [vmem:[%s12495_s1 + $0x758] sm:$0xff]  ;;  %v294_v44 = vld [vmem:[%s12495_s1 + $0x7c0] sm:$0xff]  ;;  %4773 = vmatprep.mubr.msk.f32.mxu1 %vm388_vm0, %v7001_v34  ;;  %v4951_v48 = vpack.c.bf16 %v269_v42, %v256_v40 }
  0x1a   :  { %4900 = vmatpush1.bf16.msra.mxu0 %v4899_v10  ;;  %4940 = vmatpush1.bf16.msra.mxu1 %v4939_v11  ;;  %v283_v45 = vld [vmem:[%s12495_s1 + $0x768] sm:$0xff]  ;;  %v296_v46 = vld [vmem:[%s12495_s1 + $0x7d0] sm:$0xff]  ;;  %v4911_v47 = vpack.c.bf16 %v267_v39, %v254_v38  ;;  %v4913_v49 = vpack.c.bf16 %v294_v44, %v281_v43  ;;  %v293_v51 = vld [vmem:[%s12495_s1 + $0x7b8] sm:$0xff] }
  0x1b   :  { %4902 = vmatprep.subr.bf16.mxu0 %v4901_v12  ;;  %4942 = vmatprep.subr.bf16.mxu1 %v4941_v16  ;;  %v280_v50 = vld [vmem:[%s12495_s1 + $0x750] sm:$0xff]  ;;  %v4953_v52 = vpack.c.bf16 %v296_v46, %v283_v45  ;;  %v282_v53 = vld [vmem:[%s12495_s1 + $0x760] sm:$0xff]  ;;  %v295_v54 = vld [vmem:[%s12495_s1 + $0x7c8] sm:$0xff] }
  0x1c   :  { %v4915_v55 = vpack.c.bf16 %v293_v51, %v280_v50  ;;  %v4955_v56 = vpack.c.bf16 %v295_v54, %v282_v53  ;;  %v307_v57 = vld [vmem:[%s12495_s1 + $0x828] sm:$0xf]  ;;  %v309_v58 = vld [vmem:[%s12495_s1 + $0x838] sm:$0xf]  ;;  %v306_v60 = vld [vmem:[%s12495_s1 + $0x820] sm:$0xf] }
  0x1d   :  { %v51_v59 = vld [vmem:[%s12495_s1 + $0x28] sm:$0xff]  ;;  %v64_v61 = vld [vmem:[%s12495_s1 + $0x90] sm:$0xff]  ;;  %v50_v62 = vld [vmem:[%s12495_s1 + $0x20] sm:$0xff] }
  0x1e   :  { %4904 = vmatpush1.bf16.msra.mxu0 %v4903_v22  ;;  %4944 = vmatpush1.bf16.msra.mxu1 %v4943_v23  ;;  %v63_v63 = vld [vmem:[%s12495_s1 + $0x88] sm:$0xff]  ;;  %v308_v0 = vld [vmem:[%s12495_s1 + $0x830] sm:$0xf]  ;;  %v77_v1 = vld [vmem:[%s12495_s1 + $0xf8] sm:$0xff]  ;;  %v4957_v8 = vpack.c.bf16 %v64_v61, %v51_v59 }
  0x1f   :  { %4906 = vmatprep.subr.bf16.mxu0 %v4905_v24  ;;  %4946 = vmatprep.subr.bf16.mxu1 %v4945_v28  ;;  %v53_v2 = vld [vmem:[%s12495_s1 + $0x38] sm:$0xff]  ;;  %v66_v3 = vld [vmem:[%s12495_s1 + $0xa0] sm:$0xff]  ;;  %v52_v5 = vld [vmem:[%s12495_s1 + $0x30] sm:$0xff]  ;;  %v4959_v11 = vpack.c.bf16 %v63_v63, %v50_v62 }
  0x20   :  { %v90_v4 = vld [vmem:[%s12495_s1 + $0x160] sm:$0xff]  ;;  %v65_v6 = vld [vmem:[%s12495_s1 + $0x98] sm:$0xff]  ;;  %v79_v9 = vld [vmem:[%s12495_s1 + $0x108] sm:$0xff]  ;;  %v4997_v12 = vpack.c.bf16 %v66_v3, %v53_v2 }
  0x21   :  { %v7090_v7 = vld [vmem:[%s12496_s0] sm:$0xff]  ;;  %v92_v10 = vld [vmem:[%s12495_s1 + $0x170] sm:$0xff]  ;;  %v4961_v13 = vpack.c.bf16 %v90_v4, %v77_v1  ;;  %v89_v15 = vld [vmem:[%s12495_s1 + $0x158] sm:$0xff]  ;;  %v4999_v16 = vpack.c.bf16 %v65_v6, %v52_v5 }
  0x22   :  { %4908 = vmatpush1.bf16.msra.mxu0 %v4907_v35  ;;  %4948 = vmatpush1.bf16.msra.mxu1 %v4947_v36  ;;  %v76_v14 = vld [vmem:[%s12495_s1 + $0xf0] sm:$0xff]  ;;  %v103_v17 = vld [vmem:[%s12495_s1 + $0x1c8] sm:$0xff]  ;;  %v5001_v19 = vpack.c.bf16 %v92_v10, %v79_v9  ;;  %v78_v20 = vld [vmem:[%s12495_s1 + $0x100] sm:$0xff] }
  0x23   :  { %4910 = vmatprep.subr.bf16.mxu0 %v4909_v37  ;;  %4950 = vmatprep.subr.bf16.mxu1 %v4949_v41  ;;  %v116_v18 = vld [vmem:[%s12495_s1 + $0x230] sm:$0xff]  ;;  %v91_v21 = vld [vmem:[%s12495_s1 + $0x168] sm:$0xff]  ;;  %v105_v22 = vld [vmem:[%s12495_s1 + $0x1d8] sm:$0xff]  ;;  %v4963_v24 = vpack.c.bf16 %v89_v15, %v76_v14 }
  0x24   :  { %v118_v23 = vld [vmem:[%s12495_s1 + $0x240] sm:$0xff]  ;;  %v4965_v25 = vpack.c.bf16 %v116_v18, %v103_v17  ;;  %v115_v27 = vld [vmem:[%s12495_s1 + $0x228] sm:$0xff]  ;;  %v5003_v28 = vpack.c.bf16 %v91_v21, %v78_v20  ;;  %v129_v29 = vld [vmem:[%s12495_s1 + $0x298] sm:$0xff] }
  0x25   :  { %v102_v26 = vld [vmem:[%s12495_s1 + $0x1c0] sm:$0xff]  ;;  %v5005_v31 = vpack.c.bf16 %v118_v23, %v105_v22  ;;  %v104_v32 = vld [vmem:[%s12495_s1 + $0x1d0] sm:$0xff]  ;;  %v117_v33 = vld [vmem:[%s12495_s1 + $0x238] sm:$0xff] }
  0x26   :  { %4912 = vmatpush1.bf16.msra.mxu0 %v4911_v47  ;;  %4952 = vmatpush1.bf16.msra.mxu1 %v4951_v48  ;;  %v142_v30 = vld [vmem:[%s12495_s1 + $0x300] sm:$0xff]  ;;  %v131_v35 = vld [vmem:[%s12495_s1 + $0x2a8] sm:$0xff]  ;;  %v144_v36 = vld [vmem:[%s12495_s1 + $0x310] sm:$0xff]  ;;  %v4967_v37 = vpack.c.bf16 %v115_v27, %v102_v26  ;;  %v5007_v41 = vpack.c.bf16 %v117_v33, %v104_v32 }
  0x27   :  { %4914 = vmatprep.subr.bf16.mxu0 %v4913_v49  ;;  %4954 = vmatprep.subr.bf16.mxu1 %v4953_v52  ;;  %v4969_v38 = vpack.c.bf16 %v142_v30, %v129_v29  ;;  %v128_v39 = vld [vmem:[%s12495_s1 + $0x290] sm:$0xff]  ;;  %v141_v40 = vld [vmem:[%s12495_s1 + $0x2f8] sm:$0xff]  ;;  %v155_v42 = vld [vmem:[%s12495_s1 + $0x368] sm:$0xff]  ;;  %v5009_v44 = vpack.c.bf16 %v144_v36, %v131_v35 }
  0x28   :  { %v168_v43 = vld [vmem:[%s12495_s1 + $0x3d0] sm:$0xff]  ;;  %v130_v45 = vld [vmem:[%s12495_s1 + $0x2a0] sm:$0xff]  ;;  %v143_v46 = vld [vmem:[%s12495_s1 + $0x308] sm:$0xff]  ;;  %v4971_v49 = vpack.c.bf16 %v141_v40, %v128_v39 }
  0x29   :  { %v157_v47 = vld [vmem:[%s12495_s1 + $0x378] sm:$0xff]  ;;  %v170_v48 = vld [vmem:[%s12495_s1 + $0x3e0] sm:$0xff]  ;;  %v4973_v50 = vpack.c.bf16 %v168_v43, %v155_v42  ;;  %v167_v52 = vld [vmem:[%s12495_s1 + $0x3c8] sm:$0xff]  ;;  %v5011_v53 = vpack.c.bf16 %v143_v46, %v130_v45 }
  0x2a   :  { %4916 = vmatpush1.bf16.msra.mxu0 %v4915_v55  ;;  %4956 = vmatpush1.bf16.msra.mxu1 %v4955_v56  ;;  %v154_v51 = vld [vmem:[%s12495_s1 + $0x360] sm:$0xff]  ;;  %v181_v54 = vld [vmem:[%s12495_s1 + $0x438] sm:$0xff]  ;;  %v5013_v56 = vpack.c.bf16 %v170_v48, %v157_v47  ;;  %v183_v59 = vld [vmem:[%s12495_s1 + $0x448] sm:$0xff] }
  0x2b   :  { %4768 = vmatprep.subr.msk.mxu0 %vm392_vm1, %v307_v57  ;;  %4771 = vmatprep.subr.msk.mxu1 %vm392_vm1, %v309_v58  ;;  %v194_v55 = vld [vmem:[%s12495_s1 + $0x4a0] sm:$0xff]  ;;  %v156_v57 = vld [vmem:[%s12495_s1 + $0x370] sm:$0xff]  ;;  %v169_v58 = vld [vmem:[%s12495_s1 + $0x3d8] sm:$0xff]  ;;  %v4975_v61 = vpack.c.bf16 %v167_v52, %v154_v51 }
  0x2c   :  { %v4977_v62 = vpack.c.bf16 %v194_v55, %v181_v54  ;;  %v180_v63 = vld [vmem:[%s12495_s1 + $0x430] sm:$0xff]  ;;  %v5015_v1 = vpack.c.bf16 %v169_v58, %v156_v57  ;;  %v207_v2 = vld [vmem:[%s12495_s1 + $0x508] sm:$0xff]  ;;  %v182_v5 = vld [vmem:[%s12495_s1 + $0x440] sm:$0xff] }
  0x2d   :  { %v220_v3 = vld [vmem:[%s12495_s1 + $0x570] sm:$0xff]  ;;  %v195_v6 = vld [vmem:[%s12495_s1 + $0x4a8] sm:$0xff]  ;;  %v222_v9 = vld [vmem:[%s12495_s1 + $0x580] sm:$0xff] }
  0x2e   :  { %4769 = vmatpush1.msk.msra.mxu0 %vm392_vm1, %v306_v60  ;;  %4772 = vmatpush1.msk.msra.mxu1 %vm392_vm1, %v308_v0  ;;  %v196_v60 = vld [vmem:[%s12495_s1 + $0x4b0] sm:$0xff]  ;;  %v193_v0 = vld [vmem:[%s12495_s1 + $0x498] sm:$0xff]  ;;  %v5019_v14 = vpack.c.bf16 %v195_v6, %v182_v5  ;;  %v235_v20 = vld [vmem:[%s12495_s1 + $0x5e8] sm:$0xff] }
  0x2f   :  { %497 = vmatmul.mubr.f32.vlgmr.msra.gmra.mrb[0].mxu0 %v7090_v7  ;;  %568 = vmatmul.mubr.f32.vlgmr.msra.gmra.mrb[0].mxu1 %v7090_v7  ;;  %v5017_v4 = vpack.c.bf16 %v196_v60, %v183_v59  ;;  %v4979_v10 = vpack.c.bf16 %v193_v0, %v180_v63  ;;  %v233_v15 = vld [vmem:[%s12495_s1 + $0x5d8] sm:$0xff]  ;;  %v208_v18 = vld [vmem:[%s12495_s1 + $0x510] sm:$0xff]  ;;  %v259_v27 = vld [vmem:[%s12495_s1 + $0x6a8] sm:$0xff] }
  0x30   :  { %4958 = vmatprep.subr.bf16.mxu0 %v4957_v8  ;;  %4998 = vmatprep.subr.bf16.mxu1 %v4997_v12  ;;  %v209_v8 = vld [vmem:[%s12495_s1 + $0x518] sm:$0xff]  ;;  %v206_v12 = vld [vmem:[%s12495_s1 + $0x500] sm:$0xff]  ;;  %v248_v21 = vld [vmem:[%s12495_s1 + $0x650] sm:$0xff] }
  0x31   :  { %4960 = vmatpush1.bf16.msra.mxu0 %v4959_v11  ;;  %5000 = vmatpush1.bf16.msra.mxu1 %v4999_v16  ;;  %v4981_v11 = vpack.c.bf16 %v220_v3, %v207_v2  ;;  %v246_v16 = vld [vmem:[%s12495_s1 + $0x640] sm:$0xff]  ;;  %v5021_v17 = vpack.c.bf16 %v222_v9, %v209_v8  ;;  %v5025_v29 = vpack.c.bf16 %v248_v21, %v235_v20  ;;  %v261_v32 = vld [vmem:[%s12495_s1 + $0x6b8] sm:$0xff]  ;;  %v260_v43 = vld [vmem:[%s12495_s1 + $0x6b0] sm:$0xff] }
  0x32   :  { %4962 = vmatprep.subr.bf16.mxu0 %v4961_v13  ;;  %5002 = vmatprep.subr.bf16.mxu1 %v5001_v19  ;;  %v219_v13 = vld [vmem:[%s12495_s1 + $0x568] sm:$0xff]  ;;  %v221_v19 = vld [vmem:[%s12495_s1 + $0x578] sm:$0xff]  ;;  %v4985_v23 = vpack.c.bf16 %v246_v16, %v233_v15  ;;  %v234_v30 = vld [vmem:[%s12495_s1 + $0x5e0] sm:$0xff] }
  0x33   :  { %4776 = vmatprep.mubr.msk.f32.mxu0 %vm388_vm0, %v7001_v34  ;;  %4779 = vmatprep.mubr.msk.f32.mxu1 %vm388_vm0, %v7001_v34  ;;  %v4983_v22 = vpack.c.bf16 %v219_v13, %v206_v12  ;;  %v5023_v26 = vpack.c.bf16 %v221_v19, %v208_v18  ;;  %v274_v33 = vld [vmem:[%s12495_s1 + $0x720] sm:$0xff]  ;;  %v285_v40 = vld [vmem:[%s12495_s1 + $0x778] sm:$0xff]  ;;  %v287_v45 = vld [vmem:[%s12495_s1 + $0x788] sm:$0xff] }
  0x34   :  { %v5029_v42 = vpack.c.bf16 %v274_v33, %v261_v32  ;;  %v300_v46 = vld [vmem:[%s12495_s1 + $0x7f0] sm:$0xff]  ;;  %v299_v54 = vld [vmem:[%s12495_s1 + $0x7e8] sm:$0xff]  ;;  %v54_v60 = vld [vmem:[%s12495_s1 + $0x40] sm:$0xff] }
  0x35   :  { %4964 = vmatpush1.bf16.msra.mxu0 %v4963_v24  ;;  %5004 = vmatpush1.bf16.msra.mxu1 %v5003_v28  ;;  %v232_v24 = vld [vmem:[%s12495_s1 + $0x5d0] sm:$0xff]  ;;  %v5033_v52 = vpack.c.bf16 %v300_v46, %v287_v45  ;;  %v311_v57 = vld [vmem:[%s12495_s1 + $0x848] sm:$0xf]  ;;  %v310_v63 = vld [vmem:[%s12495_s1 + $0x840] sm:$0xf] }
  0x36   :  { %4966 = vmatprep.subr.bf16.mxu0 %v4965_v25  ;;  %5006 = vmatprep.subr.bf16.mxu1 %v5005_v31  ;;  %v245_v25 = vld [vmem:[%s12495_s1 + $0x638] sm:$0xff]  ;;  %v272_v28 = vld [vmem:[%s12495_s1 + $0x710] sm:$0xff]  ;;  %v247_v31 = vld [vmem:[%s12495_s1 + $0x648] sm:$0xff] }
  0x37   :  { %v4987_v35 = vpack.c.bf16 %v245_v25, %v232_v24  ;;  %v4989_v36 = vpack.c.bf16 %v272_v28, %v259_v27  ;;  %v5027_v39 = vpack.c.bf16 %v247_v31, %v234_v30  ;;  %v55_v58 = vld [vmem:[%s12495_s1 + $0x48] sm:$0xff]  ;;  %v68_v59 = vld [vmem:[%s12495_s1 + $0xb0] sm:$0xff]  ;;  %v81_v0 = vld [vmem:[%s12495_s1 + $0x118] sm:$0xff] }
  0x38   :  { %v5037_v2 = vpack.c.bf16 %v68_v59, %v55_v58  ;;  %v312_v3 = vld [vmem:[%s12495_s1 + $0x850] sm:$0xf]  ;;  %v70_v5 = vld [vmem:[%s12495_s1 + $0xc0] sm:$0xff]  ;;  %v93_v12 = vld [vmem:[%s12495_s1 + $0x178] sm:$0xff] }
  0x39   :  { %4968 = vmatpush1.bf16.msra.mxu0 %v4967_v37  ;;  %5008 = vmatpush1.bf16.msra.mxu1 %v5007_v41  ;;  %v258_v37 = vld [vmem:[%s12495_s1 + $0x6a0] sm:$0xff]  ;;  %v80_v8 = vld [vmem:[%s12495_s1 + $0x110] sm:$0xff]  ;;  %v83_v13 = vld [vmem:[%s12495_s1 + $0x128] sm:$0xff] }
  0x3a   :  { %4970 = vmatprep.subr.bf16.mxu0 %v4969_v38  ;;  %5010 = vmatprep.subr.bf16.mxu1 %v5009_v44  ;;  %v271_v38 = vld [vmem:[%s12495_s1 + $0x708] sm:$0xff]  ;;  %v298_v41 = vld [vmem:[%s12495_s1 + $0x7e0] sm:$0xff]  ;;  %v273_v44 = vld [vmem:[%s12495_s1 + $0x718] sm:$0xff]  ;;  %v5043_v19 = vpack.c.bf16 %v93_v12, %v80_v8 }
  0x3b   :  { %v4991_v47 = vpack.c.bf16 %v271_v38, %v258_v37  ;;  %v4993_v48 = vpack.c.bf16 %v298_v41, %v285_v40  ;;  %v5031_v51 = vpack.c.bf16 %v273_v44, %v260_v43  ;;  %v56_v9 = vld [vmem:[%s12495_s1 + $0x50] sm:$0xff]  ;;  %v107_v16 = vld [vmem:[%s12495_s1 + $0x1e8] sm:$0xff]  ;;  %v106_v21 = vld [vmem:[%s12495_s1 + $0x1e0] sm:$0xff] }
  0x3c   :  { %v119_v25 = vld [vmem:[%s12495_s1 + $0x248] sm:$0xff]  ;;  %v122_v27 = vld [vmem:[%s12495_s1 + $0x260] sm:$0xff]  ;;  %v133_v28 = vld [vmem:[%s12495_s1 + $0x2b8] sm:$0xff] }
  0x3d   :  { %4972 = vmatpush1.bf16.msra.mxu0 %v4971_v49  ;;  %5012 = vmatpush1.bf16.msra.mxu1 %v5011_v53  ;;  %v284_v49 = vld [vmem:[%s12495_s1 + $0x770] sm:$0xff]  ;;  %v286_v53 = vld [vmem:[%s12495_s1 + $0x780] sm:$0xff]  ;;  %v5047_v31 = vpack.c.bf16 %v119_v25, %v106_v21  ;;  %v145_v38 = vld [vmem:[%s12495_s1 + $0x318] sm:$0xff] }
  0x3e   :  { %4974 = vmatprep.subr.bf16.mxu0 %v4973_v50  ;;  %5014 = vmatprep.subr.bf16.mxu1 %v5013_v56  ;;  %v297_v50 = vld [vmem:[%s12495_s1 + $0x7d8] sm:$0xff]  ;;  %v5035_v56 = vpack.c.bf16 %v299_v54, %v286_v53  ;;  %v132_v33 = vld [vmem:[%s12495_s1 + $0x2b0] sm:$0xff]  ;;  %v159_v41 = vld [vmem:[%s12495_s1 + $0x388] sm:$0xff] }
  0x3f   :  { %v4995_v55 = vpack.c.bf16 %v297_v50, %v284_v49  ;;  %v148_v40 = vld [vmem:[%s12495_s1 + $0x330] sm:$0xff]  ;;  %v5051_v44 = vpack.c.bf16 %v145_v38, %v132_v33  ;;  %v158_v46 = vld [vmem:[%s12495_s1 + $0x380] sm:$0xff]  ;;  %v171_v50 = vld [vmem:[%s12495_s1 + $0x3e8] sm:$0xff] }
  0x40   :  { %v185_v53 = vld [vmem:[%s12495_s1 + $0x458] sm:$0xff]  ;;  %v198_v54 = vld [vmem:[%s12495_s1 + $0x4c0] sm:$0xff]  ;;  %v184_v58 = vld [vmem:[%s12495_s1 + $0x450] sm:$0xff] }
  0x41   :  { %4976 = vmatpush1.bf16.msra.mxu0 %v4975_v61  ;;  %5016 = vmatpush1.bf16.msra.mxu1 %v5015_v1  ;;  %v67_v61 = vld [vmem:[%s12495_s1 + $0xa8] sm:$0xff]  ;;  %v94_v1 = vld [vmem:[%s12495_s1 + $0x180] sm:$0xff]  ;;  %v160_v59 = vld [vmem:[%s12495_s1 + $0x390] sm:$0xff] }
  0x42   :  { %4978 = vmatprep.subr.bf16.mxu0 %v4977_v62  ;;  %5018 = vmatprep.subr.bf16.mxu1 %v5017_v4  ;;  %v313_v62 = vld [vmem:[%s12495_s1 + $0x858] sm:$0xf]  ;;  %v5039_v6 = vpack.c.bf16 %v67_v61, %v54_v60  ;;  %v5057_v61 = vpack.c.bf16 %v198_v54, %v185_v53  ;;  %v186_v8 = vld [vmem:[%s12495_s1 + $0x460] sm:$0xff]  ;;  %v252_v25 = vld [vmem:[%s12495_s1 + $0x670] sm:$0xff] }
  0x43   :  { %v57_v4 = vld [vmem:[%s12495_s1 + $0x58] sm:$0xff]  ;;  %v251_v33 = vld [vmem:[%s12495_s1 + $0x668] sm:$0xff]  ;;  %v278_v38 = vld [vmem:[%s12495_s1 + $0x740] sm:$0xff] }
  0x44   :  { %v5077_v15 = vpack.c.bf16 %v70_v5, %v57_v4  ;;  %v173_v60 = vld [vmem:[%s12495_s1 + $0x3f8] sm:$0xff]  ;;  %v290_v54 = vld [vmem:[%s12495_s1 + $0x7a0] sm:$0xff]  ;;  %vm10145_vm6 = vmpackc.low %vm1901_vm4, %vm6722_vm5 }
  0x45   :  { %4980 = vmatpush1.bf16.msra.mxu0 %v4979_v10  ;;  %5020 = vmatpush1.bf16.msra.mxu1 %v5019_v14  ;;  %v69_v10 = vld [vmem:[%s12495_s1 + $0xb8] sm:$0xff]  ;;  %v96_v14 = vld [vmem:[%s12495_s1 + $0x190] sm:$0xff] }
  0x46   :  { %4982 = vmatprep.subr.bf16.mxu0 %v4981_v11  ;;  %5022 = vmatprep.subr.bf16.mxu1 %v5021_v17  ;;  %v5041_v11 = vpack.c.bf16 %v94_v1, %v81_v0  ;;  %v120_v17 = vld [vmem:[%s12495_s1 + $0x250] sm:$0xff]  ;;  %v5079_v18 = vpack.c.bf16 %v69_v10, %v56_v9  ;;  %v5081_v20 = vpack.c.bf16 %v96_v14, %v83_v13  ;;  %v211_v1 = vld [vmem:[%s12495_s1 + $0x528] sm:$0xff]  ;;  %v213_v12 = vld [vmem:[%s12495_s1 + $0x538] sm:$0xff] }
  0x47   :  { %v5045_v24 = vpack.c.bf16 %v120_v17, %v107_v16  ;;  %v200_v0 = vld [vmem:[%s12495_s1 + $0x4d0] sm:$0xff]  ;;  %v199_v9 = vld [vmem:[%s12495_s1 + $0x4c8] sm:$0xff]  ;;  %v226_v13 = vld [vmem:[%s12495_s1 + $0x5a0] sm:$0xff] }
  0x48   :  { %v237_v14 = vld [vmem:[%s12495_s1 + $0x5f8] sm:$0xff]  ;;  %v5099_v16 = vpack.c.bf16 %v199_v9, %v186_v8 }
  0x49   :  { %4984 = vmatpush1.bf16.msra.mxu0 %v4983_v22  ;;  %5024 = vmatpush1.bf16.msra.mxu1 %v5023_v26  ;;  %v82_v22 = vld [vmem:[%s12495_s1 + $0x120] sm:$0xff]  ;;  %v109_v26 = vld [vmem:[%s12495_s1 + $0x1f8] sm:$0xff] }
  0x4a   :  { %4986 = vmatprep.subr.bf16.mxu0 %v4985_v23  ;;  %5026 = vmatprep.subr.bf16.mxu1 %v5025_v29  ;;  %v95_v23 = vld [vmem:[%s12495_s1 + $0x188] sm:$0xff]  ;;  %v146_v29 = vld [vmem:[%s12495_s1 + $0x320] sm:$0xff]  ;;  %v5085_v32 = vpack.c.bf16 %v122_v27, %v109_v26  ;;  %v225_v21 = vld [vmem:[%s12495_s1 + $0x598] sm:$0xff] }
  0x4b   :  { %v5083_v30 = vpack.c.bf16 %v95_v23, %v82_v22  ;;  %v5049_v37 = vpack.c.bf16 %v146_v29, %v133_v28  ;;  %v249_v23 = vld [vmem:[%s12495_s1 + $0x658] sm:$0xff]  ;;  %v263_v26 = vld [vmem:[%s12495_s1 + $0x6c8] sm:$0xff]  ;;  %v276_v27 = vld [vmem:[%s12495_s1 + $0x730] sm:$0xff] }
  0x4c   :  { %v149_v8 = vld [vmem:[%s12495_s1 + $0x338] sm:$0xff] }
  0x4d   :  { %4988 = vmatpush1.bf16.msra.mxu0 %v4987_v35  ;;  %5028 = vmatpush1.bf16.msra.mxu1 %v5027_v39  ;;  %v108_v35 = vld [vmem:[%s12495_s1 + $0x1f0] sm:$0xff]  ;;  %v135_v39 = vld [vmem:[%s12495_s1 + $0x2c8] sm:$0xff] }
  0x4e   :  { %4990 = vmatprep.subr.bf16.mxu0 %v4989_v36  ;;  %5030 = vmatprep.subr.bf16.mxu1 %v5029_v42  ;;  %v121_v36 = vld [vmem:[%s12495_s1 + $0x258] sm:$0xff]  ;;  %v172_v42 = vld [vmem:[%s12495_s1 + $0x3f0] sm:$0xff]  ;;  %v5089_v45 = vpack.c.bf16 %v148_v40, %v135_v39  ;;  %v302_v40 = vld [vmem:[%s12495_s1 + $0x800] sm:$0xff] }
  0x4f   :  { %v5087_v43 = vpack.c.bf16 %v121_v36, %v108_v35  ;;  %v5053_v49 = vpack.c.bf16 %v172_v42, %v159_v41  ;;  %v5069_v35 = vpack.c.bf16 %v276_v27, %v263_v26  ;;  %v275_v36 = vld [vmem:[%s12495_s1 + $0x728] sm:$0xff]  ;;  %v289_v39 = vld [vmem:[%s12495_s1 + $0x798] sm:$0xff] }
  0x50   :  { %v305_v26 = vld [vmem:[%s12495_s1 + $0x818] sm:$0xff] }
  0x51   :  { %4992 = vmatpush1.bf16.msra.mxu0 %v4991_v47  ;;  %5032 = vmatpush1.bf16.msra.mxu1 %v5031_v51  ;;  %v134_v47 = vld [vmem:[%s12495_s1 + $0x2c0] sm:$0xff]  ;;  %v161_v51 = vld [vmem:[%s12495_s1 + $0x398] sm:$0xff] }
  0x52   :  { %4994 = vmatprep.subr.bf16.mxu0 %v4993_v48  ;;  %5034 = vmatprep.subr.bf16.mxu1 %v5033_v52  ;;  %v147_v48 = vld [vmem:[%s12495_s1 + $0x328] sm:$0xff]  ;;  %v174_v52 = vld [vmem:[%s12495_s1 + $0x400] sm:$0xff] }
  0x55   :  { %4996 = vmatpush1.bf16.msra.mxu0 %v4995_v55  ;;  %5036 = vmatpush1.bf16.msra.mxu1 %v5035_v56  ;;  %v5091_v55 = vpack.c.bf16 %v147_v48, %v134_v47  ;;  %v5055_v56 = vpack.c.bf16 %v171_v50, %v158_v46  ;;  %v277_v46 = vld [vmem:[%s12495_s1 + $0x738] sm:$0xff]  ;;  %v5073_v47 = vpack.c.bf16 %v302_v40, %v289_v39  ;;  %v304_v50 = vld [vmem:[%s12495_s1 + $0x810] sm:$0xff] }
  0x56   :  { %4774 = vmatprep.subr.msk.mxu0 %vm392_vm1, %v311_v57  ;;  %4777 = vmatprep.subr.msk.mxu1 %vm392_vm1, %v313_v62  ;;  %v5093_v57 = vpack.c.bf16 %v174_v52, %v161_v51  ;;  %v197_v62 = vld [vmem:[%s12495_s1 + $0x4b8] sm:$0xff] }
  0x57   :  { %v5059_v4 = vpack.c.bf16 %v197_v62, %v184_v58  ;;  %v301_v48 = vld [vmem:[%s12495_s1 + $0x7f8] sm:$0xff]  ;;  %v58_v58 = vld [vmem:[%s12495_s1 + $0x60] sm:$0xff] }
  0x59   :  { %4775 = vmatpush1.msk.msra.mxu0 %vm392_vm1, %v310_v63  ;;  %4778 = vmatpush1.msk.msra.mxu1 %vm392_vm1, %v312_v3  ;;  %v187_v63 = vld [vmem:[%s12495_s1 + $0x468] sm:$0xff]  ;;  %v5095_v3 = vpack.c.bf16 %v173_v60, %v160_v59  ;;  %v314_v60 = vld [vmem:[%s12495_s1 + $0x860] sm:$0xf] }
  0x5a   :  { %639 = vmatmul.mubr.f32.vlgmr.msra.gmra.mrb[2].mxu0 %v7090_v7  ;;  %5038 = vmatprep.subr.bf16.mxu0 %v5037_v2  ;;  %v224_v2 = vld [vmem:[%s12495_s1 + $0x590] sm:$0xff]  ;;  %v5097_v5 = vpack.c.bf16 %v200_v0, %v187_v63  ;;  %v71_v59 = vld [vmem:[%s12495_s1 + $0xc8] sm:$0xff]  ;;  %v97_v0 = vld [vmem:[%s12495_s1 + $0x198] sm:$0xff] }
  0x5b   :  { %5040 = vmatpush1.bf16.msra.mxu0 %v5039_v6  ;;  %710 = vmatmul.mubr.f32.vlgmr.msra.gmra.mrb[2].mxu1 %v7090_v7  ;;  %v210_v6 = vld [vmem:[%s12495_s1 + $0x520] sm:$0xff]  ;;  %v5061_v10 = vpack.c.bf16 %v224_v2, %v211_v1  ;;  %v5118_v62 = vpack.c.bf16 %v71_v59, %v58_v58  ;;  %v84_v63 = vld [vmem:[%s12495_s1 + $0x130] sm:$0xff]  ;;  %v6718_v2 = vmov 0.0|0.0  }
  0x5c   :  { %5042 = vmatprep.subr.bf16.mxu0 %v5041_v11  ;;  %5078 = vmatprep.subr.bf16.mxu1 %v5077_v15  ;;  %v223_v11 = vld [vmem:[%s12495_s1 + $0x588] sm:$0xff]  ;;  %v250_v15 = vld [vmem:[%s12495_s1 + $0x660] sm:$0xff]  ;;  %v316_v1 = vld [vmem:[%s12495_s1 + $0x870] sm:$0xf] }
  0x5d   :  { %4782 = vmatprep.mubr.msk.f32.mxu0 %vm388_vm0, %v7001_v34  ;;  %5080 = vmatpush1.bf16.msra.mxu1 %v5079_v18  ;;  %v5063_v17 = vpack.c.bf16 %v223_v11, %v210_v6  ;;  %v5101_v18 = vpack.c.bf16 %v226_v13, %v213_v12  ;;  %v5065_v22 = vpack.c.bf16 %v250_v15, %v237_v14  ;;  %v175_v11 = vld [vmem:[%s12495_s1 + $0x408] sm:$0xff]  ;;  %v188_v13 = vld [vmem:[%s12495_s1 + $0x470] sm:$0xff]  ;;  %v201_v14 = vld [vmem:[%s12495_s1 + $0x4d8] sm:$0xff] }
  0x5e   :  { %4785 = vmatprep.mubr.msk.f32.mxu1 %vm388_vm0, %v7001_v34  ;;  %5082 = vmatprep.subr.bf16.mxu1 %v5081_v20  ;;  %v212_v20 = vld [vmem:[%s12495_s1 + $0x530] sm:$0xff]  ;;  %v5133_v15 = vpack.c.bf16 %v201_v14, %v188_v13  ;;  %v1098_v13 = vld [vmem:[%s12498_s3 + $0x8] sm:$0xff] }
  0x5f   :  { %5044 = vmatpush1.bf16.msra.mxu0 %v5043_v19  ;;  %v236_v19 = vld [vmem:[%s12495_s1 + $0x5f0] sm:$0xff]  ;;  %v5103_v28 = vpack.c.bf16 %v225_v21, %v212_v20  ;;  %v253_v20 = vld [vmem:[%s12495_s1 + $0x678] sm:$0xff]  ;;  %v1102_v14 = vld [vmem:[%s12498_s3 + $0x28] sm:$0xff] }
  0x60   :  { %5046 = vmatprep.subr.bf16.mxu0 %v5045_v24  ;;  %v239_v24 = vld [vmem:[%s12495_s1 + $0x608] sm:$0xff]  ;;  %v5067_v29 = vpack.c.bf16 %v249_v23, %v236_v19  ;;  %v240_v19 = vld [vmem:[%s12495_s1 + $0x610] sm:$0xff] }
  0x61   :  { %5084 = vmatpush1.bf16.msra.mxu1 %v5083_v30  ;;  %v5105_v30 = vpack.c.bf16 %v252_v25, %v239_v24  ;;  %v5139_v21 = vpack.c.bf16 %v253_v20, %v240_v19  ;;  %v279_v23 = vld [vmem:[%s12495_s1 + $0x748] sm:$0xff]  ;;  %v292_v25 = vld [vmem:[%s12495_s1 + $0x7b0] sm:$0xff] }
  0x62   :  { %5086 = vmatprep.subr.bf16.mxu1 %v5085_v32  ;;  %v238_v32 = vld [vmem:[%s12495_s1 + $0x600] sm:$0xff]  ;;  %v5145_v27 = vpack.c.bf16 %v305_v26, %v292_v25  ;;  %v1106_v19 = vld [vmem:[%s12498_s3 + $0x48] sm:$0xff] }
  0x63   :  { %5048 = vmatpush1.bf16.msra.mxu0 %v5047_v31  ;;  %v262_v31 = vld [vmem:[%s12495_s1 + $0x6c0] sm:$0xff]  ;;  %v5107_v41 = vpack.c.bf16 %v251_v33, %v238_v32  ;;  %v1110_v20 = vld [vmem:[%s12498_s3 + $0x68] sm:$0xff] }
  0x64   :  { %5050 = vmatprep.subr.bf16.mxu0 %v5049_v37  ;;  %v265_v37 = vld [vmem:[%s12495_s1 + $0x6d8] sm:$0xff]  ;;  %v5071_v42 = vpack.c.bf16 %v275_v36, %v262_v31  ;;  %v319_v36 = vld [vmem:[%s12497_s2] sm:$0xff]  ;;  %v1114_v25 = vld [vmem:[%s12498_s3 + $0x88] sm:$0xff] }
  0x65   :  { %5088 = vmatpush1.bf16.msra.mxu1 %v5087_v43  ;;  %v5109_v43 = vpack.c.bf16 %v278_v38, %v265_v37  ;;  %v1118_v26 = vld [vmem:[%s12498_s3 + $0xa8] sm:$0xff] }
  0x66   :  { %5090 = vmatprep.subr.bf16.mxu1 %v5089_v45  ;;  %v264_v45 = vld [vmem:[%s12495_s1 + $0x6d0] sm:$0xff] }
  0x67   :  { %5052 = vmatpush1.bf16.msra.mxu0 %v5051_v44  ;;  %v288_v44 = vld [vmem:[%s12495_s1 + $0x790] sm:$0xff]  ;;  %v5111_v51 = vpack.c.bf16 %v277_v46, %v264_v45 }
  0x68   :  { %5054 = vmatprep.subr.bf16.mxu0 %v5053_v49  ;;  %v291_v49 = vld [vmem:[%s12495_s1 + $0x7a8] sm:$0xff]  ;;  %v5075_v52 = vpack.c.bf16 %v301_v48, %v288_v44 }
  0x69   :  { %5092 = vmatpush1.bf16.msra.mxu1 %v5091_v55  ;;  %v5113_v53 = vpack.c.bf16 %v304_v50, %v291_v49  ;;  %v303_v55 = vld [vmem:[%s12495_s1 + $0x808] sm:$0xff] }
  0x6a   :  { %5094 = vmatprep.subr.bf16.mxu1 %v5093_v57  ;;  %v5115_v57 = vpack.c.bf16 %v303_v55, %v290_v54 }
  0x6b   :  { %5056 = vmatpush1.bf16.msra.mxu0 %v5055_v56  ;;  %v315_v56 = vld [vmem:[%s12495_s1 + $0x868] sm:$0xf] }
  0x6c   :  { %5058 = vmatprep.subr.bf16.mxu0 %v5057_v61  ;;  %v317_v61 = vld [vmem:[%s12495_s1 + $0x878] sm:$0xf] }
  0x6d   :  { %5096 = vmatpush1.bf16.msra.mxu1 %v5095_v3  ;;  %v5121_v3 = vpack.c.bf16 %v97_v0, %v84_v63 }
  0x6e   :  { %5098 = vmatprep.subr.bf16.mxu1 %v5097_v5  ;;  %v123_v5 = vld [vmem:[%s12495_s1 + $0x268] sm:$0xff] }
  0x6f   :  { %5060 = vmatpush1.bf16.msra.mxu0 %v5059_v4  ;;  %v110_v4 = vld [vmem:[%s12495_s1 + $0x200] sm:$0xff] }
  0x70   :  { %5062 = vmatprep.subr.bf16.mxu0 %v5061_v10  ;;  %v5124_v6 = vpack.c.bf16 %v123_v5, %v110_v4  ;;  %v162_v10 = vld [vmem:[%s12495_s1 + $0x3a0] sm:$0xff] }
  0x71   :  { %5100 = vmatpush1.bf16.msra.mxu1 %v5099_v16  ;;  %v5130_v12 = vpack.c.bf16 %v175_v11, %v162_v10  ;;  %v214_v16 = vld [vmem:[%s12495_s1 + $0x540] sm:$0xff] }
  0x72   :  { %5102 = vmatprep.subr.bf16.mxu1 %v5101_v18 }
  0x73   :  { %5064 = vmatpush1.bf16.msra.mxu0 %v5063_v17  ;;  %v227_v17 = vld [vmem:[%s12495_s1 + $0x5a8] sm:$0xff] }
  0x74   :  { %5066 = vmatprep.subr.bf16.mxu0 %v5065_v22  ;;  %v5136_v18 = vpack.c.bf16 %v227_v17, %v214_v16  ;;  %v266_v22 = vld [vmem:[%s12495_s1 + $0x6e0] sm:$0xff]  ;;  %v5147_v17 = vpack.c.bf16 %v1102_v14, %v1098_v13 }
  0x75   :  { %5104 = vmatpush1.bf16.msra.mxu1 %v5103_v28  ;;  %v5142_v24 = vpack.c.bf16 %v279_v23, %v266_v22  ;;  %v6719_v28 = vmov 0.0   ;;  %v5151_v22 = vpack.c.bf16 %v1110_v20, %v1106_v19  ;;  %v1105_v23 = vld [vmem:[%s12498_s3 + $0x40] sm:$0xff] }
  0x76   :  { %5106 = vmatprep.subr.bf16.mxu1 %v5105_v30  ;;  %v323_v30 = vlaneseq }
  0x77   :  { %5068 = vmatpush1.bf16.msra.mxu0 %v5067_v29  ;;  %v318_v29 = vld [vmem:[%s12495_s1 + $0x880] sm:$0xf] }
  0x78   :  { %5070 = vmatprep.subr.bf16.mxu0 %v5069_v35  ;;  %v7668_v31 = vshrl.u32 %v323_v30, 7  ;;  %v1113_v30 = vld [vmem:[%s12498_s3 + $0x80] sm:$0xff] }
  0x79   :  { %5108 = vmatpush1.bf16.msra.mxu1 %v5107_v41 }
  0x7a   :  { %5110 = vmatprep.subr.bf16.mxu1 %v5109_v43  ;;  %v7671_v32 = vsub.s32 0, %v7668_v31  ;;  %v7674_v33 = vsub.s32 2, %v7668_v31  ;;  %v7677_v35 = vsub.s32 1, %v7668_v31  ;;  %v7683_v37 = vsub.s32 3, %v7668_v31 }
  0x7b   :  { %5072 = vmatpush1.bf16.msra.mxu0 %v5071_v42  ;;  %v7712_v55 = vsub.s32 4, %v7668_v31  ;;  %v353_v58 = vsub.s32 7, %v7668_v31 }
  0x7c   :  { %5074 = vmatprep.subr.bf16.mxu0 %v5073_v47  ;;  %v334_v38 = vrot.slane %v319_v36, %v7674_v33  ;;  %v330_v39 = vrot.slane %v319_v36, %v7677_v35  ;;  %v338_v40 = vrot.slane %v319_v36, %v7683_v37 }
  0x7d   :  { %5112 = vmatpush1.bf16.msra.mxu1 %v5111_v51  ;;  %v342_v59 = vrot.slane %v319_v36, %v7712_v55  ;;  %v354_v63 = vrot.slane %v319_v36, %v353_v58  ;;  %v1129_v58 = vld [vmem:[%s12498_s3 + $0x100] sm:$0xff] }
  0x7e   :  { %5114 = vmatprep.subr.bf16.mxu1 %v5113_v53 }
  0x7f   :  { %5076 = vmatpush1.bf16.msra.mxu0 %v5075_v52 }
  0x80   :  { %4780 = vmatprep.subr.msk.mxu0 %vm392_vm1, %v315_v56  ;;  %v345_v56 = vsub.s32 5, %v7668_v31 }
  0x81   :  { %5116 = vmatpush1.bf16.msra.mxu1 %v5115_v57  ;;  %v349_v57 = vsub.s32 6, %v7668_v31 }
  0x82   :  { %4783 = vmatprep.subr.msk.mxu1 %vm392_vm1, %v317_v61 }
  0x83   :  { %4781 = vmatpush1.msk.msra.mxu0 %vm392_vm1, %v314_v60  ;;  %v346_v60 = vrot.slane %v319_v36, %v345_v56  ;;  %v350_v61 = vrot.slane %v319_v36, %v349_v57 }
  0x84   :  { %781 = vmatmul.mubr.f32.vlgmr.msra.gmra.mrb[4].mxu0 %v7090_v7  ;;  %5117 = vmatprep.subr.bf16.mxu0 %v6718_v2 }
  0x85   :  { %5119 = vmatpush1.bf16.msra.mxu0 %v5118_v62  ;;  %4787 = vmatprep.mubr.msk.f32.mxu0 %vm388_vm0, %v7001_v34  ;;  %v136_v34 = vld [vmem:[%s12495_s1 + $0x2d0] sm:$0xff]  ;;  %s6720_s1 = smov 127  }
  0x86   :  { %4784 = vmatpush1.msk.msra.mxu1 %vm392_vm1, %v316_v1  ;;  %5120 = vmatprep.subr.bf16.mxu0 %v6718_v2  ;;  %v5127_v9 = vpack.c.bf16 %v149_v8, %v136_v34 }
  0x87   :  { %852 = vmatmul.mubr.f32.vlgmr.msra.gmra.mrb[4].mxu1 %v7090_v7 }
  0x89   :  { %5122 = vmatpush1.bf16.msra.mxu0 %v5121_v3 }
  0x8a   :  { %5123 = vmatprep.subr.bf16.mxu0 %v6718_v2 }
  0x8d   :  { %5125 = vmatpush1.bf16.msra.mxu0 %v5124_v6 }
  0x8e   :  { %5126 = vmatprep.subr.bf16.mxu0 %v6718_v2 }
  0x91   :  { %5128 = vmatpush1.bf16.msra.mxu0 %v5127_v9 }
  0x92   :  { %5129 = vmatprep.subr.bf16.mxu0 %v6718_v2 }
  0x95   :  { %5131 = vmatpush1.bf16.msra.mxu0 %v5130_v12 }
  0x96   :  { %5132 = vmatprep.subr.bf16.mxu0 %v6718_v2 }
  0x99   :  { %5134 = vmatpush1.bf16.msra.mxu0 %v5133_v15  ;;  %v1097_v15 = vld [vmem:[%s12498_s3] sm:$0xff] }
  0x9a   :  { %5135 = vmatprep.subr.bf16.mxu0 %v6718_v2 }
  0x9d   :  { %5137 = vmatpush1.bf16.msra.mxu0 %v5136_v18  ;;  %v1101_v18 = vld [vmem:[%s12498_s3 + $0x20] sm:$0xff] }
  0x9e   :  { %5138 = vmatprep.subr.bf16.mxu0 %v6718_v2 }
  0xa1   :  { %5140 = vmatpush1.bf16.msra.mxu0 %v5139_v21  ;;  %v5149_v21 = vpack.c.bf16 %v1101_v18, %v1097_v15  ;;  %v1150_v18 = vld [vmem:[%s12498_s3 + $0x1a8] sm:$0xff] }
  0xa2   :  { %5141 = vmatprep.subr.bf16.mxu0 %v6718_v2 }
  0xa5   :  { %5143 = vmatpush1.bf16.msra.mxu0 %v5142_v24  ;;  %v1109_v24 = vld [vmem:[%s12498_s3 + $0x60] sm:$0xff] }
  0xa6   :  { %5144 = vmatprep.subr.bf16.mxu0 %v6718_v2 }
  0xa9   :  { %5146 = vmatpush1.bf16.msra.mxu0 %v5145_v27  ;;  %v5153_v27 = vpack.c.bf16 %v1109_v24, %v1105_v23  ;;  %v1145_v23 = vld [vmem:[%s12498_s3 + $0x180] sm:$0xff] }
  0xaa   :  { %898 = vmatprep.subr.mxu0 %v6719_v28  ;;  %v1149_v24 = vld [vmem:[%s12498_s3 + $0x1a0] sm:$0xff] }
  0xad   :  { %4786 = vmatpush1.msk.msra.mxu0 %vm392_vm1, %v318_v29  ;;  %v5155_v29 = vpack.c.bf16 %v1118_v26, %v1114_v25  ;;  %v5173_v26 = vpack.c.bf16 %v1149_v24, %v1145_v23  ;;  %v1178_v24 = vld [vmem:[%s12498_s3 + $0x288] sm:$0xff] }
  0xae   :  { %923 = vmatmul.mubr.f32.vlgmr.msra.gmra.mrb[6].mxu0 %v7090_v7  ;;  %v326_v7 = vrot.slane %v319_v36, %v7671_v32  ;;  %5148 = vmatprep.subr.bf16.mxu0 %v5147_v17  ;;  %v1117_v36 = vld [vmem:[%s12498_s3 + $0xa0] sm:$0xff]  ;;  %v1146_v17 = vld [vmem:[%s12498_s3 + $0x188] sm:$0xff] }
  0xaf   :  { %5150 = vmatpush1.bf16.msra.mxu0 %v5149_v21 }
  0xb0   :  { %5152 = vmatprep.subr.bf16.mxu0 %v5151_v22  ;;  %v5171_v22 = vpack.c.bf16 %v1150_v18, %v1146_v17  ;;  %v1230_v18 = vld [vmem:[%s12498_s3 + $0x428] sm:$0xff] }
  0xb3   :  { %5154 = vmatpush1.bf16.msra.mxu0 %v5153_v27 }
  0xb4   :  { %5156 = vmatprep.subr.bf16.mxu0 %v5155_v29 }
 0x102   :  { %v498_v41 = vpop.f32.mrb[0].mxu0  ;;  %v569_v42 = vpop.f32.mrb[0].mxu1 }
 0x103   :  { %v500_v43 = vpop.f32.mrb[1].mxu0  ;;  %v7689_v44 = vadd.f32 %v498_v41, %v326_v7  ;;  %v7691_v45 = vadd.f32 %v569_v42, %v334_v38  ;;  %v571_v47 = vpop.f32.mrb[1].mxu1  ;;  %v1122_v7 = vld [vmem:[%s12498_s3 + $0xc8] sm:$0xff]  ;;  %v1121_v41 = vld [vmem:[%s12498_s3 + $0xc0] sm:$0xff] }
 0x104   :  { %v7693_v46 = vadd.f32 %v500_v43, %v330_v39  ;;  %v7695_v48 = vadd.f32 %v571_v47, %v338_v40  ;;  %v1126_v38 = vld [vmem:[%s12498_s3 + $0xe8] sm:$0xff]  ;;  %v5157_v39 = vpack.c.bf16 %v1117_v36, %v1113_v30  ;;  %v1125_v42 = vld [vmem:[%s12498_s3 + $0xe0] sm:$0xff] }
 0x105   :  { %v930_v49 = vmax.f32 %v7691_v45, 0.0  ;;  %v928_v51 = vmax.f32 %v7689_v44, 0.0  ;;  %v5159_v40 = vpack.c.bf16 %v1126_v38, %v1122_v7  ;;  %v5161_v43 = vpack.c.bf16 %v1125_v42, %v1121_v41  ;;  %v1130_v47 = vld [vmem:[%s12498_s3 + $0x108] sm:$0xff]  ;;  %v1153_v42 = vld [vmem:[%s12498_s3 + $0x1c0] sm:$0xff] }
 0x106   :  { %v929_v50 = vmax.f32 %v7693_v46, 0.0  ;;  %v931_v52 = vmax.f32 %v7695_v48, 0.0  ;;  %5158 = vmatpush1.bf16.msra.mxu0 %v5157_v39  ;;  %v1154_v38 = vld [vmem:[%s12498_s3 + $0x1c8] sm:$0xff]  ;;  %v1289_v46 = vld [vmem:[%s12498_s3 + $0x600] sm:$0xff] }
 0x107   :  { %5160 = vmatprep.subr.bf16.mxu0 %v5159_v40  ;;  %v1158_v39 = vld [vmem:[%s12498_s3 + $0x1e8] sm:$0xff]  ;;  %v1293_v45 = vld [vmem:[%s12498_s3 + $0x620] sm:$0xff] }
 0x108   :  { %v6638_v53 = vpack.i.bf16 %v930_v49, %v929_v50  ;;  %v6643_v54 = vpack.i.bf16 %v928_v51, %v931_v52  ;;  %v5175_v41 = vpack.c.bf16 %v1158_v39, %v1154_v38  ;;  %v1305_v44 = vld [vmem:[%s12498_s3 + $0x680] sm:$0xff] }
 0x10a   :  { %6639 = vrot.lane.b32.xlu0 %v6638_v53, %s6720_s1  ;;  %5162 = vmatpush1.bf16.msra.mxu0 %v5161_v43  ;;  %v1134_v53 = vld [vmem:[%s12498_s3 + $0x128] sm:$0xff]  ;;  %v1157_v43 = vld [vmem:[%s12498_s3 + $0x1e0] sm:$0xff] }
 0x10e   :  { %6644 = vrot.lane.b32.xlu0 %v6643_v54, %s6720_s1  ;;  %v5163_v54 = vpack.c.bf16 %v1134_v53, %v1130_v47 }
 0x110   :  { %5164 = vmatprep.subr.bf16.mxu0 %v5163_v54  ;;  %v5177_v54 = vpack.c.bf16 %v1157_v43, %v1153_v42  ;;  %v1237_v42 = vld [vmem:[%s12498_s3 + $0x460] sm:$0xff] }
 0x12d   :  { %v640_v62 = vpop.f32.mrb[2].mxu0 }
 0x12e   :  { %v7722_v0 = vadd.f32 %v640_v62, %v342_v59  ;;  %v642_v1 = vpop.f32.mrb[3].mxu0  ;;  %v711_v4 = vpop.f32.mrb[2].mxu1  ;;  %v1133_v59 = vld [vmem:[%s12498_s3 + $0x120] sm:$0xff]  ;;  %v1138_v62 = vld [vmem:[%s12498_s3 + $0x148] sm:$0xff] }
 0x12f   :  { %v7724_v3 = vadd.f32 %v642_v1, %v346_v60  ;;  %v7727_v6 = vadd.f32 %v711_v4, %v350_v61  ;;  %v713_v34 = vpop.f32.mrb[3].mxu1  ;;  %v7807_v60 = vld [vmem:[%s12497_s2 + $0x8] sm:$0x1f]  ;;  %v5165_v61 = vpack.c.bf16 %v1133_v59, %v1129_v58 }
 0x130   :  { %v932_v5 = vmax.f32 %v7722_v0, 0.0  ;;  %v7730_v9 = vadd.f32 %v713_v34, %v354_v63  ;;  %v1142_v63 = vld [vmem:[%s12498_s3 + $0x168] sm:$0xff]  ;;  %v358_v1 = vrot.slane %v7807_v60, %v7671_v32  ;;  %v1137_v34 = vld [vmem:[%s12498_s3 + $0x140] sm:$0xff]  ;;  %v362_v13 = vrot.slane %v7807_v60, %v7677_v35 }
 0x131   :  { %v933_v8 = vmax.f32 %v7724_v3, 0.0  ;;  %v934_v10 = vmax.f32 %v7727_v6, 0.0  ;;  %5166 = vmatpush1.bf16.msra.mxu0 %v5165_v61  ;;  %v5167_v4 = vpack.c.bf16 %v1142_v63, %v1138_v62  ;;  %v370_v21 = vrot.slane %v7807_v60, %v7683_v37  ;;  %v1162_v58 = vld [vmem:[%s12498_s3 + $0x208] sm:$0xff]  ;;  %v1161_v61 = vld [vmem:[%s12498_s3 + $0x200] sm:$0xff] }
 0x132   :  { %v935_v12 = vmax.f32 %v7730_v9, 0.0  ;;  %v1166_v59 = vld [vmem:[%s12498_s3 + $0x228] sm:$0xff] }
 0x133   :  { %v6653_v11 = vpack.i.bf16 %v933_v8, %v932_v5  ;;  %5168 = vmatprep.subr.bf16.mxu0 %v5167_v4  ;;  %v5179_v63 = vpack.c.bf16 %v1166_v59, %v1162_v58  ;;  %v1170_v4 = vld [vmem:[%s12498_s3 + $0x248] sm:$0xff] }
 0x134   :  { %v6663_v16 = vpack.i.bf16 %v935_v12, %v934_v10  ;;  %v1186_v58 = vld [vmem:[%s12498_s3 + $0x2c8] sm:$0xff] }
 0x135   :  { %6654 = vrot.lane.b32.xlu0 %v6653_v11, %s6720_s1  ;;  %v1141_v11 = vld [vmem:[%s12498_s3 + $0x160] sm:$0xff] }
 0x136   :  { %v5169_v14 = vpack.c.bf16 %v1141_v11, %v1137_v34  ;;  %v1174_v34 = vld [vmem:[%s12498_s3 + $0x268] sm:$0xff] }
 0x137   :  { %v5183_v17 = vpack.c.bf16 %v1174_v34, %v1170_v4  ;;  %v1241_v34 = vld [vmem:[%s12498_s3 + $0x480] sm:$0xff] }
 0x138   :  { %5170 = vmatpush1.bf16.msra.mxu0 %v5169_v14  ;;  %v1173_v14 = vld [vmem:[%s12498_s3 + $0x260] sm:$0xff] }
 0x139   :  { %6664 = vrot.lane.b32.xlu0 %v6663_v16, %s6720_s1  ;;  %v366_v16 = vrot.slane %v7807_v60, %v7674_v33  ;;  %5172 = vmatprep.subr.bf16.mxu0 %v5171_v22 }
 0x13c   :  { %5174 = vmatpush1.bf16.msra.mxu0 %v5173_v26  ;;  %v1182_v26 = vld [vmem:[%s12498_s3 + $0x2a8] sm:$0xff] }
 0x13d   :  { %5176 = vmatprep.subr.bf16.mxu0 %v5175_v41  ;;  %v1233_v41 = vld [vmem:[%s12498_s3 + $0x440] sm:$0xff]  ;;  %v5187_v43 = vpack.c.bf16 %v1182_v26, %v1178_v24 }
 0x13e   :  { %v5217_v59 = vpack.c.bf16 %v1237_v42, %v1233_v41  ;;  %v1249_v24 = vld [vmem:[%s12498_s3 + $0x4c0] sm:$0xff] }
 0x13f   :  { %v1253_v26 = vld [vmem:[%s12498_s3 + $0x4e0] sm:$0xff] }
 0x140   :  { %5178 = vmatpush1.bf16.msra.mxu0 %v5177_v54  ;;  %v1181_v54 = vld [vmem:[%s12498_s3 + $0x2a0] sm:$0xff] }
 0x141   :  { %5180 = vmatprep.subr.bf16.mxu0 %v5179_v63  ;;  %v1242_v63 = vld [vmem:[%s12498_s3 + $0x488] sm:$0xff]  ;;  %v1193_v41 = vld [vmem:[%s12498_s3 + $0x300] sm:$0xff] }
 0x142   :  { %v1197_v42 = vld [vmem:[%s12498_s3 + $0x320] sm:$0xff] }
 0x157   :  { %v782_v15 = vpop.f32.mrb[4].mxu0 }
 0x158   :  { %v7833_v19 = vadd.f32 %v782_v15, %v358_v1  ;;  %v784_v20 = vpop.f32.mrb[5].mxu0  ;;  %v1165_v1 = vld [vmem:[%s12498_s3 + $0x220] sm:$0xff]  ;;  %v1226_v15 = vld [vmem:[%s12498_s3 + $0x408] sm:$0xff] }
 0x159   :  { %v7843_v25 = vadd.f32 %v784_v20, %v362_v13  ;;  %v5181_v11 = vpack.c.bf16 %v1165_v1, %v1161_v61  ;;  %v1169_v13 = vld [vmem:[%s12498_s3 + $0x240] sm:$0xff]  ;;  %v5211_v22 = vpack.c.bf16 %v1230_v18, %v1226_v15  ;;  %v1190_v61 = vld [vmem:[%s12498_s3 + $0x2e8] sm:$0xff] }
 0x15a   :  { %v936_v27 = vmax.f32 %v7833_v19, 0.0  ;;  %v853_v29 = vpop.f32.mrb[4].mxu1  ;;  %v1225_v20 = vld [vmem:[%s12498_s3 + $0x400] sm:$0xff]  ;;  %v5185_v38 = vpack.c.bf16 %v1173_v14, %v1169_v13  ;;  %v1246_v1 = vld [vmem:[%s12498_s3 + $0x4a8] sm:$0xff]  ;;  %v5191_v15 = vpack.c.bf16 %v1190_v61, %v1186_v58 }
 0x15b   :  { %v937_v30 = vmax.f32 %v7843_v25, 0.0  ;;  %v7847_v36 = vadd.f32 %v853_v29, %v366_v16  ;;  %v855_v7 = vpop.f32.mrb[5].mxu1  ;;  %v1234_v29 = vld [vmem:[%s12498_s3 + $0x448] sm:$0xff]  ;;  %5182 = vmatpush1.bf16.msra.mxu0 %v5181_v11  ;;  %5212 = vmatprep.subr.bf16.mxu1 %v5211_v22  ;;  %v5219_v4 = vpack.c.bf16 %v1246_v1, %v1242_v63  ;;  %v1245_v11 = vld [vmem:[%s12498_s3 + $0x4a0] sm:$0xff]  ;;  %v5197_v63 = vpack.c.bf16 %v1197_v42, %v1193_v41 }
 0x15c   :  { %v7855_v40 = vadd.f32 %v855_v7, %v370_v21  ;;  %v1229_v21 = vld [vmem:[%s12498_s3 + $0x420] sm:$0xff]  ;;  %v1238_v7 = vld [vmem:[%s12498_s3 + $0x468] sm:$0xff]  ;;  %5184 = vmatprep.subr.bf16.mxu0 %v5183_v17 }
 0x15d   :  { %v6673_v47 = vpack.i.bf16 %v937_v30, %v936_v27  ;;  %v938_v53 = vmax.f32 %v7847_v36, 0.0  ;;  %v5213_v23 = vpack.c.bf16 %v1229_v21, %v1225_v20  ;;  %v5215_v39 = vpack.c.bf16 %v1238_v7, %v1234_v29  ;;  %v1250_v14 = vld [vmem:[%s12498_s3 + $0x4c8] sm:$0xff]  ;;  %v1189_v17 = vld [vmem:[%s12498_s3 + $0x2e0] sm:$0xff] }
 0x15e   :  { %v939_v62 = vmax.f32 %v7855_v40, 0.0  ;;  %v1254_v18 = vld [vmem:[%s12498_s3 + $0x4e8] sm:$0xff]  ;;  %v5221_v20 = vpack.c.bf16 %v1245_v11, %v1241_v34  ;;  %v1261_v61 = vld [vmem:[%s12498_s3 + $0x520] sm:$0xff]  ;;  %v1103_v40 = vld [vmem:[%s12498_s3 + $0x30] sm:$0xff] }
 0x15f   :  { %6674 = vrot.lane.b32.xlu0 %v6673_v47, %s6720_s1  ;;  %v1177_v47 = vld [vmem:[%s12498_s3 + $0x280] sm:$0xff]  ;;  %5214 = vmatpush1.bf16.msra.mxu1 %v5213_v23  ;;  %v1194_v21 = vld [vmem:[%s12498_s3 + $0x308] sm:$0xff]  ;;  %v5223_v23 = vpack.c.bf16 %v1254_v18, %v1250_v14 }
 0x160   :  { %v6683_v16 = vpack.i.bf16 %v939_v62, %v938_v53  ;;  %5216 = vmatprep.subr.bf16.mxu1 %v5215_v39  ;;  %5186 = vmatpush1.bf16.msra.mxu0 %v5185_v38  ;;  %v5189_v13 = vpack.c.bf16 %v1181_v54, %v1177_v47  ;;  %v1198_v22 = vld [vmem:[%s12498_s3 + $0x328] sm:$0xff]  ;;  %v1205_v34 = vld [vmem:[%s12498_s3 + $0x360] sm:$0xff] }
 0x161   :  { %5188 = vmatprep.subr.bf16.mxu0 %v5187_v43  ;;  %v1258_v7 = vld [vmem:[%s12498_s3 + $0x508] sm:$0xff]  ;;  %v5195_v39 = vpack.c.bf16 %v1198_v22, %v1194_v21  ;;  %v5225_v43 = vpack.c.bf16 %v1253_v26, %v1249_v24  ;;  %v1213_v18 = vld [vmem:[%s12498_s3 + $0x3a0] sm:$0xff] }
 0x162   :  { %v1262_v38 = vld [vmem:[%s12498_s3 + $0x528] sm:$0xff]  ;;  %v1269_v24 = vld [vmem:[%s12498_s3 + $0x560] sm:$0xff] }
 0x163   :  { %6684 = vrot.lane.b32.xlu0 %v6683_v16, %s6720_s1  ;;  %v1185_v16 = vld [vmem:[%s12498_s3 + $0x2c0] sm:$0xff]  ;;  %5218 = vmatpush1.bf16.msra.mxu1 %v5217_v59  ;;  %v1202_v47 = vld [vmem:[%s12498_s3 + $0x348] sm:$0xff]  ;;  %v5227_v58 = vpack.c.bf16 %v1262_v38, %v1258_v7 }
 0x164   :  { %5220 = vmatprep.subr.bf16.mxu1 %v5219_v4  ;;  %5190 = vmatpush1.bf16.msra.mxu0 %v5189_v13  ;;  %v5193_v29 = vpack.c.bf16 %v1189_v17, %v1185_v16  ;;  %v1206_v54 = vld [vmem:[%s12498_s3 + $0x368] sm:$0xff]  ;;  %v1257_v59 = vld [vmem:[%s12498_s3 + $0x500] sm:$0xff] }
 0x165   :  { %5192 = vmatprep.subr.bf16.mxu0 %v5191_v15  ;;  %v5199_v1 = vpack.c.bf16 %v1206_v54, %v1202_v47  ;;  %v1201_v4 = vld [vmem:[%s12498_s3 + $0x340] sm:$0xff]  ;;  %v5229_v11 = vpack.c.bf16 %v1261_v61, %v1257_v59  ;;  %v1210_v14 = vld [vmem:[%s12498_s3 + $0x388] sm:$0xff] }
 0x166   :  { %v5201_v13 = vpack.c.bf16 %v1205_v34, %v1201_v4  ;;  %v1214_v15 = vld [vmem:[%s12498_s3 + $0x3a8] sm:$0xff]  ;;  %v1209_v17 = vld [vmem:[%s12498_s3 + $0x380] sm:$0xff]  ;;  %v374_v4 = vrot.slane %v7807_v60, %v7712_v55 }
 0x167   :  { %5222 = vmatpush1.bf16.msra.mxu1 %v5221_v20  ;;  %v5203_v16 = vpack.c.bf16 %v1214_v15, %v1210_v14  ;;  %v1266_v20 = vld [vmem:[%s12498_s3 + $0x548] sm:$0xff]  ;;  %v5205_v21 = vpack.c.bf16 %v1213_v18, %v1209_v17  ;;  %v1217_v42 = vld [vmem:[%s12498_s3 + $0x3c0] sm:$0xff]  ;;  %v1104_v14 = vld [vmem:[%s12498_s3 + $0x38] sm:$0xff] }
 0x168   :  { %5224 = vmatprep.subr.bf16.mxu1 %v5223_v23  ;;  %5194 = vmatpush1.bf16.msra.mxu0 %v5193_v29  ;;  %v1270_v22 = vld [vmem:[%s12498_s3 + $0x568] sm:$0xff]  ;;  %v1265_v23 = vld [vmem:[%s12498_s3 + $0x540] sm:$0xff] }
 0x169   :  { %5196 = vmatprep.subr.bf16.mxu0 %v5195_v39  ;;  %v5231_v26 = vpack.c.bf16 %v1270_v22, %v1266_v20  ;;  %v5233_v29 = vpack.c.bf16 %v1269_v24, %v1265_v23  ;;  %v1218_v7 = vld [vmem:[%s12498_s3 + $0x3c8] sm:$0xff]  ;;  %v1281_v23 = vld [vmem:[%s12498_s3 + $0x5c0] sm:$0xff] }
 0x16a   :  { %v1222_v38 = vld [vmem:[%s12498_s3 + $0x3e8] sm:$0xff]  ;;  %v1285_v24 = vld [vmem:[%s12498_s3 + $0x5e0] sm:$0xff] }
 0x16b   :  { %5226 = vmatpush1.bf16.msra.mxu1 %v5225_v43  ;;  %v5207_v41 = vpack.c.bf16 %v1222_v38, %v1218_v7  ;;  %v1221_v43 = vld [vmem:[%s12498_s3 + $0x3e0] sm:$0xff]  ;;  %v1274_v47 = vld [vmem:[%s12498_s3 + $0x588] sm:$0xff] }
 0x16c   :  { %5228 = vmatprep.subr.bf16.mxu1 %v5227_v58  ;;  %5198 = vmatpush1.bf16.msra.mxu0 %v5197_v63  ;;  %v5209_v59 = vpack.c.bf16 %v1221_v43, %v1217_v42  ;;  %v1278_v61 = vld [vmem:[%s12498_s3 + $0x5a8] sm:$0xff]  ;;  %v1273_v63 = vld [vmem:[%s12498_s3 + $0x580] sm:$0xff] }
 0x16d   :  { %5200 = vmatprep.subr.bf16.mxu0 %v5199_v1  ;;  %v1277_v1 = vld [vmem:[%s12498_s3 + $0x5a0] sm:$0xff]  ;;  %v5235_v34 = vpack.c.bf16 %v1278_v61, %v1274_v47  ;;  %v1282_v60 = vld [vmem:[%s12498_s3 + $0x5c8] sm:$0xff] }
 0x16e   :  { %v1286_v17 = vld [vmem:[%s12498_s3 + $0x5e8] sm:$0xff] }
 0x16f   :  { %5230 = vmatpush1.bf16.msra.mxu1 %v5229_v11  ;;  %v5237_v11 = vpack.c.bf16 %v1277_v1, %v1273_v63  ;;  %v5239_v22 = vpack.c.bf16 %v1286_v17, %v1282_v60  ;;  %v1290_v47 = vld [vmem:[%s12498_s3 + $0x608] sm:$0xff] }
 0x170   :  { %5202 = vmatpush1.bf16.msra.mxu0 %v5201_v13  ;;  %5232 = vmatprep.subr.bf16.mxu1 %v5231_v26  ;;  %v1100_v13 = vld [vmem:[%s12498_s3 + $0x18] sm:$0xff]  ;;  %v1298_v63 = vld [vmem:[%s12498_s3 + $0x648] sm:$0xff] }
 0x171   :  { %5204 = vmatprep.subr.bf16.mxu0 %v5203_v16  ;;  %v5549_v16 = vpack.c.bf16 %v1104_v14, %v1100_v13  ;;  %v1302_v1 = vld [vmem:[%s12498_s3 + $0x668] sm:$0xff] }
 0x172   :  { %v1306_v14 = vld [vmem:[%s12498_s3 + $0x688] sm:$0xff] }
 0x173   :  { %5234 = vmatpush1.bf16.msra.mxu1 %v5233_v29  ;;  %v5241_v29 = vpack.c.bf16 %v1285_v24, %v1281_v23  ;;  %v1313_v23 = vld [vmem:[%s12498_s3 + $0x6c0] sm:$0xff] }
 0x174   :  { %5206 = vmatpush1.bf16.msra.mxu0 %v5205_v21  ;;  %5236 = vmatprep.subr.bf16.mxu1 %v5235_v34  ;;  %v1297_v34 = vld [vmem:[%s12498_s3 + $0x640] sm:$0xff] }
 0x175   :  { %5208 = vmatprep.subr.bf16.mxu0 %v5207_v41  ;;  %v1317_v24 = vld [vmem:[%s12498_s3 + $0x6e0] sm:$0xff] }
 0x177   :  { %5238 = vmatpush1.bf16.msra.mxu1 %v5237_v11 }
 0x178   :  { %5210 = vmatpush1.bf16.msra.mxu0 %v5209_v59  ;;  %5240 = vmatprep.subr.bf16.mxu1 %v5239_v22  ;;  %v1294_v59 = vld [vmem:[%s12498_s3 + $0x628] sm:$0xff] }
 0x179   :  { %5550 = vmatprep.subr.bf16.mxu0 %v5549_v16  ;;  %v1310_v16 = vld [vmem:[%s12498_s3 + $0x6a8] sm:$0xff] }
 0x17a   :  { %v5251_v60 = vpack.c.bf16 %v1310_v16, %v1306_v14  ;;  %v1346_v16 = vld [vmem:[%s12498_s3 + $0x7c8] sm:$0xff] }
 0x17b   :  { %5242 = vmatpush1.bf16.msra.mxu1 %v5241_v29  ;;  %v5257_v29 = vpack.c.bf16 %v1317_v24, %v1313_v23 }
 0x17c   :  { %v6640_v39 = vpop.permute.xlu0 %6639 }
 0x17d   :  { %v6642_v54 = vunpack.i.h.bf16 %v6640_v39  ;;  %v6641_v58 = vunpack.i.l.bf16 %v6640_v39 }
 0x17f   :  { %v982_v21 = vsel %vm980_vm2, %v6641_v58, %v6642_v54 }
 0x180   :  { %v8063_v15 = vpop.permute.xlu0 %6644  ;;  %v8088_v42 = vmax.f32 %v929_v50, %v982_v21  ;;  %v5245_v50 = vpack.c.bf16 %v1293_v45, %v1289_v46  ;;  %v1318_v21 = vld [vmem:[%s12498_s3 + $0x6e8] sm:$0xff] }
 0x181   :  { %v924_v18 = vpop.f32.mrb[6].mxu0  ;;  %v6646_v20 = vunpack.i.l.bf16 %v8063_v15  ;;  %v6647_v38 = vunpack.i.h.bf16 %v8063_v15  ;;  %v1330_v46 = vld [vmem:[%s12498_s3 + $0x748] sm:$0xff] }
 0x182   :  { %v8079_v26 = vadd.f32 %v924_v18, %v374_v4  ;;  %v926_v7 = vpop.f32.mrb[7].mxu0  ;;  %v5247_v4 = vpack.c.bf16 %v1302_v1, %v1298_v63  ;;  %v1314_v18 = vld [vmem:[%s12498_s3 + $0x6c8] sm:$0xff] }
 0x183   :  { %v983_v39 = vsel %vm980_vm2, %v6642_v54, %v6646_v20  ;;  %v5243_v54 = vpack.c.bf16 %v1294_v59, %v1290_v47  ;;  %v981_v61 = vsel %vm980_vm2, %v6647_v38, %v6641_v58  ;;  %v1301_v58 = vld [vmem:[%s12498_s3 + $0x660] sm:$0xff]  ;;  %v5255_v22 = vpack.c.bf16 %v1318_v21, %v1314_v18  ;;  %v1322_v7 = vld [vmem:[%s12498_s3 + $0x708] sm:$0xff] }
 0x184   :  { %v940_v41 = vmax.f32 %v8079_v26, 0.0  ;;  %v8092_v43 = vmax.f32 %v930_v49, %v983_v39  ;;  %v8127_v11 = vmax.f32 %v928_v51, %v981_v61  ;;  %v5249_v13 = vpack.c.bf16 %v1301_v58, %v1297_v34  ;;  %v1309_v51 = vld [vmem:[%s12498_s3 + $0x6a0] sm:$0xff]  ;;  %v1326_v38 = vld [vmem:[%s12498_s3 + $0x728] sm:$0xff]  ;;  %v1099_v26 = vld [vmem:[%s12498_s3 + $0x10] sm:$0xff] }
 0x185   :  { %5244 = vmatprep.subr.bf16.mxu1 %v5243_v54  ;;  %v5253_v17 = vpack.c.bf16 %v1309_v51, %v1305_v44  ;;  %v5259_v39 = vpack.c.bf16 %v1326_v38, %v1322_v7  ;;  %v1321_v47 = vld [vmem:[%s12498_s3 + $0x700] sm:$0xff]  ;;  %v1334_v45 = vld [vmem:[%s12498_s3 + $0x768] sm:$0xff] }
 0x186   :  { %978 = vrot.lane.b32.xlu0 %v940_v41, %s6720_s1  ;;  %v6648_v49 = vpack.i.bf16 %v8092_v43, %v8088_v42  ;;  %5246 = vmatpush1.bf16.msra.mxu1 %v5245_v50  ;;  %v1325_v59 = vld [vmem:[%s12498_s3 + $0x720] sm:$0xff]  ;;  %v1338_v1 = vld [vmem:[%s12498_s3 + $0x788] sm:$0xff] }
 0x187   :  { %5248 = vmatprep.subr.bf16.mxu1 %v5247_v4  ;;  %v5261_v54 = vpack.c.bf16 %v1325_v59, %v1321_v47  ;;  %v1329_v50 = vld [vmem:[%s12498_s3 + $0x740] sm:$0xff]  ;;  %v1342_v4 = vld [vmem:[%s12498_s3 + $0x7a8] sm:$0xff] }
 0x188   :  { %6649 = vrot.lane.b32.xlu1 %v6648_v49, %s6721_s29  ;;  %v5263_v49 = vpack.c.bf16 %v1334_v45, %v1330_v46  ;;  %v1333_v61 = vld [vmem:[%s12498_s3 + $0x760] sm:$0xff]  ;;  %v5267_v34 = vpack.c.bf16 %v1342_v4, %v1338_v1  ;;  %v1354_v21 = vld [vmem:[%s12498_s3 + $0x808] sm:$0xff] }
 0x189   :  { %v5265_v63 = vpack.c.bf16 %v1333_v61, %v1329_v50  ;;  %v1337_v58 = vld [vmem:[%s12498_s3 + $0x780] sm:$0xff] }
 0x18a   :  { %5250 = vmatpush1.bf16.msra.mxu1 %v5249_v13  ;;  %v1341_v13 = vld [vmem:[%s12498_s3 + $0x7a0] sm:$0xff] }
 0x18b   :  { %5252 = vmatprep.subr.bf16.mxu1 %v5251_v60  ;;  %v5269_v14 = vpack.c.bf16 %v1341_v13, %v1337_v58  ;;  %v1350_v60 = vld [vmem:[%s12498_s3 + $0x7e8] sm:$0xff]  ;;  %v1345_v51 = vld [vmem:[%s12498_s3 + $0x7c0] sm:$0xff] }
 0x18c   :  { %1032 = vrot.lane.b32.xlu1 %v8127_v11, %s6721_s29  ;;  %v5271_v44 = vpack.c.bf16 %v1350_v60, %v1346_v16  ;;  %v1112_v60 = vld [vmem:[%s12498_s3 + $0x78] sm:$0xff] }
 0x18e   :  { %5254 = vmatpush1.bf16.msra.mxu1 %v5253_v17  ;;  %v1349_v17 = vld [vmem:[%s12498_s3 + $0x7e0] sm:$0xff] }
 0x18f   :  { %5256 = vmatprep.subr.bf16.mxu1 %v5255_v22  ;;  %v5273_v18 = vpack.c.bf16 %v1349_v17, %v1345_v51  ;;  %v1358_v22 = vld [vmem:[%s12498_s3 + $0x828] sm:$0xff] }
 0x190   :  { %v5275_v23 = vpack.c.bf16 %v1358_v22, %v1354_v21 }
 0x192   :  { %5258 = vmatpush1.bf16.msra.mxu1 %v5257_v29 }
 0x193   :  { %5260 = vmatprep.subr.bf16.mxu1 %v5259_v39 }
 0x196   :  { %5262 = vmatpush1.bf16.msra.mxu1 %v5261_v54 }
 0x197   :  { %5264 = vmatprep.subr.bf16.mxu1 %v5263_v49 }
 0x19a   :  { %5266 = vmatpush1.bf16.msra.mxu1 %v5265_v63 }
 0x19b   :  { %5268 = vmatprep.subr.bf16.mxu1 %v5267_v34 }
 0x19e   :  { %5270 = vmatpush1.bf16.msra.mxu1 %v5269_v14 }
 0x19f   :  { %5272 = vmatprep.subr.bf16.mxu1 %v5271_v44 }
 0x1a2   :  { %5274 = vmatpush1.bf16.msra.mxu1 %v5273_v18  ;;  %v5551_v18 = vpack.c.bf16 %v1103_v40, %v1099_v26  ;;  %v1147_v26 = vld [vmem:[%s12498_s3 + $0x190] sm:$0xff] }
 0x1a3   :  { %5276 = vmatprep.subr.bf16.mxu1 %v5275_v23  ;;  %v1107_v23 = vld [vmem:[%s12498_s3 + $0x50] sm:$0xff] }
 0x1a4   :  { %v1151_v40 = vld [vmem:[%s12498_s3 + $0x1b0] sm:$0xff] }
 0x1a7   :  { %v6655_v24 = vpop.permute.xlu0 %6654 }
 0x1a8   :  { %v6657_v29 = vunpack.i.h.bf16 %v6655_v24  ;;  %v6656_v7 = vunpack.i.l.bf16 %v6655_v24  ;;  %v1111_v24 = vld [vmem:[%s12498_s3 + $0x70] sm:$0xff] }
 0x1aa   :  { %v984_v38 = vsel %vm980_vm2, %v6646_v20, %v6656_v7  ;;  %v985_v39 = vsel %vm980_vm2, %v6656_v7, %v6657_v29 }
 0x1ab   :  { %v6665_v47 = vpop.permute.xlu0 %6664  ;;  %v8215_v59 = vmax.f32 %v931_v52, %v984_v38  ;;  %v8219_v54 = vmax.f32 %v932_v5, %v985_v39  ;;  %v1115_v38 = vld [vmem:[%s12498_s3 + $0x90] sm:$0xff] }
 0x1ac   :  { %v6667_v46 = vunpack.i.h.bf16 %v6665_v47  ;;  %v6666_v45 = vunpack.i.l.bf16 %v6665_v47  ;;  %v1119_v39 = vld [vmem:[%s12498_s3 + $0xb0] sm:$0xff]  ;;  %v1124_v47 = vld [vmem:[%s12498_s3 + $0xd8] sm:$0xff] }
 0x1ad   :  { %v6658_v49 = vpack.i.bf16 %v8219_v54, %v8215_v59 }
 0x1ae   :  { %v986_v15 = vsel %vm980_vm2, %v6657_v29, %v6666_v45  ;;  %v987_v20 = vsel %vm980_vm2, %v6666_v45, %v6667_v46  ;;  %v1120_v29 = vld [vmem:[%s12498_s3 + $0xb8] sm:$0xff]  ;;  %v5559_v45 = vpack.c.bf16 %v1119_v39, %v1115_v38 }
 0x1af   :  { %6659 = vrot.lane.b32.xlu1 %v6658_v49, %s6721_s29  ;;  %v8228_v48 = vmax.f32 %v933_v8, %v986_v15  ;;  %v8232_v52 = vmax.f32 %v934_v10, %v987_v20  ;;  %v1123_v15 = vld [vmem:[%s12498_s3 + $0xd0] sm:$0xff] }
 0x1b0   :  { %v1127_v20 = vld [vmem:[%s12498_s3 + $0xf0] sm:$0xff] }
 0x1b1   :  { %v6668_v0 = vpack.i.bf16 %v8232_v52, %v8228_v48 }
 0x1b3   :  { %6669 = vrot.lane.b32.xlu1 %v6668_v0, %s6721_s29  ;;  %v1132_v0 = vld [vmem:[%s12498_s3 + $0x118] sm:$0xff] }
 0x1d1   :  { %v6675_v5 = vpop.permute.xlu0 %6674 }
 0x1d2   :  { %v6677_v50 = vunpack.i.h.bf16 %v6675_v5  ;;  %v6676_v61 = vunpack.i.l.bf16 %v6675_v5  ;;  %v1136_v5 = vld [vmem:[%s12498_s3 + $0x138] sm:$0xff] }
 0x1d4   :  { %v988_v63 = vsel %vm980_vm2, %v6667_v46, %v6676_v61  ;;  %v989_v1 = vsel %vm980_vm2, %v6676_v61, %v6677_v50  ;;  %v1128_v46 = vld [vmem:[%s12498_s3 + $0xf8] sm:$0xff]  ;;  %v5565_v61 = vpack.c.bf16 %v1136_v5, %v1132_v0  ;;  %v1353_v5 = vld [vmem:[%s12498_s3 + $0x800] sm:$0xff] }
 0x1d5   :  { %v6685_v4 = vpop.permute.xlu0 %6684  ;;  %v8241_v3 = vmax.f32 %v935_v12, %v988_v63  ;;  %v8245_v6 = vmax.f32 %v936_v27, %v989_v1  ;;  %v5561_v49 = vpack.c.bf16 %v1128_v46, %v1124_v47  ;;  %v1131_v63 = vld [vmem:[%s12498_s3 + $0x110] sm:$0xff] }
 0x1d6   :  { %v6687_v8 = vunpack.i.h.bf16 %v6685_v4  ;;  %v6686_v10 = vunpack.i.l.bf16 %v6685_v4  ;;  %v1135_v1 = vld [vmem:[%s12498_s3 + $0x130] sm:$0xff]  ;;  %v1140_v4 = vld [vmem:[%s12498_s3 + $0x158] sm:$0xff] }
 0x1d7   :  { %v6678_v34 = vpack.i.bf16 %v8245_v6, %v8241_v3  ;;  %v1171_v47 = vld [vmem:[%s12498_s3 + $0x250] sm:$0xff] }
 0x1d8   :  { %v990_v58 = vsel %vm980_vm2, %v6677_v50, %v6686_v10  ;;  %v991_v13 = vsel %vm980_vm2, %v6686_v10, %v6687_v8  ;;  %v5563_v50 = vpack.c.bf16 %v1127_v20, %v1123_v15  ;;  %v5567_v10 = vpack.c.bf16 %v1135_v1, %v1131_v63  ;;  %v1175_v46 = vld [vmem:[%s12498_s3 + $0x270] sm:$0xff]  ;;  %v1184_v15 = vld [vmem:[%s12498_s3 + $0x2b8] sm:$0xff]  ;;  %v1362_v63 = vld [vmem:[%s12498_s3 + $0x848] sm:$0xff] }
 0x1d9   :  { %6679 = vrot.lane.b32.xlu1 %v6678_v34, %s6721_s29  ;;  %v8254_v9 = vmax.f32 %v937_v30, %v990_v58  ;;  %v8258_v12 = vmax.f32 %v938_v53, %v991_v13  ;;  %v1139_v58 = vld [vmem:[%s12498_s3 + $0x150] sm:$0xff]  ;;  %v1366_v1 = vld [vmem:[%s12498_s3 + $0x868] sm:$0xff] }
 0x1da   :  { %v1143_v13 = vld [vmem:[%s12498_s3 + $0x170] sm:$0xff] }
 0x1db   :  { %v6688_v19 = vpack.i.bf16 %v8258_v12, %v8254_v9 }
 0x1dd   :  { %6689 = vrot.lane.b32.xlu1 %v6688_v19, %s6721_s29  ;;  %v1148_v19 = vld [vmem:[%s12498_s3 + $0x198] sm:$0xff] }
 0x1f8   :  { %v979_v27 = vpop.permute.xlu0 %978 }
 0x1f9   :  { %v992_v14 = vsel %vm980_vm2, %v6687_v8, %v979_v27  ;;  %v8266_v16 = vmax.f32 %v940_v41, %v979_v27  ;;  %v1108_v41 = vld [vmem:[%s12498_s3 + $0x58] sm:$0xff] }
 0x1fa   :  { %v8270_v25 = vmax.f32 %v939_v62, %v992_v14  ;;  %v8272_v30 = vpop.permute.xlu1 %6649  ;;  %v5553_v22 = vpack.c.bf16 %v1112_v60, %v1108_v41  ;;  %v1144_v8 = vld [vmem:[%s12498_s3 + $0x178] sm:$0xff]  ;;  %v5571_v14 = vpack.c.bf16 %v1143_v13, %v1139_v58  ;;  %v5575_v60 = vpack.c.bf16 %v1151_v40, %v1147_v26  ;;  %v1183_v58 = vld [vmem:[%s12498_s3 + $0x2b0] sm:$0xff]  ;;  %v1361_v40 = vld [vmem:[%s12498_s3 + $0x840] sm:$0xff] }
 0x1fb   :  { %1056 = vrot.lane.b32.xlu0 %v8266_v16, %s6721_s29  ;;  %v6652_v36 = vunpack.i.h.bf16 %v8272_v30  ;;  %v6651_v53 = vunpack.i.l.bf16 %v8272_v30  ;;  %v5569_v34 = vpack.c.bf16 %v1144_v8, %v1140_v4  ;;  %v1152_v27 = vld [vmem:[%s12498_s3 + $0x1b8] sm:$0xff] }
 0x1fc   :  { %1054 = vrot.lane.b32.xlu1 %v8270_v25, %s6721_s29  ;;  %v1160_v41 = vld [vmem:[%s12498_s3 + $0x1f8] sm:$0xff] }
 0x1fd   :  { %v1060_v62 = vsel %vm1058_vm3, %v6651_v53, %v6652_v36 }
 0x1fe   :  { %v1033_v44 = vpop.permute.xlu1 %1032  ;;  %v1085_v51 = vmax.f32 %v8088_v42, %v1060_v62  ;;  %v1116_v42 = vld [vmem:[%s12498_s3 + $0x98] sm:$0xff] }
 0x1ff   :  { %v1059_v17 = vsel %vm1058_vm3, %v1033_v44, %v6651_v53  ;;  %v5557_v7 = vpack.c.bf16 %v1120_v29, %v1116_v42  ;;  %v5573_v53 = vpack.c.bf16 %v1152_v27, %v1148_v19  ;;  %v1156_v62 = vld [vmem:[%s12498_s3 + $0x1d8] sm:$0xff]  ;;  %v1163_v42 = vld [vmem:[%s12498_s3 + $0x210] sm:$0xff] }
 0x200   :  { %v8298_v21 = vmax.f32 %v8127_v11, %v1059_v17  ;;  %1978 = vmatprep.mubr.f32.mxu0 %v1085_v51  ;;  %v5555_v11 = vpack.c.bf16 %v1111_v24, %v1107_v23  ;;  %v5577_v44 = vpack.c.bf16 %v1160_v41, %v1156_v62  ;;  %v1159_v17 = vld [vmem:[%s12498_s3 + $0x1f0] sm:$0xff]  ;;  %v1188_v27 = vld [vmem:[%s12498_s3 + $0x2d8] sm:$0xff]  ;;  %v1370_v41 = vld [vmem:[%s12498_s3 + $0x888] sm:$0xff] }
 0x201   :  { %v1167_v29 = vld [vmem:[%s12498_s3 + $0x230] sm:$0xff] }
 0x202   :  { %1979 = vmatmul.mubr.f32.vlgmr.msra.gmra.mrb[8].mxu0 %v8298_v21  ;;  %v5583_v38 = vpack.c.bf16 %v1167_v29, %v1163_v42  ;;  %v1200_v42 = vld [vmem:[%s12498_s3 + $0x338] sm:$0xff] }
 0x203   :  { %5552 = vmatpush1.bf16.msra.mxu0 %v5551_v18  ;;  %2475 = vmatprep.mubr.f32.mxu0 %v1085_v51  ;;  %v1155_v51 = vld [vmem:[%s12498_s3 + $0x1d0] sm:$0xff]  ;;  %v1164_v18 = vld [vmem:[%s12498_s3 + $0x218] sm:$0xff] }
 0x204   :  { %5554 = vmatprep.subr.bf16.mxu0 %v5553_v22  ;;  %v1168_v22 = vld [vmem:[%s12498_s3 + $0x238] sm:$0xff]  ;;  %v5579_v23 = vpack.c.bf16 %v1159_v17, %v1155_v51  ;;  %v1187_v17 = vld [vmem:[%s12498_s3 + $0x2d0] sm:$0xff] }
 0x205   :  { %v5581_v24 = vpack.c.bf16 %v1168_v22, %v1164_v18  ;;  %v1191_v18 = vld [vmem:[%s12498_s3 + $0x2f0] sm:$0xff] }
 0x207   :  { %5556 = vmatpush1.bf16.msra.mxu0 %v5555_v11  ;;  %v1172_v11 = vld [vmem:[%s12498_s3 + $0x258] sm:$0xff] }
 0x208   :  { %5558 = vmatprep.subr.bf16.mxu0 %v5557_v7  ;;  %v1176_v7 = vld [vmem:[%s12498_s3 + $0x278] sm:$0xff] }
 0x209   :  { %v5585_v39 = vpack.c.bf16 %v1176_v7, %v1172_v11  ;;  %v1369_v11 = vld [vmem:[%s12498_s3 + $0x880] sm:$0xff]  ;;  %v5595_v7 = vpack.c.bf16 %v1191_v18, %v1187_v17  ;;  %v1215_v17 = vld [vmem:[%s12498_s3 + $0x3b0] sm:$0xff] }
 0x20b   :  { %5560 = vmatpush1.bf16.msra.mxu0 %v5559_v45 }
 0x20c   :  { %5562 = vmatprep.subr.bf16.mxu0 %v5561_v49  ;;  %v1180_v49 = vld [vmem:[%s12498_s3 + $0x298] sm:$0xff] }
 0x20f   :  { %5564 = vmatpush1.bf16.msra.mxu0 %v5563_v50  ;;  %v1357_v50 = vld [vmem:[%s12498_s3 + $0x820] sm:$0xff] }
 0x210   :  { %5566 = vmatprep.subr.bf16.mxu0 %v5565_v61  ;;  %v5587_v61 = vpack.c.bf16 %v1175_v46, %v1171_v47  ;;  %v5277_v19 = vpack.c.bf16 %v1357_v50, %v1353_v5  ;;  %v1195_v46 = vld [vmem:[%s12498_s3 + $0x310] sm:$0xff]  ;;  %v1208_v5 = vld [vmem:[%s12498_s3 + $0x378] sm:$0xff] }
 0x213   :  { %5568 = vmatpush1.bf16.msra.mxu0 %v5567_v10  ;;  %v5589_v10 = vpack.c.bf16 %v1184_v15, %v1180_v49  ;;  %v1199_v49 = vld [vmem:[%s12498_s3 + $0x330] sm:$0xff] }
 0x214   :  { %5570 = vmatprep.subr.bf16.mxu0 %v5569_v34  ;;  %v1179_v34 = vld [vmem:[%s12498_s3 + $0x290] sm:$0xff] }
 0x215   :  { %v5591_v62 = vpack.c.bf16 %v1183_v58, %v1179_v34  ;;  %v1203_v34 = vld [vmem:[%s12498_s3 + $0x350] sm:$0xff] }
 0x216   :  { %v1207_v58 = vld [vmem:[%s12498_s3 + $0x370] sm:$0xff] }
 0x217   :  { %5572 = vmatpush1.bf16.msra.mxu0 %v5571_v14  ;;  %v1192_v14 = vld [vmem:[%s12498_s3 + $0x2f8] sm:$0xff] }
 0x218   :  { %5574 = vmatprep.subr.bf16.mxu0 %v5573_v53  ;;  %v5593_v51 = vpack.c.bf16 %v1192_v14, %v1188_v27  ;;  %v1212_v27 = vld [vmem:[%s12498_s3 + $0x398] sm:$0xff] }
 0x219   :  { %v1216_v14 = vld [vmem:[%s12498_s3 + $0x3b8] sm:$0xff] }
 0x21b   :  { %5576 = vmatpush1.bf16.msra.mxu0 %v5575_v60  ;;  %v1374_v60 = vld [vmem:[%s12498_s3 + $0x8a8] sm:$0xff] }
 0x21c   :  { %5578 = vmatprep.subr.bf16.mxu0 %v5577_v44  ;;  %v5283_v29 = vpack.c.bf16 %v1374_v60, %v1370_v41  ;;  %v1394_v41 = vld [vmem:[%s12498_s3 + $0x948] sm:$0xff] }
 0x21d   :  { %v1398_v60 = vld [vmem:[%s12498_s3 + $0x968] sm:$0xff] }
 0x21f   :  { %5580 = vmatpush1.bf16.msra.mxu0 %v5579_v23 }
 0x220   :  { %5582 = vmatprep.subr.bf16.mxu0 %v5581_v24  ;;  %v1196_v24 = vld [vmem:[%s12498_s3 + $0x318] sm:$0xff] }
 0x221   :  { %v8403_v45 = vpop.permute.xlu1 %6659  ;;  %v5597_v47 = vpack.c.bf16 %v1200_v42, %v1196_v24  ;;  %v1224_v24 = vld [vmem:[%s12498_s3 + $0x3f8] sm:$0xff]  ;;  %v5295_v42 = vpack.c.bf16 %v1398_v60, %v1394_v41  ;;  %v1422_v41 = vld [vmem:[%s12498_s3 + $0xa28] sm:$0xff] }
 0x222   :  { %v6662_v20 = vunpack.i.h.bf16 %v8403_v45  ;;  %v6661_v0 = vunpack.i.l.bf16 %v8403_v45 }
 0x223   :  { %5584 = vmatpush1.bf16.msra.mxu0 %v5583_v38  ;;  %v1378_v38 = vld [vmem:[%s12498_s3 + $0x8c8] sm:$0xff] }
 0x224   :  { %v1061_v4 = vsel %vm1058_vm3, %v6652_v36, %v6661_v0  ;;  %5586 = vmatprep.subr.bf16.mxu0 %v5585_v39  ;;  %v1062_v8 = vsel %vm1058_vm3, %v6661_v0, %v6662_v20  ;;  %v1382_v39 = vld [vmem:[%s12498_s3 + $0x8e8] sm:$0xff]  ;;  %v1204_v0 = vld [vmem:[%s12498_s3 + $0x358] sm:$0xff] }
 0x225   :  { %v8438_v13 = vmax.f32 %v8092_v43, %v1061_v4  ;;  %v8440_v30 = vpop.permute.xlu1 %6669  ;;  %v8443_v36 = vmax.f32 %v8215_v59, %v1062_v8  ;;  %v5279_v43 = vpack.c.bf16 %v1366_v1, %v1362_v63  ;;  %v1365_v59 = vld [vmem:[%s12498_s3 + $0x860] sm:$0xff]  ;;  %v5287_v50 = vpack.c.bf16 %v1382_v39, %v1378_v38  ;;  %v1386_v4 = vld [vmem:[%s12498_s3 + $0x908] sm:$0xff] }
 0x226   :  { %v6672_v53 = vunpack.i.h.bf16 %v8440_v30  ;;  %v6671_v26 = vunpack.i.l.bf16 %v8440_v30  ;;  %v5281_v23 = vpack.c.bf16 %v1365_v59, %v1361_v40  ;;  %v1381_v63 = vld [vmem:[%s12498_s3 + $0x8e0] sm:$0xff]  ;;  %v5599_v1 = vpack.c.bf16 %v1199_v49, %v1195_v46  ;;  %v1390_v8 = vld [vmem:[%s12498_s3 + $0x928] sm:$0xff]  ;;  %v1223_v46 = vld [vmem:[%s12498_s3 + $0x3f0] sm:$0xff] }
 0x227   :  { %2049 = vmatprep.mubr.f32.mxu1 %v8443_v36  ;;  %5588 = vmatpush1.bf16.msra.mxu0 %v5587_v61  ;;  %v1377_v61 = vld [vmem:[%s12498_s3 + $0x8c0] sm:$0xff]  ;;  %v1406_v38 = vld [vmem:[%s12498_s3 + $0x9a8] sm:$0xff] }
 0x228   :  { %2050 = vmatmul.mubr.f32.vlgmr.msra.gmra.mrb[6].mxu1 %v8438_v13  ;;  %5590 = vmatprep.subr.bf16.mxu0 %v5589_v10  ;;  %v1064_v44 = vsel %vm1058_vm3, %v6671_v26, %v6672_v53  ;;  %v5601_v10 = vpack.c.bf16 %v1208_v5, %v1204_v0  ;;  %v1385_v40 = vld [vmem:[%s12498_s3 + $0x900] sm:$0xff]  ;;  %v1232_v0 = vld [vmem:[%s12498_s3 + $0x438] sm:$0xff] }
 0x229   :  { %5278 = vmatpush1.bf16.msra.mxu1 %v5277_v19  ;;  %v8479_v22 = vmax.f32 %v8228_v48, %v1064_v44  ;;  %v1373_v48 = vld [vmem:[%s12498_s3 + $0x8a0] sm:$0xff]  ;;  %v5289_v19 = vpack.c.bf16 %v1381_v63, %v1377_v61  ;;  %v5605_v44 = vpack.c.bf16 %v1216_v14, %v1212_v27  ;;  %v1240_v27 = vld [vmem:[%s12498_s3 + $0x478] sm:$0xff] }
 0x22a   :  { %5280 = vmatprep.subr.bf16.mxu1 %v5279_v43  ;;  %v5285_v15 = vpack.c.bf16 %v1373_v48, %v1369_v11  ;;  %v5291_v43 = vpack.c.bf16 %v1390_v8, %v1386_v4  ;;  %v1389_v59 = vld [vmem:[%s12498_s3 + $0x920] sm:$0xff]  ;;  %v1414_v4 = vld [vmem:[%s12498_s3 + $0x9e8] sm:$0xff] }
 0x22b   :  { %2120 = vmatprep.mubr.f32.mxu1 %v8479_v22  ;;  %5592 = vmatpush1.bf16.msra.mxu0 %v5591_v62  ;;  %v5603_v62 = vpack.c.bf16 %v1207_v58, %v1203_v34  ;;  %v5293_v18 = vpack.c.bf16 %v1389_v59, %v1385_v40  ;;  %v1397_v11 = vld [vmem:[%s12498_s3 + $0x960] sm:$0xff]  ;;  %v1231_v34 = vld [vmem:[%s12498_s3 + $0x430] sm:$0xff] }
 0x22c   :  { %5594 = vmatprep.subr.bf16.mxu0 %v5593_v51  ;;  %v1211_v51 = vld [vmem:[%s12498_s3 + $0x390] sm:$0xff]  ;;  %v1405_v61 = vld [vmem:[%s12498_s3 + $0x9a0] sm:$0xff] }
 0x22d   :  { %5282 = vmatpush1.bf16.msra.mxu1 %v5281_v23  ;;  %v1220_v23 = vld [vmem:[%s12498_s3 + $0x3d8] sm:$0xff]  ;;  %v5607_v48 = vpack.c.bf16 %v1215_v17, %v1211_v51  ;;  %v1413_v40 = vld [vmem:[%s12498_s3 + $0x9e0] sm:$0xff]  ;;  %v1239_v51 = vld [vmem:[%s12498_s3 + $0x470] sm:$0xff] }
 0x22e   :  { %5284 = vmatprep.subr.bf16.mxu1 %v5283_v29  ;;  %v1393_v29 = vld [vmem:[%s12498_s3 + $0x940] sm:$0xff]  ;;  %v5609_v39 = vpack.c.bf16 %v1224_v24, %v1220_v23  ;;  %v1248_v23 = vld [vmem:[%s12498_s3 + $0x4b8] sm:$0xff] }
 0x22f   :  { %5596 = vmatpush1.bf16.msra.mxu0 %v5595_v7  ;;  %v1402_v7 = vld [vmem:[%s12498_s3 + $0x988] sm:$0xff]  ;;  %v5297_v49 = vpack.c.bf16 %v1397_v11, %v1393_v29  ;;  %v1421_v29 = vld [vmem:[%s12498_s3 + $0xa20] sm:$0xff] }
 0x230   :  { %5598 = vmatprep.subr.bf16.mxu0 %v5597_v47  ;;  %v1219_v47 = vld [vmem:[%s12498_s3 + $0x3d0] sm:$0xff]  ;;  %v5299_v5 = vpack.c.bf16 %v1406_v38, %v1402_v7 }
 0x231   :  { %5286 = vmatpush1.bf16.msra.mxu1 %v5285_v15  ;;  %v1228_v15 = vld [vmem:[%s12498_s3 + $0x418] sm:$0xff]  ;;  %v5611_v63 = vpack.c.bf16 %v1223_v46, %v1219_v47  ;;  %v1243_v38 = vld [vmem:[%s12498_s3 + $0x490] sm:$0xff] }
 0x232   :  { %5288 = vmatprep.subr.bf16.mxu1 %v5287_v50  ;;  %v1401_v50 = vld [vmem:[%s12498_s3 + $0x980] sm:$0xff]  ;;  %v5613_v8 = vpack.c.bf16 %v1232_v0, %v1228_v15  ;;  %v1252_v47 = vld [vmem:[%s12498_s3 + $0x4d8] sm:$0xff] }
 0x233   :  { %5600 = vmatpush1.bf16.msra.mxu0 %v5599_v1  ;;  %v1410_v1 = vld [vmem:[%s12498_s3 + $0x9c8] sm:$0xff]  ;;  %v5301_v58 = vpack.c.bf16 %v1405_v61, %v1401_v50  ;;  %v1256_v46 = vld [vmem:[%s12498_s3 + $0x4f8] sm:$0xff]  ;;  %v1425_v15 = vld [vmem:[%s12498_s3 + $0xa40] sm:$0xff] }
 0x234   :  { %5602 = vmatprep.subr.bf16.mxu0 %v5601_v10  ;;  %v1227_v10 = vld [vmem:[%s12498_s3 + $0x410] sm:$0xff]  ;;  %v5303_v14 = vpack.c.bf16 %v1414_v4, %v1410_v1  ;;  %v1429_v0 = vld [vmem:[%s12498_s3 + $0xa60] sm:$0xff]  ;;  %v1434_v50 = vld [vmem:[%s12498_s3 + $0xa88] sm:$0xff] }
 0x235   :  { %5290 = vmatpush1.bf16.msra.mxu1 %v5289_v19  ;;  %v1236_v19 = vld [vmem:[%s12498_s3 + $0x458] sm:$0xff]  ;;  %v5615_v59 = vpack.c.bf16 %v1231_v34, %v1227_v10  ;;  %v1438_v61 = vld [vmem:[%s12498_s3 + $0xaa8] sm:$0xff]  ;;  %v1251_v1 = vld [vmem:[%s12498_s3 + $0x4d0] sm:$0xff] }
 0x236   :  { %5292 = vmatprep.subr.bf16.mxu1 %v5291_v43  ;;  %v1409_v43 = vld [vmem:[%s12498_s3 + $0x9c0] sm:$0xff]  ;;  %v5617_v60 = vpack.c.bf16 %v1240_v27, %v1236_v19  ;;  %v1255_v4 = vld [vmem:[%s12498_s3 + $0x4f0] sm:$0xff]  ;;  %v1260_v10 = vld [vmem:[%s12498_s3 + $0x518] sm:$0xff] }
 0x237   :  { %5604 = vmatpush1.bf16.msra.mxu0 %v5603_v62  ;;  %v1418_v62 = vld [vmem:[%s12498_s3 + $0xa08] sm:$0xff]  ;;  %v5305_v17 = vpack.c.bf16 %v1413_v40, %v1409_v43  ;;  %v1264_v34 = vld [vmem:[%s12498_s3 + $0x538] sm:$0xff]  ;;  %v1433_v19 = vld [vmem:[%s12498_s3 + $0xa80] sm:$0xff]  ;;  %v5627_v43 = vpack.c.bf16 %v1255_v4, %v1251_v1 }
 0x238   :  { %5606 = vmatprep.subr.bf16.mxu0 %v5605_v44  ;;  %v1235_v44 = vld [vmem:[%s12498_s3 + $0x450] sm:$0xff]  ;;  %v5307_v24 = vpack.c.bf16 %v1422_v41, %v1418_v62  ;;  %v1437_v27 = vld [vmem:[%s12498_s3 + $0xaa0] sm:$0xff]  ;;  %v1442_v40 = vld [vmem:[%s12498_s3 + $0xac8] sm:$0xff]  ;;  %v5629_v41 = vpack.c.bf16 %v1264_v34, %v1260_v10 }
 0x239   :  { %5294 = vmatpush1.bf16.msra.mxu1 %v5293_v18  ;;  %v1244_v18 = vld [vmem:[%s12498_s3 + $0x498] sm:$0xff]  ;;  %v5619_v11 = vpack.c.bf16 %v1239_v51, %v1235_v44  ;;  %v1263_v44 = vld [vmem:[%s12498_s3 + $0x530] sm:$0xff]  ;;  %v5317_v51 = vpack.c.bf16 %v1437_v27, %v1433_v19  ;;  %v1458_v1 = vld [vmem:[%s12498_s3 + $0xb48] sm:$0xff] }
 0x23a   :  { %5296 = vmatprep.subr.bf16.mxu1 %v5295_v42  ;;  %v1417_v42 = vld [vmem:[%s12498_s3 + $0xa00] sm:$0xff]  ;;  %v5621_v7 = vpack.c.bf16 %v1248_v23, %v1244_v18  ;;  %v1272_v18 = vld [vmem:[%s12498_s3 + $0x578] sm:$0xff]  ;;  %v1462_v4 = vld [vmem:[%s12498_s3 + $0xb68] sm:$0xff] }
 0x23b   :  { %5608 = vmatpush1.bf16.msra.mxu0 %v5607_v48  ;;  %v1426_v48 = vld [vmem:[%s12498_s3 + $0xa48] sm:$0xff]  ;;  %v1275_v10 = vld [vmem:[%s12498_s3 + $0x590] sm:$0xff]  ;;  %v1284_v19 = vld [vmem:[%s12498_s3 + $0x5d8] sm:$0xff] }
 0x23c   :  { %5610 = vmatprep.subr.bf16.mxu0 %v5609_v39  ;;  %v1247_v39 = vld [vmem:[%s12498_s3 + $0x4b0] sm:$0xff]  ;;  %v1288_v27 = vld [vmem:[%s12498_s3 + $0x5f8] sm:$0xff] }
 0x23d   :  { %5298 = vmatpush1.bf16.msra.mxu1 %v5297_v49  ;;  %v1279_v34 = vld [vmem:[%s12498_s3 + $0x5b0] sm:$0xff] }
 0x23e   :  { %5300 = vmatprep.subr.bf16.mxu1 %v5299_v5  ;;  %v5623_v5 = vpack.c.bf16 %v1247_v39, %v1243_v38 }
 0x23f   :  { %5612 = vmatpush1.bf16.msra.mxu0 %v5611_v63  ;;  %v5625_v63 = vpack.c.bf16 %v1256_v46, %v1252_v47  ;;  %v1271_v47 = vld [vmem:[%s12498_s3 + $0x570] sm:$0xff] }
 0x240   :  { %5614 = vmatprep.subr.bf16.mxu0 %v5613_v8  ;;  %v5313_v8 = vpack.c.bf16 %v1429_v0, %v1425_v15  ;;  %v1280_v15 = vld [vmem:[%s12498_s3 + $0x5b8] sm:$0xff] }
 0x241   :  { %5302 = vmatpush1.bf16.msra.mxu1 %v5301_v58  ;;  %v5315_v58 = vpack.c.bf16 %v1438_v61, %v1434_v50  ;;  %v1449_v50 = vld [vmem:[%s12498_s3 + $0xb00] sm:$0xff] }
 0x242   :  { %2476 = vmatmul.mubr.f32.vlgmr.msra.gmra.mrb[10].mxu0 %v8298_v21  ;;  %5304 = vmatprep.subr.bf16.mxu1 %v5303_v14  ;;  %v1430_v21 = vld [vmem:[%s12498_s3 + $0xa68] sm:$0xff]  ;;  %v1453_v61 = vld [vmem:[%s12498_s3 + $0xb20] sm:$0xff] }
 0x243   :  { %5616 = vmatpush1.bf16.msra.mxu0 %v5615_v59  ;;  %2546 = vmatprep.mubr.f32.mxu0 %v8443_v36  ;;  %v5309_v36 = vpack.c.bf16 %v1421_v29, %v1417_v42  ;;  %v5311_v49 = vpack.c.bf16 %v1430_v21, %v1426_v48  ;;  %v1446_v59 = vld [vmem:[%s12498_s3 + $0xae8] sm:$0xff]  ;;  %v1441_v42 = vld [vmem:[%s12498_s3 + $0xac0] sm:$0xff] }
 0x244   :  { %5618 = vmatprep.subr.bf16.mxu0 %v5617_v60  ;;  %v1259_v60 = vld [vmem:[%s12498_s3 + $0x510] sm:$0xff]  ;;  %v1445_v29 = vld [vmem:[%s12498_s3 + $0xae0] sm:$0xff]  ;;  %v1450_v21 = vld [vmem:[%s12498_s3 + $0xb08] sm:$0xff] }
 0x245   :  { %5306 = vmatpush1.bf16.msra.mxu1 %v5305_v17  ;;  %v1268_v17 = vld [vmem:[%s12498_s3 + $0x558] sm:$0xff]  ;;  %v5631_v48 = vpack.c.bf16 %v1263_v44, %v1259_v60  ;;  %v5321_v46 = vpack.c.bf16 %v1445_v29, %v1441_v42  ;;  %v1466_v60 = vld [vmem:[%s12498_s3 + $0xb88] sm:$0xff] }
 0x246   :  { %5308 = vmatprep.subr.bf16.mxu1 %v5307_v24  ;;  %v5319_v24 = vpack.c.bf16 %v1446_v59, %v1442_v40  ;;  %v5633_v39 = vpack.c.bf16 %v1272_v18, %v1268_v17  ;;  %v1457_v40 = vld [vmem:[%s12498_s3 + $0xb40] sm:$0xff]  ;;  %v1470_v44 = vld [vmem:[%s12498_s3 + $0xba8] sm:$0xff]  ;;  %v1283_v17 = vld [vmem:[%s12498_s3 + $0x5d0] sm:$0xff] }
 0x247   :  { %5620 = vmatpush1.bf16.msra.mxu0 %v5619_v11  ;;  %v1461_v59 = vld [vmem:[%s12498_s3 + $0xb60] sm:$0xff]  ;;  %v1287_v18 = vld [vmem:[%s12498_s3 + $0x5f0] sm:$0xff]  ;;  %v1292_v42 = vld [vmem:[%s12498_s3 + $0x618] sm:$0xff] }
 0x248   :  { %5622 = vmatprep.subr.bf16.mxu0 %v5621_v7  ;;  %v1296_v29 = vld [vmem:[%s12498_s3 + $0x638] sm:$0xff] }
 0x249   :  { %5310 = vmatpush1.bf16.msra.mxu1 %v5309_v36  ;;  %v1267_v36 = vld [vmem:[%s12498_s3 + $0x550] sm:$0xff] }
 0x24a   :  { %5312 = vmatprep.subr.bf16.mxu1 %v5311_v49  ;;  %v1276_v49 = vld [vmem:[%s12498_s3 + $0x598] sm:$0xff] }
 0x24b   :  { %v8688_v14 = vpop.permute.xlu1 %6679  ;;  %5624 = vmatpush1.bf16.msra.mxu0 %v5623_v5 }
 0x24c   :  { %v6681_v62 = vunpack.i.l.bf16 %v8688_v14  ;;  %5626 = vmatprep.subr.bf16.mxu0 %v5625_v63  ;;  %v6682_v7 = vunpack.i.h.bf16 %v8688_v14  ;;  %v5635_v63 = vpack.c.bf16 %v1271_v47, %v1267_v36  ;;  %v1474_v36 = vld [vmem:[%s12498_s3 + $0xbc8] sm:$0xff]  ;;  %v1320_v14 = vld [vmem:[%s12498_s3 + $0x6f8] sm:$0xff] }
 0x24d   :  { %5314 = vmatpush1.bf16.msra.mxu1 %v5313_v8  ;;  %v5637_v8 = vpack.c.bf16 %v1280_v15, %v1276_v49  ;;  %v1478_v47 = vld [vmem:[%s12498_s3 + $0xbe8] sm:$0xff]  ;;  %v1291_v49 = vld [vmem:[%s12498_s3 + $0x610] sm:$0xff] }
 0x24e   :  { %v8714_v23 = vsel %vm1058_vm3, %v6672_v53, %v6681_v62  ;;  %5316 = vmatprep.subr.bf16.mxu1 %v5315_v58  ;;  %v1454_v53 = vld [vmem:[%s12498_s3 + $0xb28] sm:$0xff]  ;;  %v5325_v58 = vpack.c.bf16 %v1453_v61, %v1449_v50  ;;  %v1295_v15 = vld [vmem:[%s12498_s3 + $0x630] sm:$0xff]  ;;  %v1300_v50 = vld [vmem:[%s12498_s3 + $0x658] sm:$0xff]  ;;  %v1066_v30 = vsel %vm1058_vm3, %v6681_v62, %v6682_v7 }
 0x24f   :  { %v8722_v11 = vpop.permute.xlu1 %6689  ;;  %5628 = vmatpush1.bf16.msra.mxu0 %v5627_v43  ;;  %v5323_v5 = vpack.c.bf16 %v1454_v53, %v1450_v21  ;;  %v5327_v43 = vpack.c.bf16 %v1462_v4, %v1458_v1  ;;  %v1465_v21 = vld [vmem:[%s12498_s3 + $0xb80] sm:$0xff]  ;;  %v1304_v61 = vld [vmem:[%s12498_s3 + $0x678] sm:$0xff] }
 0x250   :  { %v6691_v38 = vunpack.i.l.bf16 %v8722_v11  ;;  %5630 = vmatprep.subr.bf16.mxu0 %v5629_v41  ;;  %v5639_v41 = vpack.c.bf16 %v1279_v34, %v1275_v10  ;;  %v1469_v53 = vld [vmem:[%s12498_s3 + $0xba0] sm:$0xff]  ;;  %v1482_v10 = vld [vmem:[%s12498_s3 + $0xc08] sm:$0xff] }
 0x251   :  { %5318 = vmatpush1.bf16.msra.mxu1 %v5317_v51  ;;  %v5641_v51 = vpack.c.bf16 %v1288_v27, %v1284_v19  ;;  %v1473_v1 = vld [vmem:[%s12498_s3 + $0xbc0] sm:$0xff]  ;;  %v1486_v34 = vld [vmem:[%s12498_s3 + $0xc28] sm:$0xff]  ;;  %v1299_v19 = vld [vmem:[%s12498_s3 + $0x650] sm:$0xff] }
 0x252   :  { %v8749_v0 = vsel %vm1058_vm3, %v6682_v7, %v6691_v38  ;;  %5320 = vmatprep.subr.bf16.mxu1 %v5319_v24  ;;  %v5329_v24 = vpack.c.bf16 %v1461_v59, %v1457_v40  ;;  %v1477_v4 = vld [vmem:[%s12498_s3 + $0xbe0] sm:$0xff]  ;;  %v1303_v27 = vld [vmem:[%s12498_s3 + $0x670] sm:$0xff]  ;;  %v1308_v40 = vld [vmem:[%s12498_s3 + $0x698] sm:$0xff] }
 0x253   :  { %5632 = vmatpush1.bf16.msra.mxu0 %v5631_v48  ;;  %v5331_v48 = vpack.c.bf16 %v1470_v44, %v1466_v60  ;;  %v1312_v59 = vld [vmem:[%s12498_s3 + $0x6b8] sm:$0xff]  ;;  %v1481_v60 = vld [vmem:[%s12498_s3 + $0xc00] sm:$0xff] }
 0x254   :  { %5634 = vmatprep.subr.bf16.mxu0 %v5633_v39  ;;  %v5643_v39 = vpack.c.bf16 %v1287_v18, %v1283_v17  ;;  %v1485_v44 = vld [vmem:[%s12498_s3 + $0xc20] sm:$0xff]  ;;  %v5651_v17 = vpack.c.bf16 %v1303_v27, %v1299_v19  ;;  %v1490_v18 = vld [vmem:[%s12498_s3 + $0xc48] sm:$0xff]  ;;  %v5653_v45 = vpack.c.bf16 %v1312_v59, %v1308_v40  ;;  %v1332_v27 = vld [vmem:[%s12498_s3 + $0x758] sm:$0xff] }
 0x255   :  { %5322 = vmatpush1.bf16.msra.mxu1 %v5321_v46  ;;  %v5645_v46 = vpack.c.bf16 %v1296_v29, %v1292_v42  ;;  %v5341_v42 = vpack.c.bf16 %v1485_v44, %v1481_v60  ;;  %v1316_v29 = vld [vmem:[%s12498_s3 + $0x6d8] sm:$0xff]  ;;  %v1505_v59 = vld [vmem:[%s12498_s3 + $0xcc0] sm:$0xff]  ;;  %v1514_v44 = vld [vmem:[%s12498_s3 + $0xd08] sm:$0xff] }
 0x256   :  { %5324 = vmatprep.subr.bf16.mxu1 %v5323_v5  ;;  %v5333_v5 = vpack.c.bf16 %v1469_v53, %v1465_v21  ;;  %v1493_v21 = vld [vmem:[%s12498_s3 + $0xc60] sm:$0xff]  ;;  %v8891_v53 = vmax.f32 %v8241_v3, %v1066_v30  ;;  %v1319_v3 = vld [vmem:[%s12498_s3 + $0x6f0] sm:$0xff] }
 0x257   :  { %5636 = vmatpush1.bf16.msra.mxu0 %v5635_v63  ;;  %v5335_v63 = vpack.c.bf16 %v1478_v47, %v1474_v36  ;;  %v1502_v36 = vld [vmem:[%s12498_s3 + $0xca8] sm:$0xff]  ;;  %v5657_v47 = vpack.c.bf16 %v1320_v14, %v1316_v29  ;;  %v1517_v29 = vld [vmem:[%s12498_s3 + $0xd20] sm:$0xff] }
 0x258   :  { %5638 = vmatprep.subr.bf16.mxu0 %v5637_v8  ;;  %v5647_v8 = vpack.c.bf16 %v1295_v15, %v1291_v49  ;;  %v1324_v15 = vld [vmem:[%s12498_s3 + $0x718] sm:$0xff] }
 0x259   :  { %5326 = vmatpush1.bf16.msra.mxu1 %v5325_v58  ;;  %v5649_v58 = vpack.c.bf16 %v1304_v61, %v1300_v50  ;;  %v1497_v61 = vld [vmem:[%s12498_s3 + $0xc80] sm:$0xff] }
 0x25a   :  { %5328 = vmatprep.subr.bf16.mxu1 %v5327_v43  ;;  %v5337_v43 = vpack.c.bf16 %v1477_v4, %v1473_v1  ;;  %v1506_v4 = vld [vmem:[%s12498_s3 + $0xcc8] sm:$0xff] }
 0x25b   :  { %5640 = vmatpush1.bf16.msra.mxu0 %v5639_v41  ;;  %v5339_v41 = vpack.c.bf16 %v1486_v34, %v1482_v10  ;;  %v1323_v34 = vld [vmem:[%s12498_s3 + $0x710] sm:$0xff] }
 0x25c   :  { %5642 = vmatprep.subr.bf16.mxu0 %v5641_v51  ;;  %v1063_v51 = vsel %vm1058_vm3, %v6662_v20, %v6671_v26  ;;  %v1307_v20 = vld [vmem:[%s12498_s3 + $0x690] sm:$0xff] }
 0x25d   :  { %5330 = vmatpush1.bf16.msra.mxu1 %v5329_v24  ;;  %v1494_v24 = vld [vmem:[%s12498_s3 + $0xc68] sm:$0xff]  ;;  %v1311_v26 = vld [vmem:[%s12498_s3 + $0x6b0] sm:$0xff]  ;;  %v8882_v62 = vmax.f32 %v8219_v54, %v1063_v51 }
 0x25e   :  { %5332 = vmatprep.subr.bf16.mxu1 %v5331_v48  ;;  %v5343_v7 = vpack.c.bf16 %v1494_v24, %v1490_v18  ;;  %v1489_v48 = vld [vmem:[%s12498_s3 + $0xc40] sm:$0xff]  ;;  %v1498_v54 = vld [vmem:[%s12498_s3 + $0xc88] sm:$0xff]  ;;  %v1331_v18 = vld [vmem:[%s12498_s3 + $0x750] sm:$0xff] }
 0x25f   :  { %5644 = vmatpush1.bf16.msra.mxu0 %v5643_v39  ;;  %v5655_v39 = vpack.c.bf16 %v1311_v26, %v1307_v20  ;;  %v5345_v49 = vpack.c.bf16 %v1493_v21, %v1489_v48  ;;  %v5347_v50 = vpack.c.bf16 %v1502_v36, %v1498_v54  ;;  %v1518_v51 = vld [vmem:[%s12498_s3 + $0xd28] sm:$0xff]  ;;  %v1335_v24 = vld [vmem:[%s12498_s3 + $0x770] sm:$0xff]  ;;  %v1344_v20 = vld [vmem:[%s12498_s3 + $0x7b8] sm:$0xff] }
 0x260   :  { %5646 = vmatprep.subr.bf16.mxu0 %v5645_v46  ;;  %v1315_v46 = vld [vmem:[%s12498_s3 + $0x6d0] sm:$0xff]  ;;  %v5355_v26 = vpack.c.bf16 %v1518_v51, %v1514_v44  ;;  %v5667_v14 = vpack.c.bf16 %v1335_v24, %v1331_v18  ;;  %v1526_v48 = vld [vmem:[%s12498_s3 + $0xd68] sm:$0xff]  ;;  %v1368_v18 = vld [vmem:[%s12498_s3 + $0x878] sm:$0xff] }
 0x261   :  { %5334 = vmatpush1.bf16.msra.mxu1 %v5333_v5  ;;  %v1328_v5 = vld [vmem:[%s12498_s3 + $0x738] sm:$0xff]  ;;  %v5659_v1 = vpack.c.bf16 %v1319_v3, %v1315_v46  ;;  %v1343_v54 = vld [vmem:[%s12498_s3 + $0x7b0] sm:$0xff] }
 0x262   :  { %5336 = vmatprep.subr.bf16.mxu1 %v5335_v63  ;;  %v1501_v63 = vld [vmem:[%s12498_s3 + $0xca0] sm:$0xff]  ;;  %v5661_v10 = vpack.c.bf16 %v1328_v5, %v1324_v15  ;;  %v1352_v46 = vld [vmem:[%s12498_s3 + $0x7f8] sm:$0xff]  ;;  %v1359_v44 = vld [vmem:[%s12498_s3 + $0x830] sm:$0xff] }
 0x263   :  { %5648 = vmatpush1.bf16.msra.mxu0 %v5647_v8  ;;  %v1510_v8 = vld [vmem:[%s12498_s3 + $0xce8] sm:$0xff]  ;;  %v5349_v19 = vpack.c.bf16 %v1501_v63, %v1497_v61  ;;  %v1525_v15 = vld [vmem:[%s12498_s3 + $0xd60] sm:$0xff] }
 0x264   :  { %5650 = vmatprep.subr.bf16.mxu0 %v5649_v58  ;;  %v1327_v58 = vld [vmem:[%s12498_s3 + $0x730] sm:$0xff]  ;;  %v5351_v40 = vpack.c.bf16 %v1510_v8, %v1506_v4  ;;  %v1534_v61 = vld [vmem:[%s12498_s3 + $0xda8] sm:$0xff] }
 0x265   :  { %5338 = vmatpush1.bf16.msra.mxu1 %v5337_v43  ;;  %v1336_v43 = vld [vmem:[%s12498_s3 + $0x778] sm:$0xff]  ;;  %v5663_v60 = vpack.c.bf16 %v1327_v58, %v1323_v34  ;;  %v1351_v4 = vld [vmem:[%s12498_s3 + $0x7f0] sm:$0xff] }
 0x266   :  { %5340 = vmatprep.subr.bf16.mxu1 %v5339_v41  ;;  %v1509_v41 = vld [vmem:[%s12498_s3 + $0xce0] sm:$0xff]  ;;  %v1360_v34 = vld [vmem:[%s12498_s3 + $0x838] sm:$0xff] }
 0x267   :  { %5652 = vmatpush1.bf16.msra.mxu0 %v5651_v17  ;;  %v5665_v17 = vpack.c.bf16 %v1336_v43, %v1332_v27  ;;  %v5353_v30 = vpack.c.bf16 %v1509_v41, %v1505_v59  ;;  %v1533_v27 = vld [vmem:[%s12498_s3 + $0xda0] sm:$0xff]  ;;  %v1542_v59 = vld [vmem:[%s12498_s3 + $0xde8] sm:$0xff] }
 0x268   :  { %2121 = vmatmul.mubr.f32.vlgmr.msra.gmra.mrb[6].mxu1 %v8882_v62  ;;  %5654 = vmatprep.subr.bf16.mxu0 %v5653_v45  ;;  %v1340_v45 = vld [vmem:[%s12498_s3 + $0x798] sm:$0xff] }
 0x269   :  { %5342 = vmatpush1.bf16.msra.mxu1 %v5341_v42  ;;  %2191 = vmatprep.mubr.f32.mxu1 %v8891_v53  ;;  %v1513_v42 = vld [vmem:[%s12498_s3 + $0xd00] sm:$0xff]  ;;  %v5669_v21 = vpack.c.bf16 %v1344_v20, %v1340_v45 }
 0x26a   :  { %5344 = vmatprep.subr.bf16.mxu1 %v5343_v7  ;;  %v1522_v7 = vld [vmem:[%s12498_s3 + $0xd48] sm:$0xff]  ;;  %v5357_v36 = vpack.c.bf16 %v1517_v29, %v1513_v42  ;;  %v1541_v45 = vld [vmem:[%s12498_s3 + $0xde0] sm:$0xff] }
 0x26b   :  { %5656 = vmatpush1.bf16.msra.mxu0 %v5655_v39  ;;  %v1339_v39 = vld [vmem:[%s12498_s3 + $0x790] sm:$0xff]  ;;  %v5359_v3 = vpack.c.bf16 %v1526_v48, %v1522_v7  ;;  %v1550_v42 = vld [vmem:[%s12498_s3 + $0xe28] sm:$0xff] }
 0x26c   :  { %5658 = vmatprep.subr.bf16.mxu0 %v5657_v47  ;;  %v1348_v47 = vld [vmem:[%s12498_s3 + $0x7d8] sm:$0xff]  ;;  %v5671_v5 = vpack.c.bf16 %v1343_v54, %v1339_v39  ;;  %v1367_v7 = vld [vmem:[%s12498_s3 + $0x870] sm:$0xff] }
 0x26d   :  { %5346 = vmatpush1.bf16.msra.mxu1 %v5345_v49  ;;  %v1521_v49 = vld [vmem:[%s12498_s3 + $0xd40] sm:$0xff]  ;;  %v5673_v63 = vpack.c.bf16 %v1352_v46, %v1348_v47  ;;  %v1376_v39 = vld [vmem:[%s12498_s3 + $0x8b8] sm:$0xff] }
 0x26e   :  { %5348 = vmatprep.subr.bf16.mxu1 %v5347_v50  ;;  %v1530_v50 = vld [vmem:[%s12498_s3 + $0xd88] sm:$0xff]  ;;  %v5361_v8 = vpack.c.bf16 %v1525_v15, %v1521_v49  ;;  %v1549_v47 = vld [vmem:[%s12498_s3 + $0xe20] sm:$0xff]  ;;  %v1371_v15 = vld [vmem:[%s12498_s3 + $0x890] sm:$0xff] }
 0x26f   :  { %5660 = vmatpush1.bf16.msra.mxu0 %v5659_v1  ;;  %v1347_v1 = vld [vmem:[%s12498_s3 + $0x7d0] sm:$0xff]  ;;  %v5363_v58 = vpack.c.bf16 %v1534_v61, %v1530_v50  ;;  %v1380_v50 = vld [vmem:[%s12498_s3 + $0x8d8] sm:$0xff] }
 0x270   :  { %5662 = vmatprep.subr.bf16.mxu0 %v5661_v10  ;;  %v1356_v10 = vld [vmem:[%s12498_s3 + $0x818] sm:$0xff]  ;;  %v5675_v43 = vpack.c.bf16 %v1351_v4, %v1347_v1  ;;  %v1553_v1 = vld [vmem:[%s12498_s3 + $0xe40] sm:$0xff] }
 0x271   :  { %5350 = vmatpush1.bf16.msra.mxu1 %v5349_v19  ;;  %v1529_v19 = vld [vmem:[%s12498_s3 + $0xd80] sm:$0xff]  ;;  %v5677_v41 = vpack.c.bf16 %v1360_v34, %v1356_v10  ;;  %v1384_v61 = vld [vmem:[%s12498_s3 + $0x8f8] sm:$0xff]  ;;  %v1562_v10 = vld [vmem:[%s12498_s3 + $0xe88] sm:$0xff] }
 0x272   :  { %5352 = vmatprep.subr.bf16.mxu1 %v5351_v40  ;;  %v1538_v40 = vld [vmem:[%s12498_s3 + $0xdc8] sm:$0xff]  ;;  %v5365_v51 = vpack.c.bf16 %v1533_v27, %v1529_v19  ;;  %v1557_v4 = vld [vmem:[%s12498_s3 + $0xe60] sm:$0xff]  ;;  %v1379_v19 = vld [vmem:[%s12498_s3 + $0x8d0] sm:$0xff] }
 0x273   :  { %5664 = vmatpush1.bf16.msra.mxu0 %v5663_v60  ;;  %v1355_v60 = vld [vmem:[%s12498_s3 + $0x810] sm:$0xff]  ;;  %v5367_v24 = vpack.c.bf16 %v1542_v59, %v1538_v40  ;;  %v1566_v34 = vld [vmem:[%s12498_s3 + $0xea8] sm:$0xff]  ;;  %v1388_v40 = vld [vmem:[%s12498_s3 + $0x918] sm:$0xff] }
 0x274   :  { %5666 = vmatprep.subr.bf16.mxu0 %v5665_v17  ;;  %v1364_v17 = vld [vmem:[%s12498_s3 + $0x858] sm:$0xff]  ;;  %v5679_v20 = vpack.c.bf16 %v1359_v44, %v1355_v60  ;;  %v1383_v27 = vld [vmem:[%s12498_s3 + $0x8f0] sm:$0xff]  ;;  %v1561_v60 = vld [vmem:[%s12498_s3 + $0xe80] sm:$0xff] }
 0x275   :  { %5354 = vmatpush1.bf16.msra.mxu1 %v5353_v30  ;;  %v1537_v30 = vld [vmem:[%s12498_s3 + $0xdc0] sm:$0xff]  ;;  %v5681_v29 = vpack.c.bf16 %v1368_v18, %v1364_v17  ;;  %v1392_v59 = vld [vmem:[%s12498_s3 + $0x938] sm:$0xff]  ;;  %v1570_v17 = vld [vmem:[%s12498_s3 + $0xec8] sm:$0xff] }
 0x276   :  { %5356 = vmatprep.subr.bf16.mxu1 %v5355_v26  ;;  %v1546_v26 = vld [vmem:[%s12498_s3 + $0xe08] sm:$0xff]  ;;  %v5369_v48 = vpack.c.bf16 %v1541_v45, %v1537_v30  ;;  %v1565_v44 = vld [vmem:[%s12498_s3 + $0xea0] sm:$0xff]  ;;  %v1387_v30 = vld [vmem:[%s12498_s3 + $0x910] sm:$0xff] }
 0x277   :  { %5668 = vmatpush1.bf16.msra.mxu0 %v5667_v14  ;;  %v1363_v14 = vld [vmem:[%s12498_s3 + $0x850] sm:$0xff]  ;;  %v5371_v54 = vpack.c.bf16 %v1550_v42, %v1546_v26  ;;  %v1574_v18 = vld [vmem:[%s12498_s3 + $0xee8] sm:$0xff]  ;;  %v1396_v26 = vld [vmem:[%s12498_s3 + $0x958] sm:$0xff] }
 0x278   :  { %5670 = vmatprep.subr.bf16.mxu0 %v5669_v21  ;;  %v1372_v21 = vld [vmem:[%s12498_s3 + $0x898] sm:$0xff]  ;;  %v5683_v46 = vpack.c.bf16 %v1367_v7, %v1363_v14  ;;  %v1391_v45 = vld [vmem:[%s12498_s3 + $0x930] sm:$0xff]  ;;  %v1569_v14 = vld [vmem:[%s12498_s3 + $0xec0] sm:$0xff] }
 0x279   :  { %5358 = vmatpush1.bf16.msra.mxu1 %v5357_v36  ;;  %v1545_v36 = vld [vmem:[%s12498_s3 + $0xe00] sm:$0xff]  ;;  %v5685_v49 = vpack.c.bf16 %v1376_v39, %v1372_v21  ;;  %v1400_v42 = vld [vmem:[%s12498_s3 + $0x978] sm:$0xff]  ;;  %v1578_v21 = vld [vmem:[%s12498_s3 + $0xf08] sm:$0xff] }
 0x27a   :  { %5360 = vmatprep.subr.bf16.mxu1 %v5359_v3  ;;  %v1554_v3 = vld [vmem:[%s12498_s3 + $0xe48] sm:$0xff]  ;;  %v1573_v7 = vld [vmem:[%s12498_s3 + $0xee0] sm:$0xff] }
 0x27b   :  { %5672 = vmatpush1.bf16.msra.mxu0 %v5671_v5  ;;  %v1375_v5 = vld [vmem:[%s12498_s3 + $0x8b0] sm:$0xff]  ;;  %v1582_v39 = vld [vmem:[%s12498_s3 + $0xf28] sm:$0xff] }
 0x27c   :  { %5674 = vmatprep.subr.bf16.mxu0 %v5673_v63 }
 0x27d   :  { %5362 = vmatpush1.bf16.msra.mxu1 %v5361_v8  ;;  %v5687_v8 = vpack.c.bf16 %v1375_v5, %v1371_v15  ;;  %v1577_v15 = vld [vmem:[%s12498_s3 + $0xf00] sm:$0xff] }
 0x27e   :  { %5364 = vmatprep.subr.bf16.mxu1 %v5363_v58  ;;  %v5689_v58 = vpack.c.bf16 %v1384_v61, %v1380_v50  ;;  %v1581_v5 = vld [vmem:[%s12498_s3 + $0xf20] sm:$0xff]  ;;  %v1586_v50 = vld [vmem:[%s12498_s3 + $0xf48] sm:$0xff] }
 0x27f   :  { %5676 = vmatpush1.bf16.msra.mxu0 %v5675_v43  ;;  %v5377_v43 = vpack.c.bf16 %v1557_v4, %v1553_v1  ;;  %v1590_v61 = vld [vmem:[%s12498_s3 + $0xf68] sm:$0xff]  ;;  %v1403_v1 = vld [vmem:[%s12498_s3 + $0x990] sm:$0xff] }
 0x280   :  { %5678 = vmatprep.subr.bf16.mxu0 %v5677_v41  ;;  %v5379_v41 = vpack.c.bf16 %v1566_v34, %v1562_v10  ;;  %v1407_v4 = vld [vmem:[%s12498_s3 + $0x9b0] sm:$0xff]  ;;  %v1412_v10 = vld [vmem:[%s12498_s3 + $0x9d8] sm:$0xff] }
 0x281   :  { %5366 = vmatpush1.bf16.msra.mxu1 %v5365_v51  ;;  %v5691_v51 = vpack.c.bf16 %v1383_v27, %v1379_v19  ;;  %v1416_v34 = vld [vmem:[%s12498_s3 + $0x9f8] sm:$0xff]  ;;  %v1585_v19 = vld [vmem:[%s12498_s3 + $0xf40] sm:$0xff] }
 0x282   :  { %2547 = vmatmul.mubr.f32.vlgmr.msra.gmra.mrb[10].mxu0 %v8438_v13  ;;  %5368 = vmatprep.subr.bf16.mxu1 %v5367_v24  ;;  %v1558_v13 = vld [vmem:[%s12498_s3 + $0xe68] sm:$0xff]  ;;  %v5693_v24 = vpack.c.bf16 %v1392_v59, %v1388_v40  ;;  %v1589_v27 = vld [vmem:[%s12498_s3 + $0xf60] sm:$0xff] }
 0x283   :  { %5680 = vmatpush1.bf16.msra.mxu0 %v5679_v20  ;;  %2617 = vmatprep.mubr.f32.mxu0 %v8479_v22  ;;  %v5373_v22 = vpack.c.bf16 %v1549_v47, %v1545_v36  ;;  %v5375_v63 = vpack.c.bf16 %v1558_v13, %v1554_v3  ;;  %v5381_v20 = vpack.c.bf16 %v1565_v44, %v1561_v60  ;;  %v1395_v36 = vld [vmem:[%s12498_s3 + $0x950] sm:$0xff]  ;;  %v1404_v3 = vld [vmem:[%s12498_s3 + $0x998] sm:$0xff]  ;;  %v1594_v40 = vld [vmem:[%s12498_s3 + $0xf88] sm:$0xff] }
 0x284   :  { %5682 = vmatprep.subr.bf16.mxu0 %v5681_v29  ;;  %v5383_v29 = vpack.c.bf16 %v1574_v18, %v1570_v17  ;;  %v1399_v47 = vld [vmem:[%s12498_s3 + $0x970] sm:$0xff]  ;;  %v1408_v13 = vld [vmem:[%s12498_s3 + $0x9b8] sm:$0xff]  ;;  %v1598_v59 = vld [vmem:[%s12498_s3 + $0xfa8] sm:$0xff] }
 0x285   :  { %5370 = vmatpush1.bf16.msra.mxu1 %v5369_v48  ;;  %v5695_v48 = vpack.c.bf16 %v1391_v45, %v1387_v30  ;;  %v1411_v60 = vld [vmem:[%s12498_s3 + $0x9d0] sm:$0xff]  ;;  %v1420_v17 = vld [vmem:[%s12498_s3 + $0xa18] sm:$0xff]  ;;  %v1593_v30 = vld [vmem:[%s12498_s3 + $0xf80] sm:$0xff] }
 0x286   :  { %5372 = vmatprep.subr.bf16.mxu1 %v5371_v54  ;;  %v5697_v54 = vpack.c.bf16 %v1400_v42, %v1396_v26  ;;  %v1415_v44 = vld [vmem:[%s12498_s3 + $0x9f0] sm:$0xff]  ;;  %v1424_v18 = vld [vmem:[%s12498_s3 + $0xa38] sm:$0xff]  ;;  %v1597_v45 = vld [vmem:[%s12498_s3 + $0xfa0] sm:$0xff] }
 0x287   :  { %5684 = vmatpush1.bf16.msra.mxu0 %v5683_v46  ;;  %v5385_v46 = vpack.c.bf16 %v1573_v7, %v1569_v14  ;;  %v1602_v26 = vld [vmem:[%s12498_s3 + $0xfc8] sm:$0xff]  ;;  %v1419_v14 = vld [vmem:[%s12498_s3 + $0xa10] sm:$0xff] }
 0x288   :  { %5686 = vmatprep.subr.bf16.mxu0 %v5685_v49  ;;  %v5387_v49 = vpack.c.bf16 %v1582_v39, %v1578_v21  ;;  %v1606_v42 = vld [vmem:[%s12498_s3 + $0xfe8] sm:$0xff]  ;;  %v1423_v7 = vld [vmem:[%s12498_s3 + $0xa30] sm:$0xff]  ;;  %v1428_v21 = vld [vmem:[%s12498_s3 + $0xa58] sm:$0xff] }
 0x289   :  { %5374 = vmatpush1.bf16.msra.mxu1 %v5373_v22  ;;  %v5699_v22 = vpack.c.bf16 %v1399_v47, %v1395_v36  ;;  %v1432_v39 = vld [vmem:[%s12498_s3 + $0xa78] sm:$0xff]  ;;  %v1601_v36 = vld [vmem:[%s12498_s3 + $0xfc0] sm:$0xff] }
 0x28a   :  { %5376 = vmatprep.subr.bf16.mxu1 %v5375_v63  ;;  %v5701_v63 = vpack.c.bf16 %v1408_v13, %v1404_v3  ;;  %v1605_v47 = vld [vmem:[%s12498_s3 + $0xfe0] sm:$0xff]  ;;  %v1610_v3 = vld [vmem:[%s12498_s3 + $0x1008] sm:$0xff] }
 0x28b   :  { %5688 = vmatpush1.bf16.msra.mxu0 %v5687_v8  ;;  %v5389_v8 = vpack.c.bf16 %v1581_v5, %v1577_v15  ;;  %v1614_v13 = vld [vmem:[%s12498_s3 + $0x1028] sm:$0xff]  ;;  %v5713_v15 = vpack.c.bf16 %v1432_v39, %v1428_v21  ;;  %v1427_v5 = vld [vmem:[%s12498_s3 + $0xa50] sm:$0xff] }
 0x28c   :  { %5690 = vmatprep.subr.bf16.mxu0 %v5689_v58  ;;  %v5391_v58 = vpack.c.bf16 %v1590_v61, %v1586_v50  ;;  %v5401_v50 = vpack.c.bf16 %v1605_v47, %v1601_v36  ;;  %v1436_v61 = vld [vmem:[%s12498_s3 + $0xa98] sm:$0xff]  ;;  %v1634_v21 = vld [vmem:[%s12498_s3 + $0x10c8] sm:$0xff]  ;;  %v1451_v36 = vld [vmem:[%s12498_s3 + $0xb10] sm:$0xff] }
 0x28d   :  { %5378 = vmatpush1.bf16.msra.mxu1 %v5377_v43  ;;  %v5703_v43 = vpack.c.bf16 %v1407_v4, %v1403_v1  ;;  %v5403_v1 = vpack.c.bf16 %v1614_v13, %v1610_v3  ;;  %v1609_v4 = vld [vmem:[%s12498_s3 + $0x1000] sm:$0xff]  ;;  %v1638_v39 = vld [vmem:[%s12498_s3 + $0x10e8] sm:$0xff]  ;;  %v1455_v47 = vld [vmem:[%s12498_s3 + $0xb30] sm:$0xff] }
 0x28e   :  { %5380 = vmatprep.subr.bf16.mxu1 %v5379_v41  ;;  %v5705_v41 = vpack.c.bf16 %v1416_v34, %v1412_v10  ;;  %v1618_v34 = vld [vmem:[%s12498_s3 + $0x1048] sm:$0xff]  ;;  %v1460_v3 = vld [vmem:[%s12498_s3 + $0xb58] sm:$0xff] }
 0x28f   :  { %5692 = vmatpush1.bf16.msra.mxu0 %v5691_v51  ;;  %v5393_v51 = vpack.c.bf16 %v1589_v27, %v1585_v19  ;;  %v1464_v13 = vld [vmem:[%s12498_s3 + $0xb78] sm:$0xff] }
 0x290   :  { %5694 = vmatprep.subr.bf16.mxu0 %v5693_v24  ;;  %v5395_v24 = vpack.c.bf16 %v1598_v59, %v1594_v40  ;;  %v1439_v40 = vld [vmem:[%s12498_s3 + $0xab0] sm:$0xff] }
 0x291   :  { %5382 = vmatpush1.bf16.msra.mxu1 %v5381_v20  ;;  %v5707_v20 = vpack.c.bf16 %v1415_v44, %v1411_v60  ;;  %v1448_v60 = vld [vmem:[%s12498_s3 + $0xaf8] sm:$0xff] }
 0x292   :  { %5384 = vmatprep.subr.bf16.mxu1 %v5383_v29  ;;  %v5709_v29 = vpack.c.bf16 %v1424_v18, %v1420_v17  ;;  %v1621_v17 = vld [vmem:[%s12498_s3 + $0x1060] sm:$0xff] }
 0x293   :  { %5696 = vmatpush1.bf16.msra.mxu0 %v5695_v48  ;;  %v5397_v48 = vpack.c.bf16 %v1597_v45, %v1593_v30  ;;  %v1443_v45 = vld [vmem:[%s12498_s3 + $0xad0] sm:$0xff] }
 0x294   :  { %5698 = vmatprep.subr.bf16.mxu0 %v5697_v54  ;;  %v5399_v54 = vpack.c.bf16 %v1606_v42, %v1602_v26  ;;  %v1452_v26 = vld [vmem:[%s12498_s3 + $0xb18] sm:$0xff] }
 0x295   :  { %5386 = vmatpush1.bf16.msra.mxu1 %v5385_v46  ;;  %v5711_v46 = vpack.c.bf16 %v1423_v7, %v1419_v14  ;;  %v1456_v42 = vld [vmem:[%s12498_s3 + $0xb38] sm:$0xff]  ;;  %v1625_v14 = vld [vmem:[%s12498_s3 + $0x1080] sm:$0xff] }
 0x296   :  { %5388 = vmatprep.subr.bf16.mxu1 %v5387_v49  ;;  %v6692_v49 = vunpack.i.h.bf16 %v8722_v11  ;;  %v1629_v7 = vld [vmem:[%s12498_s3 + $0x10a0] sm:$0xff]  ;;  %v1695_v11 = vld [vmem:[%s12498_s3 + $0x12b0] sm:$0xff] }
 0x297   :  { %5700 = vmatpush1.bf16.msra.mxu0 %v5699_v22  ;;  %v1431_v22 = vld [vmem:[%s12498_s3 + $0xa70] sm:$0xff] }
 0x298   :  { %5702 = vmatprep.subr.bf16.mxu0 %v5701_v63  ;;  %v1440_v63 = vld [vmem:[%s12498_s3 + $0xab8] sm:$0xff]  ;;  %v5715_v10 = vpack.c.bf16 %v1431_v22, %v1427_v5  ;;  %v1068_v19 = vsel %vm1058_vm3, %v6691_v38, %v6692_v49  ;;  %v9283_v38 = vmax.f32 %v8232_v52, %v8714_v23  ;;  %v1626_v52 = vld [vmem:[%s12498_s3 + $0x1088] sm:$0xff]  ;;  %v1633_v5 = vld [vmem:[%s12498_s3 + $0x10c0] sm:$0xff] }
 0x299   :  { %5390 = vmatpush1.bf16.msra.mxu1 %v5389_v8  ;;  %v1613_v8 = vld [vmem:[%s12498_s3 + $0x1020] sm:$0xff]  ;;  %v5717_v27 = vpack.c.bf16 %v1440_v63, %v1436_v61  ;;  %v9292_v18 = vmax.f32 %v8254_v9, %v1068_v19  ;;  %v1630_v23 = vld [vmem:[%s12498_s3 + $0x10a8] sm:$0xff]  ;;  %v1447_v9 = vld [vmem:[%s12498_s3 + $0xaf0] sm:$0xff] }
 0x29a   :  { %5392 = vmatprep.subr.bf16.mxu1 %v5391_v58  ;;  %v1622_v58 = vld [vmem:[%s12498_s3 + $0x1068] sm:$0xff]  ;;  %v5405_v59 = vpack.c.bf16 %v1613_v8, %v1609_v4  ;;  %v1637_v22 = vld [vmem:[%s12498_s3 + $0x10e0] sm:$0xff]  ;;  %v1459_v4 = vld [vmem:[%s12498_s3 + $0xb50] sm:$0xff] }
 0x29b   :  { %5704 = vmatpush1.bf16.msra.mxu0 %v5703_v43  ;;  %v1435_v43 = vld [vmem:[%s12498_s3 + $0xa90] sm:$0xff]  ;;  %v5407_v44 = vpack.c.bf16 %v1622_v58, %v1618_v34  ;;  %v1642_v61 = vld [vmem:[%s12498_s3 + $0x1108] sm:$0xff]  ;;  %v1468_v34 = vld [vmem:[%s12498_s3 + $0xb98] sm:$0xff] }
 0x29c   :  { %5706 = vmatprep.subr.bf16.mxu0 %v5705_v41  ;;  %v1444_v41 = vld [vmem:[%s12498_s3 + $0xad8] sm:$0xff]  ;;  %v1646_v63 = vld [vmem:[%s12498_s3 + $0x1128] sm:$0xff]  ;;  %v1463_v8 = vld [vmem:[%s12498_s3 + $0xb70] sm:$0xff] }
 0x29d   :  { %5394 = vmatpush1.bf16.msra.mxu1 %v5393_v51  ;;  %v1617_v51 = vld [vmem:[%s12498_s3 + $0x1040] sm:$0xff]  ;;  %v5721_v30 = vpack.c.bf16 %v1448_v60, %v1444_v41  ;;  %v1472_v58 = vld [vmem:[%s12498_s3 + $0xbb8] sm:$0xff]  ;;  %v5419_v19 = vpack.c.bf16 %v1646_v63, %v1642_v61  ;;  %v1654_v41 = vld [vmem:[%s12498_s3 + $0x1168] sm:$0xff] }
 0x29e   :  { %5396 = vmatprep.subr.bf16.mxu1 %v5395_v24  ;;  %v5719_v24 = vpack.c.bf16 %v1439_v40, %v1435_v43  ;;  %v1645_v43 = vld [vmem:[%s12498_s3 + $0x1120] sm:$0xff]  ;;  %v5731_v40 = vpack.c.bf16 %v1463_v8, %v1459_v4  ;;  %v5733_v60 = vpack.c.bf16 %v1472_v58, %v1468_v34  ;;  %v1496_v61 = vld [vmem:[%s12498_s3 + $0xc78] sm:$0xff]  ;;  %v1678_v34 = vld [vmem:[%s12498_s3 + $0x1228] sm:$0xff] }
 0x29f   :  { %5708 = vmatpush1.bf16.msra.mxu0 %v5707_v20  ;;  %v5409_v20 = vpack.c.bf16 %v1621_v17, %v1617_v51  ;;  %v1471_v51 = vld [vmem:[%s12498_s3 + $0xbb0] sm:$0xff]  ;;  %v1669_v4 = vld [vmem:[%s12498_s3 + $0x11e0] sm:$0xff] }
 0x2a0   :  { %5710 = vmatprep.subr.bf16.mxu0 %v5709_v29  ;;  %v5411_v29 = vpack.c.bf16 %v1630_v23, %v1626_v52  ;;  %v1480_v52 = vld [vmem:[%s12498_s3 + $0xbf8] sm:$0xff] }
 0x2a1   :  { %5398 = vmatpush1.bf16.msra.mxu1 %v5397_v48  ;;  %v5723_v48 = vpack.c.bf16 %v1447_v9, %v1443_v45  ;;  %v1653_v45 = vld [vmem:[%s12498_s3 + $0x1160] sm:$0xff] }
 0x2a2   :  { %5400 = vmatprep.subr.bf16.mxu1 %v5399_v54  ;;  %v5725_v54 = vpack.c.bf16 %v1456_v42, %v1452_v26  ;;  %v1662_v26 = vld [vmem:[%s12498_s3 + $0x11a8] sm:$0xff] }
 0x2a3   :  { %5712 = vmatpush1.bf16.msra.mxu0 %v5711_v46  ;;  %v5413_v46 = vpack.c.bf16 %v1629_v7, %v1625_v14  ;;  %v1479_v14 = vld [vmem:[%s12498_s3 + $0xbf0] sm:$0xff] }
 0x2a4   :  { %5714 = vmatprep.subr.bf16.mxu0 %v5713_v15  ;;  %v5415_v15 = vpack.c.bf16 %v1638_v39, %v1634_v21  ;;  %v1488_v21 = vld [vmem:[%s12498_s3 + $0xc38] sm:$0xff] }
 0x2a5   :  { %5402 = vmatpush1.bf16.msra.mxu1 %v5401_v50  ;;  %v5727_v50 = vpack.c.bf16 %v1455_v47, %v1451_v36  ;;  %v1661_v36 = vld [vmem:[%s12498_s3 + $0x11a0] sm:$0xff] }
 0x2a6   :  { %5404 = vmatprep.subr.bf16.mxu1 %v5403_v1  ;;  %v5729_v1 = vpack.c.bf16 %v1464_v13, %v1460_v3  ;;  %v1670_v3 = vld [vmem:[%s12498_s3 + $0x11e8] sm:$0xff] }
 0x2a7   :  { %5716 = vmatpush1.bf16.msra.mxu0 %v5715_v10  ;;  %v5417_v10 = vpack.c.bf16 %v1637_v22, %v1633_v5  ;;  %v1487_v5 = vld [vmem:[%s12498_s3 + $0xc30] sm:$0xff] }
 0x2a8   :  { %2192 = vmatmul.mubr.f32.vlgmr.msra.gmra.mrb[6].mxu1 %v9283_v38  ;;  %5718 = vmatprep.subr.bf16.mxu0 %v5717_v27  ;;  %v1641_v27 = vld [vmem:[%s12498_s3 + $0x1100] sm:$0xff] }
 0x2a9   :  { %5406 = vmatpush1.bf16.msra.mxu1 %v5405_v59  ;;  %2262 = vmatprep.mubr.f32.mxu1 %v9292_v18  ;;  %v1650_v59 = vld [vmem:[%s12498_s3 + $0x1148] sm:$0xff]  ;;  %v5421_v17 = vpack.c.bf16 %v1645_v43, %v1641_v27  ;;  %v1495_v27 = vld [vmem:[%s12498_s3 + $0xc70] sm:$0xff] }
 0x2aa   :  { %5408 = vmatprep.subr.bf16.mxu1 %v5407_v44  ;;  %v1467_v44 = vld [vmem:[%s12498_s3 + $0xb90] sm:$0xff]  ;;  %v5423_v23 = vpack.c.bf16 %v1654_v41, %v1650_v59  ;;  %v1504_v59 = vld [vmem:[%s12498_s3 + $0xcb8] sm:$0xff] }
 0x2ab   :  { %5720 = vmatpush1.bf16.msra.mxu0 %v5719_v24  ;;  %v1476_v24 = vld [vmem:[%s12498_s3 + $0xbd8] sm:$0xff]  ;;  %v5735_v9 = vpack.c.bf16 %v1471_v51, %v1467_v44  ;;  %v1677_v44 = vld [vmem:[%s12498_s3 + $0x1220] sm:$0xff] }
 0x2ac   :  { %5722 = vmatprep.subr.bf16.mxu0 %v5721_v30  ;;  %v1649_v30 = vld [vmem:[%s12498_s3 + $0x1140] sm:$0xff]  ;;  %v5737_v42 = vpack.c.bf16 %v1480_v52, %v1476_v24  ;;  %v1499_v52 = vld [vmem:[%s12498_s3 + $0xc90] sm:$0xff] }
 0x2ad   :  { %5410 = vmatpush1.bf16.msra.mxu1 %v5409_v20  ;;  %v1658_v20 = vld [vmem:[%s12498_s3 + $0x1188] sm:$0xff]  ;;  %v5425_v7 = vpack.c.bf16 %v1653_v45, %v1649_v30  ;;  %v1508_v30 = vld [vmem:[%s12498_s3 + $0xcd8] sm:$0xff] }
 0x2ae   :  { %5412 = vmatprep.subr.bf16.mxu1 %v5411_v29  ;;  %v1475_v29 = vld [vmem:[%s12498_s3 + $0xbd0] sm:$0xff]  ;;  %v5427_v39 = vpack.c.bf16 %v1662_v26, %v1658_v20  ;;  %v1512_v45 = vld [vmem:[%s12498_s3 + $0xcf8] sm:$0xff]  ;;  %v1681_v20 = vld [vmem:[%s12498_s3 + $0x1240] sm:$0xff] }
 0x2af   :  { %5724 = vmatpush1.bf16.msra.mxu0 %v5723_v48  ;;  %v1484_v48 = vld [vmem:[%s12498_s3 + $0xc18] sm:$0xff]  ;;  %v5739_v47 = vpack.c.bf16 %v1479_v14, %v1475_v29  ;;  %v1685_v26 = vld [vmem:[%s12498_s3 + $0x1260] sm:$0xff]  ;;  %v1690_v29 = vld [vmem:[%s12498_s3 + $0x1288] sm:$0xff] }
 0x2b0   :  { %5726 = vmatprep.subr.bf16.mxu0 %v5725_v54  ;;  %v1657_v54 = vld [vmem:[%s12498_s3 + $0x1180] sm:$0xff]  ;;  %v5741_v13 = vpack.c.bf16 %v1488_v21, %v1484_v48  ;;  %v1694_v14 = vld [vmem:[%s12498_s3 + $0x12a8] sm:$0xff]  ;;  %v1507_v48 = vld [vmem:[%s12498_s3 + $0xcd0] sm:$0xff] }
 0x2b1   :  { %5414 = vmatpush1.bf16.msra.mxu1 %v5413_v46  ;;  %v1666_v46 = vld [vmem:[%s12498_s3 + $0x11c8] sm:$0xff]  ;;  %v5429_v22 = vpack.c.bf16 %v1661_v36, %v1657_v54  ;;  %v1511_v21 = vld [vmem:[%s12498_s3 + $0xcf0] sm:$0xff]  ;;  %v1516_v54 = vld [vmem:[%s12498_s3 + $0xd18] sm:$0xff] }
 0x2b2   :  { %5416 = vmatprep.subr.bf16.mxu1 %v5415_v15  ;;  %v1483_v15 = vld [vmem:[%s12498_s3 + $0xc10] sm:$0xff]  ;;  %v5431_v63 = vpack.c.bf16 %v1670_v3, %v1666_v46  ;;  %v1520_v36 = vld [vmem:[%s12498_s3 + $0xd38] sm:$0xff]  ;;  %v1689_v46 = vld [vmem:[%s12498_s3 + $0x1280] sm:$0xff] }
 0x2b3   :  { %5728 = vmatpush1.bf16.msra.mxu0 %v5727_v50  ;;  %v1492_v50 = vld [vmem:[%s12498_s3 + $0xc58] sm:$0xff]  ;;  %v5743_v8 = vpack.c.bf16 %v1487_v5, %v1483_v15  ;;  %v1693_v3 = vld [vmem:[%s12498_s3 + $0x12a0] sm:$0xff]  ;;  %v1698_v15 = vld [vmem:[%s12498_s3 + $0x12c8] sm:$0xff] }
 0x2b4   :  { %5730 = vmatprep.subr.bf16.mxu0 %v5729_v1  ;;  %v1665_v1 = vld [vmem:[%s12498_s3 + $0x11c0] sm:$0xff]  ;;  %v5745_v58 = vpack.c.bf16 %v1496_v61, %v1492_v50  ;;  %v1702_v5 = vld [vmem:[%s12498_s3 + $0x12e8] sm:$0xff]  ;;  %v1515_v50 = vld [vmem:[%s12498_s3 + $0xd10] sm:$0xff] }
 0x2b5   :  { %5418 = vmatpush1.bf16.msra.mxu1 %v5417_v10  ;;  %v1674_v10 = vld [vmem:[%s12498_s3 + $0x1208] sm:$0xff]  ;;  %v5433_v43 = vpack.c.bf16 %v1669_v4, %v1665_v1  ;;  %v1519_v61 = vld [vmem:[%s12498_s3 + $0xd30] sm:$0xff]  ;;  %v1524_v1 = vld [vmem:[%s12498_s3 + $0xd58] sm:$0xff] }
 0x2b6   :  { %5420 = vmatprep.subr.bf16.mxu1 %v5419_v19  ;;  %v1491_v19 = vld [vmem:[%s12498_s3 + $0xc50] sm:$0xff]  ;;  %v5435_v41 = vpack.c.bf16 %v1678_v34, %v1674_v10  ;;  %v1528_v4 = vld [vmem:[%s12498_s3 + $0xd78] sm:$0xff]  ;;  %v1697_v10 = vld [vmem:[%s12498_s3 + $0x12c0] sm:$0xff] }
 0x2b7   :  { %5732 = vmatpush1.bf16.msra.mxu0 %v5731_v40  ;;  %v1500_v40 = vld [vmem:[%s12498_s3 + $0xc98] sm:$0xff]  ;;  %v5747_v51 = vpack.c.bf16 %v1495_v27, %v1491_v19  ;;  %v1701_v34 = vld [vmem:[%s12498_s3 + $0x12e0] sm:$0xff]  ;;  %v1706_v19 = vld [vmem:[%s12498_s3 + $0x1308] sm:$0xff] }
 0x2b8   :  { %5734 = vmatprep.subr.bf16.mxu0 %v5733_v60  ;;  %v1673_v60 = vld [vmem:[%s12498_s3 + $0x1200] sm:$0xff]  ;;  %v5749_v24 = vpack.c.bf16 %v1504_v59, %v1500_v40  ;;  %v1710_v27 = vld [vmem:[%s12498_s3 + $0x1328] sm:$0xff]  ;;  %v1523_v40 = vld [vmem:[%s12498_s3 + $0xd50] sm:$0xff] }
 0x2b9   :  { %5422 = vmatpush1.bf16.msra.mxu1 %v5421_v17  ;;  %v1682_v17 = vld [vmem:[%s12498_s3 + $0x1248] sm:$0xff]  ;;  %v1527_v59 = vld [vmem:[%s12498_s3 + $0xd70] sm:$0xff] }
 0x2ba   :  { %5424 = vmatprep.subr.bf16.mxu1 %v5423_v23  ;;  %v1503_v23 = vld [vmem:[%s12498_s3 + $0xcb0] sm:$0xff] }
 0x2bb   :  { %5736 = vmatpush1.bf16.msra.mxu0 %v5735_v9 }
 0x2bc   :  { %5738 = vmatprep.subr.bf16.mxu0 %v5737_v42  ;;  %v5751_v42 = vpack.c.bf16 %v1503_v23, %v1499_v52  ;;  %v1714_v52 = vld [vmem:[%s12498_s3 + $0x1348] sm:$0xff] }
 0x2bd   :  { %5426 = vmatpush1.bf16.msra.mxu1 %v5425_v7  ;;  %v5753_v7 = vpack.c.bf16 %v1512_v45, %v1508_v30  ;;  %v1718_v23 = vld [vmem:[%s12498_s3 + $0x1368] sm:$0xff]  ;;  %v1531_v30 = vld [vmem:[%s12498_s3 + $0xd90] sm:$0xff] }
 0x2be   :  { %5428 = vmatprep.subr.bf16.mxu1 %v5427_v39  ;;  %v5441_v39 = vpack.c.bf16 %v1685_v26, %v1681_v20  ;;  %v1535_v45 = vld [vmem:[%s12498_s3 + $0xdb0] sm:$0xff]  ;;  %v1540_v26 = vld [vmem:[%s12498_s3 + $0xdd8] sm:$0xff] }
 0x2bf   :  { %5740 = vmatpush1.bf16.msra.mxu0 %v5739_v47  ;;  %v5443_v47 = vpack.c.bf16 %v1694_v14, %v1690_v29  ;;  %v5455_v14 = vpack.c.bf16 %v1718_v23, %v1714_v52  ;;  %v1564_v23 = vld [vmem:[%s12498_s3 + $0xe98] sm:$0xff] }
 0x2c0   :  { %5742 = vmatprep.subr.bf16.mxu0 %v5741_v13  ;;  %v5755_v13 = vpack.c.bf16 %v1511_v21, %v1507_v48  ;;  %v1717_v48 = vld [vmem:[%s12498_s3 + $0x1360] sm:$0xff]  ;;  %v5767_v21 = vpack.c.bf16 %v1535_v45, %v1531_v30 }
 0x2c1   :  { %5430 = vmatpush1.bf16.msra.mxu1 %v5429_v22  ;;  %v5757_v22 = vpack.c.bf16 %v1520_v36, %v1516_v54  ;;  %v1726_v54 = vld [vmem:[%s12498_s3 + $0x13a8] sm:$0xff]  ;;  %v1737_v45 = vld [vmem:[%s12498_s3 + $0x1400] sm:$0xff] }
 0x2c2   :  { %2618 = vmatmul.mubr.f32.vlgmr.msra.gmra.mrb[10].mxu0 %v8882_v62  ;;  %5432 = vmatprep.subr.bf16.mxu1 %v5431_v63  ;;  %v1686_v62 = vld [vmem:[%s12498_s3 + $0x1268] sm:$0xff]  ;;  %v5445_v63 = vpack.c.bf16 %v1693_v3, %v1689_v46  ;;  %v1543_v46 = vld [vmem:[%s12498_s3 + $0xdf0] sm:$0xff] }
 0x2c3   :  { %5744 = vmatpush1.bf16.msra.mxu0 %v5743_v8  ;;  %2688 = vmatprep.mubr.f32.mxu0 %v8891_v53  ;;  %v5437_v53 = vpack.c.bf16 %v1677_v44, %v1673_v60  ;;  %v5439_v9 = vpack.c.bf16 %v1686_v62, %v1682_v17  ;;  %v5447_v8 = vpack.c.bf16 %v1702_v5, %v1698_v15  ;;  %v1532_v60 = vld [vmem:[%s12498_s3 + $0xd98] sm:$0xff]  ;;  %v1705_v17 = vld [vmem:[%s12498_s3 + $0x1300] sm:$0xff] }
 0x2c4   :  { %5746 = vmatprep.subr.bf16.mxu0 %v5745_v58  ;;  %v5759_v58 = vpack.c.bf16 %v1519_v61, %v1515_v50  ;;  %v1536_v44 = vld [vmem:[%s12498_s3 + $0xdb8] sm:$0xff]  ;;  %v1709_v62 = vld [vmem:[%s12498_s3 + $0x1320] sm:$0xff] }
 0x2c5   :  { %5434 = vmatpush1.bf16.msra.mxu1 %v5433_v43  ;;  %v5761_v43 = vpack.c.bf16 %v1528_v4, %v1524_v1  ;;  %v5453_v20 = vpack.c.bf16 %v1709_v62, %v1705_v17  ;;  %v1552_v15 = vld [vmem:[%s12498_s3 + $0xe38] sm:$0xff]  ;;  %v1725_v50 = vld [vmem:[%s12498_s3 + $0x13a0] sm:$0xff]  ;;  %v1734_v1 = vld [vmem:[%s12498_s3 + $0x13e8] sm:$0xff]  ;;  %v9650_v62 = vpop.permute.xlu0 %1056 }
 0x2c6   :  { %5436 = vmatprep.subr.bf16.mxu1 %v5435_v41  ;;  %v5449_v41 = vpack.c.bf16 %v1701_v34, %v1697_v10  ;;  %v1551_v10 = vld [vmem:[%s12498_s3 + $0xe30] sm:$0xff] }
 0x2c7   :  { %5748 = vmatpush1.bf16.msra.mxu0 %v5747_v51  ;;  %v5451_v51 = vpack.c.bf16 %v1710_v27, %v1706_v19  ;;  %v1560_v19 = vld [vmem:[%s12498_s3 + $0xe78] sm:$0xff]  ;;  %v1559_v17 = vld [vmem:[%s12498_s3 + $0xe70] sm:$0xff] }
 0x2c8   :  { %5750 = vmatprep.subr.bf16.mxu0 %v5749_v24  ;;  %v5763_v24 = vpack.c.bf16 %v1527_v59, %v1523_v40  ;;  %v1733_v40 = vld [vmem:[%s12498_s3 + $0x13e0] sm:$0xff] }
 0x2c9   :  { %5438 = vmatpush1.bf16.msra.mxu1 %v5437_v53  ;;  %v5765_v53 = vpack.c.bf16 %v1536_v44, %v1532_v60  ;;  %v1742_v60 = vld [vmem:[%s12498_s3 + $0x1428] sm:$0xff] }
 0x2ca   :  { %5440 = vmatprep.subr.bf16.mxu1 %v5439_v9 }
 0x2cb   :  { %5752 = vmatpush1.bf16.msra.mxu0 %v5751_v42  ;;  %v1544_v42 = vld [vmem:[%s12498_s3 + $0xdf8] sm:$0xff] }
 0x2cc   :  { %5754 = vmatprep.subr.bf16.mxu0 %v5753_v7  ;;  %v1713_v7 = vld [vmem:[%s12498_s3 + $0x1340] sm:$0xff]  ;;  %v5769_v36 = vpack.c.bf16 %v1544_v42, %v1540_v26  ;;  %v1746_v42 = vld [vmem:[%s12498_s3 + $0x1448] sm:$0xff] }
 0x2cd   :  { %5442 = vmatpush1.bf16.msra.mxu1 %v5441_v39  ;;  %v1722_v39 = vld [vmem:[%s12498_s3 + $0x1388] sm:$0xff]  ;;  %v5457_v3 = vpack.c.bf16 %v1717_v48, %v1713_v7 }
 0x2ce   :  { %5444 = vmatprep.subr.bf16.mxu1 %v5443_v47  ;;  %v1539_v47 = vld [vmem:[%s12498_s3 + $0xdd0] sm:$0xff]  ;;  %v5459_v5 = vpack.c.bf16 %v1726_v54, %v1722_v39 }
 0x2cf   :  { %5756 = vmatpush1.bf16.msra.mxu0 %v5755_v13  ;;  %v1548_v13 = vld [vmem:[%s12498_s3 + $0xe18] sm:$0xff]  ;;  %v5771_v61 = vpack.c.bf16 %v1543_v46, %v1539_v47  ;;  %v1567_v39 = vld [vmem:[%s12498_s3 + $0xeb0] sm:$0xff]  ;;  %v9689_v46 = vmax.f32 %v8245_v6, %v8749_v0  ;;  %v1754_v6 = vld [vmem:[%s12498_s3 + $0x1488] sm:$0xff] }
 0x2d0   :  { %5758 = vmatprep.subr.bf16.mxu0 %v5757_v22  ;;  %v1721_v22 = vld [vmem:[%s12498_s3 + $0x1380] sm:$0xff]  ;;  %v5773_v4 = vpack.c.bf16 %v1552_v15, %v1548_v13  ;;  %v1576_v47 = vld [vmem:[%s12498_s3 + $0xef8] sm:$0xff]  ;;  %v1758_v0 = vld [vmem:[%s12498_s3 + $0x14a8] sm:$0xff] }
 0x2d1   :  { %5446 = vmatpush1.bf16.msra.mxu1 %v5445_v63  ;;  %v1730_v63 = vld [vmem:[%s12498_s3 + $0x13c8] sm:$0xff]  ;;  %v5461_v34 = vpack.c.bf16 %v1725_v50, %v1721_v22  ;;  %v1745_v13 = vld [vmem:[%s12498_s3 + $0x1440] sm:$0xff] }
 0x2d2   :  { %5448 = vmatprep.subr.bf16.mxu1 %v5447_v8  ;;  %v1547_v8 = vld [vmem:[%s12498_s3 + $0xe10] sm:$0xff]  ;;  %v5463_v27 = vpack.c.bf16 %v1734_v1, %v1730_v63  ;;  %v1749_v15 = vld [vmem:[%s12498_s3 + $0x1460] sm:$0xff]  ;;  %v1580_v1 = vld [vmem:[%s12498_s3 + $0xf18] sm:$0xff] }
 0x2d3   :  { %5760 = vmatpush1.bf16.msra.mxu0 %v5759_v58  ;;  %v1556_v58 = vld [vmem:[%s12498_s3 + $0xe58] sm:$0xff]  ;;  %v5775_v59 = vpack.c.bf16 %v1551_v10, %v1547_v8  ;;  %v5473_v63 = vpack.c.bf16 %v1749_v15, %v1745_v13  ;;  %v5475_v8 = vpack.c.bf16 %v1758_v0, %v1754_v6  ;;  %v1753_v10 = vld [vmem:[%s12498_s3 + $0x1480] sm:$0xff]  ;;  %v1595_v13 = vld [vmem:[%s12498_s3 + $0xf90] sm:$0xff] }
 0x2d4   :  { %5762 = vmatprep.subr.bf16.mxu0 %v5761_v43  ;;  %v1729_v43 = vld [vmem:[%s12498_s3 + $0x13c0] sm:$0xff]  ;;  %v5777_v44 = vpack.c.bf16 %v1560_v19, %v1556_v58  ;;  %v1762_v19 = vld [vmem:[%s12498_s3 + $0x14c8] sm:$0xff]  ;;  %v1599_v15 = vld [vmem:[%s12498_s3 + $0xfb0] sm:$0xff] }
 0x2d5   :  { %5450 = vmatpush1.bf16.msra.mxu1 %v5449_v41  ;;  %v9574_v9 = vpop.f32.mrb[8].mxu0  ;;  %v1738_v41 = vld [vmem:[%s12498_s3 + $0x1408] sm:$0xff]  ;;  %v5465_v52 = vpack.c.bf16 %v1733_v40, %v1729_v43  ;;  %v1579_v40 = vld [vmem:[%s12498_s3 + $0xf10] sm:$0xff]  ;;  %v1604_v6 = vld [vmem:[%s12498_s3 + $0xfd8] sm:$0xff] }
 0x2d6   :  { %v9582_v29 = vpop.f32.mrb[9].mxu0  ;;  %5452 = vmatprep.subr.bf16.mxu1 %v5451_v51  ;;  %v1555_v51 = vld [vmem:[%s12498_s3 + $0xe50] sm:$0xff]  ;;  %v5467_v30 = vpack.c.bf16 %v1742_v60, %v1738_v41  ;;  %v1588_v60 = vld [vmem:[%s12498_s3 + $0xf58] sm:$0xff] }
 0x2d7   :  { %5764 = vmatpush1.bf16.msra.mxu0 %v5763_v24  ;;  %v9652_v24 = vpop.permute.xlu1 %1054  ;;  %v5779_v26 = vpack.c.bf16 %v1559_v17, %v1555_v51  ;;  %v1761_v17 = vld [vmem:[%s12498_s3 + $0x14c0] sm:$0xff]  ;;  %v1608_v0 = vld [vmem:[%s12498_s3 + $0xff8] sm:$0xff] }
 0x2d8   :  { %5766 = vmatprep.subr.bf16.mxu0 %v5765_v53  ;;  %v1568_v53 = vld [vmem:[%s12498_s3 + $0xeb8] sm:$0xff]  ;;  %v1070_v7 = vsel %vm1058_vm3, %v9652_v24, %v9650_v62 }
 0x2d9   :  { %5454 = vmatpush1.bf16.msra.mxu1 %v5453_v20  ;;  %v1741_v20 = vld [vmem:[%s12498_s3 + $0x1420] sm:$0xff]  ;;  %v5781_v48 = vpack.c.bf16 %v1568_v53, %v1564_v23  ;;  %v1770_v53 = vld [vmem:[%s12498_s3 + $0x1508] sm:$0xff] }
 0x2da   :  { %5456 = vmatprep.subr.bf16.mxu1 %v5455_v14  ;;  %v1750_v14 = vld [vmem:[%s12498_s3 + $0x1468] sm:$0xff]  ;;  %v5469_v54 = vpack.c.bf16 %v1741_v20, %v1737_v45  ;;  %v1587_v20 = vld [vmem:[%s12498_s3 + $0xf50] sm:$0xff] }
 0x2db   :  { %5768 = vmatpush1.bf16.msra.mxu0 %v5767_v21  ;;  %v1563_v21 = vld [vmem:[%s12498_s3 + $0xe90] sm:$0xff] }
 0x2dc   :  { %5770 = vmatprep.subr.bf16.mxu0 %v5769_v36  ;;  %v1572_v36 = vld [vmem:[%s12498_s3 + $0xed8] sm:$0xff]  ;;  %v5783_v22 = vpack.c.bf16 %v1567_v39, %v1563_v21  ;;  %v1769_v21 = vld [vmem:[%s12498_s3 + $0x1500] sm:$0xff] }
 0x2dd   :  { %5458 = vmatpush1.bf16.msra.mxu1 %v5457_v3  ;;  %v5471_v3 = vpack.c.bf16 %v1750_v14, %v1746_v42  ;;  %v5785_v50 = vpack.c.bf16 %v1576_v47, %v1572_v36  ;;  %v1596_v14 = vld [vmem:[%s12498_s3 + $0xf98] sm:$0xff]  ;;  %v1773_v39 = vld [vmem:[%s12498_s3 + $0x1520] sm:$0xff]  ;;  %v1778_v36 = vld [vmem:[%s12498_s3 + $0x1548] sm:$0xff] }
 0x2de   :  { %5460 = vmatprep.subr.bf16.mxu1 %v5459_v5  ;;  %v9698_v5 = vmax.f32 %v8270_v25, %v1070_v7  ;;  %v1575_v25 = vld [vmem:[%s12498_s3 + $0xef0] sm:$0xff]  ;;  %v1600_v7 = vld [vmem:[%s12498_s3 + $0xfb8] sm:$0xff]  ;;  %v1782_v47 = vld [vmem:[%s12498_s3 + $0x1568] sm:$0xff] }
 0x2df   :  { %5772 = vmatpush1.bf16.msra.mxu0 %v5771_v61  ;;  %v1571_v61 = vld [vmem:[%s12498_s3 + $0xed0] sm:$0xff] }
 0x2e0   :  { %5774 = vmatprep.subr.bf16.mxu0 %v5773_v4  ;;  %v1584_v4 = vld [vmem:[%s12498_s3 + $0xf38] sm:$0xff]  ;;  %v5787_v58 = vpack.c.bf16 %v1575_v25, %v1571_v61  ;;  %v1777_v61 = vld [vmem:[%s12498_s3 + $0x1540] sm:$0xff] }
 0x2e1   :  { %5462 = vmatpush1.bf16.msra.mxu1 %v5461_v34  ;;  %v1757_v34 = vld [vmem:[%s12498_s3 + $0x14a0] sm:$0xff]  ;;  %v5789_v43 = vpack.c.bf16 %v1584_v4, %v1580_v1  ;;  %v1786_v1 = vld [vmem:[%s12498_s3 + $0x1588] sm:$0xff] }
 0x2e2   :  { %5464 = vmatprep.subr.bf16.mxu1 %v5463_v27  ;;  %v1766_v27 = vld [vmem:[%s12498_s3 + $0x14e8] sm:$0xff]  ;;  %v5477_v41 = vpack.c.bf16 %v1757_v34, %v1753_v10  ;;  %v1781_v25 = vld [vmem:[%s12498_s3 + $0x1560] sm:$0xff]  ;;  %v1603_v10 = vld [vmem:[%s12498_s3 + $0xfd0] sm:$0xff] }
 0x2e3   :  { %5776 = vmatpush1.bf16.msra.mxu0 %v5775_v59  ;;  %v1583_v59 = vld [vmem:[%s12498_s3 + $0xf30] sm:$0xff]  ;;  %v5479_v51 = vpack.c.bf16 %v1766_v27, %v1762_v19  ;;  %v1790_v4 = vld [vmem:[%s12498_s3 + $0x15a8] sm:$0xff]  ;;  %v1612_v19 = vld [vmem:[%s12498_s3 + $0x1018] sm:$0xff] }
 0x2e4   :  { %5778 = vmatprep.subr.bf16.mxu0 %v5777_v44  ;;  %v1592_v44 = vld [vmem:[%s12498_s3 + $0xf78] sm:$0xff]  ;;  %v5791_v23 = vpack.c.bf16 %v1583_v59, %v1579_v40  ;;  %v1607_v34 = vld [vmem:[%s12498_s3 + $0xff0] sm:$0xff]  ;;  %v1785_v40 = vld [vmem:[%s12498_s3 + $0x1580] sm:$0xff] }
 0x2e5   :  { %5466 = vmatpush1.bf16.msra.mxu1 %v5465_v52  ;;  %v1765_v52 = vld [vmem:[%s12498_s3 + $0x14e0] sm:$0xff]  ;;  %v5793_v45 = vpack.c.bf16 %v1592_v44, %v1588_v60  ;;  %v1616_v27 = vld [vmem:[%s12498_s3 + $0x1038] sm:$0xff]  ;;  %v1794_v60 = vld [vmem:[%s12498_s3 + $0x15c8] sm:$0xff] }
 0x2e6   :  { %5468 = vmatprep.subr.bf16.mxu1 %v5467_v30  ;;  %v1774_v30 = vld [vmem:[%s12498_s3 + $0x1528] sm:$0xff]  ;;  %v5481_v42 = vpack.c.bf16 %v1765_v52, %v1761_v17  ;;  %v1789_v59 = vld [vmem:[%s12498_s3 + $0x15a0] sm:$0xff]  ;;  %v1611_v17 = vld [vmem:[%s12498_s3 + $0x1010] sm:$0xff] }
 0x2e7   :  { %5780 = vmatpush1.bf16.msra.mxu0 %v5779_v26  ;;  %v1591_v26 = vld [vmem:[%s12498_s3 + $0xf70] sm:$0xff]  ;;  %v1798_v44 = vld [vmem:[%s12498_s3 + $0x15e8] sm:$0xff] }
 0x2e8   :  { %2263 = vmatmul.mubr.f32.vlgmr.msra.gmra.mrb[6].mxu1 %v9689_v46  ;;  %5782 = vmatprep.subr.bf16.mxu0 %v5781_v48  ;;  %v5483_v48 = vpack.c.bf16 %v1774_v30, %v1770_v53  ;;  %v1615_v52 = vld [vmem:[%s12498_s3 + $0x1030] sm:$0xff]  ;;  %v1620_v53 = vld [vmem:[%s12498_s3 + $0x1058] sm:$0xff] }
 0x2e9   :  { %5470 = vmatpush1.bf16.msra.mxu1 %v5469_v54  ;;  %2333 = vmatprep.mubr.f32.mxu1 %v9698_v5  ;;  %v5795_v54 = vpack.c.bf16 %v1591_v26, %v1587_v20  ;;  %v1624_v30 = vld [vmem:[%s12498_s3 + $0x1078] sm:$0xff]  ;;  %v1793_v20 = vld [vmem:[%s12498_s3 + $0x15c0] sm:$0xff] }
 0x2ea   :  { %5472 = vmatprep.subr.bf16.mxu1 %v5471_v3  ;;  %v5797_v3 = vpack.c.bf16 %v1600_v7, %v1596_v14  ;;  %v1797_v26 = vld [vmem:[%s12498_s3 + $0x15e0] sm:$0xff]  ;;  %v1802_v14 = vld [vmem:[%s12498_s3 + $0x1608] sm:$0xff] }
 0x2eb   :  { %5784 = vmatpush1.bf16.msra.mxu0 %v5783_v22  ;;  %v5485_v22 = vpack.c.bf16 %v1773_v39, %v1769_v21  ;;  %v1806_v7 = vld [vmem:[%s12498_s3 + $0x1628] sm:$0xff]  ;;  %v1619_v21 = vld [vmem:[%s12498_s3 + $0x1050] sm:$0xff] }
 0x2ec   :  { %5786 = vmatprep.subr.bf16.mxu0 %v5785_v50  ;;  %v5487_v50 = vpack.c.bf16 %v1782_v47, %v1778_v36  ;;  %v1623_v39 = vld [vmem:[%s12498_s3 + $0x1070] sm:$0xff]  ;;  %v1628_v36 = vld [vmem:[%s12498_s3 + $0x1098] sm:$0xff] }
 0x2ed   :  { %5474 = vmatpush1.bf16.msra.mxu1 %v5473_v63  ;;  %v5799_v63 = vpack.c.bf16 %v1599_v15, %v1595_v13  ;;  %v1632_v47 = vld [vmem:[%s12498_s3 + $0x10b8] sm:$0xff]  ;;  %v1801_v13 = vld [vmem:[%s12498_s3 + $0x1600] sm:$0xff] }
 0x2ee   :  { %5476 = vmatprep.subr.bf16.mxu1 %v5475_v8  ;;  %v5801_v8 = vpack.c.bf16 %v1608_v0, %v1604_v6  ;;  %v1805_v15 = vld [vmem:[%s12498_s3 + $0x1620] sm:$0xff]  ;;  %v1810_v6 = vld [vmem:[%s12498_s3 + $0x1648] sm:$0xff]  ;;  %v5813_v0 = vpack.c.bf16 %v1632_v47, %v1628_v36  ;;  %v1651_v47 = vld [vmem:[%s12498_s3 + $0x1150] sm:$0xff] }
 0x2ef   :  { %5788 = vmatpush1.bf16.msra.mxu0 %v5787_v58  ;;  %v5489_v58 = vpack.c.bf16 %v1781_v25, %v1777_v61  ;;  %v1631_v61 = vld [vmem:[%s12498_s3 + $0x10b0] sm:$0xff]  ;;  %v1636_v25 = vld [vmem:[%s12498_s3 + $0x10d8] sm:$0xff] }
 0x2f0   :  { %5790 = vmatprep.subr.bf16.mxu0 %v5789_v43  ;;  %v5491_v43 = vpack.c.bf16 %v1790_v4, %v1786_v1  ;;  %v1809_v4 = vld [vmem:[%s12498_s3 + $0x1640] sm:$0xff] }
 0x2f1   :  { %5478 = vmatpush1.bf16.msra.mxu1 %v5477_v41  ;;  %v5803_v41 = vpack.c.bf16 %v1607_v34, %v1603_v10  ;;  %v1818_v34 = vld [vmem:[%s12498_s3 + $0x1688] sm:$0xff] }
 0x2f2   :  { %5480 = vmatprep.subr.bf16.mxu1 %v5479_v51  ;;  %v5805_v51 = vpack.c.bf16 %v1616_v27, %v1612_v19  ;;  %v1635_v27 = vld [vmem:[%s12498_s3 + $0x10d0] sm:$0xff] }
 0x2f3   :  { %5792 = vmatpush1.bf16.msra.mxu0 %v5791_v23  ;;  %v5493_v23 = vpack.c.bf16 %v1789_v59, %v1785_v40  ;;  %v1644_v59 = vld [vmem:[%s12498_s3 + $0x1118] sm:$0xff] }
 0x2f4   :  { %5794 = vmatprep.subr.bf16.mxu0 %v5793_v45  ;;  %v5495_v45 = vpack.c.bf16 %v1798_v44, %v1794_v60  ;;  %v1817_v44 = vld [vmem:[%s12498_s3 + $0x1680] sm:$0xff] }
 0x2f5   :  { %5482 = vmatpush1.bf16.msra.mxu1 %v5481_v42  ;;  %v5807_v42 = vpack.c.bf16 %v1615_v52, %v1611_v17  ;;  %v1826_v52 = vld [vmem:[%s12498_s3 + $0x16c8] sm:$0xff] }
 0x2f6   :  { %5484 = vmatprep.subr.bf16.mxu1 %v5483_v48  ;;  %v5809_v48 = vpack.c.bf16 %v1624_v30, %v1620_v53  ;;  %v1643_v30 = vld [vmem:[%s12498_s3 + $0x1110] sm:$0xff] }
 0x2f7   :  { %5796 = vmatpush1.bf16.msra.mxu0 %v5795_v54  ;;  %v5497_v54 = vpack.c.bf16 %v1797_v26, %v1793_v20  ;;  %v1652_v26 = vld [vmem:[%s12498_s3 + $0x1158] sm:$0xff] }
 0x2f8   :  { %5798 = vmatprep.subr.bf16.mxu0 %v5797_v3  ;;  %v5499_v3 = vpack.c.bf16 %v1806_v7, %v1802_v14  ;;  %v1825_v7 = vld [vmem:[%s12498_s3 + $0x16c0] sm:$0xff] }
 0x2f9   :  { %5486 = vmatpush1.bf16.msra.mxu1 %v5485_v22  ;;  %v5811_v22 = vpack.c.bf16 %v1623_v39, %v1619_v21  ;;  %v1834_v39 = vld [vmem:[%s12498_s3 + $0x1708] sm:$0xff] }
 0x2fa   :  { %5488 = vmatprep.subr.bf16.mxu1 %v5487_v50  ;;  %v1627_v50 = vld [vmem:[%s12498_s3 + $0x1090] sm:$0xff] }
 0x2fb   :  { %5800 = vmatpush1.bf16.msra.mxu0 %v5799_v63  ;;  %v1640_v63 = vld [vmem:[%s12498_s3 + $0x10f8] sm:$0xff]  ;;  %v5815_v10 = vpack.c.bf16 %v1631_v61, %v1627_v50  ;;  %v1842_v61 = vld [vmem:[%s12498_s3 + $0x1748] sm:$0xff] }
 0x2fc   :  { %5802 = vmatprep.subr.bf16.mxu0 %v5801_v8  ;;  %v1813_v8 = vld [vmem:[%s12498_s3 + $0x1660] sm:$0xff]  ;;  %v5817_v19 = vpack.c.bf16 %v1640_v63, %v1636_v25  ;;  %v1659_v63 = vld [vmem:[%s12498_s3 + $0x1190] sm:$0xff] }
 0x2fd   :  { %5490 = vmatpush1.bf16.msra.mxu1 %v5489_v58  ;;  %v1822_v58 = vld [vmem:[%s12498_s3 + $0x16a8] sm:$0xff]  ;;  %v5505_v40 = vpack.c.bf16 %v1813_v8, %v1809_v4  ;;  %v1668_v8 = vld [vmem:[%s12498_s3 + $0x11d8] sm:$0xff] }
 0x2fe   :  { %5492 = vmatprep.subr.bf16.mxu1 %v5491_v43  ;;  %v1639_v43 = vld [vmem:[%s12498_s3 + $0x10f0] sm:$0xff]  ;;  %v5507_v60 = vpack.c.bf16 %v1822_v58, %v1818_v34  ;;  %v1841_v58 = vld [vmem:[%s12498_s3 + $0x1740] sm:$0xff] }
 0x2ff   :  { %5804 = vmatpush1.bf16.msra.mxu0 %v5803_v41  ;;  %v1648_v41 = vld [vmem:[%s12498_s3 + $0x1138] sm:$0xff]  ;;  %v5819_v17 = vpack.c.bf16 %v1639_v43, %v1635_v27  ;;  %v1850_v43 = vld [vmem:[%s12498_s3 + $0x1788] sm:$0xff] }
 0x300   :  { %5806 = vmatprep.subr.bf16.mxu0 %v5805_v51  ;;  %v1821_v51 = vld [vmem:[%s12498_s3 + $0x16a0] sm:$0xff]  ;;  %v5821_v53 = vpack.c.bf16 %v1648_v41, %v1644_v59  ;;  %v1667_v41 = vld [vmem:[%s12498_s3 + $0x11d0] sm:$0xff] }
 0x301   :  { %5494 = vmatpush1.bf16.msra.mxu1 %v5493_v23  ;;  %v1830_v23 = vld [vmem:[%s12498_s3 + $0x16e8] sm:$0xff]  ;;  %v5509_v20 = vpack.c.bf16 %v1821_v51, %v1817_v44  ;;  %v1676_v51 = vld [vmem:[%s12498_s3 + $0x1218] sm:$0xff] }
 0x302   :  { %2689 = vmatmul.mubr.f32.vlgmr.msra.gmra.mrb[10].mxu0 %v9283_v38  ;;  %5496 = vmatprep.subr.bf16.mxu1 %v5495_v45  ;;  %v1814_v38 = vld [vmem:[%s12498_s3 + $0x1668] sm:$0xff]  ;;  %v1647_v45 = vld [vmem:[%s12498_s3 + $0x1130] sm:$0xff]  ;;  %v5511_v14 = vpack.c.bf16 %v1830_v23, %v1826_v52  ;;  %v1849_v23 = vld [vmem:[%s12498_s3 + $0x1780] sm:$0xff] }
 0x303   :  { %5808 = vmatpush1.bf16.msra.mxu0 %v5807_v42  ;;  %2759 = vmatprep.mubr.f32.mxu0 %v9292_v18  ;;  %v5501_v18 = vpack.c.bf16 %v1805_v15, %v1801_v13  ;;  %v5503_v1 = vpack.c.bf16 %v1814_v38, %v1810_v6  ;;  %v1656_v42 = vld [vmem:[%s12498_s3 + $0x1178] sm:$0xff]  ;;  %v5823_v21 = vpack.c.bf16 %v1647_v45, %v1643_v30  ;;  %v1833_v38 = vld [vmem:[%s12498_s3 + $0x1700] sm:$0xff]  ;;  %v1858_v45 = vld [vmem:[%s12498_s3 + $0x17c8] sm:$0xff] }
 0x304   :  { %5810 = vmatprep.subr.bf16.mxu0 %v5809_v48  ;;  %v1829_v48 = vld [vmem:[%s12498_s3 + $0x16e0] sm:$0xff]  ;;  %v5825_v36 = vpack.c.bf16 %v1656_v42, %v1652_v26  ;;  %v1660_v15 = vld [vmem:[%s12498_s3 + $0x1198] sm:$0xff]  ;;  %v1675_v42 = vld [vmem:[%s12498_s3 + $0x1210] sm:$0xff] }
 0x305   :  { %5498 = vmatpush1.bf16.msra.mxu1 %v5497_v54  ;;  %v1838_v54 = vld [vmem:[%s12498_s3 + $0x1728] sm:$0xff]  ;;  %v5513_v13 = vpack.c.bf16 %v1829_v48, %v1825_v7  ;;  %v1684_v48 = vld [vmem:[%s12498_s3 + $0x1258] sm:$0xff] }
 0x306   :  { %5500 = vmatprep.subr.bf16.mxu1 %v5499_v3  ;;  %v1655_v3 = vld [vmem:[%s12498_s3 + $0x1170] sm:$0xff]  ;;  %v5515_v6 = vpack.c.bf16 %v1838_v54, %v1834_v39  ;;  %v1857_v54 = vld [vmem:[%s12498_s3 + $0x17c0] sm:$0xff] }
 0x307   :  { %5812 = vmatpush1.bf16.msra.mxu0 %v5811_v22  ;;  %v1664_v22 = vld [vmem:[%s12498_s3 + $0x11b8] sm:$0xff]  ;;  %v5827_v50 = vpack.c.bf16 %v1655_v3, %v1651_v47  ;;  %v1866_v3 = vld [vmem:[%s12498_s3 + $0x1808] sm:$0xff] }
 0x308   :  { %5814 = vmatprep.subr.bf16.mxu0 %v5813_v0  ;;  %v1837_v0 = vld [vmem:[%s12498_s3 + $0x1720] sm:$0xff]  ;;  %v5829_v25 = vpack.c.bf16 %v1664_v22, %v1660_v15  ;;  %v1683_v22 = vld [vmem:[%s12498_s3 + $0x1250] sm:$0xff] }
 0x309   :  { %5502 = vmatpush1.bf16.msra.mxu1 %v5501_v18  ;;  %v1846_v18 = vld [vmem:[%s12498_s3 + $0x1768] sm:$0xff]  ;;  %v5517_v4 = vpack.c.bf16 %v1837_v0, %v1833_v38  ;;  %v1692_v0 = vld [vmem:[%s12498_s3 + $0x1298] sm:$0xff] }
 0x30a   :  { %5504 = vmatprep.subr.bf16.mxu1 %v5503_v1  ;;  %v1663_v1 = vld [vmem:[%s12498_s3 + $0x11b0] sm:$0xff]  ;;  %v5519_v34 = vpack.c.bf16 %v1846_v18, %v1842_v61  ;;  %v1865_v18 = vld [vmem:[%s12498_s3 + $0x1800] sm:$0xff] }
 0x30b   :  { %5816 = vmatpush1.bf16.msra.mxu0 %v5815_v10  ;;  %v1672_v10 = vld [vmem:[%s12498_s3 + $0x11f8] sm:$0xff]  ;;  %v5831_v27 = vpack.c.bf16 %v1663_v1, %v1659_v63  ;;  %v1069_v63 = vsel %vm1058_vm3, %v6692_v49, %v9652_v24 }
 0x30c   :  { %5818 = vmatprep.subr.bf16.mxu0 %v5817_v19  ;;  %v1845_v19 = vld [vmem:[%s12498_s3 + $0x1760] sm:$0xff]  ;;  %v5833_v59 = vpack.c.bf16 %v1672_v10, %v1668_v8  ;;  %v1878_v8 = vld [vmem:[%s12498_s3 + $0x1868] sm:$0xff]  ;;  %v1700_v24 = vld [vmem:[%s12498_s3 + $0x12d8] sm:$0xff] }
 0x30d   :  { %5506 = vmatpush1.bf16.msra.mxu1 %v5505_v40  ;;  %v1854_v40 = vld [vmem:[%s12498_s3 + $0x17a8] sm:$0xff]  ;;  %v5521_v44 = vpack.c.bf16 %v1845_v19, %v1841_v58  ;;  %v1704_v58 = vld [vmem:[%s12498_s3 + $0x12f8] sm:$0xff]  ;;  %v10087_v19 = vmax.f32 %v8258_v12, %v1069_v63 }
 0x30e   :  { %5508 = vmatprep.subr.bf16.mxu1 %v5507_v60  ;;  %v1671_v60 = vld [vmem:[%s12498_s3 + $0x11f0] sm:$0xff]  ;;  %v5523_v52 = vpack.c.bf16 %v1854_v40, %v1850_v43  ;;  %v1873_v43 = vld [vmem:[%s12498_s3 + $0x1840] sm:$0xff]  ;;  %v1886_v12 = vld [vmem:[%s12498_s3 + $0x18a8] sm:$0xff] }
 0x30f   :  { %5820 = vmatpush1.bf16.msra.mxu0 %v5819_v17  ;;  %v1680_v17 = vld [vmem:[%s12498_s3 + $0x1238] sm:$0xff]  ;;  %v5835_v30 = vpack.c.bf16 %v1671_v60, %v1667_v41  ;;  %v1877_v40 = vld [vmem:[%s12498_s3 + $0x1860] sm:$0xff]  ;;  %v1882_v41 = vld [vmem:[%s12498_s3 + $0x1888] sm:$0xff]  ;;  %v5849_v60 = vpack.c.bf16 %v1704_v58, %v1700_v24 }
 0x310   :  { %5822 = vmatprep.subr.bf16.mxu0 %v5821_v53  ;;  %v1853_v53 = vld [vmem:[%s12498_s3 + $0x17a0] sm:$0xff]  ;;  %v5837_v26 = vpack.c.bf16 %v1680_v17, %v1676_v51  ;;  %v1703_v51 = vld [vmem:[%s12498_s3 + $0x12f0] sm:$0xff]  ;;  %v5537_v17 = vpack.c.bf16 %v1877_v40, %v1873_v43  ;;  %v1732_v58 = vld [vmem:[%s12498_s3 + $0x13d8] sm:$0xff]  ;;  %v10197_v40 = vmax.f32 %v8266_v16, %v9650_v62 }
 0x311   :  { %5510 = vmatpush1.bf16.msra.mxu1 %v5509_v20  ;;  %v1862_v20 = vld [vmem:[%s12498_s3 + $0x17e8] sm:$0xff]  ;;  %v5525_v7 = vpack.c.bf16 %v1853_v53, %v1849_v23  ;;  %v1712_v23 = vld [vmem:[%s12498_s3 + $0x1338] sm:$0xff]  ;;  %v5539_v53 = vpack.c.bf16 %v1886_v12, %v1882_v41  ;;  %v1727_v24 = vld [vmem:[%s12498_s3 + $0x13b0] sm:$0xff] }
 0x312   :  { %5512 = vmatprep.subr.bf16.mxu1 %v5511_v14  ;;  %v1679_v14 = vld [vmem:[%s12498_s3 + $0x1230] sm:$0xff]  ;;  %v5527_v39 = vpack.c.bf16 %v1862_v20, %v1858_v45  ;;  %v1885_v45 = vld [vmem:[%s12498_s3 + $0x18a0] sm:$0xff]  ;;  %v2929_v12 = vld [vmem:[%s12499_s4 + $0xa8] sm:$0xff] }
 0x313   :  { %5824 = vmatpush1.bf16.msra.mxu0 %v5823_v21  ;;  %v1688_v21 = vld [vmem:[%s12498_s3 + $0x1278] sm:$0xff]  ;;  %v5839_v47 = vpack.c.bf16 %v1679_v14, %v1675_v42  ;;  %v1894_v42 = vld [vmem:[%s12498_s3 + $0x18e8] sm:$0x1f]  ;;  %v2922_v41 = vld [vmem:[%s12499_s4 + $0x70] sm:$0xff] }
 0x314   :  { %5826 = vmatprep.subr.bf16.mxu0 %v5825_v36  ;;  %v1861_v36 = vld [vmem:[%s12498_s3 + $0x17e0] sm:$0xff]  ;;  %v5841_v15 = vpack.c.bf16 %v1688_v21, %v1684_v48  ;;  %v1711_v48 = vld [vmem:[%s12498_s3 + $0x1330] sm:$0xff] }
 0x315   :  { %5514 = vmatpush1.bf16.msra.mxu1 %v5513_v13  ;;  %v1870_v13 = vld [vmem:[%s12498_s3 + $0x1828] sm:$0xff]  ;;  %v5529_v38 = vpack.c.bf16 %v1861_v36, %v1857_v54  ;;  %v1720_v54 = vld [vmem:[%s12498_s3 + $0x1378] sm:$0xff]  ;;  %v2944_v16 = vld [vmem:[%s12499_s4 + $0x120] sm:$0xff] }
 0x316   :  { %5516 = vmatprep.subr.bf16.mxu1 %v5515_v6  ;;  %v1687_v6 = vld [vmem:[%s12498_s3 + $0x1270] sm:$0xff]  ;;  %v5531_v61 = vpack.c.bf16 %v1870_v13, %v1866_v3  ;;  %v1893_v3 = vld [vmem:[%s12498_s3 + $0x18e0] sm:$0x1f]  ;;  %v4591_v13 = vld [vmem:[%s12503_s9 + $0x8] sm:$0xff] }
 0x317   :  { %5828 = vmatpush1.bf16.msra.mxu0 %v5827_v50  ;;  %v1696_v50 = vld [vmem:[%s12498_s3 + $0x12b8] sm:$0xff]  ;;  %v5843_v1 = vpack.c.bf16 %v1687_v6, %v1683_v22  ;;  %v2909_v22 = vld [vmem:[%s12499_s4 + $0x8] sm:$0xff]  ;;  %v2916_v6 = vld [vmem:[%s12499_s4 + $0x40] sm:$0xff] }
 0x318   :  { %5830 = vmatprep.subr.bf16.mxu0 %v5829_v25  ;;  %v1869_v25 = vld [vmem:[%s12498_s3 + $0x1820] sm:$0xff]  ;;  %v5845_v10 = vpack.c.bf16 %v1696_v50, %v1692_v0  ;;  %v1715_v0 = vld [vmem:[%s12498_s3 + $0x1350] sm:$0xff]  ;;  %v5951_v63 = vpack.c.bf16 %v2916_v6, %v2909_v22  ;;  %v2965_v6 = vld [vmem:[%s12499_s4 + $0x1c8] sm:$0xff] }
 0x319   :  { %5518 = vmatpush1.bf16.msra.mxu1 %v5517_v4  ;;  %v1874_v4 = vld [vmem:[%s12498_s3 + $0x1848] sm:$0xff]  ;;  %v5533_v49 = vpack.c.bf16 %v1869_v25, %v1865_v18  ;;  %v1719_v50 = vld [vmem:[%s12498_s3 + $0x1370] sm:$0xff]  ;;  %v1724_v18 = vld [vmem:[%s12498_s3 + $0x1398] sm:$0xff] }
 0x31a   :  { %5520 = vmatprep.subr.bf16.mxu1 %v5519_v34  ;;  %v1691_v34 = vld [vmem:[%s12498_s3 + $0x1290] sm:$0xff]  ;;  %v1728_v25 = vld [vmem:[%s12498_s3 + $0x13b8] sm:$0xff] }
 0x31b   :  { %5832 = vmatpush1.bf16.msra.mxu0 %v5831_v27  ;;  %v5535_v27 = vpack.c.bf16 %v1878_v8, %v1874_v4  ;;  %v2915_v4 = vld [vmem:[%s12499_s4 + $0x38] sm:$0xff]  ;;  %v5859_v8 = vpack.c.bf16 %v1719_v50, %v1715_v0  ;;  %v1747_v50 = vld [vmem:[%s12498_s3 + $0x1450] sm:$0xff] }
 0x31c   :  { %5834 = vmatprep.subr.bf16.mxu0 %v5833_v59  ;;  %v5847_v59 = vpack.c.bf16 %v1695_v11, %v1691_v34  ;;  %v2930_v34 = vld [vmem:[%s12499_s4 + $0xb0] sm:$0xff]  ;;  %v5861_v11 = vpack.c.bf16 %v1728_v25, %v1724_v18  ;;  %v1756_v18 = vld [vmem:[%s12498_s3 + $0x1498] sm:$0xff] }
 0x31d   :  { %5522 = vmatpush1.bf16.msra.mxu1 %v5521_v44  ;;  %v1699_v44 = vld [vmem:[%s12498_s3 + $0x12d0] sm:$0xff]  ;;  %v1760_v25 = vld [vmem:[%s12498_s3 + $0x14b8] sm:$0xff] }
 0x31e   :  { %5524 = vmatprep.subr.bf16.mxu1 %v5523_v52  ;;  %v1708_v52 = vld [vmem:[%s12498_s3 + $0x1318] sm:$0xff]  ;;  %v5851_v20 = vpack.c.bf16 %v1703_v51, %v1699_v44  ;;  %v2937_v44 = vld [vmem:[%s12499_s4 + $0xe8] sm:$0xff]  ;;  %v1731_v51 = vld [vmem:[%s12498_s3 + $0x13d0] sm:$0xff] }
 0x31f   :  { %5836 = vmatpush1.bf16.msra.mxu0 %v5835_v30  ;;  %v1881_v30 = vld [vmem:[%s12498_s3 + $0x1880] sm:$0xff]  ;;  %v5853_v14 = vpack.c.bf16 %v1712_v23, %v1708_v52  ;;  %v1740_v52 = vld [vmem:[%s12498_s3 + $0x1418] sm:$0xff] }
 0x320   :  { %5838 = vmatprep.subr.bf16.mxu0 %v5837_v26  ;;  %v1890_v26 = vld [vmem:[%s12498_s3 + $0x18c8] sm:$0xff]  ;;  %v5541_v21 = vpack.c.bf16 %v1885_v45, %v1881_v30  ;;  %v1744_v23 = vld [vmem:[%s12498_s3 + $0x1438] sm:$0xff]  ;;  %v5959_v30 = vpack.c.bf16 %v2944_v16, %v2937_v44  ;;  %v2936_v45 = vld [vmem:[%s12499_s4 + $0xe0] sm:$0xff] }
 0x321   :  { %5526 = vmatpush1.bf16.msra.mxu1 %v5525_v7  ;;  %v1707_v7 = vld [vmem:[%s12498_s3 + $0x1310] sm:$0xff]  ;;  %v5543_v36 = vpack.c.bf16 %v1894_v42, %v1890_v26  ;;  %v2951_v42 = vld [vmem:[%s12499_s4 + $0x158] sm:$0xff]  ;;  %v3000_v44 = vld [vmem:[%s12499_s4 + $0x2e0] sm:$0xff] }
 0x322   :  { %5528 = vmatprep.subr.bf16.mxu1 %v5527_v39  ;;  %v1716_v39 = vld [vmem:[%s12498_s3 + $0x1358] sm:$0xff] }
 0x323   :  { %5840 = vmatpush1.bf16.msra.mxu0 %v5839_v47  ;;  %v1889_v47 = vld [vmem:[%s12498_s3 + $0x18c0] sm:$0xff] }
 0x324   :  { %5842 = vmatprep.subr.bf16.mxu0 %v5841_v15  ;;  %v5855_v15 = vpack.c.bf16 %v1711_v48, %v1707_v7  ;;  %v5869_v7 = vpack.c.bf16 %v1744_v23, %v1740_v52  ;;  %v1739_v48 = vld [vmem:[%s12498_s3 + $0x1410] sm:$0xff]  ;;  %v1776_v52 = vld [vmem:[%s12498_s3 + $0x1538] sm:$0xff] }
 0x325   :  { %5530 = vmatpush1.bf16.msra.mxu1 %v5529_v38  ;;  %v5857_v38 = vpack.c.bf16 %v1720_v54, %v1716_v39  ;;  %v1748_v39 = vld [vmem:[%s12498_s3 + $0x1458] sm:$0xff] }
 0x326   :  { %5532 = vmatprep.subr.bf16.mxu1 %v5531_v61  ;;  %v5546_v61 = vpack.c.bf16 %v1893_v3, %v1889_v47  ;;  %v1752_v54 = vld [vmem:[%s12498_s3 + $0x1478] sm:$0xff]  ;;  %v2950_v3 = vld [vmem:[%s12499_s4 + $0x150] sm:$0xff] }
 0x327   :  { %5844 = vmatpush1.bf16.msra.mxu0 %v5843_v1  ;;  %v2908_v1 = vld [vmem:[%s12499_s4] sm:$0xff]  ;;  %v5873_v0 = vpack.c.bf16 %v1752_v54, %v1748_v39  ;;  %v1784_v39 = vld [vmem:[%s12498_s3 + $0x1578] sm:$0xff] }
 0x328   :  { %2334 = vmatmul.mubr.f32.vlgmr.msra.gmra.mrb[6].mxu1 %v10087_v19  ;;  %5846 = vmatprep.subr.bf16.mxu0 %v5845_v10  ;;  %v2923_v10 = vld [vmem:[%s12499_s4 + $0x78] sm:$0xff]  ;;  %v5953_v43 = vpack.c.bf16 %v2915_v4, %v2908_v1  ;;  %v2964_v4 = vld [vmem:[%s12499_s4 + $0x1c0] sm:$0xff] }
 0x329   :  { %5534 = vmatpush1.bf16.msra.mxu1 %v5533_v49  ;;  %2404 = vmatprep.mubr.f32.mxu1 %v6719_v28  ;;  %v1723_v49 = vld [vmem:[%s12498_s3 + $0x1390] sm:$0xff] }
 0x32a   :  { %5536 = vmatprep.subr.bf16.mxu1 %v5535_v27  ;;  %v1736_v27 = vld [vmem:[%s12498_s3 + $0x13f8] sm:$0xff] }
 0x32b   :  { %5848 = vmatpush1.bf16.msra.mxu0 %v5847_v59  ;;  %v5955_v59 = vpack.c.bf16 %v2930_v34, %v2923_v10  ;;  %v5865_v62 = vpack.c.bf16 %v1736_v27, %v1732_v58  ;;  %v2979_v34 = vld [vmem:[%s12499_s4 + $0x238] sm:$0xff] }
 0x32c   :  { %5850 = vmatprep.subr.bf16.mxu0 %v5849_v60  ;;  %v5863_v60 = vpack.c.bf16 %v1727_v24, %v1723_v49  ;;  %v1755_v49 = vld [vmem:[%s12498_s3 + $0x1490] sm:$0xff]  ;;  %v1768_v58 = vld [vmem:[%s12498_s3 + $0x14f8] sm:$0xff] }
 0x32d   :  { %5538 = vmatpush1.bf16.msra.mxu1 %v5537_v17  ;;  %v1735_v17 = vld [vmem:[%s12498_s3 + $0x13f0] sm:$0xff] }
 0x32e   :  { %5540 = vmatprep.subr.bf16.mxu1 %v5539_v53  ;;  %v5957_v53 = vpack.c.bf16 %v2929_v12, %v2922_v41  ;;  %v5867_v26 = vpack.c.bf16 %v1735_v17, %v1731_v51  ;;  %v1759_v24 = vld [vmem:[%s12498_s3 + $0x14b0] sm:$0xff]  ;;  %v2985_v41 = vld [vmem:[%s12499_s4 + $0x268] sm:$0xff]  ;;  %v1772_v17 = vld [vmem:[%s12498_s3 + $0x1518] sm:$0xff] }
 0x32f   :  { %5852 = vmatpush1.bf16.msra.mxu0 %v5851_v20  ;;  %v2943_v20 = vld [vmem:[%s12499_s4 + $0x118] sm:$0xff]  ;;  %v5879_v12 = vpack.c.bf16 %v1759_v24, %v1755_v49  ;;  %v1767_v51 = vld [vmem:[%s12498_s3 + $0x14f0] sm:$0xff] }
 0x330   :  { %5854 = vmatprep.subr.bf16.mxu0 %v5853_v14  ;;  %v2958_v14 = vld [vmem:[%s12499_s4 + $0x190] sm:$0xff]  ;;  %v1796_v24 = vld [vmem:[%s12498_s3 + $0x15d8] sm:$0xff] }
 0x331   :  { %5542 = vmatpush1.bf16.msra.mxu1 %v5541_v21  ;;  %v1743_v21 = vld [vmem:[%s12498_s3 + $0x1430] sm:$0xff]  ;;  %v5963_v47 = vpack.c.bf16 %v2958_v14, %v2951_v42  ;;  %v5885_v14 = vpack.c.bf16 %v1776_v52, %v1772_v17  ;;  %v1808_v17 = vld [vmem:[%s12498_s3 + $0x1638] sm:$0xff] }
 0x332   :  { %5545 = vmatprep.subr.msk.bf16.mxu1 %vm10145_vm6, %v5543_v36  ;;  %v5961_v36 = vpack.c.bf16 %v2943_v20, %v2936_v45  ;;  %v5871_v22 = vpack.c.bf16 %v1743_v21, %v1739_v48  ;;  %v2999_v45 = vld [vmem:[%s12499_s4 + $0x2d8] sm:$0xff]  ;;  %v3014_v42 = vld [vmem:[%s12499_s4 + $0x350] sm:$0xff] }
 0x333   :  { %5856 = vmatpush1.bf16.msra.mxu0 %v5855_v15  ;;  %v2957_v15 = vld [vmem:[%s12499_s4 + $0x188] sm:$0xff]  ;;  %v1775_v48 = vld [vmem:[%s12498_s3 + $0x1530] sm:$0xff]  ;;  %v1780_v21 = vld [vmem:[%s12498_s3 + $0x1558] sm:$0xff] }
 0x334   :  { %5858 = vmatprep.subr.bf16.mxu0 %v5857_v38  ;;  %v2972_v38 = vld [vmem:[%s12499_s4 + $0x200] sm:$0xff]  ;;  %v1791_v49 = vld [vmem:[%s12498_s3 + $0x15b0] sm:$0xff] }
 0x335   :  { %5548 = vmatpush1.bf16.msk.msra.mxu1 %vm10145_vm6, %v5546_v61  ;;  %v1751_v61 = vld [vmem:[%s12498_s3 + $0x1470] sm:$0xff]  ;;  %v5967_v1 = vpack.c.bf16 %v2972_v38, %v2965_v6  ;;  %v3028_v6 = vld [vmem:[%s12499_s4 + $0x3c0] sm:$0xff]  ;;  %v5889_v38 = vpack.c.bf16 %v1784_v39, %v1780_v21  ;;  %v1816_v21 = vld [vmem:[%s12498_s3 + $0x1678] sm:$0xff] }
 0x336   :  { %5952 = vmatprep.subr.bf16.mxu1 %v5951_v63  ;;  %v5965_v63 = vpack.c.bf16 %v2957_v15, %v2950_v3  ;;  %v5875_v10 = vpack.c.bf16 %v1751_v61, %v1747_v50  ;;  %v3013_v3 = vld [vmem:[%s12499_s4 + $0x348] sm:$0xff]  ;;  %v1783_v50 = vld [vmem:[%s12498_s3 + $0x1570] sm:$0xff]  ;;  %v1788_v61 = vld [vmem:[%s12498_s3 + $0x1598] sm:$0xff] }
 0x337   :  { %5860 = vmatpush1.bf16.msra.mxu0 %v5859_v8  ;;  %v2971_v8 = vld [vmem:[%s12499_s4 + $0x1f8] sm:$0xff] }
 0x338   :  { %4790 = vmatmul.mubr.msk.f32.vlgmr.msra.gmra.mrb[6].mxu1 %vm1897_vm7, %v10197_v40  ;;  %5862 = vmatprep.subr.bf16.mxu0 %v5861_v11  ;;  %v5877_v11 = vpack.c.bf16 %v1760_v25, %v1756_v18  ;;  %v5969_v27 = vpack.c.bf16 %v2971_v8, %v2964_v4  ;;  %v1792_v18 = vld [vmem:[%s12498_s3 + $0x15b8] sm:$0xff] }
 0x339   :  { %5954 = vmatpush1.bf16.msra.mxu1 %v5953_v43  ;;  %v3027_v4 = vld [vmem:[%s12499_s4 + $0x3b8] sm:$0xff] }
 0x33a   :  { %5956 = vmatprep.subr.bf16.mxu1 %v5955_v59  ;;  %v2978_v59 = vld [vmem:[%s12499_s4 + $0x230] sm:$0xff] }
 0x33b   :  { %5864 = vmatpush1.bf16.msra.mxu0 %v5863_v60  ;;  %v2993_v60 = vld [vmem:[%s12499_s4 + $0x2a8] sm:$0xff]  ;;  %v5973_v23 = vpack.c.bf16 %v2985_v41, %v2978_v59 }
 0x33c   :  { %5866 = vmatprep.subr.bf16.mxu0 %v5865_v62  ;;  %v1763_v62 = vld [vmem:[%s12498_s3 + $0x14d0] sm:$0xff]  ;;  %v3041_v59 = vld [vmem:[%s12499_s4 + $0x428] sm:$0xff] }
 0x33d   :  { %5958 = vmatpush1.bf16.msra.mxu1 %v5957_v53  ;;  %v5975_v53 = vpack.c.bf16 %v3000_v44, %v2993_v60  ;;  %v5883_v20 = vpack.c.bf16 %v1767_v51, %v1763_v62  ;;  %v3056_v60 = vld [vmem:[%s12499_s4 + $0x4a0] sm:$0xff]  ;;  %v1799_v62 = vld [vmem:[%s12498_s3 + $0x15f0] sm:$0xff]  ;;  %v1804_v51 = vld [vmem:[%s12498_s3 + $0x1618] sm:$0xff] }
 0x33e   :  { %5960 = vmatprep.subr.bf16.mxu1 %v5959_v30  ;;  %v2992_v30 = vld [vmem:[%s12499_s4 + $0x2a0] sm:$0xff] }
 0x33f   :  { %5868 = vmatpush1.bf16.msra.mxu0 %v5867_v26  ;;  %v3007_v26 = vld [vmem:[%s12499_s4 + $0x318] sm:$0xff]  ;;  %v5977_v54 = vpack.c.bf16 %v2999_v45, %v2992_v30 }
 0x340   :  { %5870 = vmatprep.subr.bf16.mxu0 %v5869_v7  ;;  %v1771_v7 = vld [vmem:[%s12498_s3 + $0x1510] sm:$0xff]  ;;  %v3055_v30 = vld [vmem:[%s12499_s4 + $0x498] sm:$0xff] }
 0x341   :  { %5962 = vmatpush1.bf16.msra.mxu1 %v5961_v36  ;;  %v5979_v36 = vpack.c.bf16 %v3014_v42, %v3007_v26  ;;  %v5887_v15 = vpack.c.bf16 %v1775_v48, %v1771_v7  ;;  %v3070_v26 = vld [vmem:[%s12499_s4 + $0x510] sm:$0xff]  ;;  %v5901_v42 = vpack.c.bf16 %v1808_v17, %v1804_v51  ;;  %v1812_v48 = vld [vmem:[%s12498_s3 + $0x1658] sm:$0xff] }
 0x342   :  { %2760 = vmatmul.mubr.f32.vlgmr.msra.gmra.mrb[10].mxu0 %v9689_v46  ;;  %5964 = vmatprep.subr.bf16.mxu1 %v5963_v47  ;;  %v2986_v46 = vld [vmem:[%s12499_s4 + $0x270] sm:$0xff]  ;;  %v1840_v51 = vld [vmem:[%s12498_s3 + $0x1738] sm:$0xff] }
 0x343   :  { %5872 = vmatpush1.bf16.msra.mxu0 %v5871_v22  ;;  %2830 = vmatprep.mubr.f32.mxu0 %v9698_v5  ;;  %v1764_v5 = vld [vmem:[%s12498_s3 + $0x14d8] sm:$0xff]  ;;  %v5971_v43 = vpack.c.bf16 %v2986_v46, %v2979_v34  ;;  %v3006_v47 = vld [vmem:[%s12499_s4 + $0x310] sm:$0xff]  ;;  %v3021_v22 = vld [vmem:[%s12499_s4 + $0x388] sm:$0xff]  ;;  %v5893_v46 = vpack.c.bf16 %v1792_v18, %v1788_v61 }
 0x344   :  { %5874 = vmatprep.subr.bf16.mxu0 %v5873_v0  ;;  %v5881_v16 = vpack.c.bf16 %v1768_v58, %v1764_v5  ;;  %v1779_v0 = vld [vmem:[%s12498_s3 + $0x1550] sm:$0xff]  ;;  %v5981_v25 = vpack.c.bf16 %v3013_v3, %v3006_v47  ;;  %v1800_v5 = vld [vmem:[%s12498_s3 + $0x15f8] sm:$0xff]  ;;  %v3069_v47 = vld [vmem:[%s12499_s4 + $0x508] sm:$0xff] }
 0x345   :  { %5966 = vmatpush1.bf16.msra.mxu1 %v5965_v63  ;;  %v5983_v63 = vpack.c.bf16 %v3028_v6, %v3021_v22  ;;  %v5891_v8 = vpack.c.bf16 %v1783_v50, %v1779_v0  ;;  %v3042_v34 = vld [vmem:[%s12499_s4 + $0x430] sm:$0xff]  ;;  %v5897_v44 = vpack.c.bf16 %v1800_v5, %v1796_v24  ;;  %v3084_v22 = vld [vmem:[%s12499_s4 + $0x580] sm:$0xff]  ;;  %v5905_v6 = vpack.c.bf16 %v1816_v21, %v1812_v48  ;;  %v1820_v50 = vld [vmem:[%s12498_s3 + $0x1698] sm:$0xff] }
 0x346   :  { %5968 = vmatprep.subr.bf16.mxu1 %v5967_v1  ;;  %v3020_v1 = vld [vmem:[%s12499_s4 + $0x380] sm:$0xff]  ;;  %v1807_v7 = vld [vmem:[%s12498_s3 + $0x1630] sm:$0xff]  ;;  %v1824_v61 = vld [vmem:[%s12498_s3 + $0x16b8] sm:$0xff] }
 0x347   :  { %5876 = vmatpush1.bf16.msra.mxu0 %v5875_v10  ;;  %v3035_v10 = vld [vmem:[%s12499_s4 + $0x3f8] sm:$0xff]  ;;  %v5985_v58 = vpack.c.bf16 %v3027_v4, %v3020_v1  ;;  %v1815_v0 = vld [vmem:[%s12498_s3 + $0x1670] sm:$0xff] }
 0x348   :  { %5878 = vmatprep.subr.bf16.mxu0 %v5877_v11  ;;  %v1787_v11 = vld [vmem:[%s12498_s3 + $0x1590] sm:$0xff]  ;;  %v3083_v1 = vld [vmem:[%s12499_s4 + $0x578] sm:$0xff] }
 0x349   :  { %5970 = vmatpush1.bf16.msra.mxu1 %v5969_v27  ;;  %v5987_v27 = vpack.c.bf16 %v3042_v34, %v3035_v10  ;;  %v5895_v41 = vpack.c.bf16 %v1791_v49, %v1787_v11  ;;  %v3098_v10 = vld [vmem:[%s12499_s4 + $0x5f0] sm:$0xff]  ;;  %v5909_v34 = vpack.c.bf16 %v1824_v61, %v1820_v50  ;;  %v1828_v49 = vld [vmem:[%s12498_s3 + $0x16d8] sm:$0xff] }
 0x34a   :  { %5972 = vmatprep.subr.bf16.mxu1 %v5971_v43  ;;  %v3034_v43 = vld [vmem:[%s12499_s4 + $0x3f0] sm:$0xff]  ;;  %v1832_v24 = vld [vmem:[%s12498_s3 + $0x16f8] sm:$0xff] }
 0x34b   :  { %5880 = vmatpush1.bf16.msra.mxu0 %v5879_v12  ;;  %v3049_v12 = vld [vmem:[%s12499_s4 + $0x468] sm:$0xff]  ;;  %v5989_v52 = vpack.c.bf16 %v3041_v59, %v3034_v43  ;;  %v1823_v11 = vld [vmem:[%s12498_s3 + $0x16b0] sm:$0xff] }
 0x34c   :  { %5882 = vmatprep.subr.bf16.mxu0 %v5881_v16  ;;  %v1795_v16 = vld [vmem:[%s12498_s3 + $0x15d0] sm:$0xff]  ;;  %v3097_v43 = vld [vmem:[%s12499_s4 + $0x5e8] sm:$0xff] }
 0x34d   :  { %5974 = vmatpush1.bf16.msra.mxu1 %v5973_v23  ;;  %v5991_v23 = vpack.c.bf16 %v3056_v60, %v3049_v12  ;;  %v5899_v45 = vpack.c.bf16 %v1799_v62, %v1795_v16  ;;  %v3112_v12 = vld [vmem:[%s12499_s4 + $0x660] sm:$0xff]  ;;  %v5913_v60 = vpack.c.bf16 %v1832_v24, %v1828_v49  ;;  %v1831_v16 = vld [vmem:[%s12498_s3 + $0x16f0] sm:$0xff]  ;;  %v1836_v62 = vld [vmem:[%s12498_s3 + $0x1718] sm:$0xff] }
 0x34e   :  { %5976 = vmatprep.subr.bf16.mxu1 %v5975_v53  ;;  %v3048_v53 = vld [vmem:[%s12499_s4 + $0x460] sm:$0xff] }
 0x34f   :  { %5884 = vmatpush1.bf16.msra.mxu0 %v5883_v20  ;;  %v3063_v20 = vld [vmem:[%s12499_s4 + $0x4d8] sm:$0xff]  ;;  %v5993_v39 = vpack.c.bf16 %v3055_v30, %v3048_v53 }
 0x350   :  { %5886 = vmatprep.subr.bf16.mxu0 %v5885_v14  ;;  %v1803_v14 = vld [vmem:[%s12498_s3 + $0x1610] sm:$0xff]  ;;  %v3111_v53 = vld [vmem:[%s12499_s4 + $0x658] sm:$0xff] }
 0x351   :  { %5978 = vmatpush1.bf16.msra.mxu1 %v5977_v54  ;;  %v5995_v54 = vpack.c.bf16 %v3070_v26, %v3063_v20  ;;  %v5903_v3 = vpack.c.bf16 %v1807_v7, %v1803_v14  ;;  %v1835_v20 = vld [vmem:[%s12498_s3 + $0x1710] sm:$0xff]  ;;  %v1848_v14 = vld [vmem:[%s12498_s3 + $0x1778] sm:$0xff] }
 0x352   :  { %5980 = vmatprep.subr.bf16.mxu1 %v5979_v36  ;;  %v3062_v36 = vld [vmem:[%s12499_s4 + $0x4d0] sm:$0xff] }
 0x353   :  { %5888 = vmatpush1.bf16.msra.mxu0 %v5887_v15  ;;  %v3077_v15 = vld [vmem:[%s12499_s4 + $0x548] sm:$0xff]  ;;  %v5997_v18 = vpack.c.bf16 %v3069_v47, %v3062_v36  ;;  %v1839_v26 = vld [vmem:[%s12498_s3 + $0x1730] sm:$0xff]  ;;  %v1852_v36 = vld [vmem:[%s12498_s3 + $0x1798] sm:$0xff] }
 0x354   :  { %5890 = vmatprep.subr.bf16.mxu0 %v5889_v38  ;;  %v1811_v38 = vld [vmem:[%s12498_s3 + $0x1650] sm:$0xff]  ;;  %v5919_v48 = vpack.c.bf16 %v1839_v26, %v1835_v20  ;;  %v1856_v47 = vld [vmem:[%s12498_s3 + $0x17b8] sm:$0xff]  ;;  %v3125_v26 = vld [vmem:[%s12499_s4 + $0x6c8] sm:$0xff] }
 0x355   :  { %5982 = vmatpush1.bf16.msra.mxu1 %v5981_v25  ;;  %v5999_v25 = vpack.c.bf16 %v3084_v22, %v3077_v15  ;;  %v5907_v4 = vpack.c.bf16 %v1815_v0, %v1811_v38  ;;  %v5925_v15 = vpack.c.bf16 %v1856_v47, %v1852_v36  ;;  %v1851_v22 = vld [vmem:[%s12498_s3 + $0x1790] sm:$0xff]  ;;  %v1860_v38 = vld [vmem:[%s12498_s3 + $0x17d8] sm:$0xff]  ;;  %v2924_v47 = vld [vmem:[%s12499_s4 + $0x80] sm:$0xff] }
 0x356   :  { %5984 = vmatprep.subr.bf16.mxu1 %v5983_v63  ;;  %v3076_v63 = vld [vmem:[%s12499_s4 + $0x540] sm:$0xff]  ;;  %v1864_v0 = vld [vmem:[%s12498_s3 + $0x17f8] sm:$0xff]  ;;  %v3118_v20 = vld [vmem:[%s12499_s4 + $0x690] sm:$0xff] }
 0x357   :  { %5892 = vmatpush1.bf16.msra.mxu0 %v5891_v8  ;;  %v3091_v8 = vld [vmem:[%s12499_s4 + $0x5b8] sm:$0xff]  ;;  %v6001_v5 = vpack.c.bf16 %v3083_v1, %v3076_v63  ;;  %v5929_v61 = vpack.c.bf16 %v1864_v0, %v1860_v38  ;;  %v2946_v0 = vld [vmem:[%s12499_s4 + $0x130] sm:$0xff] }
 0x358   :  { %5894 = vmatprep.subr.bf16.mxu0 %v5893_v46  ;;  %v1819_v46 = vld [vmem:[%s12498_s3 + $0x1690] sm:$0xff]  ;;  %v1868_v63 = vld [vmem:[%s12498_s3 + $0x1818] sm:$0xff] }
 0x359   :  { %5986 = vmatpush1.bf16.msra.mxu1 %v5985_v58  ;;  %v6003_v58 = vpack.c.bf16 %v3098_v10, %v3091_v8  ;;  %v5911_v59 = vpack.c.bf16 %v1823_v11, %v1819_v46  ;;  %v1872_v1 = vld [vmem:[%s12498_s3 + $0x1838] sm:$0xff]  ;;  %v1867_v10 = vld [vmem:[%s12498_s3 + $0x1810] sm:$0xff] }
 0x35a   :  { %5988 = vmatprep.subr.bf16.mxu1 %v5987_v27  ;;  %v3090_v27 = vld [vmem:[%s12499_s4 + $0x5b0] sm:$0xff]  ;;  %v5933_v8 = vpack.c.bf16 %v1872_v1, %v1868_v63  ;;  %v1876_v46 = vld [vmem:[%s12498_s3 + $0x1858] sm:$0xff]  ;;  %v2945_v63 = vld [vmem:[%s12499_s4 + $0x128] sm:$0xff] }
 0x35b   :  { %5896 = vmatpush1.bf16.msra.mxu0 %v5895_v41  ;;  %v3105_v41 = vld [vmem:[%s12499_s4 + $0x628] sm:$0xff]  ;;  %v6005_v17 = vpack.c.bf16 %v3097_v43, %v3090_v27  ;;  %v1880_v11 = vld [vmem:[%s12498_s3 + $0x1878] sm:$0xff] }
 0x35c   :  { %5898 = vmatprep.subr.bf16.mxu0 %v5897_v44  ;;  %v1827_v44 = vld [vmem:[%s12498_s3 + $0x16d0] sm:$0xff]  ;;  %v5937_v24 = vpack.c.bf16 %v1880_v11, %v1876_v46  ;;  %v1884_v27 = vld [vmem:[%s12498_s3 + $0x1898] sm:$0xff]  ;;  %v2953_v1 = vld [vmem:[%s12499_s4 + $0x168] sm:$0xff] }
 0x35d   :  { %5990 = vmatpush1.bf16.msra.mxu1 %v5989_v52  ;;  %v6007_v52 = vpack.c.bf16 %v3112_v12, %v3105_v41  ;;  %v5915_v30 = vpack.c.bf16 %v1831_v16, %v1827_v44  ;;  %v1888_v43 = vld [vmem:[%s12498_s3 + $0x18b8] sm:$0xff]  ;;  %v1883_v12 = vld [vmem:[%s12498_s3 + $0x1890] sm:$0xff] }
 0x35e   :  { %5992 = vmatprep.subr.bf16.mxu1 %v5991_v23  ;;  %v3104_v23 = vld [vmem:[%s12499_s4 + $0x620] sm:$0xff]  ;;  %v5941_v41 = vpack.c.bf16 %v1888_v43, %v1884_v27  ;;  %v1892_v44 = vld [vmem:[%s12498_s3 + $0x18d8] sm:$0xff]  ;;  %v2974_v11 = vld [vmem:[%s12499_s4 + $0x210] sm:$0xff] }
 0x35f   :  { %5900 = vmatpush1.bf16.msra.mxu0 %v5899_v45  ;;  %v5917_v45 = vpack.c.bf16 %v1840_v51, %v1836_v62  ;;  %v6009_v7 = vpack.c.bf16 %v3111_v53, %v3104_v23  ;;  %v1891_v51 = vld [vmem:[%s12498_s3 + $0x18d0] sm:$0xff]  ;;  %v3119_v53 = vld [vmem:[%s12499_s4 + $0x698] sm:$0xff]  ;;  %v2981_v27 = vld [vmem:[%s12499_s4 + $0x248] sm:$0xff] }
 0x360   :  { %5902 = vmatprep.subr.bf16.mxu0 %v5901_v42  ;;  %v1844_v42 = vld [vmem:[%s12498_s3 + $0x1758] sm:$0xff]  ;;  %v2918_v23 = vld [vmem:[%s12499_s4 + $0x50] sm:$0xff]  ;;  %v2988_v43 = vld [vmem:[%s12499_s4 + $0x280] sm:$0xff] }
 0x361   :  { %5994 = vmatpush1.bf16.msra.mxu1 %v5993_v39  ;;  %v5921_v21 = vpack.c.bf16 %v1848_v14, %v1844_v42  ;;  %v1843_v39 = vld [vmem:[%s12498_s3 + $0x1750] sm:$0xff]  ;;  %v6013_v14 = vpack.c.bf16 %v3125_v26, %v3118_v20  ;;  %v2939_v38 = vld [vmem:[%s12499_s4 + $0xf8] sm:$0xff] }
 0x362   :  { %5996 = vmatprep.subr.bf16.mxu1 %v5995_v54  ;;  %v1847_v54 = vld [vmem:[%s12498_s3 + $0x1770] sm:$0xff]  ;;  %v2967_v46 = vld [vmem:[%s12499_s4 + $0x1d8] sm:$0xff] }
 0x363   :  { %5904 = vmatpush1.bf16.msra.mxu0 %v5903_v3  ;;  %v5923_v3 = vpack.c.bf16 %v1847_v54, %v1843_v39  ;;  %v2925_v39 = vld [vmem:[%s12499_s4 + $0x88] sm:$0xff]  ;;  %v2932_v54 = vld [vmem:[%s12499_s4 + $0xc0] sm:$0xff]  ;;  %v3015_v20 = vld [vmem:[%s12499_s4 + $0x358] sm:$0xff] }
 0x364   :  { %5906 = vmatprep.subr.bf16.mxu0 %v5905_v6  ;;  %v1855_v6 = vld [vmem:[%s12498_s3 + $0x17b0] sm:$0xff]  ;;  %v3023_v26 = vld [vmem:[%s12499_s4 + $0x398] sm:$0xff] }
 0x365   :  { %5998 = vmatpush1.bf16.msra.mxu1 %v5997_v18  ;;  %v5927_v50 = vpack.c.bf16 %v1855_v6, %v1851_v22  ;;  %v1859_v18 = vld [vmem:[%s12498_s3 + $0x17d0] sm:$0xff]  ;;  %v3133_v22 = vld [vmem:[%s12499_s4 + $0x708] sm:$0xff]  ;;  %v3140_v6 = vld [vmem:[%s12499_s4 + $0x740] sm:$0xff] }
 0x366   :  { %6000 = vmatprep.subr.bf16.mxu1 %v5999_v25  ;;  %v1863_v25 = vld [vmem:[%s12498_s3 + $0x17f0] sm:$0xff] }
 0x367   :  { %5908 = vmatpush1.bf16.msra.mxu0 %v5907_v4  ;;  %v5931_v4 = vpack.c.bf16 %v1863_v25, %v1859_v18  ;;  %v6067_v18 = vpack.c.bf16 %v2946_v0, %v2939_v38  ;;  %v2938_v25 = vld [vmem:[%s12499_s4 + $0xf0] sm:$0xff] }
 0x368   :  { %5910 = vmatprep.subr.bf16.mxu0 %v5909_v34  ;;  %v1871_v34 = vld [vmem:[%s12498_s3 + $0x1830] sm:$0xff] }
 0x369   :  { %6002 = vmatpush1.bf16.msra.mxu1 %v6001_v5  ;;  %v5935_v49 = vpack.c.bf16 %v1871_v34, %v1867_v10  ;;  %v1875_v5 = vld [vmem:[%s12498_s3 + $0x1850] sm:$0xff]  ;;  %v2952_v10 = vld [vmem:[%s12499_s4 + $0x160] sm:$0xff]  ;;  %v2959_v34 = vld [vmem:[%s12499_s4 + $0x198] sm:$0xff] }
 0x36a   :  { %6004 = vmatprep.subr.bf16.mxu1 %v6003_v58  ;;  %v1879_v58 = vld [vmem:[%s12498_s3 + $0x1870] sm:$0xff] }
 0x36b   :  { %5912 = vmatpush1.bf16.msra.mxu0 %v5911_v59  ;;  %v5939_v59 = vpack.c.bf16 %v1879_v58, %v1875_v5  ;;  %v2966_v5 = vld [vmem:[%s12499_s4 + $0x1d0] sm:$0xff]  ;;  %v2973_v58 = vld [vmem:[%s12499_s4 + $0x208] sm:$0xff] }
 0x36c   :  { %5914 = vmatprep.subr.bf16.mxu0 %v5913_v60  ;;  %v1887_v60 = vld [vmem:[%s12498_s3 + $0x18b0] sm:$0xff] }
 0x36d   :  { %6006 = vmatpush1.bf16.msra.mxu1 %v6005_v17  ;;  %v5943_v16 = vpack.c.bf16 %v1887_v60, %v1883_v12  ;;  %v1895_v17 = vld [vmem:[%s12498_s3 + $0x18f0] sm:$0x1f]  ;;  %v2980_v12 = vld [vmem:[%s12499_s4 + $0x240] sm:$0xff]  ;;  %v2987_v60 = vld [vmem:[%s12499_s4 + $0x278] sm:$0xff] }
 0x36e   :  { %6008 = vmatprep.subr.bf16.mxu1 %v6007_v52  ;;  %v2911_v52 = vld [vmem:[%s12499_s4 + $0x18] sm:$0xff]  ;;  %v5948_v42 = vpack.c.bf16 %v1895_v17, %v1891_v51  ;;  %v2994_v51 = vld [vmem:[%s12499_s4 + $0x2b0] sm:$0xff]  ;;  %v3001_v17 = vld [vmem:[%s12499_s4 + $0x2e8] sm:$0xff] }
 0x36f   :  { %5916 = vmatpush1.bf16.msra.mxu0 %v5915_v30  ;;  %v3126_v30 = vld [vmem:[%s12499_s4 + $0x6d0] sm:$0xff] }
 0x370   :  { %5918 = vmatprep.subr.bf16.mxu0 %v5917_v45  ;;  %v6011_v45 = vpack.c.bf16 %v3126_v30, %v3119_v53  ;;  %v6085_v53 = vpack.c.bf16 %v3001_v17, %v2994_v51  ;;  %v3128_v51 = vld [vmem:[%s12499_s4 + $0x6e0] sm:$0xff] }
 0x371   :  { %6010 = vmatpush1.bf16.msra.mxu1 %v6009_v7  ;;  %v6059_v7 = vpack.c.bf16 %v2918_v23, %v2911_v52  ;;  %v3009_v52 = vld [vmem:[%s12499_s4 + $0x328] sm:$0xff]  ;;  %v3016_v23 = vld [vmem:[%s12499_s4 + $0x360] sm:$0xff] }
 0x372   :  { %6012 = vmatprep.subr.bf16.mxu1 %v6011_v45  ;;  %v6087_v30 = vpack.c.bf16 %v3016_v23, %v3009_v52  ;;  %v3008_v45 = vld [vmem:[%s12499_s4 + $0x320] sm:$0xff] }
 0x373   :  { %5920 = vmatpush1.bf16.msra.mxu0 %v5919_v48  ;;  %v2910_v48 = vld [vmem:[%s12499_s4 + $0x10] sm:$0xff]  ;;  %v3120_v23 = vld [vmem:[%s12499_s4 + $0x6a0] sm:$0xff] }
 0x374   :  { %5922 = vmatprep.subr.bf16.mxu0 %v5921_v21  ;;  %v2917_v21 = vld [vmem:[%s12499_s4 + $0x48] sm:$0xff] }
 0x375   :  { %6014 = vmatpush1.bf16.msra.mxu1 %v6013_v14  ;;  %v6061_v36 = vpack.c.bf16 %v2917_v21, %v2910_v48  ;;  %v6089_v14 = vpack.c.bf16 %v3015_v20, %v3008_v45  ;;  %v3022_v48 = vld [vmem:[%s12499_s4 + $0x390] sm:$0xff]  ;;  %v3029_v21 = vld [vmem:[%s12499_s4 + $0x3c8] sm:$0xff] }
 0x376   :  { %v3142_v45 = vld [vmem:[%s12499_s4 + $0x750] sm:$0xff] }
 0x377   :  { %5924 = vmatpush1.bf16.msra.mxu0 %v5923_v3  ;;  %v6063_v3 = vpack.c.bf16 %v2932_v54, %v2925_v39  ;;  %v3037_v39 = vld [vmem:[%s12499_s4 + $0x408] sm:$0xff]  ;;  %v3044_v54 = vld [vmem:[%s12499_s4 + $0x440] sm:$0xff] }
 0x378   :  { %5926 = vmatprep.subr.bf16.mxu0 %v5925_v15  ;;  %v2931_v15 = vld [vmem:[%s12499_s4 + $0xb8] sm:$0xff] }
 0x37b   :  { %5928 = vmatpush1.bf16.msra.mxu0 %v5927_v50  ;;  %v6015_v50 = vpack.c.bf16 %v3140_v6, %v3133_v22  ;;  %v3051_v22 = vld [vmem:[%s12499_s4 + $0x478] sm:$0xff]  ;;  %v3058_v6 = vld [vmem:[%s12499_s4 + $0x4b0] sm:$0xff] }
 0x37c   :  { %5930 = vmatprep.subr.bf16.mxu0 %v5929_v61  ;;  %v6065_v61 = vpack.c.bf16 %v2931_v15, %v2924_v47  ;;  %v6095_v47 = vpack.c.bf16 %v3044_v54, %v3037_v39  ;;  %v3043_v15 = vld [vmem:[%s12499_s4 + $0x438] sm:$0xff]  ;;  %v6099_v0 = vpack.c.bf16 %v3058_v6, %v3051_v22  ;;  %v3154_v54 = vld [vmem:[%s12499_s4 + $0x7b0] sm:$0xff] }
 0x37d   :  { %6016 = vmatprep.subr.bf16.mxu1 %v6015_v50  ;;  %v3050_v50 = vld [vmem:[%s12499_s4 + $0x470] sm:$0xff] }
 0x37f   :  { %5932 = vmatpush1.bf16.msra.mxu0 %v5931_v4  ;;  %v6069_v4 = vpack.c.bf16 %v2945_v63, %v2938_v25  ;;  %v3072_v25 = vld [vmem:[%s12499_s4 + $0x520] sm:$0xff] }
 0x380   :  { %5934 = vmatprep.subr.bf16.mxu0 %v5933_v8 }
 0x382   :  { %2831 = vmatmul.mubr.f32.vlgmr.msra.gmra.mrb[10].mxu0 %v10087_v19  ;;  %v1896_v19 = vld [vmem:[%s12498_s3 + $0x18f8] sm:$0x1f] }
 0x383   :  { %5936 = vmatpush1.bf16.msra.mxu0 %v5935_v49  ;;  %2901 = vmatprep.mubr.f32.mxu0 %v6719_v28  ;;  %v5945_v62 = vpack.c.bf16 %v1896_v19, %v1892_v44  ;;  %v6073_v49 = vpack.c.bf16 %v2959_v34, %v2952_v10  ;;  %v2995_v44 = vld [vmem:[%s12499_s4 + $0x2b8] sm:$0xff]  ;;  %v3002_v19 = vld [vmem:[%s12499_s4 + $0x2f0] sm:$0xff] }
 0x384   :  { %5938 = vmatprep.subr.bf16.mxu0 %v5937_v24  ;;  %v6075_v24 = vpack.c.bf16 %v2974_v11, %v2967_v46  ;;  %v3086_v10 = vld [vmem:[%s12499_s4 + $0x590] sm:$0xff] }
 0x385   :  { %v3078_v11 = vld [vmem:[%s12499_s4 + $0x550] sm:$0xff] }
 0x387   :  { %5940 = vmatpush1.bf16.msra.mxu0 %v5939_v59  ;;  %v6077_v59 = vpack.c.bf16 %v2973_v58, %v2966_v5  ;;  %v3100_v5 = vld [vmem:[%s12499_s4 + $0x600] sm:$0xff] }
 0x388   :  { %5942 = vmatprep.subr.bf16.mxu0 %v5941_v41  ;;  %v6079_v41 = vpack.c.bf16 %v2988_v43, %v2981_v27  ;;  %v3092_v43 = vld [vmem:[%s12499_s4 + $0x5c0] sm:$0xff] }
 0x38b   :  { %5944 = vmatpush1.bf16.msra.mxu0 %v5943_v16  ;;  %v6081_v16 = vpack.c.bf16 %v2987_v60, %v2980_v12  ;;  %v3114_v12 = vld [vmem:[%s12499_s4 + $0x670] sm:$0xff] }
 0x38c   :  { %5947 = vmatprep.subr.msk.bf16.mxu0 %vm10145_vm6, %v5945_v62  ;;  %v6083_v62 = vpack.c.bf16 %v3002_v19, %v2995_v44  ;;  %v3106_v19 = vld [vmem:[%s12499_s4 + $0x630] sm:$0xff] }
 0x38f   :  { %5950 = vmatpush1.bf16.msk.msra.mxu0 %vm10145_vm6, %v5948_v42  ;;  %v3030_v42 = vld [vmem:[%s12499_s4 + $0x3d0] sm:$0xff] }
 0x390   :  { %6060 = vmatprep.subr.bf16.mxu0 %v6059_v7  ;;  %v6091_v7 = vpack.c.bf16 %v3030_v42, %v3023_v26  ;;  %v3132_v42 = vld [vmem:[%s12499_s4 + $0x700] sm:$0xff] }
 0x392   :  { %4793 = vmatmul.mubr.msk.f32.vlgmr.msra.gmra.mrb[10].mxu0 %vm1897_vm7, %v10197_v40  ;;  %v2960_v40 = vld [vmem:[%s12499_s4 + $0x1a0] sm:$0xff] }
 0x393   :  { %6062 = vmatpush1.bf16.msra.mxu0 %v6061_v36  ;;  %v6071_v8 = vpack.c.bf16 %v2960_v40, %v2953_v1  ;;  %v6093_v36 = vpack.c.bf16 %v3029_v21, %v3022_v48  ;;  %v3064_v40 = vld [vmem:[%s12499_s4 + $0x4e0] sm:$0xff]  ;;  %v3141_v48 = vld [vmem:[%s12499_s4 + $0x748] sm:$0xff]  ;;  %v3147_v21 = vld [vmem:[%s12499_s4 + $0x778] sm:$0xff] }
 0x394   :  { %6064 = vmatprep.subr.bf16.mxu0 %v6063_v3  ;;  %v3036_v3 = vld [vmem:[%s12499_s4 + $0x400] sm:$0xff] }
 0x395   :  { %v6097_v38 = vpack.c.bf16 %v3043_v15, %v3036_v3 }
 0x397   :  { %6066 = vmatpush1.bf16.msra.mxu0 %v6065_v61  ;;  %v3057_v61 = vld [vmem:[%s12499_s4 + $0x4a8] sm:$0xff] }
 0x398   :  { %6068 = vmatprep.subr.bf16.mxu0 %v6067_v18  ;;  %v3065_v18 = vld [vmem:[%s12499_s4 + $0x4e8] sm:$0xff]  ;;  %v6101_v63 = vpack.c.bf16 %v3057_v61, %v3050_v50  ;;  %v6019_v61 = vpack.c.bf16 %v3154_v54, %v3147_v21  ;;  %v3210_v21 = vld [vmem:[%s12499_s4 + $0x970] sm:$0xff]  ;;  %v3212_v54 = vld [vmem:[%s12499_s4 + $0x980] sm:$0xff] }
 0x399   :  { %v6103_v1 = vpack.c.bf16 %v3072_v25, %v3065_v18  ;;  %v3153_v50 = vld [vmem:[%s12499_s4 + $0x7a8] sm:$0xff] }
 0x39a   :  { %v3161_v25 = vld [vmem:[%s12499_s4 + $0x7e8] sm:$0xff] }
 0x39b   :  { %6070 = vmatpush1.bf16.msra.mxu0 %v6069_v4  ;;  %v3071_v4 = vld [vmem:[%s12499_s4 + $0x518] sm:$0xff] }
 0x39c   :  { %6072 = vmatprep.subr.bf16.mxu0 %v6071_v8  ;;  %v3079_v8 = vld [vmem:[%s12499_s4 + $0x558] sm:$0xff]  ;;  %v6105_v34 = vpack.c.bf16 %v3071_v4, %v3064_v40  ;;  %v3170_v40 = vld [vmem:[%s12499_s4 + $0x830] sm:$0xff] }
 0x39d   :  { %v6107_v46 = vpack.c.bf16 %v3086_v10, %v3079_v8  ;;  %v3160_v10 = vld [vmem:[%s12499_s4 + $0x7e0] sm:$0xff] }
 0x39f   :  { %6074 = vmatpush1.bf16.msra.mxu0 %v6073_v49  ;;  %v3085_v49 = vld [vmem:[%s12499_s4 + $0x588] sm:$0xff] }
 0x3a0   :  { %6076 = vmatprep.subr.bf16.mxu0 %v6075_v24  ;;  %v3093_v24 = vld [vmem:[%s12499_s4 + $0x5c8] sm:$0xff]  ;;  %v6109_v58 = vpack.c.bf16 %v3085_v49, %v3078_v11  ;;  %v3162_v49 = vld [vmem:[%s12499_s4 + $0x7f0] sm:$0xff] }
 0x3a1   :  { %v6111_v27 = vpack.c.bf16 %v3100_v5, %v3093_v24  ;;  %v3169_v24 = vld [vmem:[%s12499_s4 + $0x828] sm:$0xff]  ;;  %v3175_v5 = vld [vmem:[%s12499_s4 + $0x858] sm:$0xff] }
 0x3a3   :  { %6078 = vmatpush1.bf16.msra.mxu0 %v6077_v59  ;;  %v3099_v59 = vld [vmem:[%s12499_s4 + $0x5f8] sm:$0xff] }
 0x3a4   :  { %6080 = vmatprep.subr.bf16.mxu0 %v6079_v41  ;;  %v3107_v41 = vld [vmem:[%s12499_s4 + $0x638] sm:$0xff]  ;;  %v6113_v60 = vpack.c.bf16 %v3099_v59, %v3092_v43  ;;  %v3184_v43 = vld [vmem:[%s12499_s4 + $0x8a0] sm:$0xff] }
 0x3a5   :  { %v6115_v44 = vpack.c.bf16 %v3114_v12, %v3107_v41  ;;  %v6133_v41 = vpack.c.bf16 %v3169_v24, %v3162_v49  ;;  %v3174_v12 = vld [vmem:[%s12499_s4 + $0x850] sm:$0xff]  ;;  %v3233_v24 = vld [vmem:[%s12499_s4 + $0xa28] sm:$0xff] }
 0x3a6   :  { %v3238_v49 = vld [vmem:[%s12499_s4 + $0xa50] sm:$0xff] }
 0x3a7   :  { %6082 = vmatpush1.bf16.msra.mxu0 %v6081_v16  ;;  %v3113_v16 = vld [vmem:[%s12499_s4 + $0x668] sm:$0xff] }
 0x3a8   :  { %6084 = vmatprep.subr.bf16.mxu0 %v6083_v62  ;;  %v3121_v62 = vld [vmem:[%s12499_s4 + $0x6a8] sm:$0xff]  ;;  %v6117_v17 = vpack.c.bf16 %v3113_v16, %v3106_v19  ;;  %v3176_v16 = vld [vmem:[%s12499_s4 + $0x860] sm:$0xff] }
 0x3a9   :  { %v6119_v52 = vpack.c.bf16 %v3128_v51, %v3121_v62  ;;  %v3183_v62 = vld [vmem:[%s12499_s4 + $0x898] sm:$0xff]  ;;  %v3189_v51 = vld [vmem:[%s12499_s4 + $0x8c8] sm:$0xff] }
 0x3ab   :  { %6086 = vmatpush1.bf16.msra.mxu0 %v6085_v53  ;;  %v3127_v53 = vld [vmem:[%s12499_s4 + $0x6d8] sm:$0xff] }
 0x3ac   :  { %6088 = vmatprep.subr.bf16.mxu0 %v6087_v30  ;;  %v3135_v30 = vld [vmem:[%s12499_s4 + $0x718] sm:$0xff]  ;;  %v6121_v20 = vpack.c.bf16 %v3127_v53, %v3120_v23  ;;  %v3198_v23 = vld [vmem:[%s12499_s4 + $0x910] sm:$0xff] }
 0x3ad   :  { %v6123_v26 = vpack.c.bf16 %v3142_v45, %v3135_v30  ;;  %v6137_v30 = vpack.c.bf16 %v3183_v62, %v3176_v16  ;;  %v3188_v45 = vld [vmem:[%s12499_s4 + $0x8c0] sm:$0xff]  ;;  %v3247_v62 = vld [vmem:[%s12499_s4 + $0xa98] sm:$0xff] }
 0x3ae   :  { %v3252_v16 = vld [vmem:[%s12499_s4 + $0xac0] sm:$0xff] }
 0x3af   :  { %6090 = vmatpush1.bf16.msra.mxu0 %v6089_v14  ;;  %v3139_v14 = vld [vmem:[%s12499_s4 + $0x738] sm:$0xff] }
 0x3b0   :  { %6092 = vmatprep.subr.bf16.mxu0 %v6091_v7  ;;  %v3134_v7 = vld [vmem:[%s12499_s4 + $0x710] sm:$0xff]  ;;  %v6017_v6 = vpack.c.bf16 %v3139_v14, %v3132_v42 }
 0x3b1   :  { %v3190_v14 = vld [vmem:[%s12499_s4 + $0x8d0] sm:$0xff] }
 0x3b3   :  { %6094 = vmatpush1.bf16.msra.mxu0 %v6093_v36  ;;  %v3149_v36 = vld [vmem:[%s12499_s4 + $0x788] sm:$0xff] }
 0x3b4   :  { %6096 = vmatprep.subr.bf16.mxu0 %v6095_v47  ;;  %v3156_v47 = vld [vmem:[%s12499_s4 + $0x7c0] sm:$0xff] }
 0x3b5   :  { %v6127_v18 = vpack.c.bf16 %v3156_v47, %v3149_v36 }
 0x3b7   :  { %6098 = vmatpush1.bf16.msra.mxu0 %v6097_v38  ;;  %v6125_v38 = vpack.c.bf16 %v3141_v48, %v3134_v7  ;;  %v3197_v7 = vld [vmem:[%s12499_s4 + $0x908] sm:$0xff]  ;;  %v3203_v48 = vld [vmem:[%s12499_s4 + $0x938] sm:$0xff] }
 0x3b8   :  { %6100 = vmatprep.subr.bf16.mxu0 %v6099_v0  ;;  %v3146_v0 = vld [vmem:[%s12499_s4 + $0x770] sm:$0xff]  ;;  %v6141_v47 = vpack.c.bf16 %v3197_v7, %v3190_v14  ;;  %v3261_v7 = vld [vmem:[%s12499_s4 + $0xb08] sm:$0xff] }
 0x3b9   :  { %v6021_v4 = vpack.c.bf16 %v3153_v50, %v3146_v0  ;;  %v3204_v50 = vld [vmem:[%s12499_s4 + $0x940] sm:$0xff]  ;;  %v3266_v14 = vld [vmem:[%s12499_s4 + $0xb30] sm:$0xff] }
 0x3bb   :  { %6102 = vmatpush1.bf16.msra.mxu0 %v6101_v63  ;;  %v3168_v63 = vld [vmem:[%s12499_s4 + $0x820] sm:$0xff] }
 0x3bc   :  { %6104 = vmatprep.subr.bf16.mxu0 %v6103_v1  ;;  %v3163_v1 = vld [vmem:[%s12499_s4 + $0x7f8] sm:$0xff] }
 0x3bd   :  { %v6131_v11 = vpack.c.bf16 %v3170_v40, %v3163_v1  ;;  %v3216_v40 = vld [vmem:[%s12499_s4 + $0x9a0] sm:$0xff] }
 0x3bf   :  { %6106 = vmatpush1.bf16.msra.mxu0 %v6105_v34  ;;  %v3167_v34 = vld [vmem:[%s12499_s4 + $0x818] sm:$0xff] }
 0x3c0   :  { %6108 = vmatprep.subr.bf16.mxu0 %v6107_v46  ;;  %v6023_v46 = vpack.c.bf16 %v3168_v63, %v3161_v25  ;;  %v6025_v59 = vpack.c.bf16 %v3167_v34, %v3160_v10  ;;  %v3226_v25 = vld [vmem:[%s12499_s4 + $0x9f0] sm:$0xff] }
 0x3c1   :  { %v3218_v34 = vld [vmem:[%s12499_s4 + $0x9b0] sm:$0xff] }
 0x3c3   :  { %6110 = vmatpush1.bf16.msra.mxu0 %v6109_v58  ;;  %v3182_v58 = vld [vmem:[%s12499_s4 + $0x890] sm:$0xff] }
 0x3c4   :  { %6112 = vmatprep.subr.bf16.mxu0 %v6111_v27  ;;  %v3177_v27 = vld [vmem:[%s12499_s4 + $0x868] sm:$0xff] }
 0x3c5   :  { %v6135_v19 = vpack.c.bf16 %v3184_v43, %v3177_v27  ;;  %v3230_v43 = vld [vmem:[%s12499_s4 + $0xa10] sm:$0xff] }
 0x3c7   :  { %6114 = vmatpush1.bf16.msra.mxu0 %v6113_v60  ;;  %v3181_v60 = vld [vmem:[%s12499_s4 + $0x888] sm:$0xff] }
 0x3c8   :  { %6116 = vmatprep.subr.bf16.mxu0 %v6115_v44  ;;  %v6027_v44 = vpack.c.bf16 %v3182_v58, %v3175_v5  ;;  %v6029_v53 = vpack.c.bf16 %v3181_v60, %v3174_v12  ;;  %v3240_v5 = vld [vmem:[%s12499_s4 + $0xa60] sm:$0xff] }
 0x3c9   :  { %v6151_v12 = vpack.c.bf16 %v3240_v5, %v3233_v24  ;;  %v3232_v60 = vld [vmem:[%s12499_s4 + $0xa20] sm:$0xff]  ;;  %v3026_v5 = vld [vmem:[%s12499_s4 + $0x3b0] sm:$0xff] }
 0x3ca   :  { %v2920_v24 = vld [vmem:[%s12499_s4 + $0x60] sm:$0xff] }
 0x3cb   :  { %6118 = vmatpush1.bf16.msra.mxu0 %v6117_v17  ;;  %v3196_v17 = vld [vmem:[%s12499_s4 + $0x900] sm:$0xff] }
 0x3cc   :  { %6120 = vmatprep.subr.bf16.mxu0 %v6119_v52  ;;  %v3191_v52 = vld [vmem:[%s12499_s4 + $0x8d8] sm:$0xff] }
 0x3cd   :  { %v6139_v42 = vpack.c.bf16 %v3198_v23, %v3191_v52  ;;  %v3244_v23 = vld [vmem:[%s12499_s4 + $0xa80] sm:$0xff] }
 0x3cf   :  { %6122 = vmatpush1.bf16.msra.mxu0 %v6121_v20  ;;  %v3195_v20 = vld [vmem:[%s12499_s4 + $0x8f8] sm:$0xff] }
 0x3d0   :  { %6124 = vmatprep.subr.bf16.mxu0 %v6123_v26  ;;  %v6031_v26 = vpack.c.bf16 %v3196_v17, %v3189_v51  ;;  %v6033_v36 = vpack.c.bf16 %v3195_v20, %v3188_v45  ;;  %v3254_v51 = vld [vmem:[%s12499_s4 + $0xad0] sm:$0xff] }
 0x3d1   :  { %v6155_v45 = vpack.c.bf16 %v3254_v51, %v3247_v62  ;;  %v3246_v20 = vld [vmem:[%s12499_s4 + $0xa90] sm:$0xff]  ;;  %v3040_v51 = vld [vmem:[%s12499_s4 + $0x420] sm:$0xff] }
 0x3d2   :  { %v2934_v62 = vld [vmem:[%s12499_s4 + $0xd0] sm:$0xff] }
 0x40b   :  { %v2406_v39 = vpop.f32.mrb[6].mxu1 }
 0x40c   :  { %v10860_v3 = vadd.f32 %v2406_v39, %v9574_v9  ;;  %v2408_v15 = vpop.f32.mrb[7].mxu1  ;;  %v3148_v9 = vld [vmem:[%s12499_s4 + $0x780] sm:$0xff]  ;;  %v3205_v39 = vld [vmem:[%s12499_s4 + $0x948] sm:$0xff] }
 0x40d   :  { %v10863_v22 = vadd.f32 %v2408_v15, %v9582_v29  ;;  %v3155_v29 = vld [vmem:[%s12499_s4 + $0x7b8] sm:$0xff]  ;;  %v3202_v15 = vld [vmem:[%s12499_s4 + $0x930] sm:$0xff]  ;;  %v6143_v0 = vpack.c.bf16 %v3212_v54, %v3205_v39 }
 0x40e   :  { %v6129_v8 = vpack.c.bf16 %v3155_v29, %v3148_v9  ;;  %v3224_v9 = vld [vmem:[%s12499_s4 + $0x9e0] sm:$0xff]  ;;  %v3219_v29 = vld [vmem:[%s12499_s4 + $0x9b8] sm:$0xff]  ;;  %v3258_v54 = vld [vmem:[%s12499_s4 + $0xaf0] sm:$0xff] }
 0x40f   :  { %3398 = vmatprep.mubr.f32.mxu1 %v10863_v22  ;;  %3540 = vmatprep.mubr.f32.mxu0 %v10863_v22  ;;  %v6147_v10 = vpack.c.bf16 %v3226_v25, %v3219_v29  ;;  %v3272_v25 = vld [vmem:[%s12499_s4 + $0xb60] sm:$0xff] }
 0x410   :  { %3399 = vmatmul.mubr.f32.vlgmr.msra.gmra.mrb[8].mxu1 %v10860_v3  ;;  %3541 = vmatmul.mubr.f32.vlgmr.msra.gmra.mrb[12].mxu0 %v10860_v3 }
 0x411   :  { %6018 = vmatpush1.bf16.msra.mxu1 %v6017_v6  ;;  %6126 = vmatpush1.bf16.msra.mxu0 %v6125_v38  ;;  %v3209_v6 = vld [vmem:[%s12499_s4 + $0x968] sm:$0xff]  ;;  %v6035_v38 = vpack.c.bf16 %v3210_v21, %v3203_v48  ;;  %v3268_v48 = vld [vmem:[%s12499_s4 + $0xb40] sm:$0xff] }
 0x412   :  { %6020 = vmatprep.subr.bf16.mxu1 %v6019_v61  ;;  %6128 = vmatprep.subr.bf16.mxu0 %v6127_v18  ;;  %v3211_v61 = vld [vmem:[%s12499_s4 + $0x978] sm:$0xff]  ;;  %v3217_v18 = vld [vmem:[%s12499_s4 + $0x9a8] sm:$0xff]  ;;  %v6037_v63 = vpack.c.bf16 %v3209_v6, %v3202_v15  ;;  %v6159_v15 = vpack.c.bf16 %v3268_v48, %v3261_v7  ;;  %v3260_v6 = vld [vmem:[%s12499_s4 + $0xb00] sm:$0xff] }
 0x413   :  { %v6145_v1 = vpack.c.bf16 %v3211_v61, %v3204_v50  ;;  %v3280_v50 = vld [vmem:[%s12499_s4 + $0xba0] sm:$0xff]  ;;  %v3275_v61 = vld [vmem:[%s12499_s4 + $0xb78] sm:$0xff] }
 0x415   :  { %6022 = vmatpush1.bf16.msra.mxu1 %v6021_v4  ;;  %6130 = vmatpush1.bf16.msra.mxu0 %v6129_v8  ;;  %v3223_v4 = vld [vmem:[%s12499_s4 + $0x9d8] sm:$0xff]  ;;  %v6039_v8 = vpack.c.bf16 %v3224_v9, %v3217_v18  ;;  %v3282_v18 = vld [vmem:[%s12499_s4 + $0xbb0] sm:$0xff] }
 0x416   :  { %6024 = vmatprep.subr.bf16.mxu1 %v6023_v46  ;;  %6132 = vmatprep.subr.bf16.mxu0 %v6131_v11  ;;  %v3225_v46 = vld [vmem:[%s12499_s4 + $0x9e8] sm:$0xff]  ;;  %v3231_v11 = vld [vmem:[%s12499_s4 + $0xa18] sm:$0xff]  ;;  %v6041_v58 = vpack.c.bf16 %v3223_v4, %v3216_v40  ;;  %v3274_v4 = vld [vmem:[%s12499_s4 + $0xb70] sm:$0xff] }
 0x417   :  { %v6149_v27 = vpack.c.bf16 %v3225_v46, %v3218_v34  ;;  %v3279_v40 = vld [vmem:[%s12499_s4 + $0xb98] sm:$0xff] }
 0x418   :  { %v3287_v46 = vld [vmem:[%s12499_s4 + $0xbd8] sm:$0xff] }
 0x419   :  { %6026 = vmatpush1.bf16.msra.mxu1 %v6025_v59  ;;  %6134 = vmatpush1.bf16.msra.mxu0 %v6133_v41  ;;  %v3237_v59 = vld [vmem:[%s12499_s4 + $0xa48] sm:$0xff]  ;;  %v6043_v41 = vpack.c.bf16 %v3238_v49, %v3231_v11 }
 0x41a   :  { %6028 = vmatprep.subr.bf16.mxu1 %v6027_v44  ;;  %6136 = vmatprep.subr.bf16.mxu0 %v6135_v19  ;;  %v3239_v44 = vld [vmem:[%s12499_s4 + $0xa58] sm:$0xff]  ;;  %v3245_v19 = vld [vmem:[%s12499_s4 + $0xa88] sm:$0xff]  ;;  %v6045_v17 = vpack.c.bf16 %v3237_v59, %v3230_v43  ;;  %v3288_v43 = vld [vmem:[%s12499_s4 + $0xbe0] sm:$0xff] }
 0x41b   :  { %v6153_v52 = vpack.c.bf16 %v3239_v44, %v3232_v60  ;;  %v3289_v11 = vld [vmem:[%s12499_s4 + $0xbe8] sm:$0xff]  ;;  %v2919_v60 = vld [vmem:[%s12499_s4 + $0x58] sm:$0xff]  ;;  %v2914_v44 = vld [vmem:[%s12499_s4 + $0x30] sm:$0xff] }
 0x41c   :  { %v2913_v49 = vld [vmem:[%s12499_s4 + $0x28] sm:$0xff] }
 0x41d   :  { %6030 = vmatpush1.bf16.msra.mxu1 %v6029_v53  ;;  %6138 = vmatpush1.bf16.msra.mxu0 %v6137_v30  ;;  %v3251_v53 = vld [vmem:[%s12499_s4 + $0xab8] sm:$0xff]  ;;  %v6047_v30 = vpack.c.bf16 %v3252_v16, %v3245_v19  ;;  %v6167_v59 = vpack.c.bf16 %v2920_v24, %v2913_v49  ;;  %v2921_v19 = vld [vmem:[%s12499_s4 + $0x68] sm:$0xff]  ;;  %v3082_v49 = vld [vmem:[%s12499_s4 + $0x570] sm:$0xff] }
 0x41e   :  { %6032 = vmatprep.subr.bf16.mxu1 %v6031_v26  ;;  %6140 = vmatprep.subr.bf16.mxu0 %v6139_v42  ;;  %v3253_v26 = vld [vmem:[%s12499_s4 + $0xac8] sm:$0xff]  ;;  %v3259_v42 = vld [vmem:[%s12499_s4 + $0xaf8] sm:$0xff]  ;;  %v6049_v21 = vpack.c.bf16 %v3251_v53, %v3244_v23  ;;  %v6277_v53 = vpack.c.bf16 %v2921_v19, %v2914_v44  ;;  %v2990_v19 = vld [vmem:[%s12499_s4 + $0x290] sm:$0xff] }
 0x41f   :  { %v6157_v39 = vpack.c.bf16 %v3253_v26, %v3246_v20  ;;  %v2927_v16 = vld [vmem:[%s12499_s4 + $0x98] sm:$0xff]  ;;  %v2928_v26 = vld [vmem:[%s12499_s4 + $0xa0] sm:$0xff]  ;;  %v3089_v24 = vld [vmem:[%s12499_s4 + $0x5a8] sm:$0xff] }
 0x420   :  { %v6171_v7 = vpack.c.bf16 %v2934_v62, %v2927_v16  ;;  %v2983_v44 = vld [vmem:[%s12499_s4 + $0x258] sm:$0xff]  ;;  %v3096_v16 = vld [vmem:[%s12499_s4 + $0x5e0] sm:$0xff] }
 0x421   :  { %6034 = vmatpush1.bf16.msra.mxu1 %v6033_v36  ;;  %6142 = vmatpush1.bf16.msra.mxu0 %v6141_v47  ;;  %v3265_v36 = vld [vmem:[%s12499_s4 + $0xb28] sm:$0xff]  ;;  %v6051_v47 = vpack.c.bf16 %v3266_v14, %v3259_v42  ;;  %v2935_v42 = vld [vmem:[%s12499_s4 + $0xd8] sm:$0xff] }
 0x422   :  { %6036 = vmatprep.subr.bf16.mxu1 %v6035_v38  ;;  %6144 = vmatprep.subr.bf16.mxu0 %v6143_v0  ;;  %v3267_v38 = vld [vmem:[%s12499_s4 + $0xb38] sm:$0xff]  ;;  %v3273_v0 = vld [vmem:[%s12499_s4 + $0xb68] sm:$0xff]  ;;  %v6053_v9 = vpack.c.bf16 %v3265_v36, %v3258_v54 }
 0x423   :  { %v6161_v29 = vpack.c.bf16 %v3267_v38, %v3260_v6  ;;  %v2941_v14 = vld [vmem:[%s12499_s4 + $0x108] sm:$0xff]  ;;  %v2947_v6 = vld [vmem:[%s12499_s4 + $0x138] sm:$0xff] }
 0x424   :  { %v3061_v54 = vld [vmem:[%s12499_s4 + $0x4c8] sm:$0xff]  ;;  %v3103_v62 = vld [vmem:[%s12499_s4 + $0x618] sm:$0xff] }
 0x425   :  { %6038 = vmatpush1.bf16.msra.mxu1 %v6037_v63  ;;  %6146 = vmatpush1.bf16.msra.mxu0 %v6145_v1  ;;  %v6055_v63 = vpack.c.bf16 %v3280_v50, %v3273_v0  ;;  %v6163_v1 = vpack.c.bf16 %v3282_v18, %v3275_v61  ;;  %v2942_v50 = vld [vmem:[%s12499_s4 + $0x110] sm:$0xff]  ;;  %v2949_v61 = vld [vmem:[%s12499_s4 + $0x148] sm:$0xff]  ;;  %v2955_v18 = vld [vmem:[%s12499_s4 + $0x178] sm:$0xff] }
 0x426   :  { %6040 = vmatprep.subr.bf16.mxu1 %v6039_v8  ;;  %6148 = vmatprep.subr.bf16.mxu0 %v6147_v10  ;;  %v3281_v8 = vld [vmem:[%s12499_s4 + $0xba8] sm:$0xff]  ;;  %v6057_v10 = vpack.c.bf16 %v3279_v40, %v3272_v25 }
 0x427   :  { %v6165_v34 = vpack.c.bf16 %v3281_v8, %v3274_v4  ;;  %v2961_v40 = vld [vmem:[%s12499_s4 + $0x1a8] sm:$0xff] }
 0x429   :  { %6042 = vmatpush1.bf16.msra.mxu1 %v6041_v58  ;;  %6150 = vmatpush1.bf16.msra.mxu0 %v6149_v27  ;;  %v3033_v58 = vld [vmem:[%s12499_s4 + $0x3e8] sm:$0xff]  ;;  %v3286_v27 = vld [vmem:[%s12499_s4 + $0xbd0] sm:$0xff] }
 0x42a   :  { %6044 = vmatprep.subr.bf16.mxu1 %v6043_v41  ;;  %6152 = vmatprep.subr.bf16.mxu0 %v6151_v12  ;;  %v6275_v41 = vpack.c.bf16 %v3033_v58, %v3026_v5  ;;  %v2912_v12 = vld [vmem:[%s12499_s4 + $0x20] sm:$0xff] }
 0x42b   :  { %v6169_v23 = vpack.c.bf16 %v2919_v60, %v2912_v12  ;;  %v2970_v12 = vld [vmem:[%s12499_s4 + $0x1f0] sm:$0xff]  ;;  %v2977_v60 = vld [vmem:[%s12499_s4 + $0x228] sm:$0xff] }
 0x42d   :  { %6046 = vmatpush1.bf16.msra.mxu1 %v6045_v17  ;;  %6154 = vmatpush1.bf16.msra.mxu0 %v6153_v52  ;;  %v3047_v17 = vld [vmem:[%s12499_s4 + $0x458] sm:$0xff] }
 0x42e   :  { %6048 = vmatprep.subr.bf16.mxu1 %v6047_v30  ;;  %6156 = vmatprep.subr.bf16.mxu0 %v6155_v45  ;;  %v2926_v30 = vld [vmem:[%s12499_s4 + $0x90] sm:$0xff]  ;;  %v2933_v45 = vld [vmem:[%s12499_s4 + $0xc8] sm:$0xff]  ;;  %v6279_v48 = vpack.c.bf16 %v3047_v17, %v3040_v51  ;;  %v6293_v17 = vpack.c.bf16 %v2977_v60, %v2970_v12 }
 0x42f   :  { %v6173_v36 = vpack.c.bf16 %v2933_v45, %v2926_v30  ;;  %v6187_v30 = vpack.c.bf16 %v2990_v19, %v2983_v44  ;;  %v6295_v45 = vpack.c.bf16 %v3103_v62, %v3096_v16  ;;  %v3038_v60 = vld [vmem:[%s12499_s4 + $0x410] sm:$0xff]  ;;  %v3045_v19 = vld [vmem:[%s12499_s4 + $0x448] sm:$0xff]  ;;  %v3152_v16 = vld [vmem:[%s12499_s4 + $0x7a0] sm:$0xff] }
 0x430   :  { %v3159_v62 = vld [vmem:[%s12499_s4 + $0x7d8] sm:$0xff] }
 0x431   :  { %6050 = vmatpush1.bf16.msra.mxu1 %v6049_v21  ;;  %6158 = vmatpush1.bf16.msra.mxu0 %v6157_v39  ;;  %v2948_v21 = vld [vmem:[%s12499_s4 + $0x140] sm:$0xff]  ;;  %v3054_v39 = vld [vmem:[%s12499_s4 + $0x490] sm:$0xff] }
 0x432   :  { %6052 = vmatprep.subr.bf16.mxu1 %v6051_v47  ;;  %6160 = vmatprep.subr.bf16.mxu0 %v6159_v15  ;;  %v6281_v47 = vpack.c.bf16 %v2935_v42, %v2928_v26  ;;  %v2940_v15 = vld [vmem:[%s12499_s4 + $0x100] sm:$0xff]  ;;  %v6175_v38 = vpack.c.bf16 %v2948_v21, %v2941_v14  ;;  %v6283_v0 = vpack.c.bf16 %v3061_v54, %v3054_v39  ;;  %v2991_v42 = vld [vmem:[%s12499_s4 + $0x298] sm:$0xff]  ;;  %v2997_v14 = vld [vmem:[%s12499_s4 + $0x2c8] sm:$0xff] }
 0x433   :  { %v6177_v25 = vpack.c.bf16 %v2947_v6, %v2940_v15  ;;  %v2984_v26 = vld [vmem:[%s12499_s4 + $0x260] sm:$0xff]  ;;  %v3117_v21 = vld [vmem:[%s12499_s4 + $0x688] sm:$0xff] }
 0x434   :  { %v6297_v54 = vpack.c.bf16 %v2991_v42, %v2984_v26  ;;  %v3059_v26 = vld [vmem:[%s12499_s4 + $0x4b8] sm:$0xff]  ;;  %v3166_v42 = vld [vmem:[%s12499_s4 + $0x810] sm:$0xff] }
 0x435   :  { %6054 = vmatpush1.bf16.msra.mxu1 %v6053_v9  ;;  %6162 = vmatpush1.bf16.msra.mxu0 %v6161_v29  ;;  %v3068_v9 = vld [vmem:[%s12499_s4 + $0x500] sm:$0xff]  ;;  %v3075_v29 = vld [vmem:[%s12499_s4 + $0x538] sm:$0xff] }
 0x436   :  { %6056 = vmatprep.subr.bf16.mxu1 %v6055_v63  ;;  %6164 = vmatprep.subr.bf16.mxu0 %v6163_v1  ;;  %v6285_v63 = vpack.c.bf16 %v2949_v61, %v2942_v50  ;;  %v2954_v1 = vld [vmem:[%s12499_s4 + $0x170] sm:$0xff]  ;;  %v6287_v8 = vpack.c.bf16 %v3075_v29, %v3068_v9  ;;  %v3011_v50 = vld [vmem:[%s12499_s4 + $0x338] sm:$0xff] }
 0x437   :  { %v6181_v5 = vpack.c.bf16 %v2961_v40, %v2954_v1  ;;  %v3018_v61 = vld [vmem:[%s12499_s4 + $0x370] sm:$0xff]  ;;  %v3017_v40 = vld [vmem:[%s12499_s4 + $0x368] sm:$0xff] }
 0x439   :  { %6058 = vmatpush1.bf16.msra.mxu1 %v6057_v10  ;;  %6166 = vmatpush1.bf16.msra.mxu0 %v6165_v34  ;;  %v2956_v10 = vld [vmem:[%s12499_s4 + $0x180] sm:$0xff]  ;;  %v2963_v34 = vld [vmem:[%s12499_s4 + $0x1b8] sm:$0xff] }
 0x43a   :  { %3449 = vmatprep.subr.mxu1 %v3287_v46  ;;  %3591 = vmatprep.subr.mxu0 %v3289_v11  ;;  %v2969_v46 = vld [vmem:[%s12499_s4 + $0x1e8] sm:$0xff]  ;;  %v2976_v11 = vld [vmem:[%s12499_s4 + $0x220] sm:$0xff]  ;;  %v6289_v58 = vpack.c.bf16 %v2963_v34, %v2956_v10 }
 0x43b   :  { %v3025_v10 = vld [vmem:[%s12499_s4 + $0x3a8] sm:$0xff]  ;;  %v3032_v34 = vld [vmem:[%s12499_s4 + $0x3e0] sm:$0xff] }
 0x43d   :  { %3450 = vmatpush1.msra.mxu1 %v3286_v27  ;;  %3592 = vmatpush1.msra.mxu0 %v3288_v43  ;;  %v2968_v27 = vld [vmem:[%s12499_s4 + $0x1e0] sm:$0xff]  ;;  %v2975_v43 = vld [vmem:[%s12499_s4 + $0x218] sm:$0xff] }
 0x43e   :  { %6168 = vmatprep.subr.bf16.mxu1 %v6167_v59  ;;  %6276 = vmatprep.subr.bf16.mxu0 %v6275_v41  ;;  %v6183_v59 = vpack.c.bf16 %v2976_v11, %v2969_v46  ;;  %v6291_v41 = vpack.c.bf16 %v3089_v24, %v3082_v49  ;;  %v6185_v51 = vpack.c.bf16 %v2975_v43, %v2968_v27  ;;  %v3024_v49 = vld [vmem:[%s12499_s4 + $0x3a0] sm:$0xff]  ;;  %v3145_v27 = vld [vmem:[%s12499_s4 + $0x768] sm:$0xff]  ;;  %v3039_v43 = vld [vmem:[%s12499_s4 + $0x418] sm:$0xff] }
 0x43f   :  { %v6199_v24 = vpack.c.bf16 %v3032_v34, %v3025_v10  ;;  %v3101_v34 = vld [vmem:[%s12499_s4 + $0x608] sm:$0xff] }
 0x465   :  { %v11145_v52 = vpop.f32.mrb[10].mxu0 }
 0x466   :  { %v11153_v20 = vpop.f32.mrb[11].mxu0 }
 0x467   :  { %4794 = vmatprep.mubr.msk.f32.mxu1 %vm3330_vm8, %v11153_v20  ;;  %4795 = vmatprep.mubr.msk.f32.mxu0 %vm3330_vm8, %v11153_v20 }
 0x468   :  { %3470 = vmatmul.mubr.f32.vlgmr.msra.gmra.mrb[8].mxu1 %v11145_v52  ;;  %3612 = vmatmul.mubr.f32.vlgmr.msra.gmra.mrb[12].mxu0 %v11145_v52 }
 0x469   :  { %6170 = vmatpush1.bf16.msra.mxu1 %v6169_v23  ;;  %6278 = vmatpush3.bf16.msra.mxu0 %v6277_v53  ;;  %v2982_v23 = vld [vmem:[%s12499_s4 + $0x250] sm:$0xff]  ;;  %v2989_v53 = vld [vmem:[%s12499_s4 + $0x288] sm:$0xff] }
 0x46a   :  { %3682 = vmatprep.mubr.f32.mxu1 %v10863_v22  ;;  %3824 = vmatprep.mubr.f32.mxu0 %v10863_v22  ;;  %v2962_v22 = vld [vmem:[%s12499_s4 + $0x1b0] sm:$0xff]  ;;  %v6189_v39 = vpack.c.bf16 %v2989_v53, %v2982_v23  ;;  %v6205_v23 = vpack.c.bf16 %v3045_v19, %v3038_v60  ;;  %v6311_v53 = vpack.c.bf16 %v3159_v62, %v3152_v16  ;;  %v3123_v60 = vld [vmem:[%s12499_s4 + $0x6b8] sm:$0xff] }
 0x46b   :  { %6172 = vmatprep.subr.bf16.mxu1 %v6171_v7  ;;  %6280 = vmatprep.subr.bf16.mxu0 %v6279_v48  ;;  %v6179_v4 = vpack.c.bf16 %v2962_v22, %v2955_v18  ;;  %v3004_v7 = vld [vmem:[%s12499_s4 + $0x300] sm:$0xff]  ;;  %v3110_v48 = vld [vmem:[%s12499_s4 + $0x650] sm:$0xff]  ;;  %v3131_v22 = vld [vmem:[%s12499_s4 + $0x6f8] sm:$0xff] }
 0x46c   :  { %v6191_v15 = vpack.c.bf16 %v3004_v7, %v2997_v14  ;;  %v6299_v6 = vpack.c.bf16 %v3117_v21, %v3110_v48  ;;  %v3124_v18 = vld [vmem:[%s12499_s4 + $0x6c0] sm:$0xff]  ;;  %v3173_v14 = vld [vmem:[%s12499_s4 + $0x848] sm:$0xff]  ;;  %v3067_v7 = vld [vmem:[%s12499_s4 + $0x4f8] sm:$0xff] }
 0x46d   :  { %6174 = vmatpush1.bf16.msra.mxu1 %v6173_v36  ;;  %6282 = vmatpush3.bf16.msra.mxu0 %v6281_v47  ;;  %v2996_v36 = vld [vmem:[%s12499_s4 + $0x2c0] sm:$0xff]  ;;  %v3003_v47 = vld [vmem:[%s12499_s4 + $0x2f8] sm:$0xff]  ;;  %v6303_v1 = vpack.c.bf16 %v3131_v22, %v3124_v18  ;;  %v3074_v48 = vld [vmem:[%s12499_s4 + $0x530] sm:$0xff] }
 0x46e   :  { %6176 = vmatprep.subr.bf16.mxu1 %v6175_v38  ;;  %6284 = vmatprep.subr.bf16.mxu0 %v6283_v0  ;;  %v2998_v38 = vld [vmem:[%s12499_s4 + $0x2d0] sm:$0xff]  ;;  %v3005_v0 = vld [vmem:[%s12499_s4 + $0x308] sm:$0xff]  ;;  %v6193_v9 = vpack.c.bf16 %v3003_v47, %v2996_v36  ;;  %v6211_v36 = vpack.c.bf16 %v3074_v48, %v3067_v7  ;;  %v3080_v18 = vld [vmem:[%s12499_s4 + $0x560] sm:$0xff] }
 0x46f   :  { %v6301_v29 = vpack.c.bf16 %v3005_v0, %v2998_v38  ;;  %v3073_v47 = vld [vmem:[%s12499_s4 + $0x528] sm:$0xff]  ;;  %v3088_v0 = vld [vmem:[%s12499_s4 + $0x5a0] sm:$0xff]  ;;  %v3122_v62 = vld [vmem:[%s12499_s4 + $0x6b0] sm:$0xff] }
 0x470   :  { %v3081_v38 = vld [vmem:[%s12499_s4 + $0x568] sm:$0xff]  ;;  %v3136_v7 = vld [vmem:[%s12499_s4 + $0x720] sm:$0xff]  ;;  %v3143_v48 = vld [vmem:[%s12499_s4 + $0x758] sm:$0xff] }
 0x471   :  { %6178 = vmatpush1.bf16.msra.mxu1 %v6177_v25  ;;  %6286 = vmatpush3.bf16.msra.mxu0 %v6285_v63  ;;  %v3010_v25 = vld [vmem:[%s12499_s4 + $0x330] sm:$0xff]  ;;  %v6195_v63 = vpack.c.bf16 %v3018_v61, %v3011_v50  ;;  %v6215_v22 = vpack.c.bf16 %v3088_v0, %v3081_v38  ;;  %v3157_v0 = vld [vmem:[%s12499_s4 + $0x7c8] sm:$0xff] }
 0x472   :  { %6180 = vmatprep.subr.bf16.mxu1 %v6179_v4  ;;  %6288 = vmatprep.subr.bf16.mxu0 %v6287_v8  ;;  %v3012_v4 = vld [vmem:[%s12499_s4 + $0x340] sm:$0xff]  ;;  %v3019_v8 = vld [vmem:[%s12499_s4 + $0x378] sm:$0xff]  ;;  %v6197_v46 = vpack.c.bf16 %v3017_v40, %v3010_v25  ;;  %v3201_v25 = vld [vmem:[%s12499_s4 + $0x928] sm:$0xff] }
 0x473   :  { %v6305_v11 = vpack.c.bf16 %v3019_v8, %v3012_v4  ;;  %v3094_v8 = vld [vmem:[%s12499_s4 + $0x5d0] sm:$0xff] }
 0x474   :  { %v3150_v38 = vld [vmem:[%s12499_s4 + $0x790] sm:$0xff] }
 0x475   :  { %6182 = vmatpush1.bf16.msra.mxu1 %v6181_v5  ;;  %6290 = vmatpush3.bf16.msra.mxu0 %v6289_v58  ;;  %v3031_v5 = vld [vmem:[%s12499_s4 + $0x3d8] sm:$0xff]  ;;  %v3138_v58 = vld [vmem:[%s12499_s4 + $0x730] sm:$0xff] }
 0x476   :  { %6184 = vmatprep.subr.bf16.mxu1 %v6183_v59  ;;  %6292 = vmatprep.subr.bf16.mxu0 %v6291_v41  ;;  %v3046_v59 = vld [vmem:[%s12499_s4 + $0x450] sm:$0xff]  ;;  %v6201_v41 = vpack.c.bf16 %v3031_v5, %v3024_v49  ;;  %v6308_v12 = vpack.c.bf16 %v3145_v27, %v3138_v58  ;;  %v3109_v49 = vld [vmem:[%s12499_s4 + $0x648] sm:$0xff]  ;;  %v6221_v5 = vpack.c.bf16 %v3101_v34, %v3094_v8  ;;  %v3108_v27 = vld [vmem:[%s12499_s4 + $0x640] sm:$0xff] }
 0x477   :  { %v6203_v44 = vpack.c.bf16 %v3046_v59, %v3039_v43  ;;  %v3115_v59 = vld [vmem:[%s12499_s4 + $0x678] sm:$0xff] }
 0x478   :  { %v6225_v19 = vpack.c.bf16 %v3115_v59, %v3108_v27  ;;  %v3192_v27 = vld [vmem:[%s12499_s4 + $0x8e0] sm:$0xff] }
 0x479   :  { %6186 = vmatpush1.bf16.msra.mxu1 %v6185_v51  ;;  %6294 = vmatpush3.bf16.msra.mxu0 %v6293_v17  ;;  %v3053_v51 = vld [vmem:[%s12499_s4 + $0x488] sm:$0xff]  ;;  %v3060_v17 = vld [vmem:[%s12499_s4 + $0x4c0] sm:$0xff] }
 0x47a   :  { %6188 = vmatprep.subr.bf16.mxu1 %v6187_v30  ;;  %6296 = vmatprep.subr.bf16.mxu0 %v6295_v45  ;;  %v3052_v30 = vld [vmem:[%s12499_s4 + $0x480] sm:$0xff]  ;;  %v6207_v45 = vpack.c.bf16 %v3060_v17, %v3053_v51  ;;  %v3129_v17 = vld [vmem:[%s12499_s4 + $0x6e8] sm:$0xff] }
 0x47b   :  { %v6209_v21 = vpack.c.bf16 %v3059_v26, %v3052_v30  ;;  %v3137_v30 = vld [vmem:[%s12499_s4 + $0x728] sm:$0xff]  ;;  %v6229_v26 = vpack.c.bf16 %v3129_v17, %v3122_v62  ;;  %v3292_v59 = vld [vmem:[%s12499_s4 + $0xc00] sm:$0xff] }
 0x47c   :  { %v3221_v62 = vld [vmem:[%s12499_s4 + $0x9c8] sm:$0xff] }
 0x47d   :  { %6190 = vmatpush1.bf16.msra.mxu1 %v6189_v39  ;;  %6298 = vmatpush3.bf16.msra.mxu0 %v6297_v54  ;;  %v6314_v39 = vpack.c.bf16 %v3173_v14, %v3166_v42  ;;  %v3066_v54 = vld [vmem:[%s12499_s4 + $0x4f0] sm:$0xff] }
 0x47e   :  { %6192 = vmatprep.subr.bf16.mxu1 %v6191_v15  ;;  %6300 = vmatprep.subr.bf16.mxu0 %v6299_v6  ;;  %v3180_v15 = vld [vmem:[%s12499_s4 + $0x880] sm:$0xff]  ;;  %v3187_v6 = vld [vmem:[%s12499_s4 + $0x8b8] sm:$0xff]  ;;  %v6213_v50 = vpack.c.bf16 %v3073_v47, %v3066_v54  ;;  %v6233_v47 = vpack.c.bf16 %v3143_v48, %v3136_v7  ;;  %v3234_v7 = vld [vmem:[%s12499_s4 + $0xa30] sm:$0xff] }
 0x47f   :  { %v6317_v61 = vpack.c.bf16 %v3187_v6, %v3180_v15  ;;  %v3151_v54 = vld [vmem:[%s12499_s4 + $0x798] sm:$0xff]  ;;  %v3241_v48 = vld [vmem:[%s12499_s4 + $0xa68] sm:$0xff] }
 0x481   :  { %6194 = vmatpush1.bf16.msra.mxu1 %v6193_v9  ;;  %6302 = vmatpush3.bf16.msra.mxu0 %v6301_v29  ;;  %v3087_v9 = vld [vmem:[%s12499_s4 + $0x598] sm:$0xff]  ;;  %v3194_v29 = vld [vmem:[%s12499_s4 + $0x8f0] sm:$0xff] }
 0x482   :  { %6196 = vmatprep.subr.bf16.mxu1 %v6195_v63  ;;  %6304 = vmatprep.subr.bf16.mxu0 %v6303_v1  ;;  %v3095_v63 = vld [vmem:[%s12499_s4 + $0x5d8] sm:$0xff]  ;;  %v3102_v1 = vld [vmem:[%s12499_s4 + $0x610] sm:$0xff]  ;;  %v6217_v40 = vpack.c.bf16 %v3087_v9, %v3080_v18  ;;  %v6320_v4 = vpack.c.bf16 %v3201_v25, %v3194_v29  ;;  %v3165_v18 = vld [vmem:[%s12499_s4 + $0x808] sm:$0xff]  ;;  %v6237_v9 = vpack.c.bf16 %v3157_v0, %v3150_v38 }
 0x483   :  { %v6219_v10 = vpack.c.bf16 %v3102_v1, %v3095_v63  ;;  %v3164_v63 = vld [vmem:[%s12499_s4 + $0x800] sm:$0xff]  ;;  %v3171_v1 = vld [vmem:[%s12499_s4 + $0x838] sm:$0xff]  ;;  %v3270_v38 = vld [vmem:[%s12499_s4 + $0xb50] sm:$0xff] }
 0x484   :  { %v6241_v8 = vpack.c.bf16 %v3171_v1, %v3164_v63  ;;  %v3276_v63 = vld [vmem:[%s12499_s4 + $0xb80] sm:$0xff]  ;;  %v3283_v1 = vld [vmem:[%s12499_s4 + $0xbb8] sm:$0xff] }
 0x485   :  { %6198 = vmatpush1.bf16.msra.mxu1 %v6197_v46  ;;  %6306 = vmatpush3.bf16.msra.mxu0 %v6305_v11  ;;  %v3208_v46 = vld [vmem:[%s12499_s4 + $0x960] sm:$0xff]  ;;  %v3215_v11 = vld [vmem:[%s12499_s4 + $0x998] sm:$0xff] }
 0x486   :  { %6200 = vmatprep.subr.bf16.mxu1 %v6199_v24  ;;  %6307 = vmatprep.subr.bf16.mxu0 %v6718_v2  ;;  %v3116_v24 = vld [vmem:[%s12499_s4 + $0x680] sm:$0xff]  ;;  %v6323_v58 = vpack.c.bf16 %v3215_v11, %v3208_v46  ;;  %v3178_v46 = vld [vmem:[%s12499_s4 + $0x870] sm:$0xff]  ;;  %v3185_v11 = vld [vmem:[%s12499_s4 + $0x8a8] sm:$0xff] }
 0x487   :  { %v6223_v43 = vpack.c.bf16 %v3116_v24, %v3109_v49  ;;  %v3193_v49 = vld [vmem:[%s12499_s4 + $0x8e8] sm:$0xff]  ;;  %v3200_v24 = vld [vmem:[%s12499_s4 + $0x920] sm:$0xff] }
 0x488   :  { %3825 = vmatmul.mubr.f32.vlgmr.msra.gmra.mrb[14].mxu0 %v10860_v3 }
 0x489   :  { %6202 = vmatpush1.bf16.msra.mxu1 %v6201_v41  ;;  %6309 = vmatpush1.bf16.msra.mxu0 %v6308_v12  ;;  %v3222_v41 = vld [vmem:[%s12499_s4 + $0x9d0] sm:$0xff]  ;;  %v3229_v12 = vld [vmem:[%s12499_s4 + $0xa08] sm:$0xff] }
 0x48a   :  { %4797 = vmatprep.mubr.msk.f32.mxu0 %vm3330_vm8, %v11153_v20  ;;  %6204 = vmatprep.subr.bf16.mxu1 %v6203_v44  ;;  %v3130_v44 = vld [vmem:[%s12499_s4 + $0x6f0] sm:$0xff]  ;;  %v6326_v16 = vpack.c.bf16 %v3229_v12, %v3222_v41  ;;  %v3207_v41 = vld [vmem:[%s12499_s4 + $0x958] sm:$0xff] }
 0x48b   :  { %6310 = vmatprep.subr.bf16.mxu0 %v6718_v2  ;;  %v6227_v51 = vpack.c.bf16 %v3130_v44, %v3123_v60  ;;  %v3214_v12 = vld [vmem:[%s12499_s4 + $0x990] sm:$0xff] }
 0x48c   :  { %v6251_v44 = vpack.c.bf16 %v3214_v12, %v3207_v41  ;;  %v3990_v12 = vld [vmem:[%s12501_s6 + $0x8] sm:$0xff] }
 0x48d   :  { %6206 = vmatpush1.bf16.msra.mxu1 %v6205_v23  ;;  %6312 = vmatpush1.bf16.msra.mxu0 %v6311_v53  ;;  %v3236_v23 = vld [vmem:[%s12499_s4 + $0xa40] sm:$0xff]  ;;  %v3243_v53 = vld [vmem:[%s12499_s4 + $0xa78] sm:$0xff] }
 0x48e   :  { %6208 = vmatprep.subr.bf16.mxu1 %v6207_v45  ;;  %6313 = vmatprep.subr.bf16.mxu0 %v6718_v2  ;;  %v3144_v45 = vld [vmem:[%s12499_s4 + $0x760] sm:$0xff]  ;;  %v6329_v42 = vpack.c.bf16 %v3243_v53, %v3236_v23 }
 0x48f   :  { %v6231_v14 = vpack.c.bf16 %v3144_v45, %v3137_v30  ;;  %v3220_v53 = vld [vmem:[%s12499_s4 + $0x9c0] sm:$0xff]  ;;  %v3227_v30 = vld [vmem:[%s12499_s4 + $0x9f8] sm:$0xff] }
 0x490   :  { %v3235_v45 = vld [vmem:[%s12499_s4 + $0xa38] sm:$0xff] }
 0x491   :  { %6210 = vmatpush1.bf16.msra.mxu1 %v6209_v21  ;;  %6315 = vmatpush1.bf16.msra.mxu0 %v6314_v39  ;;  %v3250_v21 = vld [vmem:[%s12499_s4 + $0xab0] sm:$0xff]  ;;  %v3257_v39 = vld [vmem:[%s12499_s4 + $0xae8] sm:$0xff] }
 0x492   :  { %6212 = vmatprep.subr.bf16.mxu1 %v6211_v36  ;;  %6316 = vmatprep.subr.bf16.mxu0 %v6718_v2  ;;  %v3158_v36 = vld [vmem:[%s12499_s4 + $0x7d0] sm:$0xff]  ;;  %v6332_v15 = vpack.c.bf16 %v3257_v39, %v3250_v21  ;;  %v3249_v21 = vld [vmem:[%s12499_s4 + $0xaa8] sm:$0xff]  ;;  %v3256_v39 = vld [vmem:[%s12499_s4 + $0xae0] sm:$0xff] }
 0x493   :  { %v6235_v6 = vpack.c.bf16 %v3158_v36, %v3151_v54  ;;  %v6261_v54 = vpack.c.bf16 %v3241_v48, %v3234_v7  ;;  %v6263_v36 = vpack.c.bf16 %v3256_v39, %v3249_v21  ;;  %v3997_v7 = vld [vmem:[%s12501_s6 + $0x40] sm:$0xff]  ;;  %v3999_v48 = vld [vmem:[%s12501_s6 + $0x50] sm:$0xff]  ;;  %v4002_v21 = vld [vmem:[%s12501_s6 + $0x68] sm:$0xff] }
 0x494   :  { %v4004_v39 = vld [vmem:[%s12501_s6 + $0x78] sm:$0xff] }
 0x495   :  { %6214 = vmatpush1.bf16.msra.mxu1 %v6213_v50  ;;  %6318 = vmatpush1.bf16.msra.mxu0 %v6317_v61  ;;  %v3264_v50 = vld [vmem:[%s12499_s4 + $0xb20] sm:$0xff]  ;;  %v3271_v61 = vld [vmem:[%s12499_s4 + $0xb58] sm:$0xff] }
 0x496   :  { %6216 = vmatprep.subr.bf16.mxu1 %v6215_v22  ;;  %6319 = vmatprep.subr.bf16.mxu0 %v6718_v2  ;;  %v3172_v22 = vld [vmem:[%s12499_s4 + $0x840] sm:$0xff]  ;;  %v6335_v29 = vpack.c.bf16 %v3271_v61, %v3264_v50  ;;  %v3262_v61 = vld [vmem:[%s12499_s4 + $0xb10] sm:$0xff] }
 0x497   :  { %v6239_v25 = vpack.c.bf16 %v3172_v22, %v3165_v18  ;;  %v3269_v18 = vld [vmem:[%s12499_s4 + $0xb48] sm:$0xff] }
 0x498   :  { %v3277_v22 = vld [vmem:[%s12499_s4 + $0xb88] sm:$0xff] }
 0x499   :  { %6218 = vmatpush1.bf16.msra.mxu1 %v6217_v40  ;;  %6321 = vmatpush1.bf16.msra.mxu0 %v6320_v4  ;;  %v3179_v40 = vld [vmem:[%s12499_s4 + $0x878] sm:$0xff]  ;;  %v3186_v4 = vld [vmem:[%s12499_s4 + $0x8b0] sm:$0xff] }
 0x49a   :  { %6220 = vmatprep.subr.bf16.mxu1 %v6219_v10  ;;  %6322 = vmatprep.subr.bf16.mxu0 %v6718_v2  ;;  %v6243_v34 = vpack.c.bf16 %v3186_v4, %v3179_v40  ;;  %v3290_v40 = vld [vmem:[%s12499_s4 + $0xbf0] sm:$0xff]  ;;  %v11640_v4 = vld [vmem:[%s12500_s5] sm:$0x7f] }
 0x49d   :  { %6222 = vmatpush1.bf16.msra.mxu1 %v6221_v5  ;;  %6324 = vmatpush1.bf16.msra.mxu0 %v6323_v58  ;;  %v6245_v5 = vpack.c.bf16 %v3185_v11, %v3178_v46  ;;  %v6247_v58 = vpack.c.bf16 %v3200_v24, %v3193_v49  ;;  %v3310_v46 = vrot.slane %v11640_v4, %v7683_v37 }
 0x49e   :  { %6224 = vmatprep.subr.bf16.mxu1 %v6223_v43  ;;  %6325 = vmatprep.subr.bf16.mxu0 %v6718_v2  ;;  %v3199_v43 = vld [vmem:[%s12499_s4 + $0x918] sm:$0xff] }
 0x49f   :  { %v6249_v60 = vpack.c.bf16 %v3199_v43, %v3192_v27 }
 0x4a1   :  { %6226 = vmatpush1.bf16.msra.mxu1 %v6225_v19  ;;  %6327 = vmatpush1.bf16.msra.mxu0 %v6326_v16  ;;  %v3206_v19 = vld [vmem:[%s12499_s4 + $0x950] sm:$0xff]  ;;  %v3213_v16 = vld [vmem:[%s12499_s4 + $0x988] sm:$0xff] }
 0x4a2   :  { %6228 = vmatprep.subr.bf16.mxu1 %v6227_v51  ;;  %6328 = vmatprep.subr.bf16.mxu0 %v6718_v2  ;;  %v3228_v51 = vld [vmem:[%s12499_s4 + $0xa00] sm:$0xff]  ;;  %v6253_v17 = vpack.c.bf16 %v3213_v16, %v3206_v19  ;;  %v3991_v16 = vld [vmem:[%s12501_s6 + $0x10] sm:$0xff] }
 0x4a3   :  { %v6255_v23 = vpack.c.bf16 %v3228_v51, %v3221_v62  ;;  %v3994_v62 = vld [vmem:[%s12501_s6 + $0x28] sm:$0xff]  ;;  %v3996_v51 = vld [vmem:[%s12501_s6 + $0x38] sm:$0xff] }
 0x4a5   :  { %6230 = vmatpush1.bf16.msra.mxu1 %v6229_v26  ;;  %6330 = vmatpush1.bf16.msra.mxu0 %v6329_v42  ;;  %v3242_v26 = vld [vmem:[%s12499_s4 + $0xa70] sm:$0xff]  ;;  %v6257_v42 = vpack.c.bf16 %v3227_v30, %v3220_v53  ;;  %v3993_v53 = vld [vmem:[%s12501_s6 + $0x20] sm:$0xff] }
 0x4a6   :  { %6232 = vmatprep.subr.bf16.mxu1 %v6231_v14  ;;  %6331 = vmatprep.subr.bf16.mxu0 %v6718_v2  ;;  %v6259_v14 = vpack.c.bf16 %v3242_v26, %v3235_v45  ;;  %v3995_v30 = vld [vmem:[%s12501_s6 + $0x30] sm:$0xff]  ;;  %v3998_v45 = vld [vmem:[%s12501_s6 + $0x48] sm:$0xff]  ;;  %v4000_v26 = vld [vmem:[%s12501_s6 + $0x58] sm:$0xff] }
 0x4a8   :  { %3683 = vmatmul.mubr.f32.vlgmr.msra.gmra.mrb[10].mxu1 %v10860_v3  ;;  %v3278_v3 = vld [vmem:[%s12499_s4 + $0xb90] sm:$0xff] }
 0x4a9   :  { %6234 = vmatpush1.bf16.msra.mxu1 %v6233_v47  ;;  %4796 = vmatprep.mubr.msk.f32.mxu1 %vm3330_vm8, %v11153_v20  ;;  %v3285_v20 = vld [vmem:[%s12499_s4 + $0xbc8] sm:$0xff]  ;;  %v3248_v47 = vld [vmem:[%s12499_s4 + $0xaa0] sm:$0xff] }
 0x4aa   :  { %6333 = vmatpush1.bf16.msra.mxu0 %v6332_v15  ;;  %6236 = vmatprep.subr.bf16.mxu1 %v6235_v6  ;;  %v6338_v10 = vpack.c.bf16 %v3285_v20, %v3278_v3  ;;  %v3255_v15 = vld [vmem:[%s12499_s4 + $0xad8] sm:$0xff]  ;;  %v6273_v3 = vpack.c.bf16 %v3283_v1, %v3276_v63  ;;  %v4009_v63 = vld [vmem:[%s12501_s6 + $0xa0] sm:$0xff]  ;;  %v4011_v1 = vld [vmem:[%s12501_s6 + $0xb0] sm:$0xff] }
 0x4ab   :  { %6334 = vmatprep.subr.bf16.mxu0 %v6718_v2  ;;  %v3263_v6 = vld [vmem:[%s12499_s4 + $0xb18] sm:$0xff]  ;;  %v6265_v0 = vpack.c.bf16 %v3255_v15, %v3248_v47  ;;  %v4001_v47 = vld [vmem:[%s12501_s6 + $0x60] sm:$0xff]  ;;  %v4003_v15 = vld [vmem:[%s12501_s6 + $0x70] sm:$0xff] }
 0x4ac   :  { %v6267_v50 = vpack.c.bf16 %v3270_v38, %v3263_v6  ;;  %v3291_v20 = vld [vmem:[%s12499_s4 + $0xbf8] sm:$0xff]  ;;  %v4006_v6 = vld [vmem:[%s12501_s6 + $0x88] sm:$0xff] }
 0x4ad   :  { %6238 = vmatpush1.bf16.msra.mxu1 %v6237_v9  ;;  %v3284_v9 = vld [vmem:[%s12499_s4 + $0xbc0] sm:$0xff]  ;;  %v4008_v38 = vld [vmem:[%s12501_s6 + $0x98] sm:$0xff] }
 0x4ae   :  { %6336 = vmatpush1.bf16.msra.mxu0 %v6335_v29  ;;  %6240 = vmatprep.subr.bf16.mxu1 %v6239_v25  ;;  %v6269_v29 = vpack.c.bf16 %v3269_v18, %v3262_v61  ;;  %v6271_v25 = vpack.c.bf16 %v3284_v9, %v3277_v22  ;;  %v4005_v61 = vld [vmem:[%s12501_s6 + $0x80] sm:$0xff]  ;;  %v4007_v18 = vld [vmem:[%s12501_s6 + $0x90] sm:$0xff]  ;;  %v4010_v22 = vld [vmem:[%s12501_s6 + $0xa8] sm:$0xff] }
 0x4af   :  { %6337 = vmatprep.subr.bf16.mxu0 %v6718_v2  ;;  %v4012_v9 = vld [vmem:[%s12501_s6 + $0xb8] sm:$0xff] }
 0x4b1   :  { %6242 = vmatpush1.bf16.msra.mxu1 %v6241_v8  ;;  %v3298_v8 = vrot.slane %v11640_v4, %v7671_v32 }
 0x4b2   :  { %6339 = vmatpush1.bf16.msra.mxu0 %v6338_v10  ;;  %6244 = vmatprep.subr.bf16.mxu1 %v6243_v34  ;;  %v3306_v10 = vrot.slane %v11640_v4, %v7674_v33  ;;  %v3302_v34 = vrot.slane %v11640_v4, %v7677_v35 }
 0x4b3   :  { %3874 = vmatprep.subr.mxu0 %v6719_v28 }
 0x4b5   :  { %6246 = vmatpush1.bf16.msra.mxu1 %v6245_v5 }
 0x4b6   :  { %3875 = vmatpush1.msra.mxu0 %v3292_v59  ;;  %6248 = vmatprep.subr.bf16.mxu1 %v6247_v58 }
 0x4b7   :  { %3895 = vmatmul.mubr.f32.vlgmr.msra.gmra.mrb[16].mxu0 %v11145_v52  ;;  %6542 = vmatprep.subr.bf16.mxu0 %v6718_v2 }
 0x4b9   :  { %6250 = vmatpush1.bf16.msra.mxu1 %v6249_v60  ;;  %v3992_v60 = vld [vmem:[%s12501_s6 + $0x18] sm:$0xff] }
 0x4ba   :  { %6252 = vmatprep.subr.bf16.mxu1 %v6251_v44  ;;  %v3989_v44 = vld [vmem:[%s12501_s6] sm:$0xff]  ;;  %v6340_v19 = vpack.c.bf16 %v3992_v60, %v3990_v12  ;;  %v4019_v60 = vld [vmem:[%s12501_s6 + $0xf0] sm:$0xff] }
 0x4bb   :  { %v4017_v12 = vld [vmem:[%s12501_s6 + $0xe0] sm:$0xff] }
 0x4bd   :  { %6254 = vmatpush1.bf16.msra.mxu1 %v6253_v17  ;;  %v6342_v17 = vpack.c.bf16 %v3991_v16, %v3989_v44  ;;  %v4022_v44 = vld [vmem:[%s12501_s6 + $0x108] sm:$0xff]  ;;  %v6370_v16 = vpack.c.bf16 %v4019_v60, %v4017_v12  ;;  %v4048_v12 = vld [vmem:[%s12501_s6 + $0x1d8] sm:$0xff]  ;;  %v4045_v60 = vld [vmem:[%s12501_s6 + $0x1c0] sm:$0xff] }
 0x4be   :  { %6256 = vmatprep.subr.bf16.mxu1 %v6255_v23  ;;  %v6344_v23 = vpack.c.bf16 %v3996_v51, %v3994_v62  ;;  %v4021_v51 = vld [vmem:[%s12501_s6 + $0x100] sm:$0xff] }
 0x4c1   :  { %6258 = vmatpush1.bf16.msra.mxu1 %v6257_v42  ;;  %v6346_v42 = vpack.c.bf16 %v3995_v30, %v3993_v53  ;;  %v4028_v53 = vld [vmem:[%s12501_s6 + $0x138] sm:$0xff] }
 0x4c2   :  { %6260 = vmatprep.subr.bf16.mxu1 %v6259_v14  ;;  %v6348_v14 = vpack.c.bf16 %v4000_v26, %v3998_v45  ;;  %v4025_v26 = vld [vmem:[%s12501_s6 + $0x120] sm:$0xff] }
 0x4c5   :  { %6262 = vmatpush1.bf16.msra.mxu1 %v6261_v54  ;;  %v6350_v54 = vpack.c.bf16 %v3999_v48, %v3997_v7  ;;  %v4032_v7 = vld [vmem:[%s12501_s6 + $0x158] sm:$0xff] }
 0x4c6   :  { %6264 = vmatprep.subr.bf16.mxu1 %v6263_v36  ;;  %v6352_v36 = vpack.c.bf16 %v4004_v39, %v4002_v21  ;;  %v4029_v39 = vld [vmem:[%s12501_s6 + $0x140] sm:$0xff] }
 0x4c9   :  { %6266 = vmatpush1.bf16.msra.mxu1 %v6265_v0  ;;  %v6354_v0 = vpack.c.bf16 %v4003_v15, %v4001_v47  ;;  %v4036_v47 = vld [vmem:[%s12501_s6 + $0x178] sm:$0xff] }
 0x4ca   :  { %6268 = vmatprep.subr.bf16.mxu1 %v6267_v50  ;;  %v6356_v50 = vpack.c.bf16 %v4008_v38, %v4006_v6  ;;  %v4033_v38 = vld [vmem:[%s12501_s6 + $0x160] sm:$0xff] }
 0x4cd   :  { %6270 = vmatpush1.bf16.msra.mxu1 %v6269_v29  ;;  %v6358_v29 = vpack.c.bf16 %v4007_v18, %v4005_v61  ;;  %v4040_v61 = vld [vmem:[%s12501_s6 + $0x198] sm:$0xff] }
 0x4ce   :  { %6272 = vmatprep.subr.bf16.mxu1 %v6271_v25  ;;  %v6360_v25 = vpack.c.bf16 %v4012_v9, %v4010_v22  ;;  %v4037_v9 = vld [vmem:[%s12501_s6 + $0x180] sm:$0xff] }
 0x4d1   :  { %6274 = vmatpush1.bf16.msra.mxu1 %v6273_v3  ;;  %v4014_v3 = vld [vmem:[%s12501_s6 + $0xc8] sm:$0xff] }
 0x4d2   :  { %3733 = vmatprep.subr.mxu1 %v3291_v20  ;;  %v4016_v20 = vld [vmem:[%s12501_s6 + $0xd8] sm:$0xff] }
 0x4d5   :  { %3734 = vmatpush1.msra.mxu1 %v3290_v40  ;;  %v6362_v40 = vpack.c.bf16 %v4011_v1, %v4009_v63  ;;  %v4044_v63 = vld [vmem:[%s12501_s6 + $0x1b8] sm:$0xff] }
 0x4d6   :  { %3754 = vmatmul.mubr.f32.vlgmr.msra.gmra.mrb[10].mxu1 %v11145_v52  ;;  %6341 = vmatprep.subr.bf16.mxu1 %v6340_v19  ;;  %v4024_v19 = vld [vmem:[%s12501_s6 + $0x118] sm:$0xff] }
 0x4d7   :  { %6343 = vmatpush1.bf16.msra.mxu1 %v6342_v17  ;;  %v6372_v62 = vpack.c.bf16 %v4024_v19, %v4022_v44  ;;  %v4023_v17 = vld [vmem:[%s12501_s6 + $0x110] sm:$0xff]  ;;  %v4050_v19 = vld [vmem:[%s12501_s6 + $0x1e8] sm:$0xff] }
 0x4d8   :  { %6345 = vmatprep.subr.bf16.mxu1 %v6344_v23  ;;  %v4026_v23 = vld [vmem:[%s12501_s6 + $0x128] sm:$0xff]  ;;  %v6374_v30 = vpack.c.bf16 %v4023_v17, %v4021_v51  ;;  %v4049_v51 = vld [vmem:[%s12501_s6 + $0x1e0] sm:$0xff]  ;;  %v4051_v17 = vld [vmem:[%s12501_s6 + $0x1f0] sm:$0xff] }
 0x4d9   :  { %v6376_v45 = vpack.c.bf16 %v4028_v53, %v4026_v23  ;;  %v3314_v23 = vrot.slane %v11640_v4, %v7712_v55  ;;  %v3318_v53 = vrot.slane %v11640_v4, %v345_v56 }
 0x4db   :  { %6347 = vmatpush1.bf16.msra.mxu1 %v6346_v42  ;;  %v4027_v42 = vld [vmem:[%s12501_s6 + $0x130] sm:$0xff] }
 0x4dc   :  { %6349 = vmatprep.subr.bf16.mxu1 %v6348_v14  ;;  %v4030_v14 = vld [vmem:[%s12501_s6 + $0x148] sm:$0xff]  ;;  %v6378_v48 = vpack.c.bf16 %v4027_v42, %v4025_v26 }
 0x4dd   :  { %v6380_v21 = vpack.c.bf16 %v4032_v7, %v4030_v14 }
 0x4df   :  { %6351 = vmatpush1.bf16.msra.mxu1 %v6350_v54  ;;  %v4031_v54 = vld [vmem:[%s12501_s6 + $0x150] sm:$0xff] }
 0x4e0   :  { %6353 = vmatprep.subr.bf16.mxu1 %v6352_v36  ;;  %v4034_v36 = vld [vmem:[%s12501_s6 + $0x168] sm:$0xff]  ;;  %v6382_v15 = vpack.c.bf16 %v4031_v54, %v4029_v39 }
 0x4e1   :  { %v6384_v6 = vpack.c.bf16 %v4036_v47, %v4034_v36 }
 0x4e3   :  { %6355 = vmatpush1.bf16.msra.mxu1 %v6354_v0  ;;  %v4035_v0 = vld [vmem:[%s12501_s6 + $0x170] sm:$0xff] }
 0x4e4   :  { %6357 = vmatprep.subr.bf16.mxu1 %v6356_v50  ;;  %v4038_v50 = vld [vmem:[%s12501_s6 + $0x188] sm:$0xff]  ;;  %v6386_v18 = vpack.c.bf16 %v4035_v0, %v4033_v38 }
 0x4e5   :  { %v6388_v22 = vpack.c.bf16 %v4040_v61, %v4038_v50  ;;  %v4053_v50 = vld [vmem:[%s12501_s6 + $0x200] sm:$0xff]  ;;  %v4055_v61 = vld [vmem:[%s12501_s6 + $0x210] sm:$0xff] }
 0x4e7   :  { %6359 = vmatpush1.bf16.msra.mxu1 %v6358_v29  ;;  %v4039_v29 = vld [vmem:[%s12501_s6 + $0x190] sm:$0xff] }
 0x4e8   :  { %6361 = vmatprep.subr.bf16.mxu1 %v6360_v25  ;;  %v4042_v25 = vld [vmem:[%s12501_s6 + $0x1a8] sm:$0xff]  ;;  %v6390_v1 = vpack.c.bf16 %v4039_v29, %v4037_v9  ;;  %v4060_v9 = vld [vmem:[%s12501_s6 + $0x238] sm:$0xff] }
 0x4eb   :  { %6363 = vmatpush1.bf16.msra.mxu1 %v6362_v40  ;;  %v4043_v40 = vld [vmem:[%s12501_s6 + $0x1b0] sm:$0xff] }
 0x53b   :  { %v3471_v11 = vpop.f32.mrb[8].mxu1  ;;  %v3613_v49 = vpop.f32.mrb[12].mxu0 }
 0x53c   :  { %v11650_v52 = vadd.f32 %v3471_v11, %v3298_v8  ;;  %v11652_v24 = vadd.f32 %v3613_v49, %v3306_v10  ;;  %v3473_v5 = vpop.f32.mrb[9].mxu1  ;;  %v3615_v58 = vpop.f32.mrb[13].mxu0  ;;  %v6364_v10 = vpack.c.bf16 %v4016_v20, %v4014_v3  ;;  %v4018_v49 = vld [vmem:[%s12501_s6 + $0xe8] sm:$0xff]  ;;  %v6392_v3 = vpack.c.bf16 %v4044_v63, %v4042_v25  ;;  %v4041_v20 = vld [vmem:[%s12501_s6 + $0x1a0] sm:$0xff] }
 0x53d   :  { %v11654_v27 = vadd.f32 %v3473_v5, %v3302_v34  ;;  %v11656_v32 = vadd.f32 %v3615_v58, %v3310_v46  ;;  %v4013_v34 = vld [vmem:[%s12501_s6 + $0xc0] sm:$0xff]  ;;  %v4015_v46 = vld [vmem:[%s12501_s6 + $0xd0] sm:$0xff]  ;;  %v4020_v5 = vld [vmem:[%s12501_s6 + $0xf8] sm:$0xff] }
 0x53e   :  { %v3900_v33 = vmax.f32 %v11650_v52, 0.0  ;;  %v3902_v43 = vmax.f32 %v11652_v24, 0.0  ;;  %6365 = vmatprep.subr.bf16.mxu1 %v6364_v10  ;;  %v3322_v10 = vrot.slane %v11640_v4, %v349_v57  ;;  %v4054_v52 = vld [vmem:[%s12501_s6 + $0x208] sm:$0xff]  ;;  %v4056_v24 = vld [vmem:[%s12501_s6 + $0x218] sm:$0xff] }
 0x53f   :  { %v3901_v35 = vmax.f32 %v11654_v27, 0.0  ;;  %v3903_v37 = vmax.f32 %v11656_v32, 0.0  ;;  %v6404_v27 = vpack.c.bf16 %v4056_v24, %v4054_v52  ;;  %v4077_v52 = vld [vmem:[%s12501_s6 + $0x2c0] sm:$0xff]  ;;  %v4079_v24 = vld [vmem:[%s12501_s6 + $0x2d0] sm:$0xff] }
 0x541   :  { %v6693_v59 = vpack.i.bf16 %v3902_v43, %v3901_v35  ;;  %v6698_v41 = vpack.i.bf16 %v3900_v33, %v3903_v37 }
 0x543   :  { %6694 = vrot.lane.b32.xlu1 %v6693_v59, %s6720_s1  ;;  %6699 = vrot.lane.b32.xlu0 %v6698_v41, %s6720_s1  ;;  %v6366_v59 = vpack.c.bf16 %v4015_v46, %v4013_v34  ;;  %v6368_v41 = vpack.c.bf16 %v4020_v5, %v4018_v49 }
 0x545   :  { %6367 = vmatpush1.bf16.msra.mxu1 %v6366_v59 }
 0x546   :  { %6369 = vmatprep.subr.bf16.mxu1 %v6368_v41  ;;  %v4046_v41 = vld [vmem:[%s12501_s6 + $0x1c8] sm:$0xff] }
 0x547   :  { %v6396_v57 = vpack.c.bf16 %v4048_v12, %v4046_v41 }
 0x549   :  { %6371 = vmatpush1.bf16.msra.mxu1 %v6370_v16  ;;  %v4052_v16 = vld [vmem:[%s12501_s6 + $0x1f8] sm:$0xff] }
 0x54a   :  { %6373 = vmatprep.subr.bf16.mxu1 %v6372_v62  ;;  %v6400_v62 = vpack.c.bf16 %v4052_v16, %v4050_v19  ;;  %v4061_v19 = vld [vmem:[%s12501_s6 + $0x240] sm:$0xff]  ;;  %v4063_v16 = vld [vmem:[%s12501_s6 + $0x250] sm:$0xff] }
 0x54d   :  { %6375 = vmatpush1.bf16.msra.mxu1 %v6374_v30  ;;  %v6402_v30 = vpack.c.bf16 %v4051_v17, %v4049_v51  ;;  %v6414_v17 = vpack.c.bf16 %v4063_v16, %v4061_v19 }
 0x54e   :  { %6377 = vmatprep.subr.bf16.mxu1 %v6376_v45 }
 0x551   :  { %6379 = vmatpush1.bf16.msra.mxu1 %v6378_v48 }
 0x552   :  { %6381 = vmatprep.subr.bf16.mxu1 %v6380_v21 }
 0x555   :  { %6383 = vmatpush1.bf16.msra.mxu1 %v6382_v15 }
 0x556   :  { %6385 = vmatprep.subr.bf16.mxu1 %v6384_v6 }
 0x559   :  { %6387 = vmatpush1.bf16.msra.mxu1 %v6386_v18 }
 0x55a   :  { %6389 = vmatprep.subr.bf16.mxu1 %v6388_v22  ;;  %v4058_v22 = vld [vmem:[%s12501_s6 + $0x228] sm:$0xff] }
 0x55b   :  { %v4839_v8 = vpop.f32.mrb[14].mxu0 }
 0x55c   :  { %v4840_v11 = vpop.f32.mrb[15].mxu0 }
 0x55d   :  { %v4841_v58 = vadd.f32 %v4840_v11, %v4839_v8  ;;  %6391 = vmatpush1.bf16.msra.mxu1 %v6390_v1  ;;  %v6394_v8 = vpack.c.bf16 %v4043_v40, %v4041_v20  ;;  %v6406_v20 = vpack.c.bf16 %v4055_v61, %v4053_v50  ;;  %v4081_v61 = vld [vmem:[%s12501_s6 + $0x2e0] sm:$0xff] }
 0x55e   :  { %6393 = vmatprep.subr.bf16.mxu1 %v6392_v3 }
 0x55f   :  { %v3827_v34 = vadd.f32 %v4841_v58, %v3322_v10  ;;  %v4047_v58 = vld [vmem:[%s12501_s6 + $0x1d0] sm:$0xff]  ;;  %v6408_v10 = vpack.c.bf16 %v4060_v9, %v4058_v22  ;;  %v4086_v22 = vld [vmem:[%s12501_s6 + $0x308] sm:$0xff]  ;;  %v4088_v9 = vld [vmem:[%s12501_s6 + $0x318] sm:$0xff] }
 0x560   :  { %v6398_v44 = vpack.c.bf16 %v4047_v58, %v4045_v60 }
 0x561   :  { %6395 = vmatpush1.bf16.msra.mxu1 %v6394_v8 }
 0x562   :  { %6397 = vmatprep.subr.bf16.mxu1 %v6396_v57 }
 0x565   :  { %6399 = vmatpush1.bf16.msra.mxu1 %v6398_v44 }
 0x566   :  { %6401 = vmatprep.subr.bf16.mxu1 %v6400_v62  ;;  %v4068_v62 = vld [vmem:[%s12501_s6 + $0x278] sm:$0xff] }
 0x569   :  { %6403 = vmatpush1.bf16.msra.mxu1 %v6402_v30  ;;  %v4067_v30 = vld [vmem:[%s12501_s6 + $0x270] sm:$0xff] }
 0x56a   :  { %6405 = vmatprep.subr.bf16.mxu1 %v6404_v27  ;;  %v4082_v27 = vld [vmem:[%s12501_s6 + $0x2e8] sm:$0xff] }
 0x58a   :  { %v3896_v46 = vpop.f32.mrb[16].mxu0 }
 0x58b   :  { %v11843_v11 = vadd.f32 %v3896_v46, %v3827_v34  ;;  %v3898_v49 = vpop.f32.mrb[17].mxu0  ;;  %v4057_v34 = vld [vmem:[%s12501_s6 + $0x220] sm:$0xff]  ;;  %v4059_v46 = vld [vmem:[%s12501_s6 + $0x230] sm:$0xff] }
 0x58c   :  { %v4064_v49 = vld [vmem:[%s12501_s6 + $0x258] sm:$0xff]  ;;  %v6410_v57 = vpack.c.bf16 %v4059_v46, %v4057_v34  ;;  %v4091_v34 = vld [vmem:[%s12501_s6 + $0x330] sm:$0xff]  ;;  %v4094_v46 = vld [vmem:[%s12501_s6 + $0x348] sm:$0xff] }
 0x5a9   :  { %v3755_v5 = vpop.f32.mrb[10].mxu1 }
 0x5aa   :  { %v3757_v59 = vpop.f32.mrb[11].mxu1  ;;  %v6596_v21 = vadd.f32 %v3755_v5, %v3314_v23 }
 0x5ab   :  { %v11874_v39 = vadd.f32 %v3757_v59, %v3318_v53  ;;  %v4065_v53 = vld [vmem:[%s12501_s6 + $0x260] sm:$0xff] }
 0x5ac   :  { %v3904_v47 = vmax.f32 %v6596_v21, 0.0  ;;  %v4071_v21 = vld [vmem:[%s12501_s6 + $0x290] sm:$0xff] }
 0x5ad   :  { %v3905_v15 = vmax.f32 %v11874_v39, 0.0  ;;  %v4074_v39 = vld [vmem:[%s12501_s6 + $0x2a8] sm:$0xff] }
 0x5af   :  { %v6708_v38 = vpack.i.bf16 %v3905_v15, %v3904_v47 }
 0x5b5   :  { %v6695_v45 = vpop.permute.xlu1 %6694  ;;  %v6700_v26 = vpop.permute.xlu0 %6699 }
 0x5b6   :  { %v6697_v42 = vunpack.i.h.bf16 %v6695_v45  ;;  %v6696_v14 = vunpack.i.l.bf16 %v6695_v45  ;;  %v6702_v7 = vunpack.i.h.bf16 %v6700_v26  ;;  %v6701_v48 = vunpack.i.l.bf16 %v6700_v26  ;;  %v4070_v26 = vld [vmem:[%s12501_s6 + $0x288] sm:$0xff] }
 0x5b8   :  { %v3929_v54 = vsel %vm980_vm2, %v6696_v14, %v6697_v42  ;;  %v3930_v55 = vsel %vm980_vm2, %v6697_v42, %v6701_v48  ;;  %v3928_v31 = vsel %vm980_vm2, %v6702_v7, %v6696_v14  ;;  %v4072_v42 = vld [vmem:[%s12501_s6 + $0x298] sm:$0xff]  ;;  %v6418_v14 = vpack.c.bf16 %v4067_v30, %v4065_v53  ;;  %v4101_v53 = vld [vmem:[%s12501_s6 + $0x380] sm:$0xff]  ;;  %v4103_v30 = vld [vmem:[%s12501_s6 + $0x390] sm:$0xff] }
 0x5b9   :  { %v3941_v56 = vmax.f32 %v3900_v33, %v3928_v31  ;;  %v3942_v4 = vmax.f32 %v3901_v35, %v3929_v54  ;;  %v11885_v36 = vmax.f32 %v3902_v43, %v3930_v55  ;;  %v3906_v33 = vmax.f32 %v11843_v11, 0.0  ;;  %v4062_v11 = vld [vmem:[%s12501_s6 + $0x248] sm:$0xff]  ;;  %v4076_v54 = vld [vmem:[%s12501_s6 + $0x2b8] sm:$0xff] }
 0x5ba   :  { %v6412_v44 = vpack.c.bf16 %v4064_v49, %v4062_v11  ;;  %v6420_v7 = vpack.c.bf16 %v4072_v42, %v4070_v26  ;;  %v6424_v31 = vpack.c.bf16 %v4076_v54, %v4074_v39  ;;  %v4096_v11 = vld [vmem:[%s12501_s6 + $0x358] sm:$0xff]  ;;  %v4106_v26 = vld [vmem:[%s12501_s6 + $0x3a8] sm:$0xff] }
 0x5bb   :  { %3955 = vrot.lane.b32.xlu0 %v3941_v56, %s6721_s29  ;;  %v6703_v6 = vpack.i.bf16 %v11885_v36, %v3942_v4  ;;  %v4108_v42 = vld [vmem:[%s12501_s6 + $0x3b8] sm:$0xff]  ;;  %v4110_v39 = vld [vmem:[%s12501_s6 + $0x3c8] sm:$0xff] }
 0x5bc   :  { %v4112_v54 = vld [vmem:[%s12501_s6 + $0x3d8] sm:$0xff] }
 0x5bd   :  { %6704 = vrot.lane.b32.xlu1 %v6703_v6, %s6721_s29 }
 0x5c1   :  { %6709 = vrot.lane.b32.xlu1 %v6708_v38, %s6720_s1 }
 0x5c5   :  { %3926 = vrot.lane.b32.xlu1 %v3906_v33, %s6720_s1 }
 0x62d   :  { %v3956_v18 = vpop.permute.xlu0 %3955 }
 0x62f   :  { %v11900_v43 = vpop.permute.xlu1 %6704 }
 0x630   :  { %v6707_v35 = vunpack.i.h.bf16 %v11900_v43  ;;  %v6706_v0 = vunpack.i.l.bf16 %v11900_v43 }
 0x632   :  { %v3969_v29 = vsel %vm1058_vm3, %v3956_v18, %v6706_v0  ;;  %v3970_v25 = vsel %vm1058_vm3, %v6706_v0, %v6707_v35  ;;  %v6430_v0 = vpack.c.bf16 %v4079_v24, %v4077_v52  ;;  %v4083_v18 = vld [vmem:[%s12501_s6 + $0x2f0] sm:$0xff]  ;;  %v4113_v52 = vld [vmem:[%s12501_s6 + $0x3e0] sm:$0xff] }
 0x633   :  { %v3982_v63 = vmax.f32 %v3941_v56, %v3969_v29  ;;  %v6710_v1 = vpop.permute.xlu1 %6709  ;;  %v3983_v3 = vmax.f32 %v3942_v4, %v3970_v25  ;;  %v4073_v56 = vld [vmem:[%s12501_s6 + $0x2a0] sm:$0xff]  ;;  %v4075_v4 = vld [vmem:[%s12501_s6 + $0x2b0] sm:$0xff]  ;;  %v6434_v29 = vpack.c.bf16 %v4083_v18, %v4081_v61  ;;  %v6436_v25 = vpack.c.bf16 %v4088_v9, %v4086_v22  ;;  %v4484_v18 = vld [vmem:[%s12502_s7 + $0x8] sm:$0xff] }
 0x634   :  { %v6712_v40 = vunpack.i.h.bf16 %v6710_v1  ;;  %v6711_v8 = vunpack.i.l.bf16 %v6710_v1  ;;  %v6426_v6 = vpack.c.bf16 %v4075_v4, %v4073_v56  ;;  %v4087_v1 = vld [vmem:[%s12501_s6 + $0x310] sm:$0xff]  ;;  %v4109_v56 = vld [vmem:[%s12501_s6 + $0x3c0] sm:$0xff] }
 0x635   :  { %4263 = vmatprep.mubr.f32.mxu1 %v3983_v3  ;;  %v4090_v3 = vld [vmem:[%s12501_s6 + $0x328] sm:$0xff]  ;;  %v4111_v4 = vld [vmem:[%s12501_s6 + $0x3d0] sm:$0xff]  ;;  %v4483_v61 = vld [vmem:[%s12502_s7] sm:$0xff] }
 0x636   :  { %v3931_v5 = vsel %vm980_vm2, %v6701_v48, %v6711_v8  ;;  %v3932_v59 = vsel %vm980_vm2, %v6711_v8, %v6712_v40  ;;  %4264 = vmatmul.mubr.f32.vlgmr.msra.gmra.mrb[12].mxu1 %v3982_v63  ;;  %v4069_v48 = vld [vmem:[%s12501_s6 + $0x280] sm:$0xff]  ;;  %v4115_v24 = vld [vmem:[%s12501_s6 + $0x3f0] sm:$0xff]  ;;  %v6543_v9 = vpack.c.bf16 %v4484_v18, %v4483_v61 }
 0x637   :  { %v3927_v41 = vpop.permute.xlu1 %3926  ;;  %v11936_v12 = vmax.f32 %v3903_v37, %v3931_v5  ;;  %v11938_v60 = vmax.f32 %v3904_v47, %v3932_v59  ;;  %6407 = vmatpush1.bf16.msra.mxu1 %v6406_v20  ;;  %v4066_v37 = vld [vmem:[%s12501_s6 + $0x268] sm:$0xff]  ;;  %v6422_v55 = vpack.c.bf16 %v4071_v21, %v4069_v48  ;;  %v4085_v63 = vld [vmem:[%s12501_s6 + $0x300] sm:$0xff]  ;;  %v4092_v20 = vld [vmem:[%s12501_s6 + $0x338] sm:$0xff]  ;;  %v6444_v5 = vpack.c.bf16 %v4096_v11, %v4094_v46 }
 0x638   :  { %v11940_v58 = vmax.f32 %v3906_v33, %v3927_v41  ;;  %6409 = vmatprep.subr.bf16.mxu1 %v6408_v10  ;;  %v3933_v51 = vsel %vm980_vm2, %v6712_v40, %v3927_v41  ;;  %v6416_v23 = vpack.c.bf16 %v4068_v62, %v4066_v37  ;;  %v4078_v47 = vld [vmem:[%s12501_s6 + $0x2c8] sm:$0xff]  ;;  %v4084_v33 = vld [vmem:[%s12501_s6 + $0x2f8] sm:$0xff]  ;;  %v6438_v40 = vpack.c.bf16 %v4087_v1, %v4085_v63  ;;  %v4089_v10 = vld [vmem:[%s12501_s6 + $0x320] sm:$0xff] }
 0x639   :  { %v6713_v32 = vpack.i.bf16 %v11938_v60, %v11936_v12  ;;  %v11966_v45 = vmax.f32 %v3905_v15, %v3933_v51  ;;  %v4080_v15 = vld [vmem:[%s12501_s6 + $0x2d8] sm:$0xff]  ;;  %v6432_v50 = vpack.c.bf16 %v4084_v33, %v4082_v27  ;;  %v6440_v8 = vpack.c.bf16 %v4092_v20, %v4090_v3  ;;  %v4093_v59 = vld [vmem:[%s12501_s6 + $0x340] sm:$0xff]  ;;  %v4095_v41 = vld [vmem:[%s12501_s6 + $0x350] sm:$0xff]  ;;  %6544 = vmatpush1.bf16.msra.mxu0 %v6543_v9 }
 0x63a   :  { %3967 = vrot.lane.b32.xlu1 %v11940_v58, %s6721_s29  ;;  %v6428_v38 = vpack.c.bf16 %v4080_v15, %v4078_v47  ;;  %v6442_v49 = vpack.c.bf16 %v4091_v34, %v4089_v10  ;;  %v6446_v19 = vpack.c.bf16 %v4095_v41, %v4093_v59  ;;  %v4099_v37 = vld [vmem:[%s12501_s6 + $0x370] sm:$0xff]  ;;  %v4102_v62 = vld [vmem:[%s12501_s6 + $0x388] sm:$0xff]  ;;  %v4104_v51 = vld [vmem:[%s12501_s6 + $0x398] sm:$0xff]  ;;  %6545 = vmatprep.subr.bf16.mxu0 %v6718_v2 }
 0x63b   :  { %6714 = vrot.lane.b32.xlu0 %v6713_v32, %s6721_s29  ;;  %6411 = vmatpush1.bf16.msra.mxu1 %v6410_v57  ;;  %v4098_v57 = vld [vmem:[%s12501_s6 + $0x368] sm:$0xff]  ;;  %v4097_v32 = vld [vmem:[%s12501_s6 + $0x360] sm:$0xff]  ;;  %v4107_v21 = vld [vmem:[%s12501_s6 + $0x3b0] sm:$0xff] }
 0x63c   :  { %6413 = vmatprep.subr.bf16.mxu1 %v6412_v44  ;;  %v4100_v44 = vld [vmem:[%s12501_s6 + $0x378] sm:$0xff]  ;;  %v4105_v48 = vld [vmem:[%s12501_s6 + $0x3a0] sm:$0xff]  ;;  %v4114_v47 = vld [vmem:[%s12501_s6 + $0x3e8] sm:$0xff] }
 0x63d   :  { %v6448_v16 = vpack.c.bf16 %v4100_v44, %v4098_v57  ;;  %v4116_v15 = vld [vmem:[%s12501_s6 + $0x3f8] sm:$0xff]  ;;  %v4118_v27 = vld [vmem:[%s12501_s6 + $0x408] sm:$0xff]  ;;  %v4485_v22 = vld [vmem:[%s12502_s7 + $0x10] sm:$0xff] }
 0x63e   :  { %v4120_v33 = vld [vmem:[%s12501_s6 + $0x418] sm:$0xff]  ;;  %v4487_v63 = vld [vmem:[%s12502_s7 + $0x20] sm:$0xff]  ;;  %v4488_v1 = vld [vmem:[%s12502_s7 + $0x28] sm:$0xff] }
 0x63f   :  { %3965 = vrot.lane.b32.xlu0 %v11966_v45, %s6721_s29  ;;  %6415 = vmatpush1.bf16.msra.mxu1 %v6414_v17  ;;  %v6450_v17 = vpack.c.bf16 %v4099_v37, %v4097_v32  ;;  %v6549_v3 = vpack.c.bf16 %v4488_v1, %v4487_v63  ;;  %v4489_v20 = vld [vmem:[%s12502_s7 + $0x30] sm:$0xff]  ;;  %v4491_v10 = vld [vmem:[%s12502_s7 + $0x40] sm:$0xff]  ;;  %v4492_v34 = vld [vmem:[%s12502_s7 + $0x48] sm:$0xff] }
 0x640   :  { %6417 = vmatprep.subr.bf16.mxu1 %v6416_v23  ;;  %v6452_v23 = vpack.c.bf16 %v4104_v51, %v4102_v62  ;;  %v6555_v46 = vpack.c.bf16 %v4492_v34, %v4491_v10  ;;  %v4493_v11 = vld [vmem:[%s12502_s7 + $0x50] sm:$0xff]  ;;  %v4495_v59 = vld [vmem:[%s12502_s7 + $0x60] sm:$0xff]  ;;  %v4496_v41 = vld [vmem:[%s12502_s7 + $0x68] sm:$0xff] }
 0x641   :  { %v6561_v57 = vpack.c.bf16 %v4496_v41, %v4495_v59  ;;  %v4497_v44 = vld [vmem:[%s12502_s7 + $0x70] sm:$0xff]  ;;  %v4499_v32 = vld [vmem:[%s12502_s7 + $0x80] sm:$0xff]  ;;  %v4500_v37 = vld [vmem:[%s12502_s7 + $0x88] sm:$0xff] }
 0x642   :  { %v6567_v62 = vpack.c.bf16 %v4500_v37, %v4499_v32  ;;  %v4501_v51 = vld [vmem:[%s12502_s7 + $0x90] sm:$0xff]  ;;  %v4125_v18 = vld [vmem:[%s12501_s6 + $0x440] sm:$0xff]  ;;  %v4132_v9 = vld [vmem:[%s12501_s6 + $0x478] sm:$0xff] }
 0x643   :  { %6419 = vmatpush1.bf16.msra.mxu1 %v6418_v14  ;;  %v6454_v14 = vpack.c.bf16 %v4103_v30, %v4101_v53  ;;  %v4503_v53 = vld [vmem:[%s12502_s7 + $0xa0] sm:$0xff]  ;;  %v4504_v30 = vld [vmem:[%s12502_s7 + $0xa8] sm:$0xff]  ;;  %v4131_v1 = vld [vmem:[%s12501_s6 + $0x470] sm:$0xff] }
 0x644   :  { %6421 = vmatprep.subr.bf16.mxu1 %v6420_v7  ;;  %v6456_v7 = vpack.c.bf16 %v4108_v42, %v4106_v26  ;;  %v6573_v26 = vpack.c.bf16 %v4504_v30, %v4503_v53  ;;  %v4505_v42 = vld [vmem:[%s12502_s7 + $0xb0] sm:$0xff]  ;;  %v4129_v63 = vld [vmem:[%s12501_s6 + $0x460] sm:$0xff] }
 0x645   :  { %v4133_v10 = vld [vmem:[%s12501_s6 + $0x480] sm:$0xff]  ;;  %v4135_v34 = vld [vmem:[%s12501_s6 + $0x490] sm:$0xff] }
 0x646   :  { %v4137_v59 = vld [vmem:[%s12501_s6 + $0x4a0] sm:$0xff]  ;;  %v4139_v41 = vld [vmem:[%s12501_s6 + $0x4b0] sm:$0xff] }
 0x647   :  { %6423 = vmatpush1.bf16.msra.mxu1 %v6422_v55  ;;  %v6458_v55 = vpack.c.bf16 %v4107_v21, %v4105_v48  ;;  %v4141_v32 = vld [vmem:[%s12501_s6 + $0x4c0] sm:$0xff]  ;;  %v4143_v37 = vld [vmem:[%s12501_s6 + $0x4d0] sm:$0xff] }
 0x648   :  { %6425 = vmatprep.subr.bf16.mxu1 %v6424_v31  ;;  %v6460_v31 = vpack.c.bf16 %v4112_v54, %v4110_v39  ;;  %v4117_v54 = vld [vmem:[%s12501_s6 + $0x400] sm:$0xff]  ;;  %v4147_v30 = vld [vmem:[%s12501_s6 + $0x4f0] sm:$0xff] }
 0x649   :  { %v4145_v53 = vld [vmem:[%s12501_s6 + $0x4e0] sm:$0xff] }
 0x64b   :  { %6427 = vmatpush1.bf16.msra.mxu1 %v6426_v6  ;;  %v6462_v6 = vpack.c.bf16 %v4111_v4, %v4109_v56  ;;  %v4124_v56 = vld [vmem:[%s12501_s6 + $0x438] sm:$0xff] }
 0x64c   :  { %6429 = vmatprep.subr.bf16.mxu1 %v6428_v38  ;;  %v6464_v38 = vpack.c.bf16 %v4116_v15, %v4114_v47 }
 0x64f   :  { %6431 = vmatpush1.bf16.msra.mxu1 %v6430_v0  ;;  %v6466_v0 = vpack.c.bf16 %v4115_v24, %v4113_v52 }
 0x650   :  { %6433 = vmatprep.subr.bf16.mxu1 %v6432_v50  ;;  %v6468_v50 = vpack.c.bf16 %v4120_v33, %v4118_v27  ;;  %v4123_v33 = vld [vmem:[%s12501_s6 + $0x430] sm:$0xff] }
 0x653   :  { %6435 = vmatpush1.bf16.msra.mxu1 %v6434_v29  ;;  %v4486_v29 = vld [vmem:[%s12502_s7 + $0x18] sm:$0xff] }
 0x654   :  { %6437 = vmatprep.subr.bf16.mxu1 %v6436_v25  ;;  %v6546_v25 = vpack.c.bf16 %v4486_v29, %v4485_v22  ;;  %v4130_v22 = vld [vmem:[%s12501_s6 + $0x468] sm:$0xff] }
 0x656   :  { %6547 = vmatpush1.bf16.msra.mxu0 %v6546_v25  ;;  %v6480_v25 = vpack.c.bf16 %v4132_v9, %v4130_v22  ;;  %v4168_v22 = vld [vmem:[%s12501_s6 + $0x598] sm:$0xff] }
 0x657   :  { %6439 = vmatpush1.bf16.msra.mxu1 %v6438_v40  ;;  %6548 = vmatprep.subr.bf16.mxu0 %v6718_v2  ;;  %v4490_v40 = vld [vmem:[%s12502_s7 + $0x38] sm:$0xff] }
 0x658   :  { %6441 = vmatprep.subr.bf16.mxu1 %v6440_v8  ;;  %v6552_v8 = vpack.c.bf16 %v4490_v40, %v4489_v20  ;;  %v4136_v20 = vld [vmem:[%s12501_s6 + $0x498] sm:$0xff]  ;;  %v6482_v40 = vpack.c.bf16 %v4131_v1, %v4129_v63  ;;  %v4167_v63 = vld [vmem:[%s12501_s6 + $0x590] sm:$0xff]  ;;  %v4170_v1 = vld [vmem:[%s12501_s6 + $0x5a8] sm:$0xff] }
 0x65a   :  { %6550 = vmatpush1.bf16.msra.mxu0 %v6549_v3  ;;  %v4134_v3 = vld [vmem:[%s12501_s6 + $0x488] sm:$0xff] }
 0x65b   :  { %6443 = vmatpush1.bf16.msra.mxu1 %v6442_v49  ;;  %6551 = vmatprep.subr.bf16.mxu0 %v6718_v2  ;;  %v4494_v49 = vld [vmem:[%s12502_s7 + $0x58] sm:$0xff] }
 0x65c   :  { %6445 = vmatprep.subr.bf16.mxu1 %v6444_v5  ;;  %v6558_v5 = vpack.c.bf16 %v4494_v49, %v4493_v11  ;;  %v4140_v11 = vld [vmem:[%s12501_s6 + $0x4b8] sm:$0xff]  ;;  %v6486_v49 = vpack.c.bf16 %v4135_v34, %v4133_v10  ;;  %v4171_v10 = vld [vmem:[%s12501_s6 + $0x5b0] sm:$0xff]  ;;  %v4174_v34 = vld [vmem:[%s12501_s6 + $0x5c8] sm:$0xff] }
 0x65e   :  { %6553 = vmatpush1.bf16.msra.mxu0 %v6552_v8  ;;  %v6484_v8 = vpack.c.bf16 %v4136_v20, %v4134_v3  ;;  %v4172_v3 = vld [vmem:[%s12501_s6 + $0x5b8] sm:$0xff] }
 0x65f   :  { %6447 = vmatpush1.bf16.msra.mxu1 %v6446_v19  ;;  %6554 = vmatprep.subr.bf16.mxu0 %v6718_v2  ;;  %v4498_v19 = vld [vmem:[%s12502_s7 + $0x78] sm:$0xff] }
 0x660   :  { %6449 = vmatprep.subr.bf16.mxu1 %v6448_v16  ;;  %v6564_v16 = vpack.c.bf16 %v4498_v19, %v4497_v44  ;;  %v4144_v44 = vld [vmem:[%s12501_s6 + $0x4d8] sm:$0xff]  ;;  %v6490_v19 = vpack.c.bf16 %v4139_v41, %v4137_v59  ;;  %v4175_v59 = vld [vmem:[%s12501_s6 + $0x5d0] sm:$0xff]  ;;  %v4178_v41 = vld [vmem:[%s12501_s6 + $0x5e8] sm:$0xff] }
 0x662   :  { %6556 = vmatpush1.bf16.msra.mxu0 %v6555_v46  ;;  %v4138_v46 = vld [vmem:[%s12501_s6 + $0x4a8] sm:$0xff] }
 0x663   :  { %6451 = vmatpush1.bf16.msra.mxu1 %v6450_v17  ;;  %6557 = vmatprep.subr.bf16.mxu0 %v6718_v2  ;;  %v4502_v17 = vld [vmem:[%s12502_s7 + $0x98] sm:$0xff] }
 0x664   :  { %6453 = vmatprep.subr.bf16.mxu1 %v6452_v23  ;;  %v6570_v23 = vpack.c.bf16 %v4502_v17, %v4501_v51  ;;  %v4148_v51 = vld [vmem:[%s12501_s6 + $0x4f8] sm:$0xff]  ;;  %v6494_v17 = vpack.c.bf16 %v4143_v37, %v4141_v32  ;;  %v4179_v32 = vld [vmem:[%s12501_s6 + $0x5f0] sm:$0xff]  ;;  %v4182_v37 = vld [vmem:[%s12501_s6 + $0x608] sm:$0xff] }
 0x666   :  { %6559 = vmatpush1.bf16.msra.mxu0 %v6558_v5  ;;  %v6488_v5 = vpack.c.bf16 %v4140_v11, %v4138_v46  ;;  %v4176_v46 = vld [vmem:[%s12501_s6 + $0x5d8] sm:$0xff] }
 0x667   :  { %6455 = vmatpush1.bf16.msra.mxu1 %v6454_v14  ;;  %6560 = vmatprep.subr.bf16.mxu0 %v6718_v2  ;;  %v4506_v14 = vld [vmem:[%s12502_s7 + $0xb8] sm:$0xff] }
 0x668   :  { %6457 = vmatprep.subr.bf16.mxu1 %v6456_v7  ;;  %v6576_v7 = vpack.c.bf16 %v4506_v14, %v4505_v42  ;;  %v4152_v42 = vld [vmem:[%s12501_s6 + $0x518] sm:$0xff]  ;;  %v6498_v14 = vpack.c.bf16 %v4147_v30, %v4145_v53  ;;  %v4183_v53 = vld [vmem:[%s12501_s6 + $0x610] sm:$0xff] }
 0x66a   :  { %6562 = vmatpush1.bf16.msra.mxu0 %v6561_v57  ;;  %v4142_v57 = vld [vmem:[%s12501_s6 + $0x4c8] sm:$0xff] }
 0x66b   :  { %6459 = vmatpush1.bf16.msra.mxu1 %v6458_v55  ;;  %6563 = vmatprep.subr.bf16.mxu0 %v6718_v2  ;;  %v4119_v55 = vld [vmem:[%s12501_s6 + $0x410] sm:$0xff] }
 0x66c   :  { %6461 = vmatprep.subr.bf16.mxu1 %v6460_v31  ;;  %v4122_v31 = vld [vmem:[%s12501_s6 + $0x428] sm:$0xff]  ;;  %v6470_v24 = vpack.c.bf16 %v4119_v55, %v4117_v54  ;;  %v4151_v54 = vld [vmem:[%s12501_s6 + $0x510] sm:$0xff] }
 0x66d   :  { %v6472_v43 = vpack.c.bf16 %v4124_v56, %v4122_v31  ;;  %v4154_v55 = vld [vmem:[%s12501_s6 + $0x528] sm:$0xff]  ;;  %v4156_v31 = vld [vmem:[%s12501_s6 + $0x538] sm:$0xff] }
 0x66e   :  { %6565 = vmatpush1.bf16.msra.mxu0 %v6564_v16  ;;  %v6492_v16 = vpack.c.bf16 %v4144_v44, %v4142_v57  ;;  %v4180_v57 = vld [vmem:[%s12501_s6 + $0x5f8] sm:$0xff] }
 0x66f   :  { %6463 = vmatpush1.bf16.msra.mxu1 %v6462_v6  ;;  %6566 = vmatprep.subr.bf16.mxu0 %v6718_v2 }
 0x670   :  { %6465 = vmatprep.subr.bf16.mxu1 %v6464_v38 }
 0x672   :  { %6568 = vmatpush1.bf16.msra.mxu0 %v6567_v62  ;;  %v4146_v62 = vld [vmem:[%s12501_s6 + $0x4e8] sm:$0xff] }
 0x673   :  { %6467 = vmatpush1.bf16.msra.mxu1 %v6466_v0  ;;  %6569 = vmatprep.subr.bf16.mxu0 %v6718_v2  ;;  %v4128_v0 = vld [vmem:[%s12501_s6 + $0x458] sm:$0xff] }
 0x674   :  { %6469 = vmatprep.subr.bf16.mxu1 %v6468_v50 }
 0x676   :  { %6571 = vmatpush1.bf16.msra.mxu0 %v6570_v23  ;;  %v6496_v23 = vpack.c.bf16 %v4148_v51, %v4146_v62  ;;  %v4184_v62 = vld [vmem:[%s12501_s6 + $0x618] sm:$0xff] }
 0x677   :  { %6572 = vmatprep.subr.bf16.mxu0 %v6718_v2 }
 0x67a   :  { %6574 = vmatpush1.bf16.msra.mxu0 %v6573_v26  ;;  %v4150_v26 = vld [vmem:[%s12501_s6 + $0x508] sm:$0xff] }
 0x67b   :  { %6575 = vmatprep.subr.bf16.mxu0 %v6718_v2 }
 0x67e   :  { %6577 = vmatpush1.bf16.msra.mxu0 %v6576_v7  ;;  %v6500_v7 = vpack.c.bf16 %v4152_v42, %v4150_v26  ;;  %v4186_v26 = vld [vmem:[%s12501_s6 + $0x628] sm:$0xff]  ;;  %v4188_v42 = vld [vmem:[%s12501_s6 + $0x638] sm:$0x1f] }
 0x67f   :  { %4567 = vmatprep.subr.mxu0 %v6719_v28 }
 0x6ac   :  { %v12226_v15 = vpop.permute.xlu1 %3967 }
 0x6ad   :  { %v12203_v48 = vpop.permute.xlu0 %6714 }
 0x6ae   :  { %v6717_v21 = vunpack.i.h.bf16 %v12203_v48  ;;  %v6716_v39 = vunpack.i.l.bf16 %v12203_v48  ;;  %v4185_v48 = vld [vmem:[%s12501_s6 + $0x620] sm:$0xff] }
 0x6b0   :  { %v3971_v4 = vsel %vm1058_vm3, %v6707_v35, %v6716_v39  ;;  %v3972_v47 = vsel %vm1058_vm3, %v6716_v39, %v6717_v21  ;;  %v4121_v35 = vld [vmem:[%s12501_s6 + $0x420] sm:$0xff] }
 0x6b1   :  { %v3984_v6 = vmax.f32 %v11885_v36, %v3971_v4  ;;  %v12229_v38 = vpop.permute.xlu0 %3965  ;;  %v3985_v52 = vmax.f32 %v11936_v12, %v3972_v47  ;;  %v4126_v12 = vld [vmem:[%s12501_s6 + $0x448] sm:$0xff]  ;;  %v6474_v50 = vpack.c.bf16 %v4123_v33, %v4121_v35  ;;  %v4149_v39 = vld [vmem:[%s12501_s6 + $0x500] sm:$0xff]  ;;  %v6504_v4 = vpack.c.bf16 %v4156_v31, %v4154_v55  ;;  %v4159_v33 = vld [vmem:[%s12501_s6 + $0x550] sm:$0xff] }
 0x6b2   :  { %v3974_v27 = vsel %vm1058_vm3, %v12229_v38, %v12226_v15  ;;  %v6476_v61 = vpack.c.bf16 %v4128_v0, %v4126_v12  ;;  %v6502_v56 = vpack.c.bf16 %v4151_v54, %v4149_v39  ;;  %v4153_v47 = vld [vmem:[%s12501_s6 + $0x520] sm:$0xff]  ;;  %v4164_v12 = vld [vmem:[%s12501_s6 + $0x578] sm:$0xff]  ;;  %v3973_v30 = vsel %vm1058_vm3, %v6717_v21, %v12229_v38  ;;  %v4187_v21 = vld [vmem:[%s12501_s6 + $0x630] sm:$0x1f] }
 0x6b3   :  { %v3987_v36 = vmax.f32 %v11966_v45, %v3974_v27  ;;  %4334 = vmatprep.mubr.f32.mxu1 %v3985_v52  ;;  %v4127_v45 = vld [vmem:[%s12501_s6 + $0x450] sm:$0xff]  ;;  %v4158_v52 = vld [vmem:[%s12501_s6 + $0x548] sm:$0xff]  ;;  %v4157_v35 = vld [vmem:[%s12501_s6 + $0x540] sm:$0xff]  ;;  %v6536_v39 = vpack.c.bf16 %v4188_v42, %v4186_v26  ;;  %v6539_v38 = vpack.c.bf16 %v4187_v21, %v4185_v48 }
 0x6b4   :  { %4335 = vmatmul.mubr.f32.vlgmr.msra.gmra.mrb[12].mxu1 %v3984_v6  ;;  %v6478_v29 = vpack.c.bf16 %v4127_v45, %v4125_v18  ;;  %v4155_v6 = vld [vmem:[%s12501_s6 + $0x530] sm:$0xff]  ;;  %v6510_v0 = vpack.c.bf16 %v4159_v33, %v4157_v35  ;;  %v4166_v45 = vld [vmem:[%s12501_s6 + $0x588] sm:$0xff]  ;;  %v4507_v54 = vld [vmem:[%s12502_s7 + $0xc0] sm:$0xff] }
 0x6b5   :  { %6471 = vmatpush1.bf16.msra.mxu1 %v6470_v24  ;;  %4405 = vmatprep.mubr.f32.mxu1 %v3987_v36  ;;  %v4160_v24 = vld [vmem:[%s12501_s6 + $0x558] sm:$0xff]  ;;  %v6506_v27 = vpack.c.bf16 %v4155_v6, %v4153_v47  ;;  %v4162_v36 = vld [vmem:[%s12501_s6 + $0x568] sm:$0xff]  ;;  %v4163_v18 = vld [vmem:[%s12501_s6 + $0x570] sm:$0xff] }
 0x6b6   :  { %6473 = vmatprep.subr.bf16.mxu1 %v6472_v43  ;;  %v6508_v43 = vpack.c.bf16 %v4160_v24, %v4158_v52  ;;  %4568 = vmatpush1.msra.mxu0 %v4507_v54  ;;  %v4590_v55 = vld [vmem:[%s12503_s9] sm:$0xff]  ;;  %v4595_v52 = vld [vmem:[%s12503_s9 + $0x28] sm:$0xff] }
 0x6b7   :  { %6578 = vmatprep.subr.bf16.mxu0 %v6718_v2  ;;  %v4594_v6 = vld [vmem:[%s12503_s9 + $0x20] sm:$0xff] }
 0x6b8   :  { %v6585_v24 = vpack.c.bf16 %v4595_v52, %v4594_v6  ;;  %v4801_v33 = vld [vmem:[%s12504_s8] ss:$0 sm:$0xff] }
 0x6b9   :  { %6475 = vmatpush1.bf16.msra.mxu1 %v6474_v50  ;;  %v6512_v50 = vpack.c.bf16 %v4164_v12, %v4162_v36 }
 0x6ba   :  { %6477 = vmatprep.subr.bf16.mxu1 %v6476_v61  ;;  %v4161_v61 = vld [vmem:[%s12501_s6 + $0x560] sm:$0xff] }
 0x6bb   :  { %v6514_v9 = vpack.c.bf16 %v4163_v18, %v4161_v61  ;;  %v4803_v61 = vld [vmem:[%s12506_s10] ss:$0 sm:$0xff] }
 0x6bd   :  { %6479 = vmatpush1.bf16.msra.mxu1 %v6478_v29  ;;  %v6516_v29 = vpack.c.bf16 %v4168_v22, %v4166_v45 }
 0x6be   :  { %6481 = vmatprep.subr.bf16.mxu1 %v6480_v25  ;;  %v4165_v25 = vld [vmem:[%s12501_s6 + $0x580] sm:$0xff] }
 0x6bf   :  { %v6518_v20 = vpack.c.bf16 %v4167_v63, %v4165_v25 }
 0x6c1   :  { %6483 = vmatpush1.bf16.msra.mxu1 %v6482_v40  ;;  %v6520_v40 = vpack.c.bf16 %v4172_v3, %v4170_v1 }
 0x6c2   :  { %6485 = vmatprep.subr.bf16.mxu1 %v6484_v8  ;;  %v4169_v8 = vld [vmem:[%s12501_s6 + $0x5a0] sm:$0xff] }
 0x6c3   :  { %v6522_v11 = vpack.c.bf16 %v4171_v10, %v4169_v8 }
 0x6c5   :  { %6487 = vmatpush1.bf16.msra.mxu1 %v6486_v49  ;;  %v6524_v49 = vpack.c.bf16 %v4176_v46, %v4174_v34 }
 0x6c6   :  { %6489 = vmatprep.subr.bf16.mxu1 %v6488_v5  ;;  %v4173_v5 = vld [vmem:[%s12501_s6 + $0x5c0] sm:$0xff] }
 0x6c7   :  { %v6526_v44 = vpack.c.bf16 %v4175_v59, %v4173_v5 }
 0x6c9   :  { %6491 = vmatpush1.bf16.msra.mxu1 %v6490_v19  ;;  %v6528_v19 = vpack.c.bf16 %v4180_v57, %v4178_v41 }
 0x6ca   :  { %6493 = vmatprep.subr.bf16.mxu1 %v6492_v16  ;;  %v4177_v16 = vld [vmem:[%s12501_s6 + $0x5e0] sm:$0xff] }
 0x6cb   :  { %v6530_v51 = vpack.c.bf16 %v4179_v32, %v4177_v16 }
 0x6cd   :  { %6495 = vmatpush1.bf16.msra.mxu1 %v6494_v17  ;;  %v6532_v17 = vpack.c.bf16 %v4184_v62, %v4182_v37 }
 0x6ce   :  { %6497 = vmatprep.subr.bf16.mxu1 %v6496_v23  ;;  %v4181_v23 = vld [vmem:[%s12501_s6 + $0x600] sm:$0xff] }
 0x6d1   :  { %6499 = vmatpush1.bf16.msra.mxu1 %v6498_v14  ;;  %v6534_v14 = vpack.c.bf16 %v4183_v53, %v4181_v23 }
 0x6d2   :  { %6501 = vmatprep.subr.bf16.mxu1 %v6500_v7  ;;  %v3986_v7 = vmax.f32 %v11938_v60, %v3973_v30  ;;  %v3988_v60 = vmax.f32 %v11940_v58, %v12226_v15  ;;  %v6579_v15 = vpack.c.bf16 %v4591_v13, %v4590_v55 }
 0x6d5   :  { %6503 = vmatpush1.bf16.msra.mxu1 %v6502_v56  ;;  %v4592_v56 = vld [vmem:[%s12503_s9 + $0x10] sm:$0xff] }
 0x6d6   :  { %6505 = vmatprep.subr.bf16.mxu1 %v6504_v4  ;;  %v4593_v4 = vld [vmem:[%s12503_s9 + $0x18] sm:$0xff] }
 0x6d7   :  { %v6582_v47 = vpack.c.bf16 %v4593_v4, %v4592_v56 }
 0x6d9   :  { %6507 = vmatpush1.bf16.msra.mxu1 %v6506_v27  ;;  %v4596_v27 = vld [vmem:[%s12503_s9 + $0x30] sm:$0xff] }
 0x6da   :  { %6509 = vmatprep.subr.bf16.mxu1 %v6508_v43  ;;  %v4597_v43 = vld [vmem:[%s12503_s9 + $0x38] sm:$0xff] }
 0x6db   :  { %v6588_v35 = vpack.c.bf16 %v4597_v43, %v4596_v27 }
 0x6dd   :  { %6511 = vmatpush1.bf16.msra.mxu1 %v6510_v0 }
 0x6de   :  { %6513 = vmatprep.subr.bf16.mxu1 %v6512_v50  ;;  %v4680_v50 = vld [vmem:[%s12505_s11] sm:$0xff] }
 0x6e1   :  { %6515 = vmatpush1.bf16.msra.mxu1 %v6514_v9  ;;  %v4805_v9 = vld [vmem:[%s12507_s12] ss:$0 sm:$0xff] }
 0x6e2   :  { %6517 = vmatprep.subr.bf16.mxu1 %v6516_v29 }
 0x6e5   :  { %6519 = vmatpush1.bf16.msra.mxu1 %v6518_v20 }
 0x6e6   :  { %6521 = vmatprep.subr.bf16.mxu1 %v6520_v40 }
 0x6e9   :  { %6523 = vmatpush1.bf16.msra.mxu1 %v6522_v11 }
 0x6ea   :  { %6525 = vmatprep.subr.bf16.mxu1 %v6524_v49 }
 0x6ed   :  { %6527 = vmatpush1.bf16.msra.mxu1 %v6526_v44 }
 0x6ee   :  { %6529 = vmatprep.subr.bf16.mxu1 %v6528_v19 }
 0x6f1   :  { %6531 = vmatpush1.bf16.msra.mxu1 %v6530_v51 }
 0x6f2   :  { %6533 = vmatprep.subr.bf16.mxu1 %v6532_v17 }
 0x6f4   :  { %4406 = vmatmul.mubr.f32.vlgmr.msra.gmra.mrb[12].mxu1 %v3986_v7 }
 0x6f5   :  { %6535 = vmatpush1.bf16.msra.mxu1 %v6534_v14  ;;  %4476 = vmatprep.mubr.f32.mxu1 %v6719_v28 }
 0x6f6   :  { %6538 = vmatprep.subr.msk.bf16.mxu1 %vm10145_vm6, %v6536_v39 }
 0x6f9   :  { %6541 = vmatpush1.bf16.msk.msra.mxu1 %vm10145_vm6, %v6539_v38 }
 0x6fa   :  { %4872 = vmatprep.subr.mxu1 %v6719_v28 }
 0x6fc   :  { %4800 = vmatmul.mubr.msk.f32.vlgmr.msra.gmra.mrb[12].mxu1 %vm4189_vm9, %v3988_v60 }
 0x6fd   :  { %4874 = vmatprep.mubr.msk.f32.mxu1 %vm6723_vm11, %v6719_v28  ;;  %4873 = vmatpush3.msra.mxu1 %v4680_v50 }
 0x7cf   :  { %v4478_v58 = vpop.f32.mrb[12].mxu1 }
 0x7d0   :  { %v4480_v31 = vpop.f32.mrb[13].mxu1 }
 0x7d1   :  { %4802 = vmatprep.mubr.msk.f32.mxu0 %vm4515_vm10, %v4480_v31 }
 0x7d2   :  { %4584 = vmatmul.mubr.f32.vlgmr.msra.gmra.mrb[18].mxu0 %v4478_v58 }
 0x7d3   :  { %6580 = vmatpush3.bf16.msra.mxu0 %v6579_v15  ;;  %4869 = vmatprep.mubr.msk.f32.mxu0 %vm6723_vm11, %v6719_v28 }
 0x7d4   :  { %6581 = vmatprep.subr.bf16.mxu0 %v6718_v2 }
 0x7d7   :  { %6583 = vmatpush3.bf16.msra.mxu0 %v6582_v47 }
 0x7d8   :  { %6584 = vmatprep.subr.bf16.mxu0 %v6718_v2 }
 0x7db   :  { %6586 = vmatpush3.bf16.msra.mxu0 %v6585_v24 }
 0x7dc   :  { %6587 = vmatprep.subr.bf16.mxu0 %v6718_v2 }
 0x7df   :  { %6589 = vmatpush3.bf16.msra.mxu0 %v6588_v35 }
 0x8a5   :  { %v4585_v2 = vpop.f32.mrb[18].mxu0 }
 0x8a6   :  { %v4586_v36 = vadd.f32 %v4801_v33, %v4585_v2  ;;  %v4587_v12 = vpop.f32.mrb[19].mxu0 }
 0x8a8   :  { %v4589_v0 = vmax.f32 %v4586_v36, 0.0 }
 0x8aa   :  { %4870 = vmatmul.mubr.msk.f32.vlgmr.msra.gmra.mrb[20].mxu0 %vm4605_vm12, %v4589_v0 }
 0x97d   :  { %v4675_v28 = vpop.f32.mrb[20].mxu0 }
 0x97e   :  { %v4676_v18 = vadd.f32 %v4803_v61, %v4675_v28  ;;  %v4871_v45 = vpop.f32.mrb[21].mxu0 }
 0x980   :  { %v4679_v22 = vmax.f32 %v4676_v18, 0.0 }
 0x982   :  { %4875 = vmatmul.mubr.msk.f32.vlgmr.msra.gmra.mrb[14].mxu1 %vm4688_vm13, %v4679_v22 }
 0xa55   :  { %v4758_v29 = vpop.f32.mrb[14].mxu1 }
 0xa56   :  { %v4759_v25 = vadd.f32 %v4805_v9, %v4758_v29  ;;  %v4876_v63 = vpop.f32.mrb[15].mxu1 }
 0xa58   :  { %4763 = vst.msk [vmem:[%s12508_s13] sm:$0xff] %vm4762_vm14, %v4759_v25 }

</bundles_post_ra>
